<compile_context>
chip_gen: v5e
topology: v5e:2x2
jax: 0.10.0
libtpu: 0.0.40
codegen_flags: <defaults>
</compile_context>

<pallas_src>
import functools

import jax
import jax.numpy as jnp
from jax.experimental import pallas as pl
from jax.experimental.pallas import tpu as pltpu

DIM = 32
NHEADS = 8
HEAD_DIM = DIM // NHEADS      # 4
EPS = 1e-6


# ------------------------------ fused kernel --------------------------------

def _block_kernel(
    # activations / aux
    x_ref, xmel_ref, aux_ref,
    # rotary tables + signed swap matrix
    cosx_ref, sinx_ref, cosm_ref, sinm_ref, s4_ref,
    # rmsnorm gammas
    cn1_ref, cn2_ref, n1_ref, n2_ref,
    # cmha (self attention on xmel), head-stacked weights
    cwq_ref, cwk_ref, cwv_ref, cwo_ref,
    # mha (cross attention x -> xmel), head-stacked weights
    mwq_ref, mwk_ref, mwv_ref, mwo_ref,
    # cffn (MixedActor, 2 experts) stacked weights
    cgw_ref, cgb_ref, cw1_ref, cw2_ref, cw3_ref, cseg_ref,
    # ffn (MixedActor, 4 experts) stacked weights
    fgw_ref, fgb_ref, fw1_ref, fw2_ref, fw3_ref, fseg_ref,
    # outputs
    xo_ref, xmelo_ref, auxo_ref,
    *, B, T, TM, eps):
  f32 = jnp.float32

  def dot(a, b):
    return jnp.dot(a, b, preferred_element_type=f32)

  def rmsnorm(v, g):
    ms = jnp.mean(v * v, axis=-1, keepdims=True)
    return v * jax.lax.rsqrt(ms + eps) * g

  def softmax_last(s):
    s = s - jnp.max(s, axis=-1, keepdims=True)
    p = jnp.exp(s)
    return p / jnp.sum(p, axis=-1, keepdims=True)

  s4 = s4_ref[...]                                # (hd, hd) signed rotate-half swap

  def attention(hq, hkv, wq_ref, wk_ref, wv_ref, wo_ref,
                cos_q, sin_q, cos_k, sin_k, Tq, Tk, qk_scale, logit_scale):
    # hq: (B*Tq, C) query source, hkv: (B*Tk, C) key/value source.
    out = jnp.zeros((B * Tq, DIM), f32)
    for h in range(NHEADS):                       # static unroll, all in VMEM
      q = dot(hq, wq_ref[h])                      # (B*Tq, hd)
      k = dot(hkv, wk_ref[h])                     # (B*Tk, hd)
      v = dot(hkv, wv_ref[h])                     # (B*Tk, hd)
      # rotate-half rotary:  x*cos + (x @ S)*sin
      q = (q * cos_q + dot(q, s4) * sin_q) * qk_scale
      k = (k * cos_k + dot(k, s4) * sin_k) * qk_scale
      obs = []
      for b in range(B):                          # sublane-aligned row blocks
        qb = q[b * Tq:(b + 1) * Tq]
        kb = k[b * Tk:(b + 1) * Tk]
        vb = v[b * Tk:(b + 1) * Tk]
        s = jax.lax.dot_general(qb, kb, (((1,), (1,)), ((), ())),
                                preferred_element_type=f32) * logit_scale
        obs.append(dot(softmax_last(s), vb))      # (Tq, hd)
      o_h = jnp.concatenate(obs, axis=0)          # (B*Tq, hd)
      out = out + dot(o_h, wo_ref[h])             # fused output projection
    return out

  def mixed_actor(h2, gw_ref, gb_ref, w1_ref, w2_ref, w3_ref, seg_ref):
    logits = dot(h2, gw_ref[...]) + gb_ref[...]                     # (M, 4)
    coefs = softmax_last(logits)
    hh = jax.nn.silu(dot(h2, w1_ref[...])) * dot(h2, w2_ref[...])   # (M, Htot)
    scale = dot(coefs, seg_ref[...])                                # (M, Htot)
    out = dot(hh * scale, w3_ref[...])                              # (M, C)
    avg = jnp.mean(coefs, axis=0, keepdims=True)                    # (1, 4)
    d = avg - 0.25
    aux = jnp.sum(d * d, axis=-1, keepdims=True) * 0.01             # (1, 1)
    return out, aux

  x = x_ref[...].astype(f32)            # (B*T, C)
  xmel = xmel_ref[...].astype(f32)      # (B*TM, C)
  cos_x, sin_x = cosx_ref[...], sinx_ref[...]
  cos_m, sin_m = cosm_ref[...], sinm_ref[...]

  # ---------------- cross branch: xmel update ----------------
  h = rmsnorm(xmel, cn1_ref[...])
  xmel = xmel + attention(h, h, cwq_ref, cwk_ref, cwv_ref, cwo_ref,
                          cos_m, sin_m, cos_m, sin_m,
                          TM, TM, 1.0, float(HEAD_DIM) ** -0.5)
  h = rmsnorm(xmel, cn2_ref[...])
  ffn_out, aux_c = mixed_actor(h, cgw_ref, cgb_ref, cw1_ref, cw2_ref, cw3_ref, cseg_ref)
  xmel = xmel + ffn_out

  # ---------------- main branch: x update (cross-attends to xmel) ----------------
  h = rmsnorm(x, n1_ref[...])
  x = x + attention(h, xmel, mwq_ref, mwk_ref, mwv_ref, mwo_ref,
                    cos_x, sin_x, cos_m, sin_m,
                    T, TM, float(HEAD_DIM) ** -0.25, 1.0)
  h = rmsnorm(x, n2_ref[...])
  ffn_out, aux_f = mixed_actor(h, fgw_ref, fgb_ref, fw1_ref, fw2_ref, fw3_ref, fseg_ref)
  x = x + ffn_out

  xo_ref[...] = x.astype(xo_ref.dtype)
  xmelo_ref[...] = xmel.astype(xmelo_ref.dtype)
  auxo_ref[...] = aux_ref[...] + aux_c + aux_f


# --------------------------- host-side preparation ---------------------------

def make_rope_tables(B, Tseq):
  # Per-head rotate-half tables, tiled over batch: (B*Tseq, HEAD_DIM).
  inv_freq = 1.0 / (10000.0 ** (jnp.arange(0, HEAD_DIM, 2, dtype=jnp.float32) / HEAD_DIM))
  freqs = jnp.arange(Tseq, dtype=jnp.float32)[:, None] * inv_freq[None, :]    # (Tseq, hd/2)
  cos = jnp.concatenate([jnp.cos(freqs), jnp.cos(freqs)], axis=-1)            # (Tseq, hd)
  sin = jnp.concatenate([jnp.sin(freqs), jnp.sin(freqs)], axis=-1)
  return jnp.tile(cos, (B, 1)), jnp.tile(sin, (B, 1))


def make_swap_matrix():
  # (x @ S)[:, :half] = -x[:, half:]   and   (x @ S)[:, half:] = +x[:, :half]
  half = HEAD_DIM // 2
  eye = jnp.eye(half, dtype=jnp.float32)
  s = jnp.zeros((HEAD_DIM, HEAD_DIM), jnp.float32)
  s = s.at[half:, :half].set(-eye)
  s = s.at[:half, half:].set(eye)
  return s


def prepare_params(params):
  H, hd, C = NHEADS, HEAD_DIM, DIM

  def head_split_cols(w, col_off):
    # (C, *) weight, columns ordered head-major -> (H, C, hd)
    return w[:, col_off:col_off + C].reshape(C, H, hd).transpose(1, 0, 2)

  def head_split_rows(w):
    # (C, C) output weight, rows ordered head-major -> (H, hd, C)
    return w.reshape(H, hd, C)

  def stack_experts(experts):
    w1 = jnp.concatenate([e[0] for e in experts], axis=1)
    w2 = jnp.concatenate([e[1] for e in experts], axis=1)
    w3 = jnp.concatenate([e[2] for e in experts], axis=0)
    sizes = [e[0].shape[1] for e in experts]
    seg = jnp.zeros((4, sum(sizes)), jnp.float32)
    off = 0
    for i, sz in enumerate(sizes):
      seg = seg.at[i, off:off + sz].set(1.0)
      off += sz
    return w1, w2, w3, seg

  cw1, cw2, cw3, cseg = stack_experts(params["cffn_experts"])
  fw1, fw2, fw3, fseg = stack_experts(params["ffn_experts"])

  return dict(
      cnorm1=params["cnorm1"].reshape(1, C), cnorm2=params["cnorm2"].reshape(1, C),
      norm1=params["norm1"].reshape(1, C), norm2=params["norm2"].reshape(1, C),
      cmha_wq=head_split_cols(params["cmha_qkv"], 0),
      cmha_wk=head_split_cols(params["cmha_qkv"], C),
      cmha_wv=head_split_cols(params["cmha_qkv"], 2 * C),
      cmha_wo=head_split_rows(params["cmha_out"]),
      mha_wq=head_split_cols(params["mha_q"], 0),
      mha_wk=head_split_cols(params["mha_kv"], 0),
      mha_wv=head_split_cols(params["mha_kv"], C),
      mha_wo=head_split_rows(params["mha_out"]),
      cffn_gate_w=params["cffn_gate_w"], cffn_gate_b=params["cffn_gate_b"].reshape(1, 4),
      cffn_w1=cw1, cffn_w2=cw2, cffn_w3=cw3, cffn_seg=cseg,
      ffn_gate_w=params["ffn_gate_w"], ffn_gate_b=params["ffn_gate_b"].reshape(1, 4),
      ffn_w1=fw1, ffn_w2=fw2, ffn_w3=fw3, ffn_seg=fseg,
      s4=make_swap_matrix(),
  )


# ------------------------------ forward wrapper ------------------------------

def transformer_block(prep, rope, x, xmel, aux_loss):
  B, T, C = x.shape
  TM = xmel.shape[1]
  Mx, Mm = B * T, B * TM

  args = [
      x.reshape(Mx, C).astype(jnp.float32),
      xmel.reshape(Mm, C).astype(jnp.float32),
      jnp.reshape(aux_loss, (1, 1)).astype(jnp.float32),
      rope["cos_x"], rope["sin_x"], rope["cos_m"], rope["sin_m"], prep["s4"],
      prep["cnorm1"], prep["cnorm2"], prep["norm1"], prep["norm2"],
      prep["cmha_wq"], prep["cmha_wk"], prep["cmha_wv"], prep["cmha_wo"],
      prep["mha_wq"], prep["mha_wk"], prep["mha_wv"], prep["mha_wo"],
      prep["cffn_gate_w"], prep["cffn_gate_b"],
      prep["cffn_w1"], prep["cffn_w2"], prep["cffn_w3"], prep["cffn_seg"],
      prep["ffn_gate_w"], prep["ffn_gate_b"],
      prep["ffn_w1"], prep["ffn_w2"], prep["ffn_w3"], prep["ffn_seg"],
  ]

  def _full_spec(a):
    return pl.BlockSpec(a.shape, lambda i, _nd=a.ndim: (0,) * _nd)

  x2, xm2, aux = pl.pallas_call(
      functools.partial(_block_kernel, B=B, T=T, TM=TM, eps=EPS),
      grid=(1,),
      in_specs=[_full_spec(a) for a in args],
      out_specs=(pl.BlockSpec((Mx, C), lambda i: (0, 0)),
                 pl.BlockSpec((Mm, C), lambda i: (0, 0)),
                 pl.BlockSpec((1, 1), lambda i: (0, 0))),
      out_shape=(jax.ShapeDtypeStruct((Mx, C), jnp.float32),
                 jax.ShapeDtypeStruct((Mm, C), jnp.float32),
                 jax.ShapeDtypeStruct((1, 1), jnp.float32)),
      compiler_params=pltpu.CompilerParams(dimension_semantics=("arbitrary",)),
  )(*args)
  return x2.reshape(B, T, C), xm2.reshape(B, TM, C), aux[0, 0]


# ------------------------------ param init ----------------------------------

def init_params(key):
  keys = iter(jax.random.split(key, 64))

  def w(shape, scale=0.05):
    return scale * jax.random.normal(next(keys), shape, jnp.float32)

  def gamma():
    return 1.0 + 0.1 * jax.random.normal(next(keys), (DIM,), jnp.float32)

  def experts(n):
    # NonLinear(dim, coef=2*idx) for idx in 1..n : w1/w2 (D, coef*D), w3 (coef*D, D)
    es = []
    for idx in range(1, n + 1):
      H = 2 * idx * DIM
      es.append((w((DIM, H)), w((DIM, H)), w((H, DIM))))
    return tuple(es)

  return {
      "norm1": gamma(), "norm2": gamma(), "cnorm1": gamma(), "cnorm2": gamma(),
      # cmha = MHA(dim): qkv (D, 3D), out (D, D)
      "cmha_qkv": w((DIM, 3 * DIM)), "cmha_out": w((DIM, DIM)),
      # mha = MHACross(dim): q (D, D), kv (D, 2D), out (D, D)
      "mha_q": w((DIM, DIM)), "mha_kv": w((DIM, 2 * DIM)), "mha_out": w((DIM, DIM)),
      # ffn = MixedActor(dim, 4): gate (D, 4)+bias, 4 experts (coef 2,4,6,8)
      "ffn_gate_w": w((DIM, 4)), "ffn_gate_b": w((4,)),
      "ffn_experts": experts(4),
      # cffn = MixedActor(dim, 2): gate (D, 4)+bias, 2 experts (coef 2,4)
      "cffn_gate_w": w((DIM, 4)), "cffn_gate_b": w((4,)),
      "cffn_experts": experts(2),
  }


# --------------------------------- main --------------------------------------

if __name__ == "__main__":
  key = jax.random.PRNGKey(0)
  kp, kx, km = jax.random.split(key, 3)
  params = init_params(kp)
  prep = prepare_params(params)

  B, T, TM = 2, 8, 16
  x = jax.random.normal(kx, (B, T, DIM), jnp.float32)
  xmel = jax.random.normal(km, (B, TM, DIM), jnp.float32)
  aux_loss = jnp.float32(0.0)

  cos_x, sin_x = make_rope_tables(B, T)
  cos_m, sin_m = make_rope_tables(B, TM)
  rope = {"cos_x": cos_x, "sin_x": sin_x, "cos_m": cos_m, "sin_m": sin_m}

  fwd = jax.jit(transformer_block)
  x_out, xmel_out, aux_out = fwd(prep, rope, x, xmel, aux_loss)
  jax.block_until_ready((x_out, xmel_out, aux_out))

  assert x_out.shape == (B, T, DIM)
  assert xmel_out.shape == (B, TM, DIM)
  assert aux_out.shape == ()
  print("KERNEL_OK")
</pallas_src>

<mosaic_0001>
module attributes {stable_mosaic.version = 11 : i64} {
  func.func @_block_kernel(%arg0: i32, %arg1: memref<16x32xf32, #tpu.memory_space<vmem>>, %arg2: memref<32x32xf32, #tpu.memory_space<vmem>>, %arg3: memref<1x1xf32, #tpu.memory_space<vmem>>, %arg4: memref<16x4xf32, #tpu.memory_space<vmem>>, %arg5: memref<16x4xf32, #tpu.memory_space<vmem>>, %arg6: memref<32x4xf32, #tpu.memory_space<vmem>>, %arg7: memref<32x4xf32, #tpu.memory_space<vmem>>, %arg8: memref<4x4xf32, #tpu.memory_space<vmem>>, %arg9: memref<1x32xf32, #tpu.memory_space<vmem>>, %arg10: memref<1x32xf32, #tpu.memory_space<vmem>>, %arg11: memref<1x32xf32, #tpu.memory_space<vmem>>, %arg12: memref<1x32xf32, #tpu.memory_space<vmem>>, %arg13: memref<8x32x4xf32, #tpu.memory_space<vmem>>, %arg14: memref<8x32x4xf32, #tpu.memory_space<vmem>>, %arg15: memref<8x32x4xf32, #tpu.memory_space<vmem>>, %arg16: memref<8x4x32xf32, #tpu.memory_space<vmem>>, %arg17: memref<8x32x4xf32, #tpu.memory_space<vmem>>, %arg18: memref<8x32x4xf32, #tpu.memory_space<vmem>>, %arg19: memref<8x32x4xf32, #tpu.memory_space<vmem>>, %arg20: memref<8x4x32xf32, #tpu.memory_space<vmem>>, %arg21: memref<32x4xf32, #tpu.memory_space<vmem>>, %arg22: memref<1x4xf32, #tpu.memory_space<vmem>>, %arg23: memref<32x192xf32, #tpu.memory_space<vmem>>, %arg24: memref<32x192xf32, #tpu.memory_space<vmem>>, %arg25: memref<192x32xf32, #tpu.memory_space<vmem>>, %arg26: memref<4x192xf32, #tpu.memory_space<vmem>>, %arg27: memref<32x4xf32, #tpu.memory_space<vmem>>, %arg28: memref<1x4xf32, #tpu.memory_space<vmem>>, %arg29: memref<32x640xf32, #tpu.memory_space<vmem>>, %arg30: memref<32x640xf32, #tpu.memory_space<vmem>>, %arg31: memref<640x32xf32, #tpu.memory_space<vmem>>, %arg32: memref<4x640xf32, #tpu.memory_space<vmem>>, %arg33: memref<16x32xf32, #tpu.memory_space<vmem>>, %arg34: memref<32x32xf32, #tpu.memory_space<vmem>>, %arg35: memref<1x1xf32, #tpu.memory_space<vmem>>) attributes {dimension_semantics = [#tpu.dimension_semantics<arbitrary>], iteration_bounds = array<i64: 1>, scalar_prefetch = 0 : i64, scratch_operands = 0 : i64, tpu.core_type = #tpu.core_type<tc>, window_params = [{pipeline_mode = #tpu.pipeline_mode<synchronous>, transform_indices = @transform_0, window_bounds = array<i64: 16, 32>}, {pipeline_mode = #tpu.pipeline_mode<synchronous>, transform_indices = @transform_1, window_bounds = array<i64: 32, 32>}, {pipeline_mode = #tpu.pipeline_mode<synchronous>, transform_indices = @transform_2, window_bounds = array<i64: 1, 1>}, {pipeline_mode = #tpu.pipeline_mode<synchronous>, transform_indices = @transform_3, window_bounds = array<i64: 16, 4>}, {pipeline_mode = #tpu.pipeline_mode<synchronous>, transform_indices = @transform_4, window_bounds = array<i64: 16, 4>}, {pipeline_mode = #tpu.pipeline_mode<synchronous>, transform_indices = @transform_5, window_bounds = array<i64: 32, 4>}, {pipeline_mode = #tpu.pipeline_mode<synchronous>, transform_indices = @transform_6, window_bounds = array<i64: 32, 4>}, {pipeline_mode = #tpu.pipeline_mode<synchronous>, transform_indices = @transform_7, window_bounds = array<i64: 4, 4>}, {pipeline_mode = #tpu.pipeline_mode<synchronous>, transform_indices = @transform_8, window_bounds = array<i64: 1, 32>}, {pipeline_mode = #tpu.pipeline_mode<synchronous>, transform_indices = @transform_9, window_bounds = array<i64: 1, 32>}, {pipeline_mode = #tpu.pipeline_mode<synchronous>, transform_indices = @transform_10, window_bounds = array<i64: 1, 32>}, {pipeline_mode = #tpu.pipeline_mode<synchronous>, transform_indices = @transform_11, window_bounds = array<i64: 1, 32>}, {pipeline_mode = #tpu.pipeline_mode<synchronous>, transform_indices = @transform_12, window_bounds = array<i64: 8, 32, 4>}, {pipeline_mode = #tpu.pipeline_mode<synchronous>, transform_indices = @transform_13, window_bounds = array<i64: 8, 32, 4>}, {pipeline_mode = #tpu.pipeline_mode<synchronous>, transform_indices = @transform_14, window_bounds = array<i64: 8, 32, 4>}, {pipeline_mode = #tpu.pipeline_mode<synchronous>, transform_indices = @transform_15, window_bounds = array<i64: 8, 4, 32>}, {pipeline_mode = #tpu.pipeline_mode<synchronous>, transform_indices = @transform_16, window_bounds = array<i64: 8, 32, 4>}, {pipeline_mode = #tpu.pipeline_mode<synchronous>, transform_indices = @transform_17, window_bounds = array<i64: 8, 32, 4>}, {pipeline_mode = #tpu.pipeline_mode<synchronous>, transform_indices = @transform_18, window_bounds = array<i64: 8, 32, 4>}, {pipeline_mode = #tpu.pipeline_mode<synchronous>, transform_indices = @transform_19, window_bounds = array<i64: 8, 4, 32>}, {pipeline_mode = #tpu.pipeline_mode<synchronous>, transform_indices = @transform_20, window_bounds = array<i64: 32, 4>}, {pipeline_mode = #tpu.pipeline_mode<synchronous>, transform_indices = @transform_21, window_bounds = array<i64: 1, 4>}, {pipeline_mode = #tpu.pipeline_mode<synchronous>, transform_indices = @transform_22, window_bounds = array<i64: 32, 192>}, {pipeline_mode = #tpu.pipeline_mode<synchronous>, transform_indices = @transform_23, window_bounds = array<i64: 32, 192>}, {pipeline_mode = #tpu.pipeline_mode<synchronous>, transform_indices = @transform_24, window_bounds = array<i64: 192, 32>}, {pipeline_mode = #tpu.pipeline_mode<synchronous>, transform_indices = @transform_25, window_bounds = array<i64: 4, 192>}, {pipeline_mode = #tpu.pipeline_mode<synchronous>, transform_indices = @transform_26, window_bounds = array<i64: 32, 4>}, {pipeline_mode = #tpu.pipeline_mode<synchronous>, transform_indices = @transform_27, window_bounds = array<i64: 1, 4>}, {pipeline_mode = #tpu.pipeline_mode<synchronous>, transform_indices = @transform_28, window_bounds = array<i64: 32, 640>}, {pipeline_mode = #tpu.pipeline_mode<synchronous>, transform_indices = @transform_29, window_bounds = array<i64: 32, 640>}, {pipeline_mode = #tpu.pipeline_mode<synchronous>, transform_indices = @transform_30, window_bounds = array<i64: 640, 32>}, {pipeline_mode = #tpu.pipeline_mode<synchronous>, transform_indices = @transform_31, window_bounds = array<i64: 4, 640>}, {pipeline_mode = #tpu.pipeline_mode<synchronous>, transform_indices = @transform_32, window_bounds = array<i64: 16, 32>}, {pipeline_mode = #tpu.pipeline_mode<synchronous>, transform_indices = @transform_33, window_bounds = array<i64: 32, 32>}, {pipeline_mode = #tpu.pipeline_mode<synchronous>, transform_indices = @transform_34, window_bounds = array<i64: 1, 1>}]} {
    %c0 = arith.constant 0 : index
    %c0_0 = arith.constant 0 : index
    %0 = vector.load %arg8[%c0, %c0_0] : memref<4x4xf32, #tpu.memory_space<vmem>>, vector<4x4xf32>
    %c0_1 = arith.constant 0 : index
    %c0_2 = arith.constant 0 : index
    %1 = vector.load %arg1[%c0_1, %c0_2] : memref<16x32xf32, #tpu.memory_space<vmem>>, vector<16x32xf32>
    %c0_3 = arith.constant 0 : index
    %c0_4 = arith.constant 0 : index
    %2 = vector.load %arg2[%c0_3, %c0_4] : memref<32x32xf32, #tpu.memory_space<vmem>>, vector<32x32xf32>
    %c0_5 = arith.constant 0 : index
    %c0_6 = arith.constant 0 : index
    %3 = vector.load %arg4[%c0_5, %c0_6] : memref<16x4xf32, #tpu.memory_space<vmem>>, vector<16x4xf32>
    %c0_7 = arith.constant 0 : index
    %c0_8 = arith.constant 0 : index
    %4 = vector.load %arg5[%c0_7, %c0_8] : memref<16x4xf32, #tpu.memory_space<vmem>>, vector<16x4xf32>
    %c0_9 = arith.constant 0 : index
    %c0_10 = arith.constant 0 : index
    %5 = vector.load %arg6[%c0_9, %c0_10] : memref<32x4xf32, #tpu.memory_space<vmem>>, vector<32x4xf32>
    %c0_11 = arith.constant 0 : index
    %c0_12 = arith.constant 0 : index
    %6 = vector.load %arg7[%c0_11, %c0_12] : memref<32x4xf32, #tpu.memory_space<vmem>>, vector<32x4xf32>
    %c0_13 = arith.constant 0 : index
    %c0_14 = arith.constant 0 : index
    %7 = vector.load %arg9[%c0_13, %c0_14] : memref<1x32xf32, #tpu.memory_space<vmem>>, vector<1x32xf32>
    %8 = arith.mulf %2, %2 : vector<32x32xf32>
    %cst = arith.constant dense<0.000000e+00> : vector<32xf32>
    %9 = vector.multi_reduction <add>, %8, %cst [1] : vector<32x32xf32> to vector<32xf32>
    %10 = vector.shape_cast %9 : vector<32xf32> to vector<32x1xf32>
    %cst_15 = arith.constant 3.200000e+01 : f32
    %11 = vector.broadcast %cst_15 : f32 to vector<32x1xf32>
    %12 = arith.divf %10, %11 : vector<32x1xf32>
    %cst_16 = arith.constant 9.99999997E-7 : f32
    %13 = vector.broadcast %cst_16 : f32 to vector<32x1xf32>
    %14 = arith.addf %12, %13 : vector<32x1xf32>
    %15 = math.rsqrt %14 : vector<32x1xf32>
    %16 = vector.broadcast %15 : vector<32x1xf32> to vector<32x32xf32>
    %17 = arith.mulf %2, %16 : vector<32x32xf32>
    %18 = vector.broadcast %7 : vector<1x32xf32> to vector<32x32xf32>
    %19 = arith.mulf %17, %18 : vector<32x32xf32>
    %cst_17 = arith.constant 0.000000e+00 : f32
    %20 = vector.broadcast %cst_17 : f32 to vector<32x32xf32>
    %c0_18 = arith.constant 0 : index
    %c0_19 = arith.constant 0 : index
    %c0_20 = arith.constant 0 : index
    %21 = vector.load %arg13[%c0_18, %c0_19, %c0_20] : memref<8x32x4xf32, #tpu.memory_space<vmem>>, vector<1x32x4xf32>
    %22 = vector.shape_cast %21 : vector<1x32x4xf32> to vector<32x4xf32>
    %cst_21 = arith.constant dense<0.000000e+00> : vector<32x4xf32>
    %23 = tpu.matmul %19, %22, %cst_21 {dimension_numbers = #tpu.dot_dimension_numbers<[1], [0], [0], [1], [0, 0, 1, 1], [], []>} : vector<32x32xf32>, vector<32x4xf32>, vector<32x4xf32> -> vector<32x4xf32>
    %c0_22 = arith.constant 0 : index
    %c0_23 = arith.constant 0 : index
    %c0_24 = arith.constant 0 : index
    %24 = vector.load %arg14[%c0_22, %c0_23, %c0_24] : memref<8x32x4xf32, #tpu.memory_space<vmem>>, vector<1x32x4xf32>
    %25 = vector.shape_cast %24 : vector<1x32x4xf32> to vector<32x4xf32>
    %cst_25 = arith.constant dense<0.000000e+00> : vector<32x4xf32>
    %26 = tpu.matmul %19, %25, %cst_25 {dimension_numbers = #tpu.dot_dimension_numbers<[1], [0], [0], [1], [0, 0, 1, 1], [], []>} : vector<32x32xf32>, vector<32x4xf32>, vector<32x4xf32> -> vector<32x4xf32>
    %c0_26 = arith.constant 0 : index
    %c0_27 = arith.constant 0 : index
    %c0_28 = arith.constant 0 : index
    %27 = vector.load %arg15[%c0_26, %c0_27, %c0_28] : memref<8x32x4xf32, #tpu.memory_space<vmem>>, vector<1x32x4xf32>
    %28 = vector.shape_cast %27 : vector<1x32x4xf32> to vector<32x4xf32>
    %cst_29 = arith.constant dense<0.000000e+00> : vector<32x4xf32>
    %29 = tpu.matmul %19, %28, %cst_29 {dimension_numbers = #tpu.dot_dimension_numbers<[1], [0], [0], [1], [0, 0, 1, 1], [], []>} : vector<32x32xf32>, vector<32x4xf32>, vector<32x4xf32> -> vector<32x4xf32>
    %30 = arith.mulf %23, %5 : vector<32x4xf32>
    %cst_30 = arith.constant dense<0.000000e+00> : vector<32x4xf32>
    %31 = tpu.matmul %23, %0, %cst_30 {dimension_numbers = #tpu.dot_dimension_numbers<[1], [0], [0], [1], [0, 0, 1, 1], [], []>} : vector<32x4xf32>, vector<4x4xf32>, vector<32x4xf32> -> vector<32x4xf32>
    %32 = arith.mulf %31, %6 : vector<32x4xf32>
    %33 = arith.addf %30, %32 : vector<32x4xf32>
    %cst_31 = arith.constant 1.000000e+00 : f32
    %34 = vector.broadcast %cst_31 : f32 to vector<32x4xf32>
    %35 = arith.mulf %33, %34 : vector<32x4xf32>
    %36 = arith.mulf %26, %5 : vector<32x4xf32>
    %cst_32 = arith.constant dense<0.000000e+00> : vector<32x4xf32>
    %37 = tpu.matmul %26, %0, %cst_32 {dimension_numbers = #tpu.dot_dimension_numbers<[1], [0], [0], [1], [0, 0, 1, 1], [], []>} : vector<32x4xf32>, vector<4x4xf32>, vector<32x4xf32> -> vector<32x4xf32>
    %38 = arith.mulf %37, %6 : vector<32x4xf32>
    %39 = arith.addf %36, %38 : vector<32x4xf32>
    %cst_33 = arith.constant 1.000000e+00 : f32
    %40 = vector.broadcast %cst_33 : f32 to vector<32x4xf32>
    %41 = arith.mulf %39, %40 : vector<32x4xf32>
    %42 = vector.extract_strided_slice %35 {offsets = [0, 0], sizes = [16, 4], strides = [1, 1]} : vector<32x4xf32> to vector<16x4xf32>
    %43 = vector.extract_strided_slice %41 {offsets = [0, 0], sizes = [16, 4], strides = [1, 1]} : vector<32x4xf32> to vector<16x4xf32>
    %44 = vector.extract_strided_slice %29 {offsets = [0, 0], sizes = [16, 4], strides = [1, 1]} : vector<32x4xf32> to vector<16x4xf32>
    %cst_34 = arith.constant dense<0.000000e+00> : vector<16x16xf32>
    %45 = tpu.matmul %42, %43, %cst_34 {dimension_numbers = #tpu.dot_dimension_numbers<[1], [1], [0], [0], [0, 0, 1, 0], [], []>} : vector<16x4xf32>, vector<16x4xf32>, vector<16x16xf32> -> vector<16x16xf32>
    %cst_35 = arith.constant 5.000000e-01 : f32
    %46 = vector.broadcast %cst_35 : f32 to vector<16x16xf32>
    %47 = arith.mulf %45, %46 : vector<16x16xf32>
    %cst_36 = arith.constant dense<0xFF800000> : vector<16xf32>
    %48 = vector.multi_reduction <maximumf>, %47, %cst_36 [1] : vector<16x16xf32> to vector<16xf32>
    %49 = vector.shape_cast %48 : vector<16xf32> to vector<16x1xf32>
    %50 = vector.broadcast %49 : vector<16x1xf32> to vector<16x16xf32>
    %51 = arith.subf %47, %50 : vector<16x16xf32>
    %52 = math.exp %51 : vector<16x16xf32>
    %cst_37 = arith.constant dense<0.000000e+00> : vector<16xf32>
    %53 = vector.multi_reduction <add>, %52, %cst_37 [1] : vector<16x16xf32> to vector<16xf32>
    %54 = vector.shape_cast %53 : vector<16xf32> to vector<16x1xf32>
    %55 = vector.broadcast %54 : vector<16x1xf32> to vector<16x16xf32>
    %56 = arith.divf %52, %55 : vector<16x16xf32>
    %cst_38 = arith.constant dense<0.000000e+00> : vector<16x4xf32>
    %57 = tpu.matmul %56, %44, %cst_38 {dimension_numbers = #tpu.dot_dimension_numbers<[1], [0], [0], [1], [0, 0, 1, 1], [], []>} : vector<16x16xf32>, vector<16x4xf32>, vector<16x4xf32> -> vector<16x4xf32>
    %58 = vector.extract_strided_slice %35 {offsets = [16, 0], sizes = [16, 4], strides = [1, 1]} : vector<32x4xf32> to vector<16x4xf32>
    %59 = vector.extract_strided_slice %41 {offsets = [16, 0], sizes = [16, 4], strides = [1, 1]} : vector<32x4xf32> to vector<16x4xf32>
    %60 = vector.extract_strided_slice %29 {offsets = [16, 0], sizes = [16, 4], strides = [1, 1]} : vector<32x4xf32> to vector<16x4xf32>
    %cst_39 = arith.constant dense<0.000000e+00> : vector<16x16xf32>
    %61 = tpu.matmul %58, %59, %cst_39 {dimension_numbers = #tpu.dot_dimension_numbers<[1], [1], [0], [0], [0, 0, 1, 0], [], []>} : vector<16x4xf32>, vector<16x4xf32>, vector<16x16xf32> -> vector<16x16xf32>
    %cst_40 = arith.constant 5.000000e-01 : f32
    %62 = vector.broadcast %cst_40 : f32 to vector<16x16xf32>
    %63 = arith.mulf %61, %62 : vector<16x16xf32>
    %cst_41 = arith.constant dense<0xFF800000> : vector<16xf32>
    %64 = vector.multi_reduction <maximumf>, %63, %cst_41 [1] : vector<16x16xf32> to vector<16xf32>
    %65 = vector.shape_cast %64 : vector<16xf32> to vector<16x1xf32>
    %66 = vector.broadcast %65 : vector<16x1xf32> to vector<16x16xf32>
    %67 = arith.subf %63, %66 : vector<16x16xf32>
    %68 = math.exp %67 : vector<16x16xf32>
    %cst_42 = arith.constant dense<0.000000e+00> : vector<16xf32>
    %69 = vector.multi_reduction <add>, %68, %cst_42 [1] : vector<16x16xf32> to vector<16xf32>
    %70 = vector.shape_cast %69 : vector<16xf32> to vector<16x1xf32>
    %71 = vector.broadcast %70 : vector<16x1xf32> to vector<16x16xf32>
    %72 = arith.divf %68, %71 : vector<16x16xf32>
    %cst_43 = arith.constant dense<0.000000e+00> : vector<16x4xf32>
    %73 = tpu.matmul %72, %60, %cst_43 {dimension_numbers = #tpu.dot_dimension_numbers<[1], [0], [0], [1], [0, 0, 1, 1], [], []>} : vector<16x16xf32>, vector<16x4xf32>, vector<16x4xf32> -> vector<16x4xf32>
    %74 = tpu.concatenate %57, %73 in 0 : vector<16x4xf32>, vector<16x4xf32> -> vector<32x4xf32>
    %c0_44 = arith.constant 0 : index
    %c0_45 = arith.constant 0 : index
    %c0_46 = arith.constant 0 : index
    %75 = vector.load %arg16[%c0_44, %c0_45, %c0_46] : memref<8x4x32xf32, #tpu.memory_space<vmem>>, vector<1x4x32xf32>
    %76 = vector.shape_cast %75 : vector<1x4x32xf32> to vector<4x32xf32>
    %cst_47 = arith.constant dense<0.000000e+00> : vector<32x32xf32>
    %77 = tpu.matmul %74, %76, %cst_47 {dimension_numbers = #tpu.dot_dimension_numbers<[1], [0], [0], [1], [0, 0, 1, 1], [], []>} : vector<32x4xf32>, vector<4x32xf32>, vector<32x32xf32> -> vector<32x32xf32>
    %78 = arith.addf %20, %77 : vector<32x32xf32>
    %c1 = arith.constant 1 : index
    %c0_48 = arith.constant 0 : index
    %c0_49 = arith.constant 0 : index
    %79 = vector.load %arg13[%c1, %c0_48, %c0_49] : memref<8x32x4xf32, #tpu.memory_space<vmem>>, vector<1x32x4xf32>
    %80 = vector.shape_cast %79 : vector<1x32x4xf32> to vector<32x4xf32>
    %cst_50 = arith.constant dense<0.000000e+00> : vector<32x4xf32>
    %81 = tpu.matmul %19, %80, %cst_50 {dimension_numbers = #tpu.dot_dimension_numbers<[1], [0], [0], [1], [0, 0, 1, 1], [], []>} : vector<32x32xf32>, vector<32x4xf32>, vector<32x4xf32> -> vector<32x4xf32>
    %c1_51 = arith.constant 1 : index
    %c0_52 = arith.constant 0 : index
    %c0_53 = arith.constant 0 : index
    %82 = vector.load %arg14[%c1_51, %c0_52, %c0_53] : memref<8x32x4xf32, #tpu.memory_space<vmem>>, vector<1x32x4xf32>
    %83 = vector.shape_cast %82 : vector<1x32x4xf32> to vector<32x4xf32>
    %cst_54 = arith.constant dense<0.000000e+00> : vector<32x4xf32>
    %84 = tpu.matmul %19, %83, %cst_54 {dimension_numbers = #tpu.dot_dimension_numbers<[1], [0], [0], [1], [0, 0, 1, 1], [], []>} : vector<32x32xf32>, vector<32x4xf32>, vector<32x4xf32> -> vector<32x4xf32>
    %c1_55 = arith.constant 1 : index
    %c0_56 = arith.constant 0 : index
    %c0_57 = arith.constant 0 : index
    %85 = vector.load %arg15[%c1_55, %c0_56, %c0_57] : memref<8x32x4xf32, #tpu.memory_space<vmem>>, vector<1x32x4xf32>
    %86 = vector.shape_cast %85 : vector<1x32x4xf32> to vector<32x4xf32>
    %cst_58 = arith.constant dense<0.000000e+00> : vector<32x4xf32>
    %87 = tpu.matmul %19, %86, %cst_58 {dimension_numbers = #tpu.dot_dimension_numbers<[1], [0], [0], [1], [0, 0, 1, 1], [], []>} : vector<32x32xf32>, vector<32x4xf32>, vector<32x4xf32> -> vector<32x4xf32>
    %88 = arith.mulf %81, %5 : vector<32x4xf32>
    %cst_59 = arith.constant dense<0.000000e+00> : vector<32x4xf32>
    %89 = tpu.matmul %81, %0, %cst_59 {dimension_numbers = #tpu.dot_dimension_numbers<[1], [0], [0], [1], [0, 0, 1, 1], [], []>} : vector<32x4xf32>, vector<4x4xf32>, vector<32x4xf32> -> vector<32x4xf32>
    %90 = arith.mulf %89, %6 : vector<32x4xf32>
    %91 = arith.addf %88, %90 : vector<32x4xf32>
    %cst_60 = arith.constant 1.000000e+00 : f32
    %92 = vector.broadcast %cst_60 : f32 to vector<32x4xf32>
    %93 = arith.mulf %91, %92 : vector<32x4xf32>
    %94 = arith.mulf %84, %5 : vector<32x4xf32>
    %cst_61 = arith.constant dense<0.000000e+00> : vector<32x4xf32>
    %95 = tpu.matmul %84, %0, %cst_61 {dimension_numbers = #tpu.dot_dimension_numbers<[1], [0], [0], [1], [0, 0, 1, 1], [], []>} : vector<32x4xf32>, vector<4x4xf32>, vector<32x4xf32> -> vector<32x4xf32>
    %96 = arith.mulf %95, %6 : vector<32x4xf32>
    %97 = arith.addf %94, %96 : vector<32x4xf32>
    %cst_62 = arith.constant 1.000000e+00 : f32
    %98 = vector.broadcast %cst_62 : f32 to vector<32x4xf32>
    %99 = arith.mulf %97, %98 : vector<32x4xf32>
    %100 = vector.extract_strided_slice %93 {offsets = [0, 0], sizes = [16, 4], strides = [1, 1]} : vector<32x4xf32> to vector<16x4xf32>
    %101 = vector.extract_strided_slice %99 {offsets = [0, 0], sizes = [16, 4], strides = [1, 1]} : vector<32x4xf32> to vector<16x4xf32>
    %102 = vector.extract_strided_slice %87 {offsets = [0, 0], sizes = [16, 4], strides = [1, 1]} : vector<32x4xf32> to vector<16x4xf32>
    %cst_63 = arith.constant dense<0.000000e+00> : vector<16x16xf32>
    %103 = tpu.matmul %100, %101, %cst_63 {dimension_numbers = #tpu.dot_dimension_numbers<[1], [1], [0], [0], [0, 0, 1, 0], [], []>} : vector<16x4xf32>, vector<16x4xf32>, vector<16x16xf32> -> vector<16x16xf32>
    %cst_64 = arith.constant 5.000000e-01 : f32
    %104 = vector.broadcast %cst_64 : f32 to vector<16x16xf32>
    %105 = arith.mulf %103, %104 : vector<16x16xf32>
    %cst_65 = arith.constant dense<0xFF800000> : vector<16xf32>
    %106 = vector.multi_reduction <maximumf>, %105, %cst_65 [1] : vector<16x16xf32> to vector<16xf32>
    %107 = vector.shape_cast %106 : vector<16xf32> to vector<16x1xf32>
    %108 = vector.broadcast %107 : vector<16x1xf32> to vector<16x16xf32>
    %109 = arith.subf %105, %108 : vector<16x16xf32>
    %110 = math.exp %109 : vector<16x16xf32>
    %cst_66 = arith.constant dense<0.000000e+00> : vector<16xf32>
    %111 = vector.multi_reduction <add>, %110, %cst_66 [1] : vector<16x16xf32> to vector<16xf32>
    %112 = vector.shape_cast %111 : vector<16xf32> to vector<16x1xf32>
    %113 = vector.broadcast %112 : vector<16x1xf32> to vector<16x16xf32>
    %114 = arith.divf %110, %113 : vector<16x16xf32>
    %cst_67 = arith.constant dense<0.000000e+00> : vector<16x4xf32>
    %115 = tpu.matmul %114, %102, %cst_67 {dimension_numbers = #tpu.dot_dimension_numbers<[1], [0], [0], [1], [0, 0, 1, 1], [], []>} : vector<16x16xf32>, vector<16x4xf32>, vector<16x4xf32> -> vector<16x4xf32>
    %116 = vector.extract_strided_slice %93 {offsets = [16, 0], sizes = [16, 4], strides = [1, 1]} : vector<32x4xf32> to vector<16x4xf32>
    %117 = vector.extract_strided_slice %99 {offsets = [16, 0], sizes = [16, 4], strides = [1, 1]} : vector<32x4xf32> to vector<16x4xf32>
    %118 = vector.extract_strided_slice %87 {offsets = [16, 0], sizes = [16, 4], strides = [1, 1]} : vector<32x4xf32> to vector<16x4xf32>
    %cst_68 = arith.constant dense<0.000000e+00> : vector<16x16xf32>
    %119 = tpu.matmul %116, %117, %cst_68 {dimension_numbers = #tpu.dot_dimension_numbers<[1], [1], [0], [0], [0, 0, 1, 0], [], []>} : vector<16x4xf32>, vector<16x4xf32>, vector<16x16xf32> -> vector<16x16xf32>
    %cst_69 = arith.constant 5.000000e-01 : f32
    %120 = vector.broadcast %cst_69 : f32 to vector<16x16xf32>
    %121 = arith.mulf %119, %120 : vector<16x16xf32>
    %cst_70 = arith.constant dense<0xFF800000> : vector<16xf32>
    %122 = vector.multi_reduction <maximumf>, %121, %cst_70 [1] : vector<16x16xf32> to vector<16xf32>
    %123 = vector.shape_cast %122 : vector<16xf32> to vector<16x1xf32>
    %124 = vector.broadcast %123 : vector<16x1xf32> to vector<16x16xf32>
    %125 = arith.subf %121, %124 : vector<16x16xf32>
    %126 = math.exp %125 : vector<16x16xf32>
    %cst_71 = arith.constant dense<0.000000e+00> : vector<16xf32>
    %127 = vector.multi_reduction <add>, %126, %cst_71 [1] : vector<16x16xf32> to vector<16xf32>
    %128 = vector.shape_cast %127 : vector<16xf32> to vector<16x1xf32>
    %129 = vector.broadcast %128 : vector<16x1xf32> to vector<16x16xf32>
    %130 = arith.divf %126, %129 : vector<16x16xf32>
    %cst_72 = arith.constant dense<0.000000e+00> : vector<16x4xf32>
    %131 = tpu.matmul %130, %118, %cst_72 {dimension_numbers = #tpu.dot_dimension_numbers<[1], [0], [0], [1], [0, 0, 1, 1], [], []>} : vector<16x16xf32>, vector<16x4xf32>, vector<16x4xf32> -> vector<16x4xf32>
    %132 = tpu.concatenate %115, %131 in 0 : vector<16x4xf32>, vector<16x4xf32> -> vector<32x4xf32>
    %c1_73 = arith.constant 1 : index
    %c0_74 = arith.constant 0 : index
    %c0_75 = arith.constant 0 : index
    %133 = vector.load %arg16[%c1_73, %c0_74, %c0_75] : memref<8x4x32xf32, #tpu.memory_space<vmem>>, vector<1x4x32xf32>
    %134 = vector.shape_cast %133 : vector<1x4x32xf32> to vector<4x32xf32>
    %cst_76 = arith.constant dense<0.000000e+00> : vector<32x32xf32>
    %135 = tpu.matmul %132, %134, %cst_76 {dimension_numbers = #tpu.dot_dimension_numbers<[1], [0], [0], [1], [0, 0, 1, 1], [], []>} : vector<32x4xf32>, vector<4x32xf32>, vector<32x32xf32> -> vector<32x32xf32>
    %136 = arith.addf %78, %135 : vector<32x32xf32>
    %c2 = arith.constant 2 : index
    %c0_77 = arith.constant 0 : index
    %c0_78 = arith.constant 0 : index
    %137 = vector.load %arg13[%c2, %c0_77, %c0_78] : memref<8x32x4xf32, #tpu.memory_space<vmem>>, vector<1x32x4xf32>
    %138 = vector.shape_cast %137 : vector<1x32x4xf32> to vector<32x4xf32>
    %cst_79 = arith.constant dense<0.000000e+00> : vector<32x4xf32>
    %139 = tpu.matmul %19, %138, %cst_79 {dimension_numbers = #tpu.dot_dimension_numbers<[1], [0], [0], [1], [0, 0, 1, 1], [], []>} : vector<32x32xf32>, vector<32x4xf32>, vector<32x4xf32> -> vector<32x4xf32>
    %c2_80 = arith.constant 2 : index
    %c0_81 = arith.constant 0 : index
    %c0_82 = arith.constant 0 : index
    %140 = vector.load %arg14[%c2_80, %c0_81, %c0_82] : memref<8x32x4xf32, #tpu.memory_space<vmem>>, vector<1x32x4xf32>
    %141 = vector.shape_cast %140 : vector<1x32x4xf32> to vector<32x4xf32>
    %cst_83 = arith.constant dense<0.000000e+00> : vector<32x4xf32>
    %142 = tpu.matmul %19, %141, %cst_83 {dimension_numbers = #tpu.dot_dimension_numbers<[1], [0], [0], [1], [0, 0, 1, 1], [], []>} : vector<32x32xf32>, vector<32x4xf32>, vector<32x4xf32> -> vector<32x4xf32>
    %c2_84 = arith.constant 2 : index
    %c0_85 = arith.constant 0 : index
    %c0_86 = arith.constant 0 : index
    %143 = vector.load %arg15[%c2_84, %c0_85, %c0_86] : memref<8x32x4xf32, #tpu.memory_space<vmem>>, vector<1x32x4xf32>
    %144 = vector.shape_cast %143 : vector<1x32x4xf32> to vector<32x4xf32>
    %cst_87 = arith.constant dense<0.000000e+00> : vector<32x4xf32>
    %145 = tpu.matmul %19, %144, %cst_87 {dimension_numbers = #tpu.dot_dimension_numbers<[1], [0], [0], [1], [0, 0, 1, 1], [], []>} : vector<32x32xf32>, vector<32x4xf32>, vector<32x4xf32> -> vector<32x4xf32>
    %146 = arith.mulf %139, %5 : vector<32x4xf32>
    %cst_88 = arith.constant dense<0.000000e+00> : vector<32x4xf32>
    %147 = tpu.matmul %139, %0, %cst_88 {dimension_numbers = #tpu.dot_dimension_numbers<[1], [0], [0], [1], [0, 0, 1, 1], [], []>} : vector<32x4xf32>, vector<4x4xf32>, vector<32x4xf32> -> vector<32x4xf32>
    %148 = arith.mulf %147, %6 : vector<32x4xf32>
    %149 = arith.addf %146, %148 : vector<32x4xf32>
    %cst_89 = arith.constant 1.000000e+00 : f32
    %150 = vector.broadcast %cst_89 : f32 to vector<32x4xf32>
    %151 = arith.mulf %149, %150 : vector<32x4xf32>
    %152 = arith.mulf %142, %5 : vector<32x4xf32>
    %cst_90 = arith.constant dense<0.000000e+00> : vector<32x4xf32>
    %153 = tpu.matmul %142, %0, %cst_90 {dimension_numbers = #tpu.dot_dimension_numbers<[1], [0], [0], [1], [0, 0, 1, 1], [], []>} : vector<32x4xf32>, vector<4x4xf32>, vector<32x4xf32> -> vector<32x4xf32>
    %154 = arith.mulf %153, %6 : vector<32x4xf32>
    %155 = arith.addf %152, %154 : vector<32x4xf32>
    %cst_91 = arith.constant 1.000000e+00 : f32
    %156 = vector.broadcast %cst_91 : f32 to vector<32x4xf32>
    %157 = arith.mulf %155, %156 : vector<32x4xf32>
    %158 = vector.extract_strided_slice %151 {offsets = [0, 0], sizes = [16, 4], strides = [1, 1]} : vector<32x4xf32> to vector<16x4xf32>
    %159 = vector.extract_strided_slice %157 {offsets = [0, 0], sizes = [16, 4], strides = [1, 1]} : vector<32x4xf32> to vector<16x4xf32>
    %160 = vector.extract_strided_slice %145 {offsets = [0, 0], sizes = [16, 4], strides = [1, 1]} : vector<32x4xf32> to vector<16x4xf32>
    %cst_92 = arith.constant dense<0.000000e+00> : vector<16x16xf32>
    %161 = tpu.matmul %158, %159, %cst_92 {dimension_numbers = #tpu.dot_dimension_numbers<[1], [1], [0], [0], [0, 0, 1, 0], [], []>} : vector<16x4xf32>, vector<16x4xf32>, vector<16x16xf32> -> vector<16x16xf32>
    %cst_93 = arith.constant 5.000000e-01 : f32
    %162 = vector.broadcast %cst_93 : f32 to vector<16x16xf32>
    %163 = arith.mulf %161, %162 : vector<16x16xf32>
    %cst_94 = arith.constant dense<0xFF800000> : vector<16xf32>
    %164 = vector.multi_reduction <maximumf>, %163, %cst_94 [1] : vector<16x16xf32> to vector<16xf32>
    %165 = vector.shape_cast %164 : vector<16xf32> to vector<16x1xf32>
    %166 = vector.broadcast %165 : vector<16x1xf32> to vector<16x16xf32>
    %167 = arith.subf %163, %166 : vector<16x16xf32>
    %168 = math.exp %167 : vector<16x16xf32>
    %cst_95 = arith.constant dense<0.000000e+00> : vector<16xf32>
    %169 = vector.multi_reduction <add>, %168, %cst_95 [1] : vector<16x16xf32> to vector<16xf32>
    %170 = vector.shape_cast %169 : vector<16xf32> to vector<16x1xf32>
    %171 = vector.broadcast %170 : vector<16x1xf32> to vector<16x16xf32>
    %172 = arith.divf %168, %171 : vector<16x16xf32>
    %cst_96 = arith.constant dense<0.000000e+00> : vector<16x4xf32>
    %173 = tpu.matmul %172, %160, %cst_96 {dimension_numbers = #tpu.dot_dimension_numbers<[1], [0], [0], [1], [0, 0, 1, 1], [], []>} : vector<16x16xf32>, vector<16x4xf32>, vector<16x4xf32> -> vector<16x4xf32>
    %174 = vector.extract_strided_slice %151 {offsets = [16, 0], sizes = [16, 4], strides = [1, 1]} : vector<32x4xf32> to vector<16x4xf32>
    %175 = vector.extract_strided_slice %157 {offsets = [16, 0], sizes = [16, 4], strides = [1, 1]} : vector<32x4xf32> to vector<16x4xf32>
    %176 = vector.extract_strided_slice %145 {offsets = [16, 0], sizes = [16, 4], strides = [1, 1]} : vector<32x4xf32> to vector<16x4xf32>
    %cst_97 = arith.constant dense<0.000000e+00> : vector<16x16xf32>
    %177 = tpu.matmul %174, %175, %cst_97 {dimension_numbers = #tpu.dot_dimension_numbers<[1], [1], [0], [0], [0, 0, 1, 0], [], []>} : vector<16x4xf32>, vector<16x4xf32>, vector<16x16xf32> -> vector<16x16xf32>
    %cst_98 = arith.constant 5.000000e-01 : f32
    %178 = vector.broadcast %cst_98 : f32 to vector<16x16xf32>
    %179 = arith.mulf %177, %178 : vector<16x16xf32>
    %cst_99 = arith.constant dense<0xFF800000> : vector<16xf32>
    %180 = vector.multi_reduction <maximumf>, %179, %cst_99 [1] : vector<16x16xf32> to vector<16xf32>
    %181 = vector.shape_cast %180 : vector<16xf32> to vector<16x1xf32>
    %182 = vector.broadcast %181 : vector<16x1xf32> to vector<16x16xf32>
    %183 = arith.subf %179, %182 : vector<16x16xf32>
    %184 = math.exp %183 : vector<16x16xf32>
    %cst_100 = arith.constant dense<0.000000e+00> : vector<16xf32>
    %185 = vector.multi_reduction <add>, %184, %cst_100 [1] : vector<16x16xf32> to vector<16xf32>
    %186 = vector.shape_cast %185 : vector<16xf32> to vector<16x1xf32>
    %187 = vector.broadcast %186 : vector<16x1xf32> to vector<16x16xf32>
    %188 = arith.divf %184, %187 : vector<16x16xf32>
    %cst_101 = arith.constant dense<0.000000e+00> : vector<16x4xf32>
    %189 = tpu.matmul %188, %176, %cst_101 {dimension_numbers = #tpu.dot_dimension_numbers<[1], [0], [0], [1], [0, 0, 1, 1], [], []>} : vector<16x16xf32>, vector<16x4xf32>, vector<16x4xf32> -> vector<16x4xf32>
    %190 = tpu.concatenate %173, %189 in 0 : vector<16x4xf32>, vector<16x4xf32> -> vector<32x4xf32>
    %c2_102 = arith.constant 2 : index
    %c0_103 = arith.constant 0 : index
    %c0_104 = arith.constant 0 : index
    %191 = vector.load %arg16[%c2_102, %c0_103, %c0_104] : memref<8x4x32xf32, #tpu.memory_space<vmem>>, vector<1x4x32xf32>
    %192 = vector.shape_cast %191 : vector<1x4x32xf32> to vector<4x32xf32>
    %cst_105 = arith.constant dense<0.000000e+00> : vector<32x32xf32>
    %193 = tpu.matmul %190, %192, %cst_105 {dimension_numbers = #tpu.dot_dimension_numbers<[1], [0], [0], [1], [0, 0, 1, 1], [], []>} : vector<32x4xf32>, vector<4x32xf32>, vector<32x32xf32> -> vector<32x32xf32>
    %194 = arith.addf %136, %193 : vector<32x32xf32>
    %c3 = arith.constant 3 : index
    %c0_106 = arith.constant 0 : index
    %c0_107 = arith.constant 0 : index
    %195 = vector.load %arg13[%c3, %c0_106, %c0_107] : memref<8x32x4xf32, #tpu.memory_space<vmem>>, vector<1x32x4xf32>
    %196 = vector.shape_cast %195 : vector<1x32x4xf32> to vector<32x4xf32>
    %cst_108 = arith.constant dense<0.000000e+00> : vector<32x4xf32>
    %197 = tpu.matmul %19, %196, %cst_108 {dimension_numbers = #tpu.dot_dimension_numbers<[1], [0], [0], [1], [0, 0, 1, 1], [], []>} : vector<32x32xf32>, vector<32x4xf32>, vector<32x4xf32> -> vector<32x4xf32>
    %c3_109 = arith.constant 3 : index
    %c0_110 = arith.constant 0 : index
    %c0_111 = arith.constant 0 : index
    %198 = vector.load %arg14[%c3_109, %c0_110, %c0_111] : memref<8x32x4xf32, #tpu.memory_space<vmem>>, vector<1x32x4xf32>
    %199 = vector.shape_cast %198 : vector<1x32x4xf32> to vector<32x4xf32>
    %cst_112 = arith.constant dense<0.000000e+00> : vector<32x4xf32>
    %200 = tpu.matmul %19, %199, %cst_112 {dimension_numbers = #tpu.dot_dimension_numbers<[1], [0], [0], [1], [0, 0, 1, 1], [], []>} : vector<32x32xf32>, vector<32x4xf32>, vector<32x4xf32> -> vector<32x4xf32>
    %c3_113 = arith.constant 3 : index
    %c0_114 = arith.constant 0 : index
    %c0_115 = arith.constant 0 : index
    %201 = vector.load %arg15[%c3_113, %c0_114, %c0_115] : memref<8x32x4xf32, #tpu.memory_space<vmem>>, vector<1x32x4xf32>
    %202 = vector.shape_cast %201 : vector<1x32x4xf32> to vector<32x4xf32>
    %cst_116 = arith.constant dense<0.000000e+00> : vector<32x4xf32>
    %203 = tpu.matmul %19, %202, %cst_116 {dimension_numbers = #tpu.dot_dimension_numbers<[1], [0], [0], [1], [0, 0, 1, 1], [], []>} : vector<32x32xf32>, vector<32x4xf32>, vector<32x4xf32> -> vector<32x4xf32>
    %204 = arith.mulf %197, %5 : vector<32x4xf32>
    %cst_117 = arith.constant dense<0.000000e+00> : vector<32x4xf32>
    %205 = tpu.matmul %197, %0, %cst_117 {dimension_numbers = #tpu.dot_dimension_numbers<[1], [0], [0], [1], [0, 0, 1, 1], [], []>} : vector<32x4xf32>, vector<4x4xf32>, vector<32x4xf32> -> vector<32x4xf32>
    %206 = arith.mulf %205, %6 : vector<32x4xf32>
    %207 = arith.addf %204, %206 : vector<32x4xf32>
    %cst_118 = arith.constant 1.000000e+00 : f32
    %208 = vector.broadcast %cst_118 : f32 to vector<32x4xf32>
    %209 = arith.mulf %207, %208 : vector<32x4xf32>
    %210 = arith.mulf %200, %5 : vector<32x4xf32>
    %cst_119 = arith.constant dense<0.000000e+00> : vector<32x4xf32>
    %211 = tpu.matmul %200, %0, %cst_119 {dimension_numbers = #tpu.dot_dimension_numbers<[1], [0], [0], [1], [0, 0, 1, 1], [], []>} : vector<32x4xf32>, vector<4x4xf32>, vector<32x4xf32> -> vector<32x4xf32>
    %212 = arith.mulf %211, %6 : vector<32x4xf32>
    %213 = arith.addf %210, %212 : vector<32x4xf32>
    %cst_120 = arith.constant 1.000000e+00 : f32
    %214 = vector.broadcast %cst_120 : f32 to vector<32x4xf32>
    %215 = arith.mulf %213, %214 : vector<32x4xf32>
    %216 = vector.extract_strided_slice %209 {offsets = [0, 0], sizes = [16, 4], strides = [1, 1]} : vector<32x4xf32> to vector<16x4xf32>
    %217 = vector.extract_strided_slice %215 {offsets = [0, 0], sizes = [16, 4], strides = [1, 1]} : vector<32x4xf32> to vector<16x4xf32>
    %218 = vector.extract_strided_slice %203 {offsets = [0, 0], sizes = [16, 4], strides = [1, 1]} : vector<32x4xf32> to vector<16x4xf32>
    %cst_121 = arith.constant dense<0.000000e+00> : vector<16x16xf32>
    %219 = tpu.matmul %216, %217, %cst_121 {dimension_numbers = #tpu.dot_dimension_numbers<[1], [1], [0], [0], [0, 0, 1, 0], [], []>} : vector<16x4xf32>, vector<16x4xf32>, vector<16x16xf32> -> vector<16x16xf32>
    %cst_122 = arith.constant 5.000000e-01 : f32
    %220 = vector.broadcast %cst_122 : f32 to vector<16x16xf32>
    %221 = arith.mulf %219, %220 : vector<16x16xf32>
    %cst_123 = arith.constant dense<0xFF800000> : vector<16xf32>
    %222 = vector.multi_reduction <maximumf>, %221, %cst_123 [1] : vector<16x16xf32> to vector<16xf32>
    %223 = vector.shape_cast %222 : vector<16xf32> to vector<16x1xf32>
    %224 = vector.broadcast %223 : vector<16x1xf32> to vector<16x16xf32>
    %225 = arith.subf %221, %224 : vector<16x16xf32>
    %226 = math.exp %225 : vector<16x16xf32>
    %cst_124 = arith.constant dense<0.000000e+00> : vector<16xf32>
    %227 = vector.multi_reduction <add>, %226, %cst_124 [1] : vector<16x16xf32> to vector<16xf32>
    %228 = vector.shape_cast %227 : vector<16xf32> to vector<16x1xf32>
    %229 = vector.broadcast %228 : vector<16x1xf32> to vector<16x16xf32>
    %230 = arith.divf %226, %229 : vector<16x16xf32>
    %cst_125 = arith.constant dense<0.000000e+00> : vector<16x4xf32>
    %231 = tpu.matmul %230, %218, %cst_125 {dimension_numbers = #tpu.dot_dimension_numbers<[1], [0], [0], [1], [0, 0, 1, 1], [], []>} : vector<16x16xf32>, vector<16x4xf32>, vector<16x4xf32> -> vector<16x4xf32>
    %232 = vector.extract_strided_slice %209 {offsets = [16, 0], sizes = [16, 4], strides = [1, 1]} : vector<32x4xf32> to vector<16x4xf32>
    %233 = vector.extract_strided_slice %215 {offsets = [16, 0], sizes = [16, 4], strides = [1, 1]} : vector<32x4xf32> to vector<16x4xf32>
    %234 = vector.extract_strided_slice %203 {offsets = [16, 0], sizes = [16, 4], strides = [1, 1]} : vector<32x4xf32> to vector<16x4xf32>
    %cst_126 = arith.constant dense<0.000000e+00> : vector<16x16xf32>
    %235 = tpu.matmul %232, %233, %cst_126 {dimension_numbers = #tpu.dot_dimension_numbers<[1], [1], [0], [0], [0, 0, 1, 0], [], []>} : vector<16x4xf32>, vector<16x4xf32>, vector<16x16xf32> -> vector<16x16xf32>
    %cst_127 = arith.constant 5.000000e-01 : f32
    %236 = vector.broadcast %cst_127 : f32 to vector<16x16xf32>
    %237 = arith.mulf %235, %236 : vector<16x16xf32>
    %cst_128 = arith.constant dense<0xFF800000> : vector<16xf32>
    %238 = vector.multi_reduction <maximumf>, %237, %cst_128 [1] : vector<16x16xf32> to vector<16xf32>
    %239 = vector.shape_cast %238 : vector<16xf32> to vector<16x1xf32>
    %240 = vector.broadcast %239 : vector<16x1xf32> to vector<16x16xf32>
    %241 = arith.subf %237, %240 : vector<16x16xf32>
    %242 = math.exp %241 : vector<16x16xf32>
    %cst_129 = arith.constant dense<0.000000e+00> : vector<16xf32>
    %243 = vector.multi_reduction <add>, %242, %cst_129 [1] : vector<16x16xf32> to vector<16xf32>
    %244 = vector.shape_cast %243 : vector<16xf32> to vector<16x1xf32>
    %245 = vector.broadcast %244 : vector<16x1xf32> to vector<16x16xf32>
    %246 = arith.divf %242, %245 : vector<16x16xf32>
    %cst_130 = arith.constant dense<0.000000e+00> : vector<16x4xf32>
    %247 = tpu.matmul %246, %234, %cst_130 {dimension_numbers = #tpu.dot_dimension_numbers<[1], [0], [0], [1], [0, 0, 1, 1], [], []>} : vector<16x16xf32>, vector<16x4xf32>, vector<16x4xf32> -> vector<16x4xf32>
    %248 = tpu.concatenate %231, %247 in 0 : vector<16x4xf32>, vector<16x4xf32> -> vector<32x4xf32>
    %c3_131 = arith.constant 3 : index
    %c0_132 = arith.constant 0 : index
    %c0_133 = arith.constant 0 : index
    %249 = vector.load %arg16[%c3_131, %c0_132, %c0_133] : memref<8x4x32xf32, #tpu.memory_space<vmem>>, vector<1x4x32xf32>
    %250 = vector.shape_cast %249 : vector<1x4x32xf32> to vector<4x32xf32>
    %cst_134 = arith.constant dense<0.000000e+00> : vector<32x32xf32>
    %251 = tpu.matmul %248, %250, %cst_134 {dimension_numbers = #tpu.dot_dimension_numbers<[1], [0], [0], [1], [0, 0, 1, 1], [], []>} : vector<32x4xf32>, vector<4x32xf32>, vector<32x32xf32> -> vector<32x32xf32>
    %252 = arith.addf %194, %251 : vector<32x32xf32>
    %c4 = arith.constant 4 : index
    %c0_135 = arith.constant 0 : index
    %c0_136 = arith.constant 0 : index
    %253 = vector.load %arg13[%c4, %c0_135, %c0_136] : memref<8x32x4xf32, #tpu.memory_space<vmem>>, vector<1x32x4xf32>
    %254 = vector.shape_cast %253 : vector<1x32x4xf32> to vector<32x4xf32>
    %cst_137 = arith.constant dense<0.000000e+00> : vector<32x4xf32>
    %255 = tpu.matmul %19, %254, %cst_137 {dimension_numbers = #tpu.dot_dimension_numbers<[1], [0], [0], [1], [0, 0, 1, 1], [], []>} : vector<32x32xf32>, vector<32x4xf32>, vector<32x4xf32> -> vector<32x4xf32>
    %c4_138 = arith.constant 4 : index
    %c0_139 = arith.constant 0 : index
    %c0_140 = arith.constant 0 : index
    %256 = vector.load %arg14[%c4_138, %c0_139, %c0_140] : memref<8x32x4xf32, #tpu.memory_space<vmem>>, vector<1x32x4xf32>
    %257 = vector.shape_cast %256 : vector<1x32x4xf32> to vector<32x4xf32>
    %cst_141 = arith.constant dense<0.000000e+00> : vector<32x4xf32>
    %258 = tpu.matmul %19, %257, %cst_141 {dimension_numbers = #tpu.dot_dimension_numbers<[1], [0], [0], [1], [0, 0, 1, 1], [], []>} : vector<32x32xf32>, vector<32x4xf32>, vector<32x4xf32> -> vector<32x4xf32>
    %c4_142 = arith.constant 4 : index
    %c0_143 = arith.constant 0 : index
    %c0_144 = arith.constant 0 : index
    %259 = vector.load %arg15[%c4_142, %c0_143, %c0_144] : memref<8x32x4xf32, #tpu.memory_space<vmem>>, vector<1x32x4xf32>
    %260 = vector.shape_cast %259 : vector<1x32x4xf32> to vector<32x4xf32>
    %cst_145 = arith.constant dense<0.000000e+00> : vector<32x4xf32>
    %261 = tpu.matmul %19, %260, %cst_145 {dimension_numbers = #tpu.dot_dimension_numbers<[1], [0], [0], [1], [0, 0, 1, 1], [], []>} : vector<32x32xf32>, vector<32x4xf32>, vector<32x4xf32> -> vector<32x4xf32>
    %262 = arith.mulf %255, %5 : vector<32x4xf32>
    %cst_146 = arith.constant dense<0.000000e+00> : vector<32x4xf32>
    %263 = tpu.matmul %255, %0, %cst_146 {dimension_numbers = #tpu.dot_dimension_numbers<[1], [0], [0], [1], [0, 0, 1, 1], [], []>} : vector<32x4xf32>, vector<4x4xf32>, vector<32x4xf32> -> vector<32x4xf32>
    %264 = arith.mulf %263, %6 : vector<32x4xf32>
    %265 = arith.addf %262, %264 : vector<32x4xf32>
    %cst_147 = arith.constant 1.000000e+00 : f32
    %266 = vector.broadcast %cst_147 : f32 to vector<32x4xf32>
    %267 = arith.mulf %265, %266 : vector<32x4xf32>
    %268 = arith.mulf %258, %5 : vector<32x4xf32>
    %cst_148 = arith.constant dense<0.000000e+00> : vector<32x4xf32>
    %269 = tpu.matmul %258, %0, %cst_148 {dimension_numbers = #tpu.dot_dimension_numbers<[1], [0], [0], [1], [0, 0, 1, 1], [], []>} : vector<32x4xf32>, vector<4x4xf32>, vector<32x4xf32> -> vector<32x4xf32>
    %270 = arith.mulf %269, %6 : vector<32x4xf32>
    %271 = arith.addf %268, %270 : vector<32x4xf32>
    %cst_149 = arith.constant 1.000000e+00 : f32
    %272 = vector.broadcast %cst_149 : f32 to vector<32x4xf32>
    %273 = arith.mulf %271, %272 : vector<32x4xf32>
    %274 = vector.extract_strided_slice %267 {offsets = [0, 0], sizes = [16, 4], strides = [1, 1]} : vector<32x4xf32> to vector<16x4xf32>
    %275 = vector.extract_strided_slice %273 {offsets = [0, 0], sizes = [16, 4], strides = [1, 1]} : vector<32x4xf32> to vector<16x4xf32>
    %276 = vector.extract_strided_slice %261 {offsets = [0, 0], sizes = [16, 4], strides = [1, 1]} : vector<32x4xf32> to vector<16x4xf32>
    %cst_150 = arith.constant dense<0.000000e+00> : vector<16x16xf32>
    %277 = tpu.matmul %274, %275, %cst_150 {dimension_numbers = #tpu.dot_dimension_numbers<[1], [1], [0], [0], [0, 0, 1, 0], [], []>} : vector<16x4xf32>, vector<16x4xf32>, vector<16x16xf32> -> vector<16x16xf32>
    %cst_151 = arith.constant 5.000000e-01 : f32
    %278 = vector.broadcast %cst_151 : f32 to vector<16x16xf32>
    %279 = arith.mulf %277, %278 : vector<16x16xf32>
    %cst_152 = arith.constant dense<0xFF800000> : vector<16xf32>
    %280 = vector.multi_reduction <maximumf>, %279, %cst_152 [1] : vector<16x16xf32> to vector<16xf32>
    %281 = vector.shape_cast %280 : vector<16xf32> to vector<16x1xf32>
    %282 = vector.broadcast %281 : vector<16x1xf32> to vector<16x16xf32>
    %283 = arith.subf %279, %282 : vector<16x16xf32>
    %284 = math.exp %283 : vector<16x16xf32>
    %cst_153 = arith.constant dense<0.000000e+00> : vector<16xf32>
    %285 = vector.multi_reduction <add>, %284, %cst_153 [1] : vector<16x16xf32> to vector<16xf32>
    %286 = vector.shape_cast %285 : vector<16xf32> to vector<16x1xf32>
    %287 = vector.broadcast %286 : vector<16x1xf32> to vector<16x16xf32>
    %288 = arith.divf %284, %287 : vector<16x16xf32>
    %cst_154 = arith.constant dense<0.000000e+00> : vector<16x4xf32>
    %289 = tpu.matmul %288, %276, %cst_154 {dimension_numbers = #tpu.dot_dimension_numbers<[1], [0], [0], [1], [0, 0, 1, 1], [], []>} : vector<16x16xf32>, vector<16x4xf32>, vector<16x4xf32> -> vector<16x4xf32>
    %290 = vector.extract_strided_slice %267 {offsets = [16, 0], sizes = [16, 4], strides = [1, 1]} : vector<32x4xf32> to vector<16x4xf32>
    %291 = vector.extract_strided_slice %273 {offsets = [16, 0], sizes = [16, 4], strides = [1, 1]} : vector<32x4xf32> to vector<16x4xf32>
    %292 = vector.extract_strided_slice %261 {offsets = [16, 0], sizes = [16, 4], strides = [1, 1]} : vector<32x4xf32> to vector<16x4xf32>
    %cst_155 = arith.constant dense<0.000000e+00> : vector<16x16xf32>
    %293 = tpu.matmul %290, %291, %cst_155 {dimension_numbers = #tpu.dot_dimension_numbers<[1], [1], [0], [0], [0, 0, 1, 0], [], []>} : vector<16x4xf32>, vector<16x4xf32>, vector<16x16xf32> -> vector<16x16xf32>
    %cst_156 = arith.constant 5.000000e-01 : f32
    %294 = vector.broadcast %cst_156 : f32 to vector<16x16xf32>
    %295 = arith.mulf %293, %294 : vector<16x16xf32>
    %cst_157 = arith.constant dense<0xFF800000> : vector<16xf32>
    %296 = vector.multi_reduction <maximumf>, %295, %cst_157 [1] : vector<16x16xf32> to vector<16xf32>
    %297 = vector.shape_cast %296 : vector<16xf32> to vector<16x1xf32>
    %298 = vector.broadcast %297 : vector<16x1xf32> to vector<16x16xf32>
    %299 = arith.subf %295, %298 : vector<16x16xf32>
    %300 = math.exp %299 : vector<16x16xf32>
    %cst_158 = arith.constant dense<0.000000e+00> : vector<16xf32>
    %301 = vector.multi_reduction <add>, %300, %cst_158 [1] : vector<16x16xf32> to vector<16xf32>
    %302 = vector.shape_cast %301 : vector<16xf32> to vector<16x1xf32>
    %303 = vector.broadcast %302 : vector<16x1xf32> to vector<16x16xf32>
    %304 = arith.divf %300, %303 : vector<16x16xf32>
    %cst_159 = arith.constant dense<0.000000e+00> : vector<16x4xf32>
    %305 = tpu.matmul %304, %292, %cst_159 {dimension_numbers = #tpu.dot_dimension_numbers<[1], [0], [0], [1], [0, 0, 1, 1], [], []>} : vector<16x16xf32>, vector<16x4xf32>, vector<16x4xf32> -> vector<16x4xf32>
    %306 = tpu.concatenate %289, %305 in 0 : vector<16x4xf32>, vector<16x4xf32> -> vector<32x4xf32>
    %c4_160 = arith.constant 4 : index
    %c0_161 = arith.constant 0 : index
    %c0_162 = arith.constant 0 : index
    %307 = vector.load %arg16[%c4_160, %c0_161, %c0_162] : memref<8x4x32xf32, #tpu.memory_space<vmem>>, vector<1x4x32xf32>
    %308 = vector.shape_cast %307 : vector<1x4x32xf32> to vector<4x32xf32>
    %cst_163 = arith.constant dense<0.000000e+00> : vector<32x32xf32>
    %309 = tpu.matmul %306, %308, %cst_163 {dimension_numbers = #tpu.dot_dimension_numbers<[1], [0], [0], [1], [0, 0, 1, 1], [], []>} : vector<32x4xf32>, vector<4x32xf32>, vector<32x32xf32> -> vector<32x32xf32>
    %310 = arith.addf %252, %309 : vector<32x32xf32>
    %c5 = arith.constant 5 : index
    %c0_164 = arith.constant 0 : index
    %c0_165 = arith.constant 0 : index
    %311 = vector.load %arg13[%c5, %c0_164, %c0_165] : memref<8x32x4xf32, #tpu.memory_space<vmem>>, vector<1x32x4xf32>
    %312 = vector.shape_cast %311 : vector<1x32x4xf32> to vector<32x4xf32>
    %cst_166 = arith.constant dense<0.000000e+00> : vector<32x4xf32>
    %313 = tpu.matmul %19, %312, %cst_166 {dimension_numbers = #tpu.dot_dimension_numbers<[1], [0], [0], [1], [0, 0, 1, 1], [], []>} : vector<32x32xf32>, vector<32x4xf32>, vector<32x4xf32> -> vector<32x4xf32>
    %c5_167 = arith.constant 5 : index
    %c0_168 = arith.constant 0 : index
    %c0_169 = arith.constant 0 : index
    %314 = vector.load %arg14[%c5_167, %c0_168, %c0_169] : memref<8x32x4xf32, #tpu.memory_space<vmem>>, vector<1x32x4xf32>
    %315 = vector.shape_cast %314 : vector<1x32x4xf32> to vector<32x4xf32>
    %cst_170 = arith.constant dense<0.000000e+00> : vector<32x4xf32>
    %316 = tpu.matmul %19, %315, %cst_170 {dimension_numbers = #tpu.dot_dimension_numbers<[1], [0], [0], [1], [0, 0, 1, 1], [], []>} : vector<32x32xf32>, vector<32x4xf32>, vector<32x4xf32> -> vector<32x4xf32>
    %c5_171 = arith.constant 5 : index
    %c0_172 = arith.constant 0 : index
    %c0_173 = arith.constant 0 : index
    %317 = vector.load %arg15[%c5_171, %c0_172, %c0_173] : memref<8x32x4xf32, #tpu.memory_space<vmem>>, vector<1x32x4xf32>
    %318 = vector.shape_cast %317 : vector<1x32x4xf32> to vector<32x4xf32>
    %cst_174 = arith.constant dense<0.000000e+00> : vector<32x4xf32>
    %319 = tpu.matmul %19, %318, %cst_174 {dimension_numbers = #tpu.dot_dimension_numbers<[1], [0], [0], [1], [0, 0, 1, 1], [], []>} : vector<32x32xf32>, vector<32x4xf32>, vector<32x4xf32> -> vector<32x4xf32>
    %320 = arith.mulf %313, %5 : vector<32x4xf32>
    %cst_175 = arith.constant dense<0.000000e+00> : vector<32x4xf32>
    %321 = tpu.matmul %313, %0, %cst_175 {dimension_numbers = #tpu.dot_dimension_numbers<[1], [0], [0], [1], [0, 0, 1, 1], [], []>} : vector<32x4xf32>, vector<4x4xf32>, vector<32x4xf32> -> vector<32x4xf32>
    %322 = arith.mulf %321, %6 : vector<32x4xf32>
    %323 = arith.addf %320, %322 : vector<32x4xf32>
    %cst_176 = arith.constant 1.000000e+00 : f32
    %324 = vector.broadcast %cst_176 : f32 to vector<32x4xf32>
    %325 = arith.mulf %323, %324 : vector<32x4xf32>
    %326 = arith.mulf %316, %5 : vector<32x4xf32>
    %cst_177 = arith.constant dense<0.000000e+00> : vector<32x4xf32>
    %327 = tpu.matmul %316, %0, %cst_177 {dimension_numbers = #tpu.dot_dimension_numbers<[1], [0], [0], [1], [0, 0, 1, 1], [], []>} : vector<32x4xf32>, vector<4x4xf32>, vector<32x4xf32> -> vector<32x4xf32>
    %328 = arith.mulf %327, %6 : vector<32x4xf32>
    %329 = arith.addf %326, %328 : vector<32x4xf32>
    %cst_178 = arith.constant 1.000000e+00 : f32
    %330 = vector.broadcast %cst_178 : f32 to vector<32x4xf32>
    %331 = arith.mulf %329, %330 : vector<32x4xf32>
    %332 = vector.extract_strided_slice %325 {offsets = [0, 0], sizes = [16, 4], strides = [1, 1]} : vector<32x4xf32> to vector<16x4xf32>
    %333 = vector.extract_strided_slice %331 {offsets = [0, 0], sizes = [16, 4], strides = [1, 1]} : vector<32x4xf32> to vector<16x4xf32>
    %334 = vector.extract_strided_slice %319 {offsets = [0, 0], sizes = [16, 4], strides = [1, 1]} : vector<32x4xf32> to vector<16x4xf32>
    %cst_179 = arith.constant dense<0.000000e+00> : vector<16x16xf32>
    %335 = tpu.matmul %332, %333, %cst_179 {dimension_numbers = #tpu.dot_dimension_numbers<[1], [1], [0], [0], [0, 0, 1, 0], [], []>} : vector<16x4xf32>, vector<16x4xf32>, vector<16x16xf32> -> vector<16x16xf32>
    %cst_180 = arith.constant 5.000000e-01 : f32
    %336 = vector.broadcast %cst_180 : f32 to vector<16x16xf32>
    %337 = arith.mulf %335, %336 : vector<16x16xf32>
    %cst_181 = arith.constant dense<0xFF800000> : vector<16xf32>
    %338 = vector.multi_reduction <maximumf>, %337, %cst_181 [1] : vector<16x16xf32> to vector<16xf32>
    %339 = vector.shape_cast %338 : vector<16xf32> to vector<16x1xf32>
    %340 = vector.broadcast %339 : vector<16x1xf32> to vector<16x16xf32>
    %341 = arith.subf %337, %340 : vector<16x16xf32>
    %342 = math.exp %341 : vector<16x16xf32>
    %cst_182 = arith.constant dense<0.000000e+00> : vector<16xf32>
    %343 = vector.multi_reduction <add>, %342, %cst_182 [1] : vector<16x16xf32> to vector<16xf32>
    %344 = vector.shape_cast %343 : vector<16xf32> to vector<16x1xf32>
    %345 = vector.broadcast %344 : vector<16x1xf32> to vector<16x16xf32>
    %346 = arith.divf %342, %345 : vector<16x16xf32>
    %cst_183 = arith.constant dense<0.000000e+00> : vector<16x4xf32>
    %347 = tpu.matmul %346, %334, %cst_183 {dimension_numbers = #tpu.dot_dimension_numbers<[1], [0], [0], [1], [0, 0, 1, 1], [], []>} : vector<16x16xf32>, vector<16x4xf32>, vector<16x4xf32> -> vector<16x4xf32>
    %348 = vector.extract_strided_slice %325 {offsets = [16, 0], sizes = [16, 4], strides = [1, 1]} : vector<32x4xf32> to vector<16x4xf32>
    %349 = vector.extract_strided_slice %331 {offsets = [16, 0], sizes = [16, 4], strides = [1, 1]} : vector<32x4xf32> to vector<16x4xf32>
    %350 = vector.extract_strided_slice %319 {offsets = [16, 0], sizes = [16, 4], strides = [1, 1]} : vector<32x4xf32> to vector<16x4xf32>
    %cst_184 = arith.constant dense<0.000000e+00> : vector<16x16xf32>
    %351 = tpu.matmul %348, %349, %cst_184 {dimension_numbers = #tpu.dot_dimension_numbers<[1], [1], [0], [0], [0, 0, 1, 0], [], []>} : vector<16x4xf32>, vector<16x4xf32>, vector<16x16xf32> -> vector<16x16xf32>
    %cst_185 = arith.constant 5.000000e-01 : f32
    %352 = vector.broadcast %cst_185 : f32 to vector<16x16xf32>
    %353 = arith.mulf %351, %352 : vector<16x16xf32>
    %cst_186 = arith.constant dense<0xFF800000> : vector<16xf32>
    %354 = vector.multi_reduction <maximumf>, %353, %cst_186 [1] : vector<16x16xf32> to vector<16xf32>
    %355 = vector.shape_cast %354 : vector<16xf32> to vector<16x1xf32>
    %356 = vector.broadcast %355 : vector<16x1xf32> to vector<16x16xf32>
    %357 = arith.subf %353, %356 : vector<16x16xf32>
    %358 = math.exp %357 : vector<16x16xf32>
    %cst_187 = arith.constant dense<0.000000e+00> : vector<16xf32>
    %359 = vector.multi_reduction <add>, %358, %cst_187 [1] : vector<16x16xf32> to vector<16xf32>
    %360 = vector.shape_cast %359 : vector<16xf32> to vector<16x1xf32>
    %361 = vector.broadcast %360 : vector<16x1xf32> to vector<16x16xf32>
    %362 = arith.divf %358, %361 : vector<16x16xf32>
    %cst_188 = arith.constant dense<0.000000e+00> : vector<16x4xf32>
    %363 = tpu.matmul %362, %350, %cst_188 {dimension_numbers = #tpu.dot_dimension_numbers<[1], [0], [0], [1], [0, 0, 1, 1], [], []>} : vector<16x16xf32>, vector<16x4xf32>, vector<16x4xf32> -> vector<16x4xf32>
    %364 = tpu.concatenate %347, %363 in 0 : vector<16x4xf32>, vector<16x4xf32> -> vector<32x4xf32>
    %c5_189 = arith.constant 5 : index
    %c0_190 = arith.constant 0 : index
    %c0_191 = arith.constant 0 : index
    %365 = vector.load %arg16[%c5_189, %c0_190, %c0_191] : memref<8x4x32xf32, #tpu.memory_space<vmem>>, vector<1x4x32xf32>
    %366 = vector.shape_cast %365 : vector<1x4x32xf32> to vector<4x32xf32>
    %cst_192 = arith.constant dense<0.000000e+00> : vector<32x32xf32>
    %367 = tpu.matmul %364, %366, %cst_192 {dimension_numbers = #tpu.dot_dimension_numbers<[1], [0], [0], [1], [0, 0, 1, 1], [], []>} : vector<32x4xf32>, vector<4x32xf32>, vector<32x32xf32> -> vector<32x32xf32>
    %368 = arith.addf %310, %367 : vector<32x32xf32>
    %c6 = arith.constant 6 : index
    %c0_193 = arith.constant 0 : index
    %c0_194 = arith.constant 0 : index
    %369 = vector.load %arg13[%c6, %c0_193, %c0_194] : memref<8x32x4xf32, #tpu.memory_space<vmem>>, vector<1x32x4xf32>
    %370 = vector.shape_cast %369 : vector<1x32x4xf32> to vector<32x4xf32>
    %cst_195 = arith.constant dense<0.000000e+00> : vector<32x4xf32>
    %371 = tpu.matmul %19, %370, %cst_195 {dimension_numbers = #tpu.dot_dimension_numbers<[1], [0], [0], [1], [0, 0, 1, 1], [], []>} : vector<32x32xf32>, vector<32x4xf32>, vector<32x4xf32> -> vector<32x4xf32>
    %c6_196 = arith.constant 6 : index
    %c0_197 = arith.constant 0 : index
    %c0_198 = arith.constant 0 : index
    %372 = vector.load %arg14[%c6_196, %c0_197, %c0_198] : memref<8x32x4xf32, #tpu.memory_space<vmem>>, vector<1x32x4xf32>
    %373 = vector.shape_cast %372 : vector<1x32x4xf32> to vector<32x4xf32>
    %cst_199 = arith.constant dense<0.000000e+00> : vector<32x4xf32>
    %374 = tpu.matmul %19, %373, %cst_199 {dimension_numbers = #tpu.dot_dimension_numbers<[1], [0], [0], [1], [0, 0, 1, 1], [], []>} : vector<32x32xf32>, vector<32x4xf32>, vector<32x4xf32> -> vector<32x4xf32>
    %c6_200 = arith.constant 6 : index
    %c0_201 = arith.constant 0 : index
    %c0_202 = arith.constant 0 : index
    %375 = vector.load %arg15[%c6_200, %c0_201, %c0_202] : memref<8x32x4xf32, #tpu.memory_space<vmem>>, vector<1x32x4xf32>
    %376 = vector.shape_cast %375 : vector<1x32x4xf32> to vector<32x4xf32>
    %cst_203 = arith.constant dense<0.000000e+00> : vector<32x4xf32>
    %377 = tpu.matmul %19, %376, %cst_203 {dimension_numbers = #tpu.dot_dimension_numbers<[1], [0], [0], [1], [0, 0, 1, 1], [], []>} : vector<32x32xf32>, vector<32x4xf32>, vector<32x4xf32> -> vector<32x4xf32>
    %378 = arith.mulf %371, %5 : vector<32x4xf32>
    %cst_204 = arith.constant dense<0.000000e+00> : vector<32x4xf32>
    %379 = tpu.matmul %371, %0, %cst_204 {dimension_numbers = #tpu.dot_dimension_numbers<[1], [0], [0], [1], [0, 0, 1, 1], [], []>} : vector<32x4xf32>, vector<4x4xf32>, vector<32x4xf32> -> vector<32x4xf32>
    %380 = arith.mulf %379, %6 : vector<32x4xf32>
    %381 = arith.addf %378, %380 : vector<32x4xf32>
    %cst_205 = arith.constant 1.000000e+00 : f32
    %382 = vector.broadcast %cst_205 : f32 to vector<32x4xf32>
    %383 = arith.mulf %381, %382 : vector<32x4xf32>
    %384 = arith.mulf %374, %5 : vector<32x4xf32>
    %cst_206 = arith.constant dense<0.000000e+00> : vector<32x4xf32>
    %385 = tpu.matmul %374, %0, %cst_206 {dimension_numbers = #tpu.dot_dimension_numbers<[1], [0], [0], [1], [0, 0, 1, 1], [], []>} : vector<32x4xf32>, vector<4x4xf32>, vector<32x4xf32> -> vector<32x4xf32>
    %386 = arith.mulf %385, %6 : vector<32x4xf32>
    %387 = arith.addf %384, %386 : vector<32x4xf32>
    %cst_207 = arith.constant 1.000000e+00 : f32
    %388 = vector.broadcast %cst_207 : f32 to vector<32x4xf32>
    %389 = arith.mulf %387, %388 : vector<32x4xf32>
    %390 = vector.extract_strided_slice %383 {offsets = [0, 0], sizes = [16, 4], strides = [1, 1]} : vector<32x4xf32> to vector<16x4xf32>
    %391 = vector.extract_strided_slice %389 {offsets = [0, 0], sizes = [16, 4], strides = [1, 1]} : vector<32x4xf32> to vector<16x4xf32>
    %392 = vector.extract_strided_slice %377 {offsets = [0, 0], sizes = [16, 4], strides = [1, 1]} : vector<32x4xf32> to vector<16x4xf32>
    %cst_208 = arith.constant dense<0.000000e+00> : vector<16x16xf32>
    %393 = tpu.matmul %390, %391, %cst_208 {dimension_numbers = #tpu.dot_dimension_numbers<[1], [1], [0], [0], [0, 0, 1, 0], [], []>} : vector<16x4xf32>, vector<16x4xf32>, vector<16x16xf32> -> vector<16x16xf32>
    %cst_209 = arith.constant 5.000000e-01 : f32
    %394 = vector.broadcast %cst_209 : f32 to vector<16x16xf32>
    %395 = arith.mulf %393, %394 : vector<16x16xf32>
    %cst_210 = arith.constant dense<0xFF800000> : vector<16xf32>
    %396 = vector.multi_reduction <maximumf>, %395, %cst_210 [1] : vector<16x16xf32> to vector<16xf32>
    %397 = vector.shape_cast %396 : vector<16xf32> to vector<16x1xf32>
    %398 = vector.broadcast %397 : vector<16x1xf32> to vector<16x16xf32>
    %399 = arith.subf %395, %398 : vector<16x16xf32>
    %400 = math.exp %399 : vector<16x16xf32>
    %cst_211 = arith.constant dense<0.000000e+00> : vector<16xf32>
    %401 = vector.multi_reduction <add>, %400, %cst_211 [1] : vector<16x16xf32> to vector<16xf32>
    %402 = vector.shape_cast %401 : vector<16xf32> to vector<16x1xf32>
    %403 = vector.broadcast %402 : vector<16x1xf32> to vector<16x16xf32>
    %404 = arith.divf %400, %403 : vector<16x16xf32>
    %cst_212 = arith.constant dense<0.000000e+00> : vector<16x4xf32>
    %405 = tpu.matmul %404, %392, %cst_212 {dimension_numbers = #tpu.dot_dimension_numbers<[1], [0], [0], [1], [0, 0, 1, 1], [], []>} : vector<16x16xf32>, vector<16x4xf32>, vector<16x4xf32> -> vector<16x4xf32>
    %406 = vector.extract_strided_slice %383 {offsets = [16, 0], sizes = [16, 4], strides = [1, 1]} : vector<32x4xf32> to vector<16x4xf32>
    %407 = vector.extract_strided_slice %389 {offsets = [16, 0], sizes = [16, 4], strides = [1, 1]} : vector<32x4xf32> to vector<16x4xf32>
    %408 = vector.extract_strided_slice %377 {offsets = [16, 0], sizes = [16, 4], strides = [1, 1]} : vector<32x4xf32> to vector<16x4xf32>
    %cst_213 = arith.constant dense<0.000000e+00> : vector<16x16xf32>
    %409 = tpu.matmul %406, %407, %cst_213 {dimension_numbers = #tpu.dot_dimension_numbers<[1], [1], [0], [0], [0, 0, 1, 0], [], []>} : vector<16x4xf32>, vector<16x4xf32>, vector<16x16xf32> -> vector<16x16xf32>
    %cst_214 = arith.constant 5.000000e-01 : f32
    %410 = vector.broadcast %cst_214 : f32 to vector<16x16xf32>
    %411 = arith.mulf %409, %410 : vector<16x16xf32>
    %cst_215 = arith.constant dense<0xFF800000> : vector<16xf32>
    %412 = vector.multi_reduction <maximumf>, %411, %cst_215 [1] : vector<16x16xf32> to vector<16xf32>
    %413 = vector.shape_cast %412 : vector<16xf32> to vector<16x1xf32>
    %414 = vector.broadcast %413 : vector<16x1xf32> to vector<16x16xf32>
    %415 = arith.subf %411, %414 : vector<16x16xf32>
    %416 = math.exp %415 : vector<16x16xf32>
    %cst_216 = arith.constant dense<0.000000e+00> : vector<16xf32>
    %417 = vector.multi_reduction <add>, %416, %cst_216 [1] : vector<16x16xf32> to vector<16xf32>
    %418 = vector.shape_cast %417 : vector<16xf32> to vector<16x1xf32>
    %419 = vector.broadcast %418 : vector<16x1xf32> to vector<16x16xf32>
    %420 = arith.divf %416, %419 : vector<16x16xf32>
    %cst_217 = arith.constant dense<0.000000e+00> : vector<16x4xf32>
    %421 = tpu.matmul %420, %408, %cst_217 {dimension_numbers = #tpu.dot_dimension_numbers<[1], [0], [0], [1], [0, 0, 1, 1], [], []>} : vector<16x16xf32>, vector<16x4xf32>, vector<16x4xf32> -> vector<16x4xf32>
    %422 = tpu.concatenate %405, %421 in 0 : vector<16x4xf32>, vector<16x4xf32> -> vector<32x4xf32>
    %c6_218 = arith.constant 6 : index
    %c0_219 = arith.constant 0 : index
    %c0_220 = arith.constant 0 : index
    %423 = vector.load %arg16[%c6_218, %c0_219, %c0_220] : memref<8x4x32xf32, #tpu.memory_space<vmem>>, vector<1x4x32xf32>
    %424 = vector.shape_cast %423 : vector<1x4x32xf32> to vector<4x32xf32>
    %cst_221 = arith.constant dense<0.000000e+00> : vector<32x32xf32>
    %425 = tpu.matmul %422, %424, %cst_221 {dimension_numbers = #tpu.dot_dimension_numbers<[1], [0], [0], [1], [0, 0, 1, 1], [], []>} : vector<32x4xf32>, vector<4x32xf32>, vector<32x32xf32> -> vector<32x32xf32>
    %426 = arith.addf %368, %425 : vector<32x32xf32>
    %c7 = arith.constant 7 : index
    %c0_222 = arith.constant 0 : index
    %c0_223 = arith.constant 0 : index
    %427 = vector.load %arg13[%c7, %c0_222, %c0_223] : memref<8x32x4xf32, #tpu.memory_space<vmem>>, vector<1x32x4xf32>
    %428 = vector.shape_cast %427 : vector<1x32x4xf32> to vector<32x4xf32>
    %cst_224 = arith.constant dense<0.000000e+00> : vector<32x4xf32>
    %429 = tpu.matmul %19, %428, %cst_224 {dimension_numbers = #tpu.dot_dimension_numbers<[1], [0], [0], [1], [0, 0, 1, 1], [], []>} : vector<32x32xf32>, vector<32x4xf32>, vector<32x4xf32> -> vector<32x4xf32>
    %c7_225 = arith.constant 7 : index
    %c0_226 = arith.constant 0 : index
    %c0_227 = arith.constant 0 : index
    %430 = vector.load %arg14[%c7_225, %c0_226, %c0_227] : memref<8x32x4xf32, #tpu.memory_space<vmem>>, vector<1x32x4xf32>
    %431 = vector.shape_cast %430 : vector<1x32x4xf32> to vector<32x4xf32>
    %cst_228 = arith.constant dense<0.000000e+00> : vector<32x4xf32>
    %432 = tpu.matmul %19, %431, %cst_228 {dimension_numbers = #tpu.dot_dimension_numbers<[1], [0], [0], [1], [0, 0, 1, 1], [], []>} : vector<32x32xf32>, vector<32x4xf32>, vector<32x4xf32> -> vector<32x4xf32>
    %c7_229 = arith.constant 7 : index
    %c0_230 = arith.constant 0 : index
    %c0_231 = arith.constant 0 : index
    %433 = vector.load %arg15[%c7_229, %c0_230, %c0_231] : memref<8x32x4xf32, #tpu.memory_space<vmem>>, vector<1x32x4xf32>
    %434 = vector.shape_cast %433 : vector<1x32x4xf32> to vector<32x4xf32>
    %cst_232 = arith.constant dense<0.000000e+00> : vector<32x4xf32>
    %435 = tpu.matmul %19, %434, %cst_232 {dimension_numbers = #tpu.dot_dimension_numbers<[1], [0], [0], [1], [0, 0, 1, 1], [], []>} : vector<32x32xf32>, vector<32x4xf32>, vector<32x4xf32> -> vector<32x4xf32>
    %436 = arith.mulf %429, %5 : vector<32x4xf32>
    %cst_233 = arith.constant dense<0.000000e+00> : vector<32x4xf32>
    %437 = tpu.matmul %429, %0, %cst_233 {dimension_numbers = #tpu.dot_dimension_numbers<[1], [0], [0], [1], [0, 0, 1, 1], [], []>} : vector<32x4xf32>, vector<4x4xf32>, vector<32x4xf32> -> vector<32x4xf32>
    %438 = arith.mulf %437, %6 : vector<32x4xf32>
    %439 = arith.addf %436, %438 : vector<32x4xf32>
    %cst_234 = arith.constant 1.000000e+00 : f32
    %440 = vector.broadcast %cst_234 : f32 to vector<32x4xf32>
    %441 = arith.mulf %439, %440 : vector<32x4xf32>
    %442 = arith.mulf %432, %5 : vector<32x4xf32>
    %cst_235 = arith.constant dense<0.000000e+00> : vector<32x4xf32>
    %443 = tpu.matmul %432, %0, %cst_235 {dimension_numbers = #tpu.dot_dimension_numbers<[1], [0], [0], [1], [0, 0, 1, 1], [], []>} : vector<32x4xf32>, vector<4x4xf32>, vector<32x4xf32> -> vector<32x4xf32>
    %444 = arith.mulf %443, %6 : vector<32x4xf32>
    %445 = arith.addf %442, %444 : vector<32x4xf32>
    %cst_236 = arith.constant 1.000000e+00 : f32
    %446 = vector.broadcast %cst_236 : f32 to vector<32x4xf32>
    %447 = arith.mulf %445, %446 : vector<32x4xf32>
    %448 = vector.extract_strided_slice %441 {offsets = [0, 0], sizes = [16, 4], strides = [1, 1]} : vector<32x4xf32> to vector<16x4xf32>
    %449 = vector.extract_strided_slice %447 {offsets = [0, 0], sizes = [16, 4], strides = [1, 1]} : vector<32x4xf32> to vector<16x4xf32>
    %450 = vector.extract_strided_slice %435 {offsets = [0, 0], sizes = [16, 4], strides = [1, 1]} : vector<32x4xf32> to vector<16x4xf32>
    %cst_237 = arith.constant dense<0.000000e+00> : vector<16x16xf32>
    %451 = tpu.matmul %448, %449, %cst_237 {dimension_numbers = #tpu.dot_dimension_numbers<[1], [1], [0], [0], [0, 0, 1, 0], [], []>} : vector<16x4xf32>, vector<16x4xf32>, vector<16x16xf32> -> vector<16x16xf32>
    %cst_238 = arith.constant 5.000000e-01 : f32
    %452 = vector.broadcast %cst_238 : f32 to vector<16x16xf32>
    %453 = arith.mulf %451, %452 : vector<16x16xf32>
    %cst_239 = arith.constant dense<0xFF800000> : vector<16xf32>
    %454 = vector.multi_reduction <maximumf>, %453, %cst_239 [1] : vector<16x16xf32> to vector<16xf32>
    %455 = vector.shape_cast %454 : vector<16xf32> to vector<16x1xf32>
    %456 = vector.broadcast %455 : vector<16x1xf32> to vector<16x16xf32>
    %457 = arith.subf %453, %456 : vector<16x16xf32>
    %458 = math.exp %457 : vector<16x16xf32>
    %cst_240 = arith.constant dense<0.000000e+00> : vector<16xf32>
    %459 = vector.multi_reduction <add>, %458, %cst_240 [1] : vector<16x16xf32> to vector<16xf32>
    %460 = vector.shape_cast %459 : vector<16xf32> to vector<16x1xf32>
    %461 = vector.broadcast %460 : vector<16x1xf32> to vector<16x16xf32>
    %462 = arith.divf %458, %461 : vector<16x16xf32>
    %cst_241 = arith.constant dense<0.000000e+00> : vector<16x4xf32>
    %463 = tpu.matmul %462, %450, %cst_241 {dimension_numbers = #tpu.dot_dimension_numbers<[1], [0], [0], [1], [0, 0, 1, 1], [], []>} : vector<16x16xf32>, vector<16x4xf32>, vector<16x4xf32> -> vector<16x4xf32>
    %464 = vector.extract_strided_slice %441 {offsets = [16, 0], sizes = [16, 4], strides = [1, 1]} : vector<32x4xf32> to vector<16x4xf32>
    %465 = vector.extract_strided_slice %447 {offsets = [16, 0], sizes = [16, 4], strides = [1, 1]} : vector<32x4xf32> to vector<16x4xf32>
    %466 = vector.extract_strided_slice %435 {offsets = [16, 0], sizes = [16, 4], strides = [1, 1]} : vector<32x4xf32> to vector<16x4xf32>
    %cst_242 = arith.constant dense<0.000000e+00> : vector<16x16xf32>
    %467 = tpu.matmul %464, %465, %cst_242 {dimension_numbers = #tpu.dot_dimension_numbers<[1], [1], [0], [0], [0, 0, 1, 0], [], []>} : vector<16x4xf32>, vector<16x4xf32>, vector<16x16xf32> -> vector<16x16xf32>
    %cst_243 = arith.constant 5.000000e-01 : f32
    %468 = vector.broadcast %cst_243 : f32 to vector<16x16xf32>
    %469 = arith.mulf %467, %468 : vector<16x16xf32>
    %cst_244 = arith.constant dense<0xFF800000> : vector<16xf32>
    %470 = vector.multi_reduction <maximumf>, %469, %cst_244 [1] : vector<16x16xf32> to vector<16xf32>
    %471 = vector.shape_cast %470 : vector<16xf32> to vector<16x1xf32>
    %472 = vector.broadcast %471 : vector<16x1xf32> to vector<16x16xf32>
    %473 = arith.subf %469, %472 : vector<16x16xf32>
    %474 = math.exp %473 : vector<16x16xf32>
    %cst_245 = arith.constant dense<0.000000e+00> : vector<16xf32>
    %475 = vector.multi_reduction <add>, %474, %cst_245 [1] : vector<16x16xf32> to vector<16xf32>
    %476 = vector.shape_cast %475 : vector<16xf32> to vector<16x1xf32>
    %477 = vector.broadcast %476 : vector<16x1xf32> to vector<16x16xf32>
    %478 = arith.divf %474, %477 : vector<16x16xf32>
    %cst_246 = arith.constant dense<0.000000e+00> : vector<16x4xf32>
    %479 = tpu.matmul %478, %466, %cst_246 {dimension_numbers = #tpu.dot_dimension_numbers<[1], [0], [0], [1], [0, 0, 1, 1], [], []>} : vector<16x16xf32>, vector<16x4xf32>, vector<16x4xf32> -> vector<16x4xf32>
    %480 = tpu.concatenate %463, %479 in 0 : vector<16x4xf32>, vector<16x4xf32> -> vector<32x4xf32>
    %c7_247 = arith.constant 7 : index
    %c0_248 = arith.constant 0 : index
    %c0_249 = arith.constant 0 : index
    %481 = vector.load %arg16[%c7_247, %c0_248, %c0_249] : memref<8x4x32xf32, #tpu.memory_space<vmem>>, vector<1x4x32xf32>
    %482 = vector.shape_cast %481 : vector<1x4x32xf32> to vector<4x32xf32>
    %cst_250 = arith.constant dense<0.000000e+00> : vector<32x32xf32>
    %483 = tpu.matmul %480, %482, %cst_250 {dimension_numbers = #tpu.dot_dimension_numbers<[1], [0], [0], [1], [0, 0, 1, 1], [], []>} : vector<32x4xf32>, vector<4x32xf32>, vector<32x32xf32> -> vector<32x32xf32>
    %484 = arith.addf %426, %483 : vector<32x32xf32>
    %485 = arith.addf %2, %484 : vector<32x32xf32>
    %c0_251 = arith.constant 0 : index
    %c0_252 = arith.constant 0 : index
    %486 = vector.load %arg10[%c0_251, %c0_252] : memref<1x32xf32, #tpu.memory_space<vmem>>, vector<1x32xf32>
    %487 = arith.mulf %485, %485 : vector<32x32xf32>
    %cst_253 = arith.constant dense<0.000000e+00> : vector<32xf32>
    %488 = vector.multi_reduction <add>, %487, %cst_253 [1] : vector<32x32xf32> to vector<32xf32>
    %489 = vector.shape_cast %488 : vector<32xf32> to vector<32x1xf32>
    %cst_254 = arith.constant 3.200000e+01 : f32
    %490 = vector.broadcast %cst_254 : f32 to vector<32x1xf32>
    %491 = arith.divf %489, %490 : vector<32x1xf32>
    %cst_255 = arith.constant 9.99999997E-7 : f32
    %492 = vector.broadcast %cst_255 : f32 to vector<32x1xf32>
    %493 = arith.addf %491, %492 : vector<32x1xf32>
    %494 = math.rsqrt %493 : vector<32x1xf32>
    %495 = vector.broadcast %494 : vector<32x1xf32> to vector<32x32xf32>
    %496 = arith.mulf %485, %495 : vector<32x32xf32>
    %497 = vector.broadcast %486 : vector<1x32xf32> to vector<32x32xf32>
    %498 = arith.mulf %496, %497 : vector<32x32xf32>
    %c0_256 = arith.constant 0 : index
    %c0_257 = arith.constant 0 : index
    %499 = vector.load %arg21[%c0_256, %c0_257] : memref<32x4xf32, #tpu.memory_space<vmem>>, vector<32x4xf32>
    %cst_258 = arith.constant dense<0.000000e+00> : vector<32x4xf32>
    %500 = tpu.matmul %498, %499, %cst_258 {dimension_numbers = #tpu.dot_dimension_numbers<[1], [0], [0], [1], [0, 0, 1, 1], [], []>} : vector<32x32xf32>, vector<32x4xf32>, vector<32x4xf32> -> vector<32x4xf32>
    %c0_259 = arith.constant 0 : index
    %c0_260 = arith.constant 0 : index
    %501 = vector.load %arg22[%c0_259, %c0_260] : memref<1x4xf32, #tpu.memory_space<vmem>>, vector<1x4xf32>
    %502 = vector.broadcast %501 : vector<1x4xf32> to vector<32x4xf32>
    %503 = arith.addf %500, %502 : vector<32x4xf32>
    %cst_261 = arith.constant dense<0xFF800000> : vector<32xf32>
    %504 = vector.multi_reduction <maximumf>, %503, %cst_261 [1] : vector<32x4xf32> to vector<32xf32>
    %505 = vector.shape_cast %504 : vector<32xf32> to vector<32x1xf32>
    %506 = vector.broadcast %505 : vector<32x1xf32> to vector<32x4xf32>
    %507 = arith.subf %503, %506 : vector<32x4xf32>
    %508 = math.exp %507 : vector<32x4xf32>
    %cst_262 = arith.constant dense<0.000000e+00> : vector<32xf32>
    %509 = vector.multi_reduction <add>, %508, %cst_262 [1] : vector<32x4xf32> to vector<32xf32>
    %510 = vector.shape_cast %509 : vector<32xf32> to vector<32x1xf32>
    %511 = vector.broadcast %510 : vector<32x1xf32> to vector<32x4xf32>
    %512 = arith.divf %508, %511 : vector<32x4xf32>
    %c0_263 = arith.constant 0 : index
    %c0_264 = arith.constant 0 : index
    %513 = vector.load %arg23[%c0_263, %c0_264] : memref<32x192xf32, #tpu.memory_space<vmem>>, vector<32x192xf32>
    %cst_265 = arith.constant dense<0.000000e+00> : vector<32x192xf32>
    %514 = tpu.matmul %498, %513, %cst_265 {dimension_numbers = #tpu.dot_dimension_numbers<[1], [0], [0], [1], [0, 0, 1, 1], [], []>} : vector<32x32xf32>, vector<32x192xf32>, vector<32x192xf32> -> vector<32x192xf32>
    %515 = arith.negf %514 : vector<32x192xf32>
    %516 = math.exp %515 : vector<32x192xf32>
    %cst_266 = arith.constant 1.000000e+00 : f32
    %517 = vector.broadcast %cst_266 : f32 to vector<32x192xf32>
    %518 = arith.addf %517, %516 : vector<32x192xf32>
    %519 = arith.divf %517, %518 : vector<32x192xf32>
    %520 = arith.mulf %514, %519 : vector<32x192xf32>
    %c0_267 = arith.constant 0 : index
    %c0_268 = arith.constant 0 : index
    %521 = vector.load %arg24[%c0_267, %c0_268] : memref<32x192xf32, #tpu.memory_space<vmem>>, vector<32x192xf32>
    %cst_269 = arith.constant dense<0.000000e+00> : vector<32x192xf32>
    %522 = tpu.matmul %498, %521, %cst_269 {dimension_numbers = #tpu.dot_dimension_numbers<[1], [0], [0], [1], [0, 0, 1, 1], [], []>} : vector<32x32xf32>, vector<32x192xf32>, vector<32x192xf32> -> vector<32x192xf32>
    %523 = arith.mulf %520, %522 : vector<32x192xf32>
    %c0_270 = arith.constant 0 : index
    %c0_271 = arith.constant 0 : index
    %524 = vector.load %arg26[%c0_270, %c0_271] : memref<4x192xf32, #tpu.memory_space<vmem>>, vector<4x192xf32>
    %cst_272 = arith.constant dense<0.000000e+00> : vector<32x192xf32>
    %525 = tpu.matmul %512, %524, %cst_272 {dimension_numbers = #tpu.dot_dimension_numbers<[1], [0], [0], [1], [0, 0, 1, 1], [], []>} : vector<32x4xf32>, vector<4x192xf32>, vector<32x192xf32> -> vector<32x192xf32>
    %526 = arith.mulf %523, %525 : vector<32x192xf32>
    %c0_273 = arith.constant 0 : index
    %c0_274 = arith.constant 0 : index
    %527 = vector.load %arg25[%c0_273, %c0_274] : memref<192x32xf32, #tpu.memory_space<vmem>>, vector<192x32xf32>
    %cst_275 = arith.constant dense<0.000000e+00> : vector<32x32xf32>
    %528 = tpu.matmul %526, %527, %cst_275 {dimension_numbers = #tpu.dot_dimension_numbers<[1], [0], [0], [1], [0, 0, 1, 1], [], []>} : vector<32x192xf32>, vector<192x32xf32>, vector<32x32xf32> -> vector<32x32xf32>
    %cst_276 = arith.constant dense<0.000000e+00> : vector<4xf32>
    %529 = vector.multi_reduction <add>, %512, %cst_276 [0] : vector<32x4xf32> to vector<4xf32>
    %530 = vector.shape_cast %529 : vector<4xf32> to vector<1x4xf32>
    %cst_277 = arith.constant 3.200000e+01 : f32
    %531 = vector.broadcast %cst_277 : f32 to vector<1x4xf32>
    %532 = arith.divf %530, %531 : vector<1x4xf32>
    %cst_278 = arith.constant 2.500000e-01 : f32
    %533 = vector.broadcast %cst_278 : f32 to vector<1x4xf32>
    %534 = arith.subf %532, %533 : vector<1x4xf32>
    %535 = arith.mulf %534, %534 : vector<1x4xf32>
    %cst_279 = arith.constant dense<0.000000e+00> : vector<1xf32>
    %536 = vector.multi_reduction <add>, %535, %cst_279 [1] : vector<1x4xf32> to vector<1xf32>
    %537 = vector.shape_cast %536 : vector<1xf32> to vector<1x1xf32>
    %cst_280 = arith.constant 0.00999999977 : f32
    %538 = vector.broadcast %cst_280 : f32 to vector<1x1xf32>
    %539 = arith.mulf %537, %538 : vector<1x1xf32>
    %540 = arith.addf %485, %528 : vector<32x32xf32>
    %c0_281 = arith.constant 0 : index
    %c0_282 = arith.constant 0 : index
    %541 = vector.load %arg11[%c0_281, %c0_282] : memref<1x32xf32, #tpu.memory_space<vmem>>, vector<1x32xf32>
    %542 = arith.mulf %1, %1 : vector<16x32xf32>
    %cst_283 = arith.constant dense<0.000000e+00> : vector<16xf32>
    %543 = vector.multi_reduction <add>, %542, %cst_283 [1] : vector<16x32xf32> to vector<16xf32>
    %544 = vector.shape_cast %543 : vector<16xf32> to vector<16x1xf32>
    %cst_284 = arith.constant 3.200000e+01 : f32
    %545 = vector.broadcast %cst_284 : f32 to vector<16x1xf32>
    %546 = arith.divf %544, %545 : vector<16x1xf32>
    %cst_285 = arith.constant 9.99999997E-7 : f32
    %547 = vector.broadcast %cst_285 : f32 to vector<16x1xf32>
    %548 = arith.addf %546, %547 : vector<16x1xf32>
    %549 = math.rsqrt %548 : vector<16x1xf32>
    %550 = vector.broadcast %549 : vector<16x1xf32> to vector<16x32xf32>
    %551 = arith.mulf %1, %550 : vector<16x32xf32>
    %552 = vector.broadcast %541 : vector<1x32xf32> to vector<16x32xf32>
    %553 = arith.mulf %551, %552 : vector<16x32xf32>
    %cst_286 = arith.constant 0.000000e+00 : f32
    %554 = vector.broadcast %cst_286 : f32 to vector<16x32xf32>
    %c0_287 = arith.constant 0 : index
    %c0_288 = arith.constant 0 : index
    %c0_289 = arith.constant 0 : index
    %555 = vector.load %arg17[%c0_287, %c0_288, %c0_289] : memref<8x32x4xf32, #tpu.memory_space<vmem>>, vector<1x32x4xf32>
    %556 = vector.shape_cast %555 : vector<1x32x4xf32> to vector<32x4xf32>
    %cst_290 = arith.constant dense<0.000000e+00> : vector<16x4xf32>
    %557 = tpu.matmul %553, %556, %cst_290 {dimension_numbers = #tpu.dot_dimension_numbers<[1], [0], [0], [1], [0, 0, 1, 1], [], []>} : vector<16x32xf32>, vector<32x4xf32>, vector<16x4xf32> -> vector<16x4xf32>
    %c0_291 = arith.constant 0 : index
    %c0_292 = arith.constant 0 : index
    %c0_293 = arith.constant 0 : index
    %558 = vector.load %arg18[%c0_291, %c0_292, %c0_293] : memref<8x32x4xf32, #tpu.memory_space<vmem>>, vector<1x32x4xf32>
    %559 = vector.shape_cast %558 : vector<1x32x4xf32> to vector<32x4xf32>
    %cst_294 = arith.constant dense<0.000000e+00> : vector<32x4xf32>
    %560 = tpu.matmul %540, %559, %cst_294 {dimension_numbers = #tpu.dot_dimension_numbers<[1], [0], [0], [1], [0, 0, 1, 1], [], []>} : vector<32x32xf32>, vector<32x4xf32>, vector<32x4xf32> -> vector<32x4xf32>
    %c0_295 = arith.constant 0 : index
    %c0_296 = arith.constant 0 : index
    %c0_297 = arith.constant 0 : index
    %561 = vector.load %arg19[%c0_295, %c0_296, %c0_297] : memref<8x32x4xf32, #tpu.memory_space<vmem>>, vector<1x32x4xf32>
    %562 = vector.shape_cast %561 : vector<1x32x4xf32> to vector<32x4xf32>
    %cst_298 = arith.constant dense<0.000000e+00> : vector<32x4xf32>
    %563 = tpu.matmul %540, %562, %cst_298 {dimension_numbers = #tpu.dot_dimension_numbers<[1], [0], [0], [1], [0, 0, 1, 1], [], []>} : vector<32x32xf32>, vector<32x4xf32>, vector<32x4xf32> -> vector<32x4xf32>
    %564 = arith.mulf %557, %3 : vector<16x4xf32>
    %cst_299 = arith.constant dense<0.000000e+00> : vector<16x4xf32>
    %565 = tpu.matmul %557, %0, %cst_299 {dimension_numbers = #tpu.dot_dimension_numbers<[1], [0], [0], [1], [0, 0, 1, 1], [], []>} : vector<16x4xf32>, vector<4x4xf32>, vector<16x4xf32> -> vector<16x4xf32>
    %566 = arith.mulf %565, %4 : vector<16x4xf32>
    %567 = arith.addf %564, %566 : vector<16x4xf32>
    %cst_300 = arith.constant 0.707106769 : f32
    %568 = vector.broadcast %cst_300 : f32 to vector<16x4xf32>
    %569 = arith.mulf %567, %568 : vector<16x4xf32>
    %570 = arith.mulf %560, %5 : vector<32x4xf32>
    %cst_301 = arith.constant dense<0.000000e+00> : vector<32x4xf32>
    %571 = tpu.matmul %560, %0, %cst_301 {dimension_numbers = #tpu.dot_dimension_numbers<[1], [0], [0], [1], [0, 0, 1, 1], [], []>} : vector<32x4xf32>, vector<4x4xf32>, vector<32x4xf32> -> vector<32x4xf32>
    %572 = arith.mulf %571, %6 : vector<32x4xf32>
    %573 = arith.addf %570, %572 : vector<32x4xf32>
    %cst_302 = arith.constant 0.707106769 : f32
    %574 = vector.broadcast %cst_302 : f32 to vector<32x4xf32>
    %575 = arith.mulf %573, %574 : vector<32x4xf32>
    %576 = vector.extract_strided_slice %569 {offsets = [0, 0], sizes = [8, 4], strides = [1, 1]} : vector<16x4xf32> to vector<8x4xf32>
    %577 = vector.extract_strided_slice %575 {offsets = [0, 0], sizes = [16, 4], strides = [1, 1]} : vector<32x4xf32> to vector<16x4xf32>
    %578 = vector.extract_strided_slice %563 {offsets = [0, 0], sizes = [16, 4], strides = [1, 1]} : vector<32x4xf32> to vector<16x4xf32>
    %cst_303 = arith.constant dense<0.000000e+00> : vector<8x16xf32>
    %579 = tpu.matmul %576, %577, %cst_303 {dimension_numbers = #tpu.dot_dimension_numbers<[1], [1], [0], [0], [0, 0, 1, 0], [], []>} : vector<8x4xf32>, vector<16x4xf32>, vector<8x16xf32> -> vector<8x16xf32>
    %cst_304 = arith.constant 1.000000e+00 : f32
    %580 = vector.broadcast %cst_304 : f32 to vector<8x16xf32>
    %581 = arith.mulf %579, %580 : vector<8x16xf32>
    %cst_305 = arith.constant dense<0xFF800000> : vector<8xf32>
    %582 = vector.multi_reduction <maximumf>, %581, %cst_305 [1] : vector<8x16xf32> to vector<8xf32>
    %583 = vector.shape_cast %582 : vector<8xf32> to vector<8x1xf32>
    %584 = vector.broadcast %583 : vector<8x1xf32> to vector<8x16xf32>
    %585 = arith.subf %581, %584 : vector<8x16xf32>
    %586 = math.exp %585 : vector<8x16xf32>
    %cst_306 = arith.constant dense<0.000000e+00> : vector<8xf32>
    %587 = vector.multi_reduction <add>, %586, %cst_306 [1] : vector<8x16xf32> to vector<8xf32>
    %588 = vector.shape_cast %587 : vector<8xf32> to vector<8x1xf32>
    %589 = vector.broadcast %588 : vector<8x1xf32> to vector<8x16xf32>
    %590 = arith.divf %586, %589 : vector<8x16xf32>
    %cst_307 = arith.constant dense<0.000000e+00> : vector<8x4xf32>
    %591 = tpu.matmul %590, %578, %cst_307 {dimension_numbers = #tpu.dot_dimension_numbers<[1], [0], [0], [1], [0, 0, 1, 1], [], []>} : vector<8x16xf32>, vector<16x4xf32>, vector<8x4xf32> -> vector<8x4xf32>
    %592 = vector.extract_strided_slice %569 {offsets = [8, 0], sizes = [8, 4], strides = [1, 1]} : vector<16x4xf32> to vector<8x4xf32>
    %593 = vector.extract_strided_slice %575 {offsets = [16, 0], sizes = [16, 4], strides = [1, 1]} : vector<32x4xf32> to vector<16x4xf32>
    %594 = vector.extract_strided_slice %563 {offsets = [16, 0], sizes = [16, 4], strides = [1, 1]} : vector<32x4xf32> to vector<16x4xf32>
    %cst_308 = arith.constant dense<0.000000e+00> : vector<8x16xf32>
    %595 = tpu.matmul %592, %593, %cst_308 {dimension_numbers = #tpu.dot_dimension_numbers<[1], [1], [0], [0], [0, 0, 1, 0], [], []>} : vector<8x4xf32>, vector<16x4xf32>, vector<8x16xf32> -> vector<8x16xf32>
    %cst_309 = arith.constant 1.000000e+00 : f32
    %596 = vector.broadcast %cst_309 : f32 to vector<8x16xf32>
    %597 = arith.mulf %595, %596 : vector<8x16xf32>
    %cst_310 = arith.constant dense<0xFF800000> : vector<8xf32>
    %598 = vector.multi_reduction <maximumf>, %597, %cst_310 [1] : vector<8x16xf32> to vector<8xf32>
    %599 = vector.shape_cast %598 : vector<8xf32> to vector<8x1xf32>
    %600 = vector.broadcast %599 : vector<8x1xf32> to vector<8x16xf32>
    %601 = arith.subf %597, %600 : vector<8x16xf32>
    %602 = math.exp %601 : vector<8x16xf32>
    %cst_311 = arith.constant dense<0.000000e+00> : vector<8xf32>
    %603 = vector.multi_reduction <add>, %602, %cst_311 [1] : vector<8x16xf32> to vector<8xf32>
    %604 = vector.shape_cast %603 : vector<8xf32> to vector<8x1xf32>
    %605 = vector.broadcast %604 : vector<8x1xf32> to vector<8x16xf32>
    %606 = arith.divf %602, %605 : vector<8x16xf32>
    %cst_312 = arith.constant dense<0.000000e+00> : vector<8x4xf32>
    %607 = tpu.matmul %606, %594, %cst_312 {dimension_numbers = #tpu.dot_dimension_numbers<[1], [0], [0], [1], [0, 0, 1, 1], [], []>} : vector<8x16xf32>, vector<16x4xf32>, vector<8x4xf32> -> vector<8x4xf32>
    %608 = tpu.concatenate %591, %607 in 0 : vector<8x4xf32>, vector<8x4xf32> -> vector<16x4xf32>
    %c0_313 = arith.constant 0 : index
    %c0_314 = arith.constant 0 : index
    %c0_315 = arith.constant 0 : index
    %609 = vector.load %arg20[%c0_313, %c0_314, %c0_315] : memref<8x4x32xf32, #tpu.memory_space<vmem>>, vector<1x4x32xf32>
    %610 = vector.shape_cast %609 : vector<1x4x32xf32> to vector<4x32xf32>
    %cst_316 = arith.constant dense<0.000000e+00> : vector<16x32xf32>
    %611 = tpu.matmul %608, %610, %cst_316 {dimension_numbers = #tpu.dot_dimension_numbers<[1], [0], [0], [1], [0, 0, 1, 1], [], []>} : vector<16x4xf32>, vector<4x32xf32>, vector<16x32xf32> -> vector<16x32xf32>
    %612 = arith.addf %554, %611 : vector<16x32xf32>
    %c1_317 = arith.constant 1 : index
    %c0_318 = arith.constant 0 : index
    %c0_319 = arith.constant 0 : index
    %613 = vector.load %arg17[%c1_317, %c0_318, %c0_319] : memref<8x32x4xf32, #tpu.memory_space<vmem>>, vector<1x32x4xf32>
    %614 = vector.shape_cast %613 : vector<1x32x4xf32> to vector<32x4xf32>
    %cst_320 = arith.constant dense<0.000000e+00> : vector<16x4xf32>
    %615 = tpu.matmul %553, %614, %cst_320 {dimension_numbers = #tpu.dot_dimension_numbers<[1], [0], [0], [1], [0, 0, 1, 1], [], []>} : vector<16x32xf32>, vector<32x4xf32>, vector<16x4xf32> -> vector<16x4xf32>
    %c1_321 = arith.constant 1 : index
    %c0_322 = arith.constant 0 : index
    %c0_323 = arith.constant 0 : index
    %616 = vector.load %arg18[%c1_321, %c0_322, %c0_323] : memref<8x32x4xf32, #tpu.memory_space<vmem>>, vector<1x32x4xf32>
    %617 = vector.shape_cast %616 : vector<1x32x4xf32> to vector<32x4xf32>
    %cst_324 = arith.constant dense<0.000000e+00> : vector<32x4xf32>
    %618 = tpu.matmul %540, %617, %cst_324 {dimension_numbers = #tpu.dot_dimension_numbers<[1], [0], [0], [1], [0, 0, 1, 1], [], []>} : vector<32x32xf32>, vector<32x4xf32>, vector<32x4xf32> -> vector<32x4xf32>
    %c1_325 = arith.constant 1 : index
    %c0_326 = arith.constant 0 : index
    %c0_327 = arith.constant 0 : index
    %619 = vector.load %arg19[%c1_325, %c0_326, %c0_327] : memref<8x32x4xf32, #tpu.memory_space<vmem>>, vector<1x32x4xf32>
    %620 = vector.shape_cast %619 : vector<1x32x4xf32> to vector<32x4xf32>
    %cst_328 = arith.constant dense<0.000000e+00> : vector<32x4xf32>
    %621 = tpu.matmul %540, %620, %cst_328 {dimension_numbers = #tpu.dot_dimension_numbers<[1], [0], [0], [1], [0, 0, 1, 1], [], []>} : vector<32x32xf32>, vector<32x4xf32>, vector<32x4xf32> -> vector<32x4xf32>
    %622 = arith.mulf %615, %3 : vector<16x4xf32>
    %cst_329 = arith.constant dense<0.000000e+00> : vector<16x4xf32>
    %623 = tpu.matmul %615, %0, %cst_329 {dimension_numbers = #tpu.dot_dimension_numbers<[1], [0], [0], [1], [0, 0, 1, 1], [], []>} : vector<16x4xf32>, vector<4x4xf32>, vector<16x4xf32> -> vector<16x4xf32>
    %624 = arith.mulf %623, %4 : vector<16x4xf32>
    %625 = arith.addf %622, %624 : vector<16x4xf32>
    %cst_330 = arith.constant 0.707106769 : f32
    %626 = vector.broadcast %cst_330 : f32 to vector<16x4xf32>
    %627 = arith.mulf %625, %626 : vector<16x4xf32>
    %628 = arith.mulf %618, %5 : vector<32x4xf32>
    %cst_331 = arith.constant dense<0.000000e+00> : vector<32x4xf32>
    %629 = tpu.matmul %618, %0, %cst_331 {dimension_numbers = #tpu.dot_dimension_numbers<[1], [0], [0], [1], [0, 0, 1, 1], [], []>} : vector<32x4xf32>, vector<4x4xf32>, vector<32x4xf32> -> vector<32x4xf32>
    %630 = arith.mulf %629, %6 : vector<32x4xf32>
    %631 = arith.addf %628, %630 : vector<32x4xf32>
    %cst_332 = arith.constant 0.707106769 : f32
    %632 = vector.broadcast %cst_332 : f32 to vector<32x4xf32>
    %633 = arith.mulf %631, %632 : vector<32x4xf32>
    %634 = vector.extract_strided_slice %627 {offsets = [0, 0], sizes = [8, 4], strides = [1, 1]} : vector<16x4xf32> to vector<8x4xf32>
    %635 = vector.extract_strided_slice %633 {offsets = [0, 0], sizes = [16, 4], strides = [1, 1]} : vector<32x4xf32> to vector<16x4xf32>
    %636 = vector.extract_strided_slice %621 {offsets = [0, 0], sizes = [16, 4], strides = [1, 1]} : vector<32x4xf32> to vector<16x4xf32>
    %cst_333 = arith.constant dense<0.000000e+00> : vector<8x16xf32>
    %637 = tpu.matmul %634, %635, %cst_333 {dimension_numbers = #tpu.dot_dimension_numbers<[1], [1], [0], [0], [0, 0, 1, 0], [], []>} : vector<8x4xf32>, vector<16x4xf32>, vector<8x16xf32> -> vector<8x16xf32>
    %cst_334 = arith.constant 1.000000e+00 : f32
    %638 = vector.broadcast %cst_334 : f32 to vector<8x16xf32>
    %639 = arith.mulf %637, %638 : vector<8x16xf32>
    %cst_335 = arith.constant dense<0xFF800000> : vector<8xf32>
    %640 = vector.multi_reduction <maximumf>, %639, %cst_335 [1] : vector<8x16xf32> to vector<8xf32>
    %641 = vector.shape_cast %640 : vector<8xf32> to vector<8x1xf32>
    %642 = vector.broadcast %641 : vector<8x1xf32> to vector<8x16xf32>
    %643 = arith.subf %639, %642 : vector<8x16xf32>
    %644 = math.exp %643 : vector<8x16xf32>
    %cst_336 = arith.constant dense<0.000000e+00> : vector<8xf32>
    %645 = vector.multi_reduction <add>, %644, %cst_336 [1] : vector<8x16xf32> to vector<8xf32>
    %646 = vector.shape_cast %645 : vector<8xf32> to vector<8x1xf32>
    %647 = vector.broadcast %646 : vector<8x1xf32> to vector<8x16xf32>
    %648 = arith.divf %644, %647 : vector<8x16xf32>
    %cst_337 = arith.constant dense<0.000000e+00> : vector<8x4xf32>
    %649 = tpu.matmul %648, %636, %cst_337 {dimension_numbers = #tpu.dot_dimension_numbers<[1], [0], [0], [1], [0, 0, 1, 1], [], []>} : vector<8x16xf32>, vector<16x4xf32>, vector<8x4xf32> -> vector<8x4xf32>
    %650 = vector.extract_strided_slice %627 {offsets = [8, 0], sizes = [8, 4], strides = [1, 1]} : vector<16x4xf32> to vector<8x4xf32>
    %651 = vector.extract_strided_slice %633 {offsets = [16, 0], sizes = [16, 4], strides = [1, 1]} : vector<32x4xf32> to vector<16x4xf32>
    %652 = vector.extract_strided_slice %621 {offsets = [16, 0], sizes = [16, 4], strides = [1, 1]} : vector<32x4xf32> to vector<16x4xf32>
    %cst_338 = arith.constant dense<0.000000e+00> : vector<8x16xf32>
    %653 = tpu.matmul %650, %651, %cst_338 {dimension_numbers = #tpu.dot_dimension_numbers<[1], [1], [0], [0], [0, 0, 1, 0], [], []>} : vector<8x4xf32>, vector<16x4xf32>, vector<8x16xf32> -> vector<8x16xf32>
    %cst_339 = arith.constant 1.000000e+00 : f32
    %654 = vector.broadcast %cst_339 : f32 to vector<8x16xf32>
    %655 = arith.mulf %653, %654 : vector<8x16xf32>
    %cst_340 = arith.constant dense<0xFF800000> : vector<8xf32>
    %656 = vector.multi_reduction <maximumf>, %655, %cst_340 [1] : vector<8x16xf32> to vector<8xf32>
    %657 = vector.shape_cast %656 : vector<8xf32> to vector<8x1xf32>
    %658 = vector.broadcast %657 : vector<8x1xf32> to vector<8x16xf32>
    %659 = arith.subf %655, %658 : vector<8x16xf32>
    %660 = math.exp %659 : vector<8x16xf32>
    %cst_341 = arith.constant dense<0.000000e+00> : vector<8xf32>
    %661 = vector.multi_reduction <add>, %660, %cst_341 [1] : vector<8x16xf32> to vector<8xf32>
    %662 = vector.shape_cast %661 : vector<8xf32> to vector<8x1xf32>
    %663 = vector.broadcast %662 : vector<8x1xf32> to vector<8x16xf32>
    %664 = arith.divf %660, %663 : vector<8x16xf32>
    %cst_342 = arith.constant dense<0.000000e+00> : vector<8x4xf32>
    %665 = tpu.matmul %664, %652, %cst_342 {dimension_numbers = #tpu.dot_dimension_numbers<[1], [0], [0], [1], [0, 0, 1, 1], [], []>} : vector<8x16xf32>, vector<16x4xf32>, vector<8x4xf32> -> vector<8x4xf32>
    %666 = tpu.concatenate %649, %665 in 0 : vector<8x4xf32>, vector<8x4xf32> -> vector<16x4xf32>
    %c1_343 = arith.constant 1 : index
    %c0_344 = arith.constant 0 : index
    %c0_345 = arith.constant 0 : index
    %667 = vector.load %arg20[%c1_343, %c0_344, %c0_345] : memref<8x4x32xf32, #tpu.memory_space<vmem>>, vector<1x4x32xf32>
    %668 = vector.shape_cast %667 : vector<1x4x32xf32> to vector<4x32xf32>
    %cst_346 = arith.constant dense<0.000000e+00> : vector<16x32xf32>
    %669 = tpu.matmul %666, %668, %cst_346 {dimension_numbers = #tpu.dot_dimension_numbers<[1], [0], [0], [1], [0, 0, 1, 1], [], []>} : vector<16x4xf32>, vector<4x32xf32>, vector<16x32xf32> -> vector<16x32xf32>
    %670 = arith.addf %612, %669 : vector<16x32xf32>
    %c2_347 = arith.constant 2 : index
    %c0_348 = arith.constant 0 : index
    %c0_349 = arith.constant 0 : index
    %671 = vector.load %arg17[%c2_347, %c0_348, %c0_349] : memref<8x32x4xf32, #tpu.memory_space<vmem>>, vector<1x32x4xf32>
    %672 = vector.shape_cast %671 : vector<1x32x4xf32> to vector<32x4xf32>
    %cst_350 = arith.constant dense<0.000000e+00> : vector<16x4xf32>
    %673 = tpu.matmul %553, %672, %cst_350 {dimension_numbers = #tpu.dot_dimension_numbers<[1], [0], [0], [1], [0, 0, 1, 1], [], []>} : vector<16x32xf32>, vector<32x4xf32>, vector<16x4xf32> -> vector<16x4xf32>
    %c2_351 = arith.constant 2 : index
    %c0_352 = arith.constant 0 : index
    %c0_353 = arith.constant 0 : index
    %674 = vector.load %arg18[%c2_351, %c0_352, %c0_353] : memref<8x32x4xf32, #tpu.memory_space<vmem>>, vector<1x32x4xf32>
    %675 = vector.shape_cast %674 : vector<1x32x4xf32> to vector<32x4xf32>
    %cst_354 = arith.constant dense<0.000000e+00> : vector<32x4xf32>
    %676 = tpu.matmul %540, %675, %cst_354 {dimension_numbers = #tpu.dot_dimension_numbers<[1], [0], [0], [1], [0, 0, 1, 1], [], []>} : vector<32x32xf32>, vector<32x4xf32>, vector<32x4xf32> -> vector<32x4xf32>
    %c2_355 = arith.constant 2 : index
    %c0_356 = arith.constant 0 : index
    %c0_357 = arith.constant 0 : index
    %677 = vector.load %arg19[%c2_355, %c0_356, %c0_357] : memref<8x32x4xf32, #tpu.memory_space<vmem>>, vector<1x32x4xf32>
    %678 = vector.shape_cast %677 : vector<1x32x4xf32> to vector<32x4xf32>
    %cst_358 = arith.constant dense<0.000000e+00> : vector<32x4xf32>
    %679 = tpu.matmul %540, %678, %cst_358 {dimension_numbers = #tpu.dot_dimension_numbers<[1], [0], [0], [1], [0, 0, 1, 1], [], []>} : vector<32x32xf32>, vector<32x4xf32>, vector<32x4xf32> -> vector<32x4xf32>
    %680 = arith.mulf %673, %3 : vector<16x4xf32>
    %cst_359 = arith.constant dense<0.000000e+00> : vector<16x4xf32>
    %681 = tpu.matmul %673, %0, %cst_359 {dimension_numbers = #tpu.dot_dimension_numbers<[1], [0], [0], [1], [0, 0, 1, 1], [], []>} : vector<16x4xf32>, vector<4x4xf32>, vector<16x4xf32> -> vector<16x4xf32>
    %682 = arith.mulf %681, %4 : vector<16x4xf32>
    %683 = arith.addf %680, %682 : vector<16x4xf32>
    %cst_360 = arith.constant 0.707106769 : f32
    %684 = vector.broadcast %cst_360 : f32 to vector<16x4xf32>
    %685 = arith.mulf %683, %684 : vector<16x4xf32>
    %686 = arith.mulf %676, %5 : vector<32x4xf32>
    %cst_361 = arith.constant dense<0.000000e+00> : vector<32x4xf32>
    %687 = tpu.matmul %676, %0, %cst_361 {dimension_numbers = #tpu.dot_dimension_numbers<[1], [0], [0], [1], [0, 0, 1, 1], [], []>} : vector<32x4xf32>, vector<4x4xf32>, vector<32x4xf32> -> vector<32x4xf32>
    %688 = arith.mulf %687, %6 : vector<32x4xf32>
    %689 = arith.addf %686, %688 : vector<32x4xf32>
    %cst_362 = arith.constant 0.707106769 : f32
    %690 = vector.broadcast %cst_362 : f32 to vector<32x4xf32>
    %691 = arith.mulf %689, %690 : vector<32x4xf32>
    %692 = vector.extract_strided_slice %685 {offsets = [0, 0], sizes = [8, 4], strides = [1, 1]} : vector<16x4xf32> to vector<8x4xf32>
    %693 = vector.extract_strided_slice %691 {offsets = [0, 0], sizes = [16, 4], strides = [1, 1]} : vector<32x4xf32> to vector<16x4xf32>
    %694 = vector.extract_strided_slice %679 {offsets = [0, 0], sizes = [16, 4], strides = [1, 1]} : vector<32x4xf32> to vector<16x4xf32>
    %cst_363 = arith.constant dense<0.000000e+00> : vector<8x16xf32>
    %695 = tpu.matmul %692, %693, %cst_363 {dimension_numbers = #tpu.dot_dimension_numbers<[1], [1], [0], [0], [0, 0, 1, 0], [], []>} : vector<8x4xf32>, vector<16x4xf32>, vector<8x16xf32> -> vector<8x16xf32>
    %cst_364 = arith.constant 1.000000e+00 : f32
    %696 = vector.broadcast %cst_364 : f32 to vector<8x16xf32>
    %697 = arith.mulf %695, %696 : vector<8x16xf32>
    %cst_365 = arith.constant dense<0xFF800000> : vector<8xf32>
    %698 = vector.multi_reduction <maximumf>, %697, %cst_365 [1] : vector<8x16xf32> to vector<8xf32>
    %699 = vector.shape_cast %698 : vector<8xf32> to vector<8x1xf32>
    %700 = vector.broadcast %699 : vector<8x1xf32> to vector<8x16xf32>
    %701 = arith.subf %697, %700 : vector<8x16xf32>
    %702 = math.exp %701 : vector<8x16xf32>
    %cst_366 = arith.constant dense<0.000000e+00> : vector<8xf32>
    %703 = vector.multi_reduction <add>, %702, %cst_366 [1] : vector<8x16xf32> to vector<8xf32>
    %704 = vector.shape_cast %703 : vector<8xf32> to vector<8x1xf32>
    %705 = vector.broadcast %704 : vector<8x1xf32> to vector<8x16xf32>
    %706 = arith.divf %702, %705 : vector<8x16xf32>
    %cst_367 = arith.constant dense<0.000000e+00> : vector<8x4xf32>
    %707 = tpu.matmul %706, %694, %cst_367 {dimension_numbers = #tpu.dot_dimension_numbers<[1], [0], [0], [1], [0, 0, 1, 1], [], []>} : vector<8x16xf32>, vector<16x4xf32>, vector<8x4xf32> -> vector<8x4xf32>
    %708 = vector.extract_strided_slice %685 {offsets = [8, 0], sizes = [8, 4], strides = [1, 1]} : vector<16x4xf32> to vector<8x4xf32>
    %709 = vector.extract_strided_slice %691 {offsets = [16, 0], sizes = [16, 4], strides = [1, 1]} : vector<32x4xf32> to vector<16x4xf32>
    %710 = vector.extract_strided_slice %679 {offsets = [16, 0], sizes = [16, 4], strides = [1, 1]} : vector<32x4xf32> to vector<16x4xf32>
    %cst_368 = arith.constant dense<0.000000e+00> : vector<8x16xf32>
    %711 = tpu.matmul %708, %709, %cst_368 {dimension_numbers = #tpu.dot_dimension_numbers<[1], [1], [0], [0], [0, 0, 1, 0], [], []>} : vector<8x4xf32>, vector<16x4xf32>, vector<8x16xf32> -> vector<8x16xf32>
    %cst_369 = arith.constant 1.000000e+00 : f32
    %712 = vector.broadcast %cst_369 : f32 to vector<8x16xf32>
    %713 = arith.mulf %711, %712 : vector<8x16xf32>
    %cst_370 = arith.constant dense<0xFF800000> : vector<8xf32>
    %714 = vector.multi_reduction <maximumf>, %713, %cst_370 [1] : vector<8x16xf32> to vector<8xf32>
    %715 = vector.shape_cast %714 : vector<8xf32> to vector<8x1xf32>
    %716 = vector.broadcast %715 : vector<8x1xf32> to vector<8x16xf32>
    %717 = arith.subf %713, %716 : vector<8x16xf32>
    %718 = math.exp %717 : vector<8x16xf32>
    %cst_371 = arith.constant dense<0.000000e+00> : vector<8xf32>
    %719 = vector.multi_reduction <add>, %718, %cst_371 [1] : vector<8x16xf32> to vector<8xf32>
    %720 = vector.shape_cast %719 : vector<8xf32> to vector<8x1xf32>
    %721 = vector.broadcast %720 : vector<8x1xf32> to vector<8x16xf32>
    %722 = arith.divf %718, %721 : vector<8x16xf32>
    %cst_372 = arith.constant dense<0.000000e+00> : vector<8x4xf32>
    %723 = tpu.matmul %722, %710, %cst_372 {dimension_numbers = #tpu.dot_dimension_numbers<[1], [0], [0], [1], [0, 0, 1, 1], [], []>} : vector<8x16xf32>, vector<16x4xf32>, vector<8x4xf32> -> vector<8x4xf32>
    %724 = tpu.concatenate %707, %723 in 0 : vector<8x4xf32>, vector<8x4xf32> -> vector<16x4xf32>
    %c2_373 = arith.constant 2 : index
    %c0_374 = arith.constant 0 : index
    %c0_375 = arith.constant 0 : index
    %725 = vector.load %arg20[%c2_373, %c0_374, %c0_375] : memref<8x4x32xf32, #tpu.memory_space<vmem>>, vector<1x4x32xf32>
    %726 = vector.shape_cast %725 : vector<1x4x32xf32> to vector<4x32xf32>
    %cst_376 = arith.constant dense<0.000000e+00> : vector<16x32xf32>
    %727 = tpu.matmul %724, %726, %cst_376 {dimension_numbers = #tpu.dot_dimension_numbers<[1], [0], [0], [1], [0, 0, 1, 1], [], []>} : vector<16x4xf32>, vector<4x32xf32>, vector<16x32xf32> -> vector<16x32xf32>
    %728 = arith.addf %670, %727 : vector<16x32xf32>
    %c3_377 = arith.constant 3 : index
    %c0_378 = arith.constant 0 : index
    %c0_379 = arith.constant 0 : index
    %729 = vector.load %arg17[%c3_377, %c0_378, %c0_379] : memref<8x32x4xf32, #tpu.memory_space<vmem>>, vector<1x32x4xf32>
    %730 = vector.shape_cast %729 : vector<1x32x4xf32> to vector<32x4xf32>
    %cst_380 = arith.constant dense<0.000000e+00> : vector<16x4xf32>
    %731 = tpu.matmul %553, %730, %cst_380 {dimension_numbers = #tpu.dot_dimension_numbers<[1], [0], [0], [1], [0, 0, 1, 1], [], []>} : vector<16x32xf32>, vector<32x4xf32>, vector<16x4xf32> -> vector<16x4xf32>
    %c3_381 = arith.constant 3 : index
    %c0_382 = arith.constant 0 : index
    %c0_383 = arith.constant 0 : index
    %732 = vector.load %arg18[%c3_381, %c0_382, %c0_383] : memref<8x32x4xf32, #tpu.memory_space<vmem>>, vector<1x32x4xf32>
    %733 = vector.shape_cast %732 : vector<1x32x4xf32> to vector<32x4xf32>
    %cst_384 = arith.constant dense<0.000000e+00> : vector<32x4xf32>
    %734 = tpu.matmul %540, %733, %cst_384 {dimension_numbers = #tpu.dot_dimension_numbers<[1], [0], [0], [1], [0, 0, 1, 1], [], []>} : vector<32x32xf32>, vector<32x4xf32>, vector<32x4xf32> -> vector<32x4xf32>
    %c3_385 = arith.constant 3 : index
    %c0_386 = arith.constant 0 : index
    %c0_387 = arith.constant 0 : index
    %735 = vector.load %arg19[%c3_385, %c0_386, %c0_387] : memref<8x32x4xf32, #tpu.memory_space<vmem>>, vector<1x32x4xf32>
    %736 = vector.shape_cast %735 : vector<1x32x4xf32> to vector<32x4xf32>
    %cst_388 = arith.constant dense<0.000000e+00> : vector<32x4xf32>
    %737 = tpu.matmul %540, %736, %cst_388 {dimension_numbers = #tpu.dot_dimension_numbers<[1], [0], [0], [1], [0, 0, 1, 1], [], []>} : vector<32x32xf32>, vector<32x4xf32>, vector<32x4xf32> -> vector<32x4xf32>
    %738 = arith.mulf %731, %3 : vector<16x4xf32>
    %cst_389 = arith.constant dense<0.000000e+00> : vector<16x4xf32>
    %739 = tpu.matmul %731, %0, %cst_389 {dimension_numbers = #tpu.dot_dimension_numbers<[1], [0], [0], [1], [0, 0, 1, 1], [], []>} : vector<16x4xf32>, vector<4x4xf32>, vector<16x4xf32> -> vector<16x4xf32>
    %740 = arith.mulf %739, %4 : vector<16x4xf32>
    %741 = arith.addf %738, %740 : vector<16x4xf32>
    %cst_390 = arith.constant 0.707106769 : f32
    %742 = vector.broadcast %cst_390 : f32 to vector<16x4xf32>
    %743 = arith.mulf %741, %742 : vector<16x4xf32>
    %744 = arith.mulf %734, %5 : vector<32x4xf32>
    %cst_391 = arith.constant dense<0.000000e+00> : vector<32x4xf32>
    %745 = tpu.matmul %734, %0, %cst_391 {dimension_numbers = #tpu.dot_dimension_numbers<[1], [0], [0], [1], [0, 0, 1, 1], [], []>} : vector<32x4xf32>, vector<4x4xf32>, vector<32x4xf32> -> vector<32x4xf32>
    %746 = arith.mulf %745, %6 : vector<32x4xf32>
    %747 = arith.addf %744, %746 : vector<32x4xf32>
    %cst_392 = arith.constant 0.707106769 : f32
    %748 = vector.broadcast %cst_392 : f32 to vector<32x4xf32>
    %749 = arith.mulf %747, %748 : vector<32x4xf32>
    %750 = vector.extract_strided_slice %743 {offsets = [0, 0], sizes = [8, 4], strides = [1, 1]} : vector<16x4xf32> to vector<8x4xf32>
    %751 = vector.extract_strided_slice %749 {offsets = [0, 0], sizes = [16, 4], strides = [1, 1]} : vector<32x4xf32> to vector<16x4xf32>
    %752 = vector.extract_strided_slice %737 {offsets = [0, 0], sizes = [16, 4], strides = [1, 1]} : vector<32x4xf32> to vector<16x4xf32>
    %cst_393 = arith.constant dense<0.000000e+00> : vector<8x16xf32>
    %753 = tpu.matmul %750, %751, %cst_393 {dimension_numbers = #tpu.dot_dimension_numbers<[1], [1], [0], [0], [0, 0, 1, 0], [], []>} : vector<8x4xf32>, vector<16x4xf32>, vector<8x16xf32> -> vector<8x16xf32>
    %cst_394 = arith.constant 1.000000e+00 : f32
    %754 = vector.broadcast %cst_394 : f32 to vector<8x16xf32>
    %755 = arith.mulf %753, %754 : vector<8x16xf32>
    %cst_395 = arith.constant dense<0xFF800000> : vector<8xf32>
    %756 = vector.multi_reduction <maximumf>, %755, %cst_395 [1] : vector<8x16xf32> to vector<8xf32>
    %757 = vector.shape_cast %756 : vector<8xf32> to vector<8x1xf32>
    %758 = vector.broadcast %757 : vector<8x1xf32> to vector<8x16xf32>
    %759 = arith.subf %755, %758 : vector<8x16xf32>
    %760 = math.exp %759 : vector<8x16xf32>
    %cst_396 = arith.constant dense<0.000000e+00> : vector<8xf32>
    %761 = vector.multi_reduction <add>, %760, %cst_396 [1] : vector<8x16xf32> to vector<8xf32>
    %762 = vector.shape_cast %761 : vector<8xf32> to vector<8x1xf32>
    %763 = vector.broadcast %762 : vector<8x1xf32> to vector<8x16xf32>
    %764 = arith.divf %760, %763 : vector<8x16xf32>
    %cst_397 = arith.constant dense<0.000000e+00> : vector<8x4xf32>
    %765 = tpu.matmul %764, %752, %cst_397 {dimension_numbers = #tpu.dot_dimension_numbers<[1], [0], [0], [1], [0, 0, 1, 1], [], []>} : vector<8x16xf32>, vector<16x4xf32>, vector<8x4xf32> -> vector<8x4xf32>
    %766 = vector.extract_strided_slice %743 {offsets = [8, 0], sizes = [8, 4], strides = [1, 1]} : vector<16x4xf32> to vector<8x4xf32>
    %767 = vector.extract_strided_slice %749 {offsets = [16, 0], sizes = [16, 4], strides = [1, 1]} : vector<32x4xf32> to vector<16x4xf32>
    %768 = vector.extract_strided_slice %737 {offsets = [16, 0], sizes = [16, 4], strides = [1, 1]} : vector<32x4xf32> to vector<16x4xf32>
    %cst_398 = arith.constant dense<0.000000e+00> : vector<8x16xf32>
    %769 = tpu.matmul %766, %767, %cst_398 {dimension_numbers = #tpu.dot_dimension_numbers<[1], [1], [0], [0], [0, 0, 1, 0], [], []>} : vector<8x4xf32>, vector<16x4xf32>, vector<8x16xf32> -> vector<8x16xf32>
    %cst_399 = arith.constant 1.000000e+00 : f32
    %770 = vector.broadcast %cst_399 : f32 to vector<8x16xf32>
    %771 = arith.mulf %769, %770 : vector<8x16xf32>
    %cst_400 = arith.constant dense<0xFF800000> : vector<8xf32>
    %772 = vector.multi_reduction <maximumf>, %771, %cst_400 [1] : vector<8x16xf32> to vector<8xf32>
    %773 = vector.shape_cast %772 : vector<8xf32> to vector<8x1xf32>
    %774 = vector.broadcast %773 : vector<8x1xf32> to vector<8x16xf32>
    %775 = arith.subf %771, %774 : vector<8x16xf32>
    %776 = math.exp %775 : vector<8x16xf32>
    %cst_401 = arith.constant dense<0.000000e+00> : vector<8xf32>
    %777 = vector.multi_reduction <add>, %776, %cst_401 [1] : vector<8x16xf32> to vector<8xf32>
    %778 = vector.shape_cast %777 : vector<8xf32> to vector<8x1xf32>
    %779 = vector.broadcast %778 : vector<8x1xf32> to vector<8x16xf32>
    %780 = arith.divf %776, %779 : vector<8x16xf32>
    %cst_402 = arith.constant dense<0.000000e+00> : vector<8x4xf32>
    %781 = tpu.matmul %780, %768, %cst_402 {dimension_numbers = #tpu.dot_dimension_numbers<[1], [0], [0], [1], [0, 0, 1, 1], [], []>} : vector<8x16xf32>, vector<16x4xf32>, vector<8x4xf32> -> vector<8x4xf32>
    %782 = tpu.concatenate %765, %781 in 0 : vector<8x4xf32>, vector<8x4xf32> -> vector<16x4xf32>
    %c3_403 = arith.constant 3 : index
    %c0_404 = arith.constant 0 : index
    %c0_405 = arith.constant 0 : index
    %783 = vector.load %arg20[%c3_403, %c0_404, %c0_405] : memref<8x4x32xf32, #tpu.memory_space<vmem>>, vector<1x4x32xf32>
    %784 = vector.shape_cast %783 : vector<1x4x32xf32> to vector<4x32xf32>
    %cst_406 = arith.constant dense<0.000000e+00> : vector<16x32xf32>
    %785 = tpu.matmul %782, %784, %cst_406 {dimension_numbers = #tpu.dot_dimension_numbers<[1], [0], [0], [1], [0, 0, 1, 1], [], []>} : vector<16x4xf32>, vector<4x32xf32>, vector<16x32xf32> -> vector<16x32xf32>
    %786 = arith.addf %728, %785 : vector<16x32xf32>
    %c4_407 = arith.constant 4 : index
    %c0_408 = arith.constant 0 : index
    %c0_409 = arith.constant 0 : index
    %787 = vector.load %arg17[%c4_407, %c0_408, %c0_409] : memref<8x32x4xf32, #tpu.memory_space<vmem>>, vector<1x32x4xf32>
    %788 = vector.shape_cast %787 : vector<1x32x4xf32> to vector<32x4xf32>
    %cst_410 = arith.constant dense<0.000000e+00> : vector<16x4xf32>
    %789 = tpu.matmul %553, %788, %cst_410 {dimension_numbers = #tpu.dot_dimension_numbers<[1], [0], [0], [1], [0, 0, 1, 1], [], []>} : vector<16x32xf32>, vector<32x4xf32>, vector<16x4xf32> -> vector<16x4xf32>
    %c4_411 = arith.constant 4 : index
    %c0_412 = arith.constant 0 : index
    %c0_413 = arith.constant 0 : index
    %790 = vector.load %arg18[%c4_411, %c0_412, %c0_413] : memref<8x32x4xf32, #tpu.memory_space<vmem>>, vector<1x32x4xf32>
    %791 = vector.shape_cast %790 : vector<1x32x4xf32> to vector<32x4xf32>
    %cst_414 = arith.constant dense<0.000000e+00> : vector<32x4xf32>
    %792 = tpu.matmul %540, %791, %cst_414 {dimension_numbers = #tpu.dot_dimension_numbers<[1], [0], [0], [1], [0, 0, 1, 1], [], []>} : vector<32x32xf32>, vector<32x4xf32>, vector<32x4xf32> -> vector<32x4xf32>
    %c4_415 = arith.constant 4 : index
    %c0_416 = arith.constant 0 : index
    %c0_417 = arith.constant 0 : index
    %793 = vector.load %arg19[%c4_415, %c0_416, %c0_417] : memref<8x32x4xf32, #tpu.memory_space<vmem>>, vector<1x32x4xf32>
    %794 = vector.shape_cast %793 : vector<1x32x4xf32> to vector<32x4xf32>
    %cst_418 = arith.constant dense<0.000000e+00> : vector<32x4xf32>
    %795 = tpu.matmul %540, %794, %cst_418 {dimension_numbers = #tpu.dot_dimension_numbers<[1], [0], [0], [1], [0, 0, 1, 1], [], []>} : vector<32x32xf32>, vector<32x4xf32>, vector<32x4xf32> -> vector<32x4xf32>
    %796 = arith.mulf %789, %3 : vector<16x4xf32>
    %cst_419 = arith.constant dense<0.000000e+00> : vector<16x4xf32>
    %797 = tpu.matmul %789, %0, %cst_419 {dimension_numbers = #tpu.dot_dimension_numbers<[1], [0], [0], [1], [0, 0, 1, 1], [], []>} : vector<16x4xf32>, vector<4x4xf32>, vector<16x4xf32> -> vector<16x4xf32>
    %798 = arith.mulf %797, %4 : vector<16x4xf32>
    %799 = arith.addf %796, %798 : vector<16x4xf32>
    %cst_420 = arith.constant 0.707106769 : f32
    %800 = vector.broadcast %cst_420 : f32 to vector<16x4xf32>
    %801 = arith.mulf %799, %800 : vector<16x4xf32>
    %802 = arith.mulf %792, %5 : vector<32x4xf32>
    %cst_421 = arith.constant dense<0.000000e+00> : vector<32x4xf32>
    %803 = tpu.matmul %792, %0, %cst_421 {dimension_numbers = #tpu.dot_dimension_numbers<[1], [0], [0], [1], [0, 0, 1, 1], [], []>} : vector<32x4xf32>, vector<4x4xf32>, vector<32x4xf32> -> vector<32x4xf32>
    %804 = arith.mulf %803, %6 : vector<32x4xf32>
    %805 = arith.addf %802, %804 : vector<32x4xf32>
    %cst_422 = arith.constant 0.707106769 : f32
    %806 = vector.broadcast %cst_422 : f32 to vector<32x4xf32>
    %807 = arith.mulf %805, %806 : vector<32x4xf32>
    %808 = vector.extract_strided_slice %801 {offsets = [0, 0], sizes = [8, 4], strides = [1, 1]} : vector<16x4xf32> to vector<8x4xf32>
    %809 = vector.extract_strided_slice %807 {offsets = [0, 0], sizes = [16, 4], strides = [1, 1]} : vector<32x4xf32> to vector<16x4xf32>
    %810 = vector.extract_strided_slice %795 {offsets = [0, 0], sizes = [16, 4], strides = [1, 1]} : vector<32x4xf32> to vector<16x4xf32>
    %cst_423 = arith.constant dense<0.000000e+00> : vector<8x16xf32>
    %811 = tpu.matmul %808, %809, %cst_423 {dimension_numbers = #tpu.dot_dimension_numbers<[1], [1], [0], [0], [0, 0, 1, 0], [], []>} : vector<8x4xf32>, vector<16x4xf32>, vector<8x16xf32> -> vector<8x16xf32>
    %cst_424 = arith.constant 1.000000e+00 : f32
    %812 = vector.broadcast %cst_424 : f32 to vector<8x16xf32>
    %813 = arith.mulf %811, %812 : vector<8x16xf32>
    %cst_425 = arith.constant dense<0xFF800000> : vector<8xf32>
    %814 = vector.multi_reduction <maximumf>, %813, %cst_425 [1] : vector<8x16xf32> to vector<8xf32>
    %815 = vector.shape_cast %814 : vector<8xf32> to vector<8x1xf32>
    %816 = vector.broadcast %815 : vector<8x1xf32> to vector<8x16xf32>
    %817 = arith.subf %813, %816 : vector<8x16xf32>
    %818 = math.exp %817 : vector<8x16xf32>
    %cst_426 = arith.constant dense<0.000000e+00> : vector<8xf32>
    %819 = vector.multi_reduction <add>, %818, %cst_426 [1] : vector<8x16xf32> to vector<8xf32>
    %820 = vector.shape_cast %819 : vector<8xf32> to vector<8x1xf32>
    %821 = vector.broadcast %820 : vector<8x1xf32> to vector<8x16xf32>
    %822 = arith.divf %818, %821 : vector<8x16xf32>
    %cst_427 = arith.constant dense<0.000000e+00> : vector<8x4xf32>
    %823 = tpu.matmul %822, %810, %cst_427 {dimension_numbers = #tpu.dot_dimension_numbers<[1], [0], [0], [1], [0, 0, 1, 1], [], []>} : vector<8x16xf32>, vector<16x4xf32>, vector<8x4xf32> -> vector<8x4xf32>
    %824 = vector.extract_strided_slice %801 {offsets = [8, 0], sizes = [8, 4], strides = [1, 1]} : vector<16x4xf32> to vector<8x4xf32>
    %825 = vector.extract_strided_slice %807 {offsets = [16, 0], sizes = [16, 4], strides = [1, 1]} : vector<32x4xf32> to vector<16x4xf32>
    %826 = vector.extract_strided_slice %795 {offsets = [16, 0], sizes = [16, 4], strides = [1, 1]} : vector<32x4xf32> to vector<16x4xf32>
    %cst_428 = arith.constant dense<0.000000e+00> : vector<8x16xf32>
    %827 = tpu.matmul %824, %825, %cst_428 {dimension_numbers = #tpu.dot_dimension_numbers<[1], [1], [0], [0], [0, 0, 1, 0], [], []>} : vector<8x4xf32>, vector<16x4xf32>, vector<8x16xf32> -> vector<8x16xf32>
    %cst_429 = arith.constant 1.000000e+00 : f32
    %828 = vector.broadcast %cst_429 : f32 to vector<8x16xf32>
    %829 = arith.mulf %827, %828 : vector<8x16xf32>
    %cst_430 = arith.constant dense<0xFF800000> : vector<8xf32>
    %830 = vector.multi_reduction <maximumf>, %829, %cst_430 [1] : vector<8x16xf32> to vector<8xf32>
    %831 = vector.shape_cast %830 : vector<8xf32> to vector<8x1xf32>
    %832 = vector.broadcast %831 : vector<8x1xf32> to vector<8x16xf32>
    %833 = arith.subf %829, %832 : vector<8x16xf32>
    %834 = math.exp %833 : vector<8x16xf32>
    %cst_431 = arith.constant dense<0.000000e+00> : vector<8xf32>
    %835 = vector.multi_reduction <add>, %834, %cst_431 [1] : vector<8x16xf32> to vector<8xf32>
    %836 = vector.shape_cast %835 : vector<8xf32> to vector<8x1xf32>
    %837 = vector.broadcast %836 : vector<8x1xf32> to vector<8x16xf32>
    %838 = arith.divf %834, %837 : vector<8x16xf32>
    %cst_432 = arith.constant dense<0.000000e+00> : vector<8x4xf32>
    %839 = tpu.matmul %838, %826, %cst_432 {dimension_numbers = #tpu.dot_dimension_numbers<[1], [0], [0], [1], [0, 0, 1, 1], [], []>} : vector<8x16xf32>, vector<16x4xf32>, vector<8x4xf32> -> vector<8x4xf32>
    %840 = tpu.concatenate %823, %839 in 0 : vector<8x4xf32>, vector<8x4xf32> -> vector<16x4xf32>
    %c4_433 = arith.constant 4 : index
    %c0_434 = arith.constant 0 : index
    %c0_435 = arith.constant 0 : index
    %841 = vector.load %arg20[%c4_433, %c0_434, %c0_435] : memref<8x4x32xf32, #tpu.memory_space<vmem>>, vector<1x4x32xf32>
    %842 = vector.shape_cast %841 : vector<1x4x32xf32> to vector<4x32xf32>
    %cst_436 = arith.constant dense<0.000000e+00> : vector<16x32xf32>
    %843 = tpu.matmul %840, %842, %cst_436 {dimension_numbers = #tpu.dot_dimension_numbers<[1], [0], [0], [1], [0, 0, 1, 1], [], []>} : vector<16x4xf32>, vector<4x32xf32>, vector<16x32xf32> -> vector<16x32xf32>
    %844 = arith.addf %786, %843 : vector<16x32xf32>
    %c5_437 = arith.constant 5 : index
    %c0_438 = arith.constant 0 : index
    %c0_439 = arith.constant 0 : index
    %845 = vector.load %arg17[%c5_437, %c0_438, %c0_439] : memref<8x32x4xf32, #tpu.memory_space<vmem>>, vector<1x32x4xf32>
    %846 = vector.shape_cast %845 : vector<1x32x4xf32> to vector<32x4xf32>
    %cst_440 = arith.constant dense<0.000000e+00> : vector<16x4xf32>
    %847 = tpu.matmul %553, %846, %cst_440 {dimension_numbers = #tpu.dot_dimension_numbers<[1], [0], [0], [1], [0, 0, 1, 1], [], []>} : vector<16x32xf32>, vector<32x4xf32>, vector<16x4xf32> -> vector<16x4xf32>
    %c5_441 = arith.constant 5 : index
    %c0_442 = arith.constant 0 : index
    %c0_443 = arith.constant 0 : index
    %848 = vector.load %arg18[%c5_441, %c0_442, %c0_443] : memref<8x32x4xf32, #tpu.memory_space<vmem>>, vector<1x32x4xf32>
    %849 = vector.shape_cast %848 : vector<1x32x4xf32> to vector<32x4xf32>
    %cst_444 = arith.constant dense<0.000000e+00> : vector<32x4xf32>
    %850 = tpu.matmul %540, %849, %cst_444 {dimension_numbers = #tpu.dot_dimension_numbers<[1], [0], [0], [1], [0, 0, 1, 1], [], []>} : vector<32x32xf32>, vector<32x4xf32>, vector<32x4xf32> -> vector<32x4xf32>
    %c5_445 = arith.constant 5 : index
    %c0_446 = arith.constant 0 : index
    %c0_447 = arith.constant 0 : index
    %851 = vector.load %arg19[%c5_445, %c0_446, %c0_447] : memref<8x32x4xf32, #tpu.memory_space<vmem>>, vector<1x32x4xf32>
    %852 = vector.shape_cast %851 : vector<1x32x4xf32> to vector<32x4xf32>
    %cst_448 = arith.constant dense<0.000000e+00> : vector<32x4xf32>
    %853 = tpu.matmul %540, %852, %cst_448 {dimension_numbers = #tpu.dot_dimension_numbers<[1], [0], [0], [1], [0, 0, 1, 1], [], []>} : vector<32x32xf32>, vector<32x4xf32>, vector<32x4xf32> -> vector<32x4xf32>
    %854 = arith.mulf %847, %3 : vector<16x4xf32>
    %cst_449 = arith.constant dense<0.000000e+00> : vector<16x4xf32>
    %855 = tpu.matmul %847, %0, %cst_449 {dimension_numbers = #tpu.dot_dimension_numbers<[1], [0], [0], [1], [0, 0, 1, 1], [], []>} : vector<16x4xf32>, vector<4x4xf32>, vector<16x4xf32> -> vector<16x4xf32>
    %856 = arith.mulf %855, %4 : vector<16x4xf32>
    %857 = arith.addf %854, %856 : vector<16x4xf32>
    %cst_450 = arith.constant 0.707106769 : f32
    %858 = vector.broadcast %cst_450 : f32 to vector<16x4xf32>
    %859 = arith.mulf %857, %858 : vector<16x4xf32>
    %860 = arith.mulf %850, %5 : vector<32x4xf32>
    %cst_451 = arith.constant dense<0.000000e+00> : vector<32x4xf32>
    %861 = tpu.matmul %850, %0, %cst_451 {dimension_numbers = #tpu.dot_dimension_numbers<[1], [0], [0], [1], [0, 0, 1, 1], [], []>} : vector<32x4xf32>, vector<4x4xf32>, vector<32x4xf32> -> vector<32x4xf32>
    %862 = arith.mulf %861, %6 : vector<32x4xf32>
    %863 = arith.addf %860, %862 : vector<32x4xf32>
    %cst_452 = arith.constant 0.707106769 : f32
    %864 = vector.broadcast %cst_452 : f32 to vector<32x4xf32>
    %865 = arith.mulf %863, %864 : vector<32x4xf32>
    %866 = vector.extract_strided_slice %859 {offsets = [0, 0], sizes = [8, 4], strides = [1, 1]} : vector<16x4xf32> to vector<8x4xf32>
    %867 = vector.extract_strided_slice %865 {offsets = [0, 0], sizes = [16, 4], strides = [1, 1]} : vector<32x4xf32> to vector<16x4xf32>
    %868 = vector.extract_strided_slice %853 {offsets = [0, 0], sizes = [16, 4], strides = [1, 1]} : vector<32x4xf32> to vector<16x4xf32>
    %cst_453 = arith.constant dense<0.000000e+00> : vector<8x16xf32>
    %869 = tpu.matmul %866, %867, %cst_453 {dimension_numbers = #tpu.dot_dimension_numbers<[1], [1], [0], [0], [0, 0, 1, 0], [], []>} : vector<8x4xf32>, vector<16x4xf32>, vector<8x16xf32> -> vector<8x16xf32>
    %cst_454 = arith.constant 1.000000e+00 : f32
    %870 = vector.broadcast %cst_454 : f32 to vector<8x16xf32>
    %871 = arith.mulf %869, %870 : vector<8x16xf32>
    %cst_455 = arith.constant dense<0xFF800000> : vector<8xf32>
    %872 = vector.multi_reduction <maximumf>, %871, %cst_455 [1] : vector<8x16xf32> to vector<8xf32>
    %873 = vector.shape_cast %872 : vector<8xf32> to vector<8x1xf32>
    %874 = vector.broadcast %873 : vector<8x1xf32> to vector<8x16xf32>
    %875 = arith.subf %871, %874 : vector<8x16xf32>
    %876 = math.exp %875 : vector<8x16xf32>
    %cst_456 = arith.constant dense<0.000000e+00> : vector<8xf32>
    %877 = vector.multi_reduction <add>, %876, %cst_456 [1] : vector<8x16xf32> to vector<8xf32>
    %878 = vector.shape_cast %877 : vector<8xf32> to vector<8x1xf32>
    %879 = vector.broadcast %878 : vector<8x1xf32> to vector<8x16xf32>
    %880 = arith.divf %876, %879 : vector<8x16xf32>
    %cst_457 = arith.constant dense<0.000000e+00> : vector<8x4xf32>
    %881 = tpu.matmul %880, %868, %cst_457 {dimension_numbers = #tpu.dot_dimension_numbers<[1], [0], [0], [1], [0, 0, 1, 1], [], []>} : vector<8x16xf32>, vector<16x4xf32>, vector<8x4xf32> -> vector<8x4xf32>
    %882 = vector.extract_strided_slice %859 {offsets = [8, 0], sizes = [8, 4], strides = [1, 1]} : vector<16x4xf32> to vector<8x4xf32>
    %883 = vector.extract_strided_slice %865 {offsets = [16, 0], sizes = [16, 4], strides = [1, 1]} : vector<32x4xf32> to vector<16x4xf32>
    %884 = vector.extract_strided_slice %853 {offsets = [16, 0], sizes = [16, 4], strides = [1, 1]} : vector<32x4xf32> to vector<16x4xf32>
    %cst_458 = arith.constant dense<0.000000e+00> : vector<8x16xf32>
    %885 = tpu.matmul %882, %883, %cst_458 {dimension_numbers = #tpu.dot_dimension_numbers<[1], [1], [0], [0], [0, 0, 1, 0], [], []>} : vector<8x4xf32>, vector<16x4xf32>, vector<8x16xf32> -> vector<8x16xf32>
    %cst_459 = arith.constant 1.000000e+00 : f32
    %886 = vector.broadcast %cst_459 : f32 to vector<8x16xf32>
    %887 = arith.mulf %885, %886 : vector<8x16xf32>
    %cst_460 = arith.constant dense<0xFF800000> : vector<8xf32>
    %888 = vector.multi_reduction <maximumf>, %887, %cst_460 [1] : vector<8x16xf32> to vector<8xf32>
    %889 = vector.shape_cast %888 : vector<8xf32> to vector<8x1xf32>
    %890 = vector.broadcast %889 : vector<8x1xf32> to vector<8x16xf32>
    %891 = arith.subf %887, %890 : vector<8x16xf32>
    %892 = math.exp %891 : vector<8x16xf32>
    %cst_461 = arith.constant dense<0.000000e+00> : vector<8xf32>
    %893 = vector.multi_reduction <add>, %892, %cst_461 [1] : vector<8x16xf32> to vector<8xf32>
    %894 = vector.shape_cast %893 : vector<8xf32> to vector<8x1xf32>
    %895 = vector.broadcast %894 : vector<8x1xf32> to vector<8x16xf32>
    %896 = arith.divf %892, %895 : vector<8x16xf32>
    %cst_462 = arith.constant dense<0.000000e+00> : vector<8x4xf32>
    %897 = tpu.matmul %896, %884, %cst_462 {dimension_numbers = #tpu.dot_dimension_numbers<[1], [0], [0], [1], [0, 0, 1, 1], [], []>} : vector<8x16xf32>, vector<16x4xf32>, vector<8x4xf32> -> vector<8x4xf32>
    %898 = tpu.concatenate %881, %897 in 0 : vector<8x4xf32>, vector<8x4xf32> -> vector<16x4xf32>
    %c5_463 = arith.constant 5 : index
    %c0_464 = arith.constant 0 : index
    %c0_465 = arith.constant 0 : index
    %899 = vector.load %arg20[%c5_463, %c0_464, %c0_465] : memref<8x4x32xf32, #tpu.memory_space<vmem>>, vector<1x4x32xf32>
    %900 = vector.shape_cast %899 : vector<1x4x32xf32> to vector<4x32xf32>
    %cst_466 = arith.constant dense<0.000000e+00> : vector<16x32xf32>
    %901 = tpu.matmul %898, %900, %cst_466 {dimension_numbers = #tpu.dot_dimension_numbers<[1], [0], [0], [1], [0, 0, 1, 1], [], []>} : vector<16x4xf32>, vector<4x32xf32>, vector<16x32xf32> -> vector<16x32xf32>
    %902 = arith.addf %844, %901 : vector<16x32xf32>
    %c6_467 = arith.constant 6 : index
    %c0_468 = arith.constant 0 : index
    %c0_469 = arith.constant 0 : index
    %903 = vector.load %arg17[%c6_467, %c0_468, %c0_469] : memref<8x32x4xf32, #tpu.memory_space<vmem>>, vector<1x32x4xf32>
    %904 = vector.shape_cast %903 : vector<1x32x4xf32> to vector<32x4xf32>
    %cst_470 = arith.constant dense<0.000000e+00> : vector<16x4xf32>
    %905 = tpu.matmul %553, %904, %cst_470 {dimension_numbers = #tpu.dot_dimension_numbers<[1], [0], [0], [1], [0, 0, 1, 1], [], []>} : vector<16x32xf32>, vector<32x4xf32>, vector<16x4xf32> -> vector<16x4xf32>
    %c6_471 = arith.constant 6 : index
    %c0_472 = arith.constant 0 : index
    %c0_473 = arith.constant 0 : index
    %906 = vector.load %arg18[%c6_471, %c0_472, %c0_473] : memref<8x32x4xf32, #tpu.memory_space<vmem>>, vector<1x32x4xf32>
    %907 = vector.shape_cast %906 : vector<1x32x4xf32> to vector<32x4xf32>
    %cst_474 = arith.constant dense<0.000000e+00> : vector<32x4xf32>
    %908 = tpu.matmul %540, %907, %cst_474 {dimension_numbers = #tpu.dot_dimension_numbers<[1], [0], [0], [1], [0, 0, 1, 1], [], []>} : vector<32x32xf32>, vector<32x4xf32>, vector<32x4xf32> -> vector<32x4xf32>
    %c6_475 = arith.constant 6 : index
    %c0_476 = arith.constant 0 : index
    %c0_477 = arith.constant 0 : index
    %909 = vector.load %arg19[%c6_475, %c0_476, %c0_477] : memref<8x32x4xf32, #tpu.memory_space<vmem>>, vector<1x32x4xf32>
    %910 = vector.shape_cast %909 : vector<1x32x4xf32> to vector<32x4xf32>
    %cst_478 = arith.constant dense<0.000000e+00> : vector<32x4xf32>
    %911 = tpu.matmul %540, %910, %cst_478 {dimension_numbers = #tpu.dot_dimension_numbers<[1], [0], [0], [1], [0, 0, 1, 1], [], []>} : vector<32x32xf32>, vector<32x4xf32>, vector<32x4xf32> -> vector<32x4xf32>
    %912 = arith.mulf %905, %3 : vector<16x4xf32>
    %cst_479 = arith.constant dense<0.000000e+00> : vector<16x4xf32>
    %913 = tpu.matmul %905, %0, %cst_479 {dimension_numbers = #tpu.dot_dimension_numbers<[1], [0], [0], [1], [0, 0, 1, 1], [], []>} : vector<16x4xf32>, vector<4x4xf32>, vector<16x4xf32> -> vector<16x4xf32>
    %914 = arith.mulf %913, %4 : vector<16x4xf32>
    %915 = arith.addf %912, %914 : vector<16x4xf32>
    %cst_480 = arith.constant 0.707106769 : f32
    %916 = vector.broadcast %cst_480 : f32 to vector<16x4xf32>
    %917 = arith.mulf %915, %916 : vector<16x4xf32>
    %918 = arith.mulf %908, %5 : vector<32x4xf32>
    %cst_481 = arith.constant dense<0.000000e+00> : vector<32x4xf32>
    %919 = tpu.matmul %908, %0, %cst_481 {dimension_numbers = #tpu.dot_dimension_numbers<[1], [0], [0], [1], [0, 0, 1, 1], [], []>} : vector<32x4xf32>, vector<4x4xf32>, vector<32x4xf32> -> vector<32x4xf32>
    %920 = arith.mulf %919, %6 : vector<32x4xf32>
    %921 = arith.addf %918, %920 : vector<32x4xf32>
    %cst_482 = arith.constant 0.707106769 : f32
    %922 = vector.broadcast %cst_482 : f32 to vector<32x4xf32>
    %923 = arith.mulf %921, %922 : vector<32x4xf32>
    %924 = vector.extract_strided_slice %917 {offsets = [0, 0], sizes = [8, 4], strides = [1, 1]} : vector<16x4xf32> to vector<8x4xf32>
    %925 = vector.extract_strided_slice %923 {offsets = [0, 0], sizes = [16, 4], strides = [1, 1]} : vector<32x4xf32> to vector<16x4xf32>
    %926 = vector.extract_strided_slice %911 {offsets = [0, 0], sizes = [16, 4], strides = [1, 1]} : vector<32x4xf32> to vector<16x4xf32>
    %cst_483 = arith.constant dense<0.000000e+00> : vector<8x16xf32>
    %927 = tpu.matmul %924, %925, %cst_483 {dimension_numbers = #tpu.dot_dimension_numbers<[1], [1], [0], [0], [0, 0, 1, 0], [], []>} : vector<8x4xf32>, vector<16x4xf32>, vector<8x16xf32> -> vector<8x16xf32>
    %cst_484 = arith.constant 1.000000e+00 : f32
    %928 = vector.broadcast %cst_484 : f32 to vector<8x16xf32>
    %929 = arith.mulf %927, %928 : vector<8x16xf32>
    %cst_485 = arith.constant dense<0xFF800000> : vector<8xf32>
    %930 = vector.multi_reduction <maximumf>, %929, %cst_485 [1] : vector<8x16xf32> to vector<8xf32>
    %931 = vector.shape_cast %930 : vector<8xf32> to vector<8x1xf32>
    %932 = vector.broadcast %931 : vector<8x1xf32> to vector<8x16xf32>
    %933 = arith.subf %929, %932 : vector<8x16xf32>
    %934 = math.exp %933 : vector<8x16xf32>
    %cst_486 = arith.constant dense<0.000000e+00> : vector<8xf32>
    %935 = vector.multi_reduction <add>, %934, %cst_486 [1] : vector<8x16xf32> to vector<8xf32>
    %936 = vector.shape_cast %935 : vector<8xf32> to vector<8x1xf32>
    %937 = vector.broadcast %936 : vector<8x1xf32> to vector<8x16xf32>
    %938 = arith.divf %934, %937 : vector<8x16xf32>
    %cst_487 = arith.constant dense<0.000000e+00> : vector<8x4xf32>
    %939 = tpu.matmul %938, %926, %cst_487 {dimension_numbers = #tpu.dot_dimension_numbers<[1], [0], [0], [1], [0, 0, 1, 1], [], []>} : vector<8x16xf32>, vector<16x4xf32>, vector<8x4xf32> -> vector<8x4xf32>
    %940 = vector.extract_strided_slice %917 {offsets = [8, 0], sizes = [8, 4], strides = [1, 1]} : vector<16x4xf32> to vector<8x4xf32>
    %941 = vector.extract_strided_slice %923 {offsets = [16, 0], sizes = [16, 4], strides = [1, 1]} : vector<32x4xf32> to vector<16x4xf32>
    %942 = vector.extract_strided_slice %911 {offsets = [16, 0], sizes = [16, 4], strides = [1, 1]} : vector<32x4xf32> to vector<16x4xf32>
    %cst_488 = arith.constant dense<0.000000e+00> : vector<8x16xf32>
    %943 = tpu.matmul %940, %941, %cst_488 {dimension_numbers = #tpu.dot_dimension_numbers<[1], [1], [0], [0], [0, 0, 1, 0], [], []>} : vector<8x4xf32>, vector<16x4xf32>, vector<8x16xf32> -> vector<8x16xf32>
    %cst_489 = arith.constant 1.000000e+00 : f32
    %944 = vector.broadcast %cst_489 : f32 to vector<8x16xf32>
    %945 = arith.mulf %943, %944 : vector<8x16xf32>
    %cst_490 = arith.constant dense<0xFF800000> : vector<8xf32>
    %946 = vector.multi_reduction <maximumf>, %945, %cst_490 [1] : vector<8x16xf32> to vector<8xf32>
    %947 = vector.shape_cast %946 : vector<8xf32> to vector<8x1xf32>
    %948 = vector.broadcast %947 : vector<8x1xf32> to vector<8x16xf32>
    %949 = arith.subf %945, %948 : vector<8x16xf32>
    %950 = math.exp %949 : vector<8x16xf32>
    %cst_491 = arith.constant dense<0.000000e+00> : vector<8xf32>
    %951 = vector.multi_reduction <add>, %950, %cst_491 [1] : vector<8x16xf32> to vector<8xf32>
    %952 = vector.shape_cast %951 : vector<8xf32> to vector<8x1xf32>
    %953 = vector.broadcast %952 : vector<8x1xf32> to vector<8x16xf32>
    %954 = arith.divf %950, %953 : vector<8x16xf32>
    %cst_492 = arith.constant dense<0.000000e+00> : vector<8x4xf32>
    %955 = tpu.matmul %954, %942, %cst_492 {dimension_numbers = #tpu.dot_dimension_numbers<[1], [0], [0], [1], [0, 0, 1, 1], [], []>} : vector<8x16xf32>, vector<16x4xf32>, vector<8x4xf32> -> vector<8x4xf32>
    %956 = tpu.concatenate %939, %955 in 0 : vector<8x4xf32>, vector<8x4xf32> -> vector<16x4xf32>
    %c6_493 = arith.constant 6 : index
    %c0_494 = arith.constant 0 : index
    %c0_495 = arith.constant 0 : index
    %957 = vector.load %arg20[%c6_493, %c0_494, %c0_495] : memref<8x4x32xf32, #tpu.memory_space<vmem>>, vector<1x4x32xf32>
    %958 = vector.shape_cast %957 : vector<1x4x32xf32> to vector<4x32xf32>
    %cst_496 = arith.constant dense<0.000000e+00> : vector<16x32xf32>
    %959 = tpu.matmul %956, %958, %cst_496 {dimension_numbers = #tpu.dot_dimension_numbers<[1], [0], [0], [1], [0, 0, 1, 1], [], []>} : vector<16x4xf32>, vector<4x32xf32>, vector<16x32xf32> -> vector<16x32xf32>
    %960 = arith.addf %902, %959 : vector<16x32xf32>
    %c7_497 = arith.constant 7 : index
    %c0_498 = arith.constant 0 : index
    %c0_499 = arith.constant 0 : index
    %961 = vector.load %arg17[%c7_497, %c0_498, %c0_499] : memref<8x32x4xf32, #tpu.memory_space<vmem>>, vector<1x32x4xf32>
    %962 = vector.shape_cast %961 : vector<1x32x4xf32> to vector<32x4xf32>
    %cst_500 = arith.constant dense<0.000000e+00> : vector<16x4xf32>
    %963 = tpu.matmul %553, %962, %cst_500 {dimension_numbers = #tpu.dot_dimension_numbers<[1], [0], [0], [1], [0, 0, 1, 1], [], []>} : vector<16x32xf32>, vector<32x4xf32>, vector<16x4xf32> -> vector<16x4xf32>
    %c7_501 = arith.constant 7 : index
    %c0_502 = arith.constant 0 : index
    %c0_503 = arith.constant 0 : index
    %964 = vector.load %arg18[%c7_501, %c0_502, %c0_503] : memref<8x32x4xf32, #tpu.memory_space<vmem>>, vector<1x32x4xf32>
    %965 = vector.shape_cast %964 : vector<1x32x4xf32> to vector<32x4xf32>
    %cst_504 = arith.constant dense<0.000000e+00> : vector<32x4xf32>
    %966 = tpu.matmul %540, %965, %cst_504 {dimension_numbers = #tpu.dot_dimension_numbers<[1], [0], [0], [1], [0, 0, 1, 1], [], []>} : vector<32x32xf32>, vector<32x4xf32>, vector<32x4xf32> -> vector<32x4xf32>
    %c7_505 = arith.constant 7 : index
    %c0_506 = arith.constant 0 : index
    %c0_507 = arith.constant 0 : index
    %967 = vector.load %arg19[%c7_505, %c0_506, %c0_507] : memref<8x32x4xf32, #tpu.memory_space<vmem>>, vector<1x32x4xf32>
    %968 = vector.shape_cast %967 : vector<1x32x4xf32> to vector<32x4xf32>
    %cst_508 = arith.constant dense<0.000000e+00> : vector<32x4xf32>
    %969 = tpu.matmul %540, %968, %cst_508 {dimension_numbers = #tpu.dot_dimension_numbers<[1], [0], [0], [1], [0, 0, 1, 1], [], []>} : vector<32x32xf32>, vector<32x4xf32>, vector<32x4xf32> -> vector<32x4xf32>
    %970 = arith.mulf %963, %3 : vector<16x4xf32>
    %cst_509 = arith.constant dense<0.000000e+00> : vector<16x4xf32>
    %971 = tpu.matmul %963, %0, %cst_509 {dimension_numbers = #tpu.dot_dimension_numbers<[1], [0], [0], [1], [0, 0, 1, 1], [], []>} : vector<16x4xf32>, vector<4x4xf32>, vector<16x4xf32> -> vector<16x4xf32>
    %972 = arith.mulf %971, %4 : vector<16x4xf32>
    %973 = arith.addf %970, %972 : vector<16x4xf32>
    %cst_510 = arith.constant 0.707106769 : f32
    %974 = vector.broadcast %cst_510 : f32 to vector<16x4xf32>
    %975 = arith.mulf %973, %974 : vector<16x4xf32>
    %976 = arith.mulf %966, %5 : vector<32x4xf32>
    %cst_511 = arith.constant dense<0.000000e+00> : vector<32x4xf32>
    %977 = tpu.matmul %966, %0, %cst_511 {dimension_numbers = #tpu.dot_dimension_numbers<[1], [0], [0], [1], [0, 0, 1, 1], [], []>} : vector<32x4xf32>, vector<4x4xf32>, vector<32x4xf32> -> vector<32x4xf32>
    %978 = arith.mulf %977, %6 : vector<32x4xf32>
    %979 = arith.addf %976, %978 : vector<32x4xf32>
    %cst_512 = arith.constant 0.707106769 : f32
    %980 = vector.broadcast %cst_512 : f32 to vector<32x4xf32>
    %981 = arith.mulf %979, %980 : vector<32x4xf32>
    %982 = vector.extract_strided_slice %975 {offsets = [0, 0], sizes = [8, 4], strides = [1, 1]} : vector<16x4xf32> to vector<8x4xf32>
    %983 = vector.extract_strided_slice %981 {offsets = [0, 0], sizes = [16, 4], strides = [1, 1]} : vector<32x4xf32> to vector<16x4xf32>
    %984 = vector.extract_strided_slice %969 {offsets = [0, 0], sizes = [16, 4], strides = [1, 1]} : vector<32x4xf32> to vector<16x4xf32>
    %cst_513 = arith.constant dense<0.000000e+00> : vector<8x16xf32>
    %985 = tpu.matmul %982, %983, %cst_513 {dimension_numbers = #tpu.dot_dimension_numbers<[1], [1], [0], [0], [0, 0, 1, 0], [], []>} : vector<8x4xf32>, vector<16x4xf32>, vector<8x16xf32> -> vector<8x16xf32>
    %cst_514 = arith.constant 1.000000e+00 : f32
    %986 = vector.broadcast %cst_514 : f32 to vector<8x16xf32>
    %987 = arith.mulf %985, %986 : vector<8x16xf32>
    %cst_515 = arith.constant dense<0xFF800000> : vector<8xf32>
    %988 = vector.multi_reduction <maximumf>, %987, %cst_515 [1] : vector<8x16xf32> to vector<8xf32>
    %989 = vector.shape_cast %988 : vector<8xf32> to vector<8x1xf32>
    %990 = vector.broadcast %989 : vector<8x1xf32> to vector<8x16xf32>
    %991 = arith.subf %987, %990 : vector<8x16xf32>
    %992 = math.exp %991 : vector<8x16xf32>
    %cst_516 = arith.constant dense<0.000000e+00> : vector<8xf32>
    %993 = vector.multi_reduction <add>, %992, %cst_516 [1] : vector<8x16xf32> to vector<8xf32>
    %994 = vector.shape_cast %993 : vector<8xf32> to vector<8x1xf32>
    %995 = vector.broadcast %994 : vector<8x1xf32> to vector<8x16xf32>
    %996 = arith.divf %992, %995 : vector<8x16xf32>
    %cst_517 = arith.constant dense<0.000000e+00> : vector<8x4xf32>
    %997 = tpu.matmul %996, %984, %cst_517 {dimension_numbers = #tpu.dot_dimension_numbers<[1], [0], [0], [1], [0, 0, 1, 1], [], []>} : vector<8x16xf32>, vector<16x4xf32>, vector<8x4xf32> -> vector<8x4xf32>
    %998 = vector.extract_strided_slice %975 {offsets = [8, 0], sizes = [8, 4], strides = [1, 1]} : vector<16x4xf32> to vector<8x4xf32>
    %999 = vector.extract_strided_slice %981 {offsets = [16, 0], sizes = [16, 4], strides = [1, 1]} : vector<32x4xf32> to vector<16x4xf32>
    %1000 = vector.extract_strided_slice %969 {offsets = [16, 0], sizes = [16, 4], strides = [1, 1]} : vector<32x4xf32> to vector<16x4xf32>
    %cst_518 = arith.constant dense<0.000000e+00> : vector<8x16xf32>
    %1001 = tpu.matmul %998, %999, %cst_518 {dimension_numbers = #tpu.dot_dimension_numbers<[1], [1], [0], [0], [0, 0, 1, 0], [], []>} : vector<8x4xf32>, vector<16x4xf32>, vector<8x16xf32> -> vector<8x16xf32>
    %cst_519 = arith.constant 1.000000e+00 : f32
    %1002 = vector.broadcast %cst_519 : f32 to vector<8x16xf32>
    %1003 = arith.mulf %1001, %1002 : vector<8x16xf32>
    %cst_520 = arith.constant dense<0xFF800000> : vector<8xf32>
    %1004 = vector.multi_reduction <maximumf>, %1003, %cst_520 [1] : vector<8x16xf32> to vector<8xf32>
    %1005 = vector.shape_cast %1004 : vector<8xf32> to vector<8x1xf32>
    %1006 = vector.broadcast %1005 : vector<8x1xf32> to vector<8x16xf32>
    %1007 = arith.subf %1003, %1006 : vector<8x16xf32>
    %1008 = math.exp %1007 : vector<8x16xf32>
    %cst_521 = arith.constant dense<0.000000e+00> : vector<8xf32>
    %1009 = vector.multi_reduction <add>, %1008, %cst_521 [1] : vector<8x16xf32> to vector<8xf32>
    %1010 = vector.shape_cast %1009 : vector<8xf32> to vector<8x1xf32>
    %1011 = vector.broadcast %1010 : vector<8x1xf32> to vector<8x16xf32>
    %1012 = arith.divf %1008, %1011 : vector<8x16xf32>
    %cst_522 = arith.constant dense<0.000000e+00> : vector<8x4xf32>
    %1013 = tpu.matmul %1012, %1000, %cst_522 {dimension_numbers = #tpu.dot_dimension_numbers<[1], [0], [0], [1], [0, 0, 1, 1], [], []>} : vector<8x16xf32>, vector<16x4xf32>, vector<8x4xf32> -> vector<8x4xf32>
    %1014 = tpu.concatenate %997, %1013 in 0 : vector<8x4xf32>, vector<8x4xf32> -> vector<16x4xf32>
    %c7_523 = arith.constant 7 : index
    %c0_524 = arith.constant 0 : index
    %c0_525 = arith.constant 0 : index
    %1015 = vector.load %arg20[%c7_523, %c0_524, %c0_525] : memref<8x4x32xf32, #tpu.memory_space<vmem>>, vector<1x4x32xf32>
    %1016 = vector.shape_cast %1015 : vector<1x4x32xf32> to vector<4x32xf32>
    %cst_526 = arith.constant dense<0.000000e+00> : vector<16x32xf32>
    %1017 = tpu.matmul %1014, %1016, %cst_526 {dimension_numbers = #tpu.dot_dimension_numbers<[1], [0], [0], [1], [0, 0, 1, 1], [], []>} : vector<16x4xf32>, vector<4x32xf32>, vector<16x32xf32> -> vector<16x32xf32>
    %1018 = arith.addf %960, %1017 : vector<16x32xf32>
    %1019 = arith.addf %1, %1018 : vector<16x32xf32>
    %c0_527 = arith.constant 0 : index
    %c0_528 = arith.constant 0 : index
    %1020 = vector.load %arg12[%c0_527, %c0_528] : memref<1x32xf32, #tpu.memory_space<vmem>>, vector<1x32xf32>
    %1021 = arith.mulf %1019, %1019 : vector<16x32xf32>
    %cst_529 = arith.constant dense<0.000000e+00> : vector<16xf32>
    %1022 = vector.multi_reduction <add>, %1021, %cst_529 [1] : vector<16x32xf32> to vector<16xf32>
    %1023 = vector.shape_cast %1022 : vector<16xf32> to vector<16x1xf32>
    %cst_530 = arith.constant 3.200000e+01 : f32
    %1024 = vector.broadcast %cst_530 : f32 to vector<16x1xf32>
    %1025 = arith.divf %1023, %1024 : vector<16x1xf32>
    %cst_531 = arith.constant 9.99999997E-7 : f32
    %1026 = vector.broadcast %cst_531 : f32 to vector<16x1xf32>
    %1027 = arith.addf %1025, %1026 : vector<16x1xf32>
    %1028 = math.rsqrt %1027 : vector<16x1xf32>
    %1029 = vector.broadcast %1028 : vector<16x1xf32> to vector<16x32xf32>
    %1030 = arith.mulf %1019, %1029 : vector<16x32xf32>
    %1031 = vector.broadcast %1020 : vector<1x32xf32> to vector<16x32xf32>
    %1032 = arith.mulf %1030, %1031 : vector<16x32xf32>
    %c0_532 = arith.constant 0 : index
    %c0_533 = arith.constant 0 : index
    %1033 = vector.load %arg27[%c0_532, %c0_533] : memref<32x4xf32, #tpu.memory_space<vmem>>, vector<32x4xf32>
    %cst_534 = arith.constant dense<0.000000e+00> : vector<16x4xf32>
    %1034 = tpu.matmul %1032, %1033, %cst_534 {dimension_numbers = #tpu.dot_dimension_numbers<[1], [0], [0], [1], [0, 0, 1, 1], [], []>} : vector<16x32xf32>, vector<32x4xf32>, vector<16x4xf32> -> vector<16x4xf32>
    %c0_535 = arith.constant 0 : index
    %c0_536 = arith.constant 0 : index
    %1035 = vector.load %arg28[%c0_535, %c0_536] : memref<1x4xf32, #tpu.memory_space<vmem>>, vector<1x4xf32>
    %1036 = vector.broadcast %1035 : vector<1x4xf32> to vector<16x4xf32>
    %1037 = arith.addf %1034, %1036 : vector<16x4xf32>
    %cst_537 = arith.constant dense<0xFF800000> : vector<16xf32>
    %1038 = vector.multi_reduction <maximumf>, %1037, %cst_537 [1] : vector<16x4xf32> to vector<16xf32>
    %1039 = vector.shape_cast %1038 : vector<16xf32> to vector<16x1xf32>
    %1040 = vector.broadcast %1039 : vector<16x1xf32> to vector<16x4xf32>
    %1041 = arith.subf %1037, %1040 : vector<16x4xf32>
    %1042 = math.exp %1041 : vector<16x4xf32>
    %cst_538 = arith.constant dense<0.000000e+00> : vector<16xf32>
    %1043 = vector.multi_reduction <add>, %1042, %cst_538 [1] : vector<16x4xf32> to vector<16xf32>
    %1044 = vector.shape_cast %1043 : vector<16xf32> to vector<16x1xf32>
    %1045 = vector.broadcast %1044 : vector<16x1xf32> to vector<16x4xf32>
    %1046 = arith.divf %1042, %1045 : vector<16x4xf32>
    %c0_539 = arith.constant 0 : index
    %c0_540 = arith.constant 0 : index
    %1047 = vector.load %arg29[%c0_539, %c0_540] : memref<32x640xf32, #tpu.memory_space<vmem>>, vector<32x640xf32>
    %cst_541 = arith.constant dense<0.000000e+00> : vector<16x640xf32>
    %1048 = tpu.matmul %1032, %1047, %cst_541 {dimension_numbers = #tpu.dot_dimension_numbers<[1], [0], [0], [1], [0, 0, 1, 1], [], []>} : vector<16x32xf32>, vector<32x640xf32>, vector<16x640xf32> -> vector<16x640xf32>
    %1049 = arith.negf %1048 : vector<16x640xf32>
    %1050 = math.exp %1049 : vector<16x640xf32>
    %cst_542 = arith.constant 1.000000e+00 : f32
    %1051 = vector.broadcast %cst_542 : f32 to vector<16x640xf32>
    %1052 = arith.addf %1051, %1050 : vector<16x640xf32>
    %1053 = arith.divf %1051, %1052 : vector<16x640xf32>
    %1054 = arith.mulf %1048, %1053 : vector<16x640xf32>
    %c0_543 = arith.constant 0 : index
    %c0_544 = arith.constant 0 : index
    %1055 = vector.load %arg30[%c0_543, %c0_544] : memref<32x640xf32, #tpu.memory_space<vmem>>, vector<32x640xf32>
    %cst_545 = arith.constant dense<0.000000e+00> : vector<16x640xf32>
    %1056 = tpu.matmul %1032, %1055, %cst_545 {dimension_numbers = #tpu.dot_dimension_numbers<[1], [0], [0], [1], [0, 0, 1, 1], [], []>} : vector<16x32xf32>, vector<32x640xf32>, vector<16x640xf32> -> vector<16x640xf32>
    %1057 = arith.mulf %1054, %1056 : vector<16x640xf32>
    %c0_546 = arith.constant 0 : index
    %c0_547 = arith.constant 0 : index
    %1058 = vector.load %arg32[%c0_546, %c0_547] : memref<4x640xf32, #tpu.memory_space<vmem>>, vector<4x640xf32>
    %cst_548 = arith.constant dense<0.000000e+00> : vector<16x640xf32>
    %1059 = tpu.matmul %1046, %1058, %cst_548 {dimension_numbers = #tpu.dot_dimension_numbers<[1], [0], [0], [1], [0, 0, 1, 1], [], []>} : vector<16x4xf32>, vector<4x640xf32>, vector<16x640xf32> -> vector<16x640xf32>
    %1060 = arith.mulf %1057, %1059 : vector<16x640xf32>
    %c0_549 = arith.constant 0 : index
    %c0_550 = arith.constant 0 : index
    %1061 = vector.load %arg31[%c0_549, %c0_550] : memref<640x32xf32, #tpu.memory_space<vmem>>, vector<640x32xf32>
    %cst_551 = arith.constant dense<0.000000e+00> : vector<16x32xf32>
    %1062 = tpu.matmul %1060, %1061, %cst_551 {dimension_numbers = #tpu.dot_dimension_numbers<[1], [0], [0], [1], [0, 0, 1, 1], [], []>} : vector<16x640xf32>, vector<640x32xf32>, vector<16x32xf32> -> vector<16x32xf32>
    %cst_552 = arith.constant dense<0.000000e+00> : vector<4xf32>
    %1063 = vector.multi_reduction <add>, %1046, %cst_552 [0] : vector<16x4xf32> to vector<4xf32>
    %1064 = vector.shape_cast %1063 : vector<4xf32> to vector<1x4xf32>
    %cst_553 = arith.constant 1.600000e+01 : f32
    %1065 = vector.broadcast %cst_553 : f32 to vector<1x4xf32>
    %1066 = arith.divf %1064, %1065 : vector<1x4xf32>
    %cst_554 = arith.constant 2.500000e-01 : f32
    %1067 = vector.broadcast %cst_554 : f32 to vector<1x4xf32>
    %1068 = arith.subf %1066, %1067 : vector<1x4xf32>
    %1069 = arith.mulf %1068, %1068 : vector<1x4xf32>
    %cst_555 = arith.constant dense<0.000000e+00> : vector<1xf32>
    %1070 = vector.multi_reduction <add>, %1069, %cst_555 [1] : vector<1x4xf32> to vector<1xf32>
    %1071 = vector.shape_cast %1070 : vector<1xf32> to vector<1x1xf32>
    %cst_556 = arith.constant 0.00999999977 : f32
    %1072 = vector.broadcast %cst_556 : f32 to vector<1x1xf32>
    %1073 = arith.mulf %1071, %1072 : vector<1x1xf32>
    %1074 = arith.addf %1019, %1062 : vector<16x32xf32>
    %c0_557 = arith.constant 0 : index
    %c0_558 = arith.constant 0 : index
    %1075 = vector.load %arg33[%c0_557, %c0_558] : memref<16x32xf32, #tpu.memory_space<vmem>>, vector<16x32xf32>
    tpu.vector_store %arg33[%c0_557, %c0_558], %1074 {strides = array<i32>} : memref<16x32xf32, #tpu.memory_space<vmem>>, vector<16x32xf32>,
    %c0_559 = arith.constant 0 : index
    %c0_560 = arith.constant 0 : index
    %1076 = vector.load %arg34[%c0_559, %c0_560] : memref<32x32xf32, #tpu.memory_space<vmem>>, vector<32x32xf32>
    tpu.vector_store %arg34[%c0_559, %c0_560], %540 {strides = array<i32>} : memref<32x32xf32, #tpu.memory_space<vmem>>, vector<32x32xf32>,
    %c0_561 = arith.constant 0 : index
    %c0_562 = arith.constant 0 : index
    %1077 = vector.load %arg3[%c0_561, %c0_562] : memref<1x1xf32, #tpu.memory_space<vmem>>, vector<1x1xf32>
    %1078 = arith.addf %1077, %539 : vector<1x1xf32>
    %1079 = arith.addf %1078, %1073 : vector<1x1xf32>
    %c0_563 = arith.constant 0 : index
    %c0_564 = arith.constant 0 : index
    %1080 = vector.load %arg35[%c0_563, %c0_564] : memref<1x1xf32, #tpu.memory_space<vmem>>, vector<1x1xf32>
    tpu.vector_store %arg35[%c0_563, %c0_564], %1079 {strides = array<i32>} : memref<1x1xf32, #tpu.memory_space<vmem>>, vector<1x1xf32>,
    return
  }
  func.func @transform_0(%arg0: i32) -> (i32, i32) {
    %c0_i32 = arith.constant 0 : i32
    %c0_i32_0 = arith.constant 0 : i32
    %c0_i32_1 = arith.constant 0 : i32
    return %c0_i32, %c0_i32_0 : i32, i32
  }
  func.func @transform_1(%arg0: i32) -> (i32, i32) {
    %c0_i32 = arith.constant 0 : i32
    %c0_i32_0 = arith.constant 0 : i32
    %c0_i32_1 = arith.constant 0 : i32
    return %c0_i32, %c0_i32_0 : i32, i32
  }
  func.func @transform_2(%arg0: i32) -> (i32, i32) {
    %c0_i32 = arith.constant 0 : i32
    %c0_i32_0 = arith.constant 0 : i32
    %c0_i32_1 = arith.constant 0 : i32
    return %c0_i32, %c0_i32_0 : i32, i32
  }
  func.func @transform_3(%arg0: i32) -> (i32, i32) {
    %c0_i32 = arith.constant 0 : i32
    %c0_i32_0 = arith.constant 0 : i32
    %c0_i32_1 = arith.constant 0 : i32
    return %c0_i32, %c0_i32_0 : i32, i32
  }
  func.func @transform_4(%arg0: i32) -> (i32, i32) {
    %c0_i32 = arith.constant 0 : i32
    %c0_i32_0 = arith.constant 0 : i32
    %c0_i32_1 = arith.constant 0 : i32
    return %c0_i32, %c0_i32_0 : i32, i32
  }
  func.func @transform_5(%arg0: i32) -> (i32, i32) {
    %c0_i32 = arith.constant 0 : i32
    %c0_i32_0 = arith.constant 0 : i32
    %c0_i32_1 = arith.constant 0 : i32
    return %c0_i32, %c0_i32_0 : i32, i32
  }
  func.func @transform_6(%arg0: i32) -> (i32, i32) {
    %c0_i32 = arith.constant 0 : i32
    %c0_i32_0 = arith.constant 0 : i32
    %c0_i32_1 = arith.constant 0 : i32
    return %c0_i32, %c0_i32_0 : i32, i32
  }
  func.func @transform_7(%arg0: i32) -> (i32, i32) {
    %c0_i32 = arith.constant 0 : i32
    %c0_i32_0 = arith.constant 0 : i32
    %c0_i32_1 = arith.constant 0 : i32
    return %c0_i32, %c0_i32_0 : i32, i32
  }
  func.func @transform_8(%arg0: i32) -> (i32, i32) {
    %c0_i32 = arith.constant 0 : i32
    %c0_i32_0 = arith.constant 0 : i32
    %c0_i32_1 = arith.constant 0 : i32
    return %c0_i32, %c0_i32_0 : i32, i32
  }
  func.func @transform_9(%arg0: i32) -> (i32, i32) {
    %c0_i32 = arith.constant 0 : i32
    %c0_i32_0 = arith.constant 0 : i32
    %c0_i32_1 = arith.constant 0 : i32
    return %c0_i32, %c0_i32_0 : i32, i32
  }
  func.func @transform_10(%arg0: i32) -> (i32, i32) {
    %c0_i32 = arith.constant 0 : i32
    %c0_i32_0 = arith.constant 0 : i32
    %c0_i32_1 = arith.constant 0 : i32
    return %c0_i32, %c0_i32_0 : i32, i32
  }
  func.func @transform_11(%arg0: i32) -> (i32, i32) {
    %c0_i32 = arith.constant 0 : i32
    %c0_i32_0 = arith.constant 0 : i32
    %c0_i32_1 = arith.constant 0 : i32
    return %c0_i32, %c0_i32_0 : i32, i32
  }
  func.func @transform_12(%arg0: i32) -> (i32, i32, i32) {
    %c0_i32 = arith.constant 0 : i32
    %c0_i32_0 = arith.constant 0 : i32
    %c0_i32_1 = arith.constant 0 : i32
    %c0_i32_2 = arith.constant 0 : i32
    return %c0_i32, %c0_i32_0, %c0_i32_1 : i32, i32, i32
  }
  func.func @transform_13(%arg0: i32) -> (i32, i32, i32) {
    %c0_i32 = arith.constant 0 : i32
    %c0_i32_0 = arith.constant 0 : i32
    %c0_i32_1 = arith.constant 0 : i32
    %c0_i32_2 = arith.constant 0 : i32
    return %c0_i32, %c0_i32_0, %c0_i32_1 : i32, i32, i32
  }
  func.func @transform_14(%arg0: i32) -> (i32, i32, i32) {
    %c0_i32 = arith.constant 0 : i32
    %c0_i32_0 = arith.constant 0 : i32
    %c0_i32_1 = arith.constant 0 : i32
    %c0_i32_2 = arith.constant 0 : i32
    return %c0_i32, %c0_i32_0, %c0_i32_1 : i32, i32, i32
  }
  func.func @transform_15(%arg0: i32) -> (i32, i32, i32) {
    %c0_i32 = arith.constant 0 : i32
    %c0_i32_0 = arith.constant 0 : i32
    %c0_i32_1 = arith.constant 0 : i32
    %c0_i32_2 = arith.constant 0 : i32
    return %c0_i32, %c0_i32_0, %c0_i32_1 : i32, i32, i32
  }
  func.func @transform_16(%arg0: i32) -> (i32, i32, i32) {
    %c0_i32 = arith.constant 0 : i32
    %c0_i32_0 = arith.constant 0 : i32
    %c0_i32_1 = arith.constant 0 : i32
    %c0_i32_2 = arith.constant 0 : i32
    return %c0_i32, %c0_i32_0, %c0_i32_1 : i32, i32, i32
  }
  func.func @transform_17(%arg0: i32) -> (i32, i32, i32) {
    %c0_i32 = arith.constant 0 : i32
    %c0_i32_0 = arith.constant 0 : i32
    %c0_i32_1 = arith.constant 0 : i32
    %c0_i32_2 = arith.constant 0 : i32
    return %c0_i32, %c0_i32_0, %c0_i32_1 : i32, i32, i32
  }
  func.func @transform_18(%arg0: i32) -> (i32, i32, i32) {
    %c0_i32 = arith.constant 0 : i32
    %c0_i32_0 = arith.constant 0 : i32
    %c0_i32_1 = arith.constant 0 : i32
    %c0_i32_2 = arith.constant 0 : i32
    return %c0_i32, %c0_i32_0, %c0_i32_1 : i32, i32, i32
  }
  func.func @transform_19(%arg0: i32) -> (i32, i32, i32) {
    %c0_i32 = arith.constant 0 : i32
    %c0_i32_0 = arith.constant 0 : i32
    %c0_i32_1 = arith.constant 0 : i32
    %c0_i32_2 = arith.constant 0 : i32
    return %c0_i32, %c0_i32_0, %c0_i32_1 : i32, i32, i32
  }
  func.func @transform_20(%arg0: i32) -> (i32, i32) {
    %c0_i32 = arith.constant 0 : i32
    %c0_i32_0 = arith.constant 0 : i32
    %c0_i32_1 = arith.constant 0 : i32
    return %c0_i32, %c0_i32_0 : i32, i32
  }
  func.func @transform_21(%arg0: i32) -> (i32, i32) {
    %c0_i32 = arith.constant 0 : i32
    %c0_i32_0 = arith.constant 0 : i32
    %c0_i32_1 = arith.constant 0 : i32
    return %c0_i32, %c0_i32_0 : i32, i32
  }
  func.func @transform_22(%arg0: i32) -> (i32, i32) {
    %c0_i32 = arith.constant 0 : i32
    %c0_i32_0 = arith.constant 0 : i32
    %c0_i32_1 = arith.constant 0 : i32
    return %c0_i32, %c0_i32_0 : i32, i32
  }
  func.func @transform_23(%arg0: i32) -> (i32, i32) {
    %c0_i32 = arith.constant 0 : i32
    %c0_i32_0 = arith.constant 0 : i32
    %c0_i32_1 = arith.constant 0 : i32
    return %c0_i32, %c0_i32_0 : i32, i32
  }
  func.func @transform_24(%arg0: i32) -> (i32, i32) {
    %c0_i32 = arith.constant 0 : i32
    %c0_i32_0 = arith.constant 0 : i32
    %c0_i32_1 = arith.constant 0 : i32
    return %c0_i32, %c0_i32_0 : i32, i32
  }
  func.func @transform_25(%arg0: i32) -> (i32, i32) {
    %c0_i32 = arith.constant 0 : i32
    %c0_i32_0 = arith.constant 0 : i32
    %c0_i32_1 = arith.constant 0 : i32
    return %c0_i32, %c0_i32_0 : i32, i32
  }
  func.func @transform_26(%arg0: i32) -> (i32, i32) {
    %c0_i32 = arith.constant 0 : i32
    %c0_i32_0 = arith.constant 0 : i32
    %c0_i32_1 = arith.constant 0 : i32
    return %c0_i32, %c0_i32_0 : i32, i32
  }
  func.func @transform_27(%arg0: i32) -> (i32, i32) {
    %c0_i32 = arith.constant 0 : i32
    %c0_i32_0 = arith.constant 0 : i32
    %c0_i32_1 = arith.constant 0 : i32
    return %c0_i32, %c0_i32_0 : i32, i32
  }
  func.func @transform_28(%arg0: i32) -> (i32, i32) {
    %c0_i32 = arith.constant 0 : i32
    %c0_i32_0 = arith.constant 0 : i32
    %c0_i32_1 = arith.constant 0 : i32
    return %c0_i32, %c0_i32_0 : i32, i32
  }
  func.func @transform_29(%arg0: i32) -> (i32, i32) {
    %c0_i32 = arith.constant 0 : i32
    %c0_i32_0 = arith.constant 0 : i32
    %c0_i32_1 = arith.constant 0 : i32
    return %c0_i32, %c0_i32_0 : i32, i32
  }
  func.func @transform_30(%arg0: i32) -> (i32, i32) {
    %c0_i32 = arith.constant 0 : i32
    %c0_i32_0 = arith.constant 0 : i32
    %c0_i32_1 = arith.constant 0 : i32
    return %c0_i32, %c0_i32_0 : i32, i32
  }
  func.func @transform_31(%arg0: i32) -> (i32, i32) {
    %c0_i32 = arith.constant 0 : i32
    %c0_i32_0 = arith.constant 0 : i32
    %c0_i32_1 = arith.constant 0 : i32
    return %c0_i32, %c0_i32_0 : i32, i32
  }
  func.func @transform_32(%arg0: i32) -> (i32, i32) {
    %c0_i32 = arith.constant 0 : i32
    %c0_i32_0 = arith.constant 0 : i32
    %c0_i32_1 = arith.constant 0 : i32
    return %c0_i32, %c0_i32_0 : i32, i32
  }
  func.func @transform_33(%arg0: i32) -> (i32, i32) {
    %c0_i32 = arith.constant 0 : i32
    %c0_i32_0 = arith.constant 0 : i32
    %c0_i32_1 = arith.constant 0 : i32
    return %c0_i32, %c0_i32_0 : i32, i32
  }
  func.func @transform_34(%arg0: i32) -> (i32, i32) {
    %c0_i32 = arith.constant 0 : i32
    %c0_i32_0 = arith.constant 0 : i32
    %c0_i32_1 = arith.constant 0 : i32
    return %c0_i32, %c0_i32_0 : i32, i32
  }
}

</mosaic_0001>

<bundles_post_ra>
// kernel: transformer_block.1
= control target key start
LH: loop header
LB: loop body
LE: loop exit
PB: predicated region body
PF: predicated region fallthrough
CT: control target
= control target key end

     0   :  { %s10330_s6 = smov 1   ;;  %s10331_s10 = smov 2   ;;  %s13329_s0 = inlined_call_operand.smem [shape: u32[35], index: -1, kind: input, shape index: {}] }
   0x1   :  { %s10379_s5 = sld [smem:[%s13329_s0]]   ;;  %s10332_s14 = smov 3  }
   0x2   :  { %s10384_s9 = sld [smem:[%s13329_s0 + %s10330_s6]]   ;;  %s10333_s18 = smov 4  }
   0x3   :  { %s8992_s13 = sld [smem:[%s13329_s0 + %s10331_s10]]   ;;  %s10334_s22 = smov 5  }
   0x4   :  { %s10392_s17 = sld [smem:[%s13329_s0 + %s10332_s14]]   ;;  %s10335_s26 = smov 6  }
   0x5   :  { %s10397_s21 = sld [smem:[%s13329_s0 + %s10333_s18]]   ;;  %s10336_s30 = smov 7  }
   0x6   :  { %s10402_s25 = sld [smem:[%s13329_s0 + %s10334_s22]]   ;;  %s10337_s4 = smov 8  }
   0x7   :  { %13344 = sst [smem:[#allocation10_spill]] %s10379_s5  ;;  %s10338_s10 = smov 9  }
   0x8   :  { %s10407_s29 = sld [smem:[%s13329_s0 + %s10335_s26]]   ;;  %s10339_s15 = smov 10  }
   0x9   :  { %s10412_s3 = sld [smem:[%s13329_s0 + %s10336_s30]]   ;;  %v75_v0 = vstv %s8992_s13  ;;  %s10340_s20 = smov 11  }
   0xa   :  { %13345 = sst [smem:[#allocation11_spill]] %s10392_s17  ;;  %76 = vst [vmem:[#allocation2] sm:$0x1] %v75_v0  ;;  %s10341_s13 = smov 12  }
   0xb   :  { %13346 = sst [smem:[#allocation12_spill]] %s10397_s21  ;;  %s10342_s30 = smov 13  }
   0xc   :  { %s10417_s8 = sld [smem:[%s13329_s0 + %s10337_s4]]   ;;  %s10343_s6 = smov 14  }
   0xd   :  { %s10422_s14 = sld [smem:[%s13329_s0 + %s10338_s10]]   ;;  %s10344_s12 = smov 15  }
   0xe   :  { %s10427_s19 = sld [smem:[%s13329_s0 + %s10339_s15]]   ;;  %s10346_s26 = smov 17  }
   0xf   :  { %s10432_s24 = sld [smem:[%s13329_s0 + %s10340_s20]]   ;;  %s10345_s20 = smov 16  }
  0x10   :  { %s10437_s28 = sld [smem:[%s13329_s0 + %s10341_s13]]   ;;  %s10347_s2 = smov 18  }
  0x11   :  { %s10442_s4 = sld [smem:[%s13329_s0 + %s10342_s30]]  }
  0x12   :  { %s10447_s11 = sld [smem:[%s13329_s0 + %s10343_s6]]  }
  0x13   :  { %s10452_s18 = sld [smem:[%s13329_s0 + %s10344_s12]]   ;;  %s10348_s12 = smov 19  }
  0x14   :  { %13347 = sst [smem:[#allocation13_spill]] %s10427_s19 }
  0x15   :  { %13348 = sst [smem:[#allocation14_spill]] %s10432_s24 }
  0x16   :  { %s10457_s13 = sld [smem:[%s13329_s0 + %s10345_s20]]   ;;  %s10349_s20 = smov 20  }
  0x17   :  { %s10462_s1 = sld [smem:[%s13329_s0 + %s10346_s26]]   ;;  %s10350_s26 = smov 21  }
  0x18   :  { %s10467_s10 = sld [smem:[%s13329_s0 + %s10347_s2]]   ;;  %s10351_s2 = smov 22  }
  0x19   :  { %s10472_s24 = sld [smem:[%s13329_s0 + %s10348_s12]]   ;;  %s10352_s12 = smov 23  }
  0x1a   :  { %s10477_s21 = sld [smem:[%s13329_s0 + %s10349_s20]]   ;;  %s10353_s20 = smov 24  }
  0x1b   :  { %s10482_s17 = sld [smem:[%s13329_s0 + %s10350_s26]]   ;;  %s10354_s26 = smov 25  }
  0x1c   :  { %13349 = sst [smem:[#allocation15_spill]] %s10457_s13 }
  0x1d   :  { %13350 = sst [smem:[#allocation16_spill]] %s10462_s1 }
  0x1e   :  { %13351 = sst [smem:[#allocation17_spill]] %s10467_s10 }
  0x1f   :  { %13352 = sst [smem:[#allocation18_spill]] %s10472_s24 }
  0x20   :  { %s10487_s10 = sld [smem:[%s13329_s0 + %s10351_s2]]   ;;  %s10355_s2 = smov 26  }
  0x21   :  { %s10492_s24 = sld [smem:[%s13329_s0 + %s10352_s12]]   ;;  %s10356_s12 = smov 27  }
  0x22   :  { %s10497_s1 = sld [smem:[%s13329_s0 + %s10353_s20]]   ;;  %s10357_s20 = smov 28  }
  0x23   :  { %s10502_s19 = sld [smem:[%s13329_s0 + %s10354_s26]]   ;;  %s10358_s26 = smov 29  }
  0x24   :  { %s10507_s13 = sld [smem:[%s13329_s0 + %s10355_s2]]   ;;  %s10359_s2 = smov 30  }
  0x25   :  { %s10512_s5 = sld [smem:[%s13329_s0 + %s10356_s12]]   ;;  %s10360_s12 = smov 31  }
  0x28   :  { %13353 = sst [smem:[#allocation19_spill]] %s10497_s1 }
  0x29   :  { %13354 = sst [smem:[#allocation20_spill]] %s10502_s19 }
  0x2a   :  { %13355 = sst [smem:[#allocation21_spill]] %s10507_s13 }
  0x2b   :  { %13356 = sst [smem:[#allocation22_spill]] %s10512_s5 }
  0x2c   :  { %s10517_s1 = sld [smem:[%s13329_s0 + %s10357_s20]]   ;;  %s10361_s20 = smov 32  }
  0x2d   :  { %s10522_s19 = sld [smem:[%s13329_s0 + %s10358_s26]]   ;;  %s10362_s26 = smov 33  }
  0x2e   :  { %s10527_s13 = sld [smem:[%s13329_s0 + %s10359_s2]]   ;;  %s10363_s2 = smov 34  }
  0x2f   :  { %s10532_s5 = sld [smem:[%s13329_s0 + %s10360_s12]]  }
  0x32   :  { %13357 = sst [smem:[#allocation23_spill]] %s10517_s1 }
  0x33   :  { %13358 = sst [smem:[#allocation24_spill]] %s10522_s19 }
  0x34   :  { %13359 = sst [smem:[#allocation25_spill]] %s10527_s13 }
  0x35   :  { %s10537_s1 = sld [smem:[%s13329_s0 + %s10361_s20]]  }
  0x36   :  { %s10542_s19 = sld [smem:[%s13329_s0 + %s10362_s26]]  }
  0x37   :  { %s10547_s13 = sld [smem:[%s13329_s0 + %s10363_s2]]  }
  0x38   :  { %77 = vsyncpa [#allocation4], 0  ;;  %v10550_v1 = vld [vmem:[%s10384_s9] sm:$0xff]  ;;  %vm167_vm0 = vcmask 261120   ;;  %v10553_v2 = vld [vmem:[%s10384_s9 + $0x10] sm:$0xff] }
  0x39   :  { %v163_v3 = vmul.f32 %v10550_v1, %v10550_v1  ;;  %v165_v4 = vmul.f32 %v10553_v2, %v10553_v2  ;;  %v10560_v5 = vld [vmem:[%s10384_s9 + $0x8] sm:$0xff]  ;;  %v10563_v6 = vld [vmem:[%s10384_s9 + $0x18] sm:$0xff] }
  0x3b   :  { %v168_v7 = vsel %vm167_vm0, %v163_v3, 0.0  ;;  %v174_v8 = vsel %vm167_vm0, %v165_v4, 0.0 }
  0x3c   :  { %169 = vadd.xlane.f32.xlu0 %v168_v7  ;;  %175 = vadd.xlane.f32.xlu1 %v174_v8 }
  0x3d   :  { %78 = vsyncpa [#allocation6], 0  ;;  %v164_v9 = vmul.f32 %v10560_v5, %v10560_v5  ;;  %v166_v10 = vmul.f32 %v10563_v6, %v10563_v6  ;;  %v10364_v13 = vmov 32.0   ;;  %v249_v17 = vld [vmem:[%s10437_s28 + $0x18] sm:$0xff]  ;;  %v248_v20 = vld [vmem:[%s10437_s28 + $0x10] sm:$0xff]  ;;  %vm374_vm14 = vcmask 1043456  }
  0x3e   :  { %9891 = vrcp.f32 %v10364_v13  ;;  %v294_v18 = vld [vmem:[%s10442_s4 + $0x18] sm:$0xff]  ;;  %274 = vmatpush.msra.mxu0 %v249_v17  ;;  %v293_v21 = vld [vmem:[%s10442_s4 + $0x10] sm:$0xff]  ;;  %v247_v24 = vld [vmem:[%s10437_s28 + $0x8] sm:$0xff]  ;;  %vm361_vm15 = vcmask 31744   ;;  %s13362_s0 = sld [smem:[#allocation20_spill]]  ;;  %s10366_s15 = smov [#allocation5]  }
  0x3f   :  { %v171_v11 = vsel %vm167_vm0, %v164_v9, 0.0  ;;  %v177_v12 = vsel %vm167_vm0, %v166_v10, 0.0  ;;  %v327_v19 = vld [vmem:[%s10447_s11 + $0x18] sm:$0xff]  ;;  %307 = vmatpush.msra.mxu1 %v294_v18  ;;  %v326_v22 = vld [vmem:[%s10447_s11 + $0x10] sm:$0xff]  ;;  %v292_v25 = vld [vmem:[%s10442_s4 + $0x8] sm:$0xff]  ;;  %s13395_s12 = sld [smem:[#allocation25_spill]] }
  0x40   :  { %340 = vmatpush.msra.mxu2 %v327_v19  ;;  %275 = vmatpush.msra.mxu0 %v248_v20  ;;  %v325_v26 = vld [vmem:[%s10447_s11 + $0x8] sm:$0xff]  ;;  %v246_v27 = vld [vmem:[%s10437_s28] sm:$0xff]  ;;  %v9070_v56 = vld [vmem:[%s10442_s4 + $0x38] sm:$0xff]  ;;  %s8957_s16 = sshll.u32 %s10366_s15, 4  ;;  %s10270_s23 = scalar_lea.hbm %s10542_s19, 32  ;;  %s8958_s16 = int_to_ptr.vmem [resolvable:$true] %s8957_s16 }
  0x41   :  { %308 = vmatpush.msra.mxu1 %v293_v21  ;;  %v291_v28 = vld [vmem:[%s10442_s4] sm:$0xff]  ;;  %v9069_v57 = vld [vmem:[%s10442_s4 + $0x30] sm:$0xff]  ;;  %v9068_v63 = vld [vmem:[%s10442_s4 + $0x28] sm:$0xff] }
  0x42   :  { %341 = vmatpush.msra.mxu2 %v326_v22  ;;  %276 = vmatpush.msra.mxu0 %v247_v24  ;;  %v324_v29 = vld [vmem:[%s10447_s11] sm:$0xff] }
  0x43   :  { %309 = vmatpush.msra.mxu1 %v292_v25  ;;  %v9885_v58 = vld [vmem:[%s10417_s8] ss:$0 sm:$0xff]  ;;  %s13366_s8 = sld [smem:[#allocation13_spill]] }
  0x44   :  { %172 = vadd.xlane.f32.xlu0 %v171_v11  ;;  %178 = vadd.xlane.f32.xlu1 %v177_v12  ;;  %v9892_v14 = vpop.eup %9891  ;;  %v9067_v10 = vld [vmem:[%s10442_s4 + $0x20] sm:$0xff] }
  0x45   :  { %v181_v15 = vmul.f32 32.0, %v9892_v14  ;;  %342 = vmatpush.msra.mxu2 %v325_v26  ;;  %277 = vmatpush.msra.mxu0 %v246_v27  ;;  %vm185_vm1 = vweird.f32 %v9892_v14 }
  0x46   :  { %310 = vmatpush.msra.mxu1 %v291_v28 }
  0x47   :  { %v182_v16 = vsub.f32 1.0, %v181_v15  ;;  %343 = vmatpush.msra.mxu2 %v324_v29 }
  0x49   :  { %v183_v23 = vmul.f32 %v9892_v14, %v182_v16  ;;  %749 = vmatpush.msrb.mxu2 %v9070_v56 }
  0x4b   :  { %v184_v30 = vadd.f32 %v9892_v14, %v183_v23  ;;  %750 = vmatpush.msrb.mxu2 %v9069_v57  ;;  %v10682_v57 = vld [vmem:[%s10407_s29 + $0x18] sm:$0xff] }
  0x4d   :  { %v10585_v31 = vsel %vm185_vm1, %v9892_v14, %v184_v30  ;;  %751 = vmatpush.msrb.mxu2 %v9068_v63  ;;  %v10690_v63 = vld [vmem:[%s10407_s29 + $0x10] sm:$0xff]  ;;  %vm505_vm1 = vcmask 130048  }
  0x4e   :  { %13360 = vst [vmem:[#allocation26_spill] sm:$0xff] %v10585_v31 }
  0x4f   :  { %752 = vmatpush.msrb.mxu2 %v9067_v10 }
  0xaf   :  { %v170_v32 = vpop.xlane.xlu0 %169  ;;  %v176_v33 = vpop.xlane.xlu1 %175 }
  0xb0   :  { %v187_v34 = vmul.f32 %v10585_v31, %v170_v32  ;;  %v189_v35 = vmul.f32 %v10585_v31, %v176_v33 }
  0xb2   :  { %v191_v36 = vadd.f32 1e-06, %v187_v34  ;;  %v193_v37 = vadd.f32 1e-06, %v189_v35 }
  0xb4   :  { %9893 = vrsqrt.f32 %v191_v36  ;;  %vm201_vm3 = vweird.f32 %v191_v36  ;;  %vm221_vm6 = vweird.f32 %v193_v37 }
  0xb5   :  { %9895 = vrsqrt.f32 %v193_v37 }
  0xb7   :  { %v173_v38 = vpop.xlane.xlu0 %172  ;;  %v179_v39 = vpop.xlane.xlu1 %178 }
  0xb8   :  { %v188_v40 = vmul.f32 %v10585_v31, %v173_v38  ;;  %v190_v41 = vmul.f32 %v10585_v31, %v179_v39  ;;  %v10656_v38 = vld [vmem:[%s10402_s25 + $0x8] sm:$0xff] }
  0xb9   :  { %v10659_v39 = vld [vmem:[%s10407_s29 + $0x8] sm:$0xff] }
  0xba   :  { %v9894_v42 = vpop.eup %9893  ;;  %v192_v43 = vadd.f32 1e-06, %v188_v40  ;;  %v194_v44 = vadd.f32 1e-06, %v190_v41 }
  0xbb   :  { %v9896_v45 = vpop.eup %9895  ;;  %v196_v46 = vmul.f32 %v9894_v42, %v191_v36  ;;  %vm202_vm2 = vweird.f32 %v9894_v42 }
  0xbc   :  { %9897 = vrsqrt.f32 %v192_v43  ;;  %v216_v48 = vmul.f32 %v9896_v45, %v193_v37  ;;  %vm203_vm4 = vmor %vm201_vm3, %vm202_vm2  ;;  %vm222_vm7 = vweird.f32 %v9896_v45  ;;  %vm211_vm8 = vweird.f32 %v192_v43 }
  0xbd   :  { %v197_v47 = vmul.f32 %v9894_v42, %v196_v46  ;;  %9899 = vrsqrt.f32 %v194_v44  ;;  %vm223_vm10 = vmor %vm221_vm6, %vm222_vm7  ;;  %vm231_vm11 = vweird.f32 %v194_v44 }
  0xbe   :  { %v217_v51 = vmul.f32 %v9896_v45, %v216_v48 }
  0xbf   :  { %v198_v49 = vmul.f32 0.5, %v197_v47 }
  0xc0   :  { %v218_v60 = vmul.f32 0.5, %v217_v51 }
  0xc1   :  { %v199_v50 = vsub.f32 1.5, %v198_v49 }
  0xc2   :  { %v9898_v52 = vpop.eup %9897  ;;  %v219_v7 = vsub.f32 1.5, %v218_v60 }
  0xc3   :  { %v9900_v53 = vpop.eup %9899  ;;  %v200_v54 = vmul.f32 %v9894_v42, %v199_v50  ;;  %v206_v55 = vmul.f32 %v9898_v52, %v192_v43  ;;  %vm212_vm5 = vweird.f32 %v9898_v52  ;;  %v10664_v43 = vld [vmem:[%s10402_s25] sm:$0xff] }
  0xc4   :  { %v226_v62 = vmul.f32 %v9900_v53, %v194_v44  ;;  %vm213_vm9 = vmor %vm211_vm8, %vm212_vm5  ;;  %vm232_vm12 = vweird.f32 %v9900_v53  ;;  %v10667_v44 = vld [vmem:[%s10407_s29] sm:$0xff] }
  0xc5   :  { %v204_v59 = vsel %vm203_vm4, %v9894_v42, %v200_v54  ;;  %v207_v61 = vmul.f32 %v9898_v52, %v206_v55  ;;  %vm233_vm13 = vmor %vm231_vm11, %vm232_vm12 }
  0xc6   :  { %v235_v0 = vmul.f32 %v204_v59, %v10550_v1  ;;  %v227_v9 = vmul.f32 %v9900_v53, %v226_v62  ;;  %v220_v1 = vmul.f32 %v9896_v45, %v219_v7 }
  0xc7   :  { %v208_v3 = vmul.f32 0.5, %v207_v61  ;;  %v10687_v61 = vld [vmem:[%s10402_s25 + $0x10] sm:$0xff] }
  0xc8   :  { %v10596_v4 = vmul.f32 %v9885_v58, %v235_v0  ;;  %v228_v13 = vmul.f32 0.5, %v227_v9  ;;  %v224_v16 = vsel %vm223_vm10, %v9896_v45, %v220_v1 }
  0xc9   :  { %v209_v8 = vsub.f32 1.5, %v208_v3  ;;  %v237_v18 = vmul.f32 %v224_v16, %v10553_v2  ;;  %v10641_v2 = vld [vmem:[%s10412_s3] sm:$0xf] }
  0xca   :  { %9025 = vmatmul.msk.f32.vlgmr.msra.gmra.mxu0 %vm167_vm0, %v10596_v4  ;;  %9029 = vmatmul.msk.f32.vlgmr.msra.gmra.mxu1 %vm167_vm0, %v10596_v4  ;;  %v229_v17 = vsub.f32 1.5, %v228_v13 }
  0xcb   :  { %v210_v11 = vmul.f32 %v9898_v52, %v209_v8  ;;  %9033 = vmatmul.msk.f32.vlgmr.msra.gmra.mxu2 %vm167_vm0, %v10596_v4  ;;  %9037 = vmatpush.msk.msra.mxu3 %vm374_vm14, %v10641_v2 }
  0xcc   :  { %v230_v19 = vmul.f32 %v9900_v53, %v229_v17  ;;  %v9077_v17 = vld [vmem:[%s10447_s11 + $0x30] sm:$0xff] }
  0xcd   :  { %v214_v12 = vsel %vm213_vm9, %v9898_v52, %v210_v11  ;;  %9042 = vmatpush.msk.msrb.mxu3 %vm374_vm14, %v10641_v2  ;;  %v9078_v11 = vld [vmem:[%s10447_s11 + $0x38] sm:$0xff] }
  0xce   :  { %v236_v14 = vmul.f32 %v214_v12, %v10560_v5  ;;  %v10615_v5 = vmul.f32 %v9885_v58, %v237_v18  ;;  %v234_v20 = vsel %vm233_vm13, %v9900_v53, %v230_v19  ;;  %v10677_v53 = vld [vmem:[%s10402_s25 + $0x18] sm:$0xff]  ;;  %v9076_v18 = vld [vmem:[%s10447_s11 + $0x28] sm:$0xff]  ;;  %v9075_v19 = vld [vmem:[%s10447_s11 + $0x20] sm:$0xff] }
  0xcf   :  { %v238_v21 = vmul.f32 %v234_v20, %v10563_v6 }
  0xd0   :  { %v10606_v15 = vmul.f32 %v9885_v58, %v236_v14 }
  0xd1   :  { %v10624_v22 = vmul.f32 %v9885_v58, %v238_v21 }
  0xd2   :  { %9026 = vmatmul.msk.f32.gmra.mxu0 %vm167_vm0, %v10606_v15  ;;  %9030 = vmatmul.msk.f32.gmra.mxu1 %vm167_vm0, %v10606_v15 }
  0xd3   :  { %9034 = vmatmul.msk.f32.gmra.mxu2 %vm167_vm0, %v10606_v15 }
  0xda   :  { %9027 = vmatmul.msk.f32.gmra.mxu0 %vm167_vm0, %v10615_v5  ;;  %9031 = vmatmul.msk.f32.gmra.mxu1 %vm167_vm0, %v10615_v5 }
  0xdb   :  { %9035 = vmatmul.msk.f32.gmra.mxu2 %vm167_vm0, %v10615_v5 }
  0xe2   :  { %9028 = vmatmul.msk.f32.gmra.mxu0 %vm167_vm0, %v10624_v22  ;;  %9032 = vmatmul.msk.f32.gmra.mxu1 %vm167_vm0, %v10624_v22 }
  0xe3   :  { %9036 = vmatmul.msk.f32.gmra.mxu2 %vm167_vm0, %v10624_v22 }
  0xeb   :  { %9071 = vmatmul.msk.f32.vlgmr.msrb.gmra.mxu2 %vm167_vm0, %v10596_v4 }
  0xf3   :  { %9072 = vmatmul.msk.f32.gmra.mxu2 %vm167_vm0, %v10606_v15 }
  0xfb   :  { %9073 = vmatmul.msk.f32.gmra.mxu2 %vm167_vm0, %v10615_v5 }
 0x103   :  { %9074 = vmatmul.msk.f32.gmra.mxu2 %vm167_vm0, %v10624_v22 }
 0x147   :  { %v279_v6 = vpop.f32.mrf.mxu0  ;;  %v312_v28 = vpop.f32.mrf.mxu1 }
 0x148   :  { %9038 = vmatmul.msk.f32.vlgmr.msra.gmra.mxu3 %vm361_vm15, %v279_v6  ;;  %v415_v47 = vmul.f32 %v312_v28, %v10664_v43  ;;  %v357_v50 = vmul.f32 %v279_v6, %v10664_v43 }
 0x14e   :  { %v345_v23 = vpop.f32.mrf.mxu2 }
 0x14f   :  { %v282_v24 = vpop.f32.mrf.mxu0  ;;  %v315_v29 = vpop.f32.mrf.mxu1 }
 0x150   :  { %9039 = vmatmul.msk.f32.gmra.mxu3 %vm361_vm15, %v282_v24  ;;  %v416_v41 = vmul.f32 %v315_v29, %v10656_v38  ;;  %v358_v56 = vmul.f32 %v282_v24, %v10656_v38 }
 0x156   :  { %v348_v25 = vpop.f32.mrf.mxu2 }
 0x157   :  { %574 = vmatpush.msrb.mxu1 %v348_v25  ;;  %v285_v26 = vpop.f32.mrf.mxu0  ;;  %v318_v30 = vpop.f32.mrf.mxu1 }
 0x158   :  { %9040 = vmatmul.msk.f32.gmra.mxu3 %vm361_vm15, %v285_v26  ;;  %v417_v7 = vmul.f32 %v318_v30, %v10687_v61  ;;  %v359_v1 = vmul.f32 %v285_v26, %v10687_v61 }
 0x159   :  { %575 = vmatpush.msrb.mxu1 %v345_v23 }
 0x15e   :  { %v351_v55 = vpop.f32.mrf.mxu2 }
 0x15f   :  { %v288_v27 = vpop.f32.mrf.mxu0  ;;  %v321_v32 = vpop.f32.mrf.mxu1 }
 0x160   :  { %9041 = vmatmul.msk.f32.gmra.mxu3 %vm361_vm15, %v288_v27  ;;  %v418_v59 = vmul.f32 %v321_v32, %v10677_v53  ;;  %v360_v12 = vmul.f32 %v288_v27, %v10677_v53 }
 0x166   :  { %v354_v13 = vpop.f32.mrf.mxu2 }
 0x168   :  { %9043 = vmatmul.msk.f32.vlgmr.msrb.gmra.mxu3 %vm361_vm15, %v312_v28 }
 0x170   :  { %9044 = vmatmul.msk.f32.gmra.mxu3 %vm361_vm15, %v315_v29 }
 0x178   :  { %9045 = vmatmul.msk.f32.gmra.mxu3 %vm361_vm15, %v318_v30 }
 0x180   :  { %9046 = vmatmul.msk.f32.gmra.mxu3 %vm361_vm15, %v321_v32 }
 0x1cb   :  { %v395_v33 = vpop.f32.mrf.mxu3 }
 0x1cc   :  { %v407_v48 = vmul.f32 %v395_v33, %v10667_v44 }
 0x1ce   :  { %v411_v52 = vadd.f32 %v407_v48, %v357_v50 }
 0x1d3   :  { %v398_v34 = vpop.f32.mrf.mxu3 }
 0x1d4   :  { %v408_v54 = vmul.f32 %v398_v34, %v10659_v39 }
 0x1d6   :  { %v412_v62 = vadd.f32 %v408_v54, %v358_v56  ;;  %v9061_v56 = vld [vmem:[%s10437_s28 + $0x30] sm:$0xff] }
 0x1db   :  { %v401_v35 = vpop.f32.mrf.mxu3 }
 0x1dc   :  { %v409_v8 = vmul.f32 %v401_v35, %v10690_v63 }
 0x1de   :  { %v413_v14 = vadd.f32 %v409_v8, %v359_v1 }
 0x1e3   :  { %v404_v36 = vpop.f32.mrf.mxu3 }
 0x1e4   :  { %v410_v9 = vmul.f32 %v404_v36, %v10682_v57 }
 0x1e6   :  { %v414_v16 = vadd.f32 %v410_v9, %v360_v12 }
 0x1eb   :  { %v448_v37 = vpop.f32.mrf.mxu3 }
 0x1ec   :  { %v460_v45 = vmul.f32 %v448_v37, %v10667_v44 }
 0x1ee   :  { %v464_v49 = vadd.f32 %v460_v45, %v415_v47 }
 0x1f3   :  { %v451_v40 = vpop.f32.mrf.mxu3 }
 0x1f4   :  { %v461_v42 = vmul.f32 %v451_v40, %v10659_v39 }
 0x1f6   :  { %v465_v46 = vadd.f32 %v461_v42, %v416_v41 }
 0x1f8   :  { %9047 = vmatpush.xpose.msk.msrb.mxu0 %vm361_vm15, %v465_v46 }
 0x1fb   :  { %v454_v51 = vpop.f32.mrf.mxu3 }
 0x1fc   :  { %9048 = vmatpush.xpose.msk.msrb.mxu0 %vm361_vm15, %v464_v49  ;;  %v462_v0 = vmul.f32 %v454_v51, %v10690_v63 }
 0x1fe   :  { %v466_v10 = vadd.f32 %v462_v0, %v417_v7 }
 0x1ff   :  { %9049 = vmatmul.msk.f32.vlgmr.msrb.gmra.mxu0 %vm361_vm15, %v411_v52 }
 0x203   :  { %v457_v58 = vpop.f32.mrf.mxu3 }
 0x204   :  { %v463_v60 = vmul.f32 %v457_v58, %v10682_v57 }
 0x206   :  { %v467_v3 = vadd.f32 %v463_v60, %v418_v59  ;;  %v9060_v59 = vld [vmem:[%s10437_s28 + $0x28] sm:$0xff]  ;;  %v9059_v60 = vld [vmem:[%s10437_s28 + $0x20] sm:$0xff] }
 0x207   :  { %9050 = vmatmul.msk.f32.gmra.mxu0 %vm361_vm15, %v412_v62 }
 0x208   :  { %9053 = vmatpush.xpose.msk.msra.mxu0 %vm361_vm15, %v467_v3  ;;  %9842 = vmatpush.xpose.msk.msra.mxu3 %vm361_vm15, %v467_v3 }
 0x20c   :  { %9054 = vmatpush.xpose.msk.msra.mxu0 %vm361_vm15, %v466_v10  ;;  %9843 = vmatpush.xpose.msk.msra.mxu3 %vm361_vm15, %v466_v10 }
 0x20f   :  { %9055 = vmatmul.msk.f32.vlgmr.msra.gmra.mxu0 %vm361_vm15, %v413_v14  ;;  %9056 = vmatmul.msk.f32.vlgmr.msra.gmra.mxu3 %vm361_vm15, %v414_v16 }
 0x210   :  { %688 = vmatpush.msrb.mxu0 %v354_v13  ;;  %783 = vmatpush.msrb.mxu3 %v9078_v11 }
 0x212   :  { %689 = vmatpush.msrb.mxu0 %v351_v55  ;;  %784 = vmatpush.msrb.mxu3 %v9077_v17  ;;  %v9062_v55 = vld [vmem:[%s10437_s28 + $0x38] sm:$0xff] }
 0x213   :  { %715 = vmatpush.msra.mxu1 %v9062_v55 }
 0x214   :  { %9083 = vmatpush.msk.msra.mxu0 %vm374_vm14, %v10641_v2  ;;  %785 = vmatpush.msrb.mxu3 %v9076_v18 }
 0x215   :  { %716 = vmatpush.msra.mxu1 %v9061_v56 }
 0x216   :  { %786 = vmatpush.msrb.mxu3 %v9075_v19 }
 0x217   :  { %9079 = vmatmul.msk.f32.vlgmr.msrb.gmra.mxu3 %vm167_vm0, %v10596_v4  ;;  %717 = vmatpush.msra.mxu1 %v9060_v59 }
 0x219   :  { %718 = vmatpush.msra.mxu1 %v9059_v60 }
 0x21f   :  { %9080 = vmatmul.msk.f32.gmra.mxu3 %vm167_vm0, %v10606_v15 }
 0x227   :  { %9081 = vmatmul.msk.f32.gmra.mxu3 %vm167_vm0, %v10615_v5 }
 0x22f   :  { %9082 = vmatmul.msk.f32.gmra.mxu3 %vm167_vm0, %v10624_v22 }
 0x27c   :  { %v497_v20 = vpop.f32.mrf.mxu0 }
 0x27d   :  { %v503_v21 = vmul.f32 0.5, %v497_v20 }
 0x27f   :  { %v506_v6 = vsel %vm505_vm1, %v503_v21, -inf }
 0x280   :  { %507 = vmax.xlane.f32.xlu2 %v506_v6 }
 0x284   :  { %v500_v23 = vpop.f32.mrf.mxu0 }
 0x285   :  { %v504_v24 = vmul.f32 0.5, %v500_v23 }
 0x287   :  { %v509_v25 = vsel %vm505_vm1, %v504_v24, -inf }
 0x288   :  { %510 = vmax.xlane.f32.xlu2 %v509_v25 }
 0x28c   :  { %v612_v26 = vpop.f32.mrf.mxu0 }
 0x28d   :  { %v618_v27 = vmul.f32 0.5, %v612_v26 }
 0x28f   :  { %v620_v28 = vsel %vm505_vm1, %v618_v27, -inf }
 0x290   :  { %621 = vmax.xlane.f32.xlu2 %v620_v28 }
 0x292   :  { %v615_v29 = vpop.f32.mrf.mxu3 }
 0x293   :  { %v619_v45 = vmul.f32 0.5, %v615_v29 }
 0x295   :  { %v623_v51 = vsel %vm505_vm1, %v619_v45, -inf }
 0x29a   :  { %v788_v30 = vpop.f32.mrf.mxu3 }
 0x2a2   :  { %v791_v32 = vpop.f32.mrf.mxu3 }
 0x2a3   :  { %1011 = vmatpush.msra.mxu3 %v791_v32 }
 0x2a5   :  { %1012 = vmatpush.msra.mxu3 %v788_v30 }
 0x2f3   :  { %v508_v33 = vpop.xlane.xlu2 %507 }
 0x2f4   :  { %v512_v34 = vsub.f32 %v503_v21, %v508_v33 }
 0x2f6   :  { %v514_v35 = vmul.f32 1.442695, %v512_v34 }
 0x2f8   :  { %9901 = vpow2.f32 %v514_v35 }
 0x2fb   :  { %v511_v36 = vpop.xlane.xlu2 %510 }
 0x2fc   :  { %v513_v37 = vsub.f32 %v504_v24, %v511_v36 }
 0x2fe   :  { %v9902_v40 = vpop.eup %9901  ;;  %v516_v41 = vmul.f32 1.442695, %v513_v37 }
 0x2ff   :  { %v518_v42 = vsel %vm505_vm1, %v9902_v40, 0.0 }
 0x300   :  { %9903 = vpow2.f32 %v516_v41  ;;  %519 = vadd.xlane.f32.xlu0 %v518_v42 }
 0x303   :  { %v622_v46 = vpop.xlane.xlu2 %621 }
 0x304   :  { %v626_v47 = vsub.f32 %v618_v27, %v622_v46 }
 0x306   :  { %v10723_v48 = vpop.eup %9903  ;;  %v628_v49 = vmul.f32 1.442695, %v626_v47 }
 0x307   :  { %v521_v50 = vsel %vm505_vm1, %v10723_v48, 0.0 }
 0x308   :  { %9905 = vpow2.f32 %v628_v49  ;;  %522 = vadd.xlane.f32.xlu1 %v521_v50  ;;  %624 = vmax.xlane.f32.xlu0 %v623_v51  ;;  %v9118_v50 = vld [vmem:[%s10437_s28 + $0x50] sm:$0xff]  ;;  %v754_v51 = vpop.f32.mrf.mxu2 }
 0x30e   :  { %v10728_v52 = vpop.eup %9905 }
 0x30f   :  { %v632_v54 = vsel %vm505_vm1, %v10728_v52, 0.0 }
 0x310   :  { %633 = vadd.xlane.f32.xlu1 %v632_v54  ;;  %v9117_v54 = vld [vmem:[%s10437_s28 + $0x48] sm:$0xff]  ;;  %v757_v55 = vpop.f32.mrf.mxu2 }
 0x318   :  { %v760_v56 = vpop.f32.mrf.mxu2 }
 0x373   :  { %v520_v58 = vpop.xlane.xlu0 %519 }
 0x374   :  { %9907 = vrcp.f32 %v520_v58  ;;  %v535_v1 = vand.u32 2147483648, %v520_v58  ;;  %v533_v12 = vand.u32 2147483647, %v520_v58  ;;  %vm529_vm3 = vweird.f32 %v520_v58 }
 0x376   :  { %v536_v16 = vor.u32 1.1754944e-38, %v535_v1  ;;  %vm534_vm5 = vcmp.eq.f32.partialorder %v533_v12, 8.507059e+37 }
 0x37a   :  { %v9908_v62 = vpop.eup %9907 }
 0x37b   :  { %v525_v0 = vmul.f32 %v9908_v62, %v520_v58  ;;  %v523_v3 = vpop.xlane.xlu1 %522  ;;  %v625_v7 = vpop.xlane.xlu0 %624  ;;  %vm530_vm2 = vweird.f32 %v9908_v62 }
 0x37c   :  { %9909 = vrcp.f32 %v523_v3  ;;  %v627_v8 = vsub.f32 %v619_v45, %v625_v7  ;;  %vm531_vm4 = vmor %vm529_vm3, %vm530_vm2  ;;  %v550_v23 = vand.u32 2147483648, %v523_v3  ;;  %v548_v27 = vand.u32 2147483647, %v523_v3  ;;  %v763_v58 = vpop.f32.mrf.mxu2 }
 0x37d   :  { %v526_v9 = vsub.f32 1.0, %v525_v0  ;;  %vm544_vm7 = vweird.f32 %v523_v3 }
 0x37e   :  { %v630_v10 = vmul.f32 1.442695, %v627_v8  ;;  %v551_v30 = vor.u32 1.1754944e-38, %v550_v23  ;;  %vm549_vm9 = vcmp.eq.f32.partialorder %v548_v27, 8.507059e+37  ;;  %v853_v27 = vmul.f32 %v754_v51, %v10664_v43 }
 0x37f   :  { %v527_v11 = vmul.f32 %v9908_v62, %v526_v9 }
 0x380   :  { %9911 = vpow2.f32 %v630_v10 }
 0x381   :  { %v528_v13 = vadd.f32 %v9908_v62, %v527_v11 }
 0x382   :  { %v9910_v14 = vpop.eup %9909 }
 0x383   :  { %v540_v17 = vmul.f32 %v9910_v14, %v523_v3  ;;  %v634_v18 = vpop.xlane.xlu1 %633  ;;  %v532_v19 = vsel %vm531_vm4, %v9908_v62, %v528_v13  ;;  %vm545_vm6 = vweird.f32 %v9910_v14 }
 0x384   :  { %9913 = vrcp.f32 %v634_v18  ;;  %v537_v21 = vsel %vm534_vm5, %v536_v16, %v532_v19  ;;  %vm546_vm8 = vmor %vm544_vm7, %vm545_vm6  ;;  %v649_v37 = vand.u32 2147483648, %v634_v18  ;;  %v647_v41 = vand.u32 2147483647, %v634_v18 }
 0x385   :  { %v541_v20 = vsub.f32 1.0, %v540_v17  ;;  %v538_v24 = vmul.f32 %v9902_v40, %v537_v21  ;;  %vm643_vm11 = vweird.f32 %v634_v18  ;;  %v794_v21 = vpop.f32.mrf.mxu3 }
 0x386   :  { %v10736_v6 = vpop.eup %9911  ;;  %v650_v45 = vor.u32 1.1754944e-38, %v649_v37  ;;  %vm648_vm13 = vcmp.eq.f32.partialorder %v647_v41, 8.507059e+37  ;;  %v855_v37 = vmul.f32 %v760_v56, %v10687_v61 }
 0x387   :  { %v542_v25 = vmul.f32 %v9910_v14, %v541_v20  ;;  %v635_v26 = vsel %vm505_vm1, %v10736_v6, 0.0  ;;  %9051 = vmatmul.msk.f32.vlgmr.msrb.gmra.mxu1 %vm505_vm1, %v538_v24  ;;  %v854_v24 = vmul.f32 %v757_v55, %v10656_v38 }
 0x388   :  { %636 = vadd.xlane.f32.xlu2 %v635_v26  ;;  %9088 = vmatpush.msk.msrb.mxu1 %vm374_vm14, %v10641_v2 }
 0x389   :  { %v543_v28 = vadd.f32 %v9910_v14, %v542_v25 }
 0x38a   :  { %v9914_v29 = vpop.eup %9913 }
 0x38b   :  { %v639_v32 = vmul.f32 %v9914_v29, %v634_v18  ;;  %v547_v33 = vsel %vm546_vm8, %v9910_v14, %v543_v28  ;;  %vm644_vm10 = vweird.f32 %v9914_v29 }
 0x38c   :  { %v552_v34 = vsel %vm549_vm9, %v551_v30, %v547_v33  ;;  %vm645_vm12 = vmor %vm643_vm11, %vm644_vm10  ;;  %v856_v33 = vmul.f32 %v763_v58, %v10677_v53 }
 0x38d   :  { %v640_v35 = vsub.f32 1.0, %v639_v32  ;;  %v553_v36 = vmul.f32 %v10723_v48, %v552_v34  ;;  %v9119_v48 = vld [vmem:[%s10437_s28 + $0x58] sm:$0xff]  ;;  %v797_v30 = vpop.f32.mrf.mxu3 }
 0x38f   :  { %v641_v40 = vmul.f32 %v9914_v29, %v640_v35  ;;  %9052 = vmatmul.msk.f32.gmra.mxu1 %vm505_vm1, %v553_v36 }
 0x391   :  { %v642_v42 = vadd.f32 %v9914_v29, %v641_v40 }
 0x393   :  { %v646_v46 = vsel %vm645_vm12, %v9914_v29, %v642_v42 }
 0x394   :  { %v651_v47 = vsel %vm648_vm13, %v650_v45, %v646_v46  ;;  %v697_v45 = vld [vmem:[%s10452_s18] sm:$0xf] }
 0x395   :  { %v652_v49 = vmul.f32 %v10728_v52, %v651_v47  ;;  %v9116_v52 = vld [vmem:[%s10437_s28 + $0x40] sm:$0xff] }
 0x397   :  { %9057 = vmatmul.msk.f32.vlgmr.msrb.gmra.mxu0 %vm505_vm1, %v652_v49  ;;  %9063 = vmatmul.msk.f32.vlgmr.msra.gmra.mxu1 %vm167_vm0, %v10596_v4 }
 0x398   :  { %1241 = vmatpush.msra.mxu1 %v9119_v48 }
 0x39a   :  { %1242 = vmatpush.msra.mxu1 %v9118_v50 }
 0x39c   :  { %1243 = vmatpush.msra.mxu1 %v9117_v54 }
 0x39e   :  { %1244 = vmatpush.msra.mxu1 %v9116_v52 }
 0x39f   :  { %9064 = vmatmul.msk.f32.gmra.mxu1 %vm167_vm0, %v10606_v15 }
 0x3a7   :  { %9065 = vmatmul.msk.f32.gmra.mxu1 %vm167_vm0, %v10615_v5 }
 0x3af   :  { %9066 = vmatmul.msk.f32.gmra.mxu1 %vm167_vm0, %v10624_v22 }
 0x3b7   :  { %9089 = vmatmul.msk.f32.vlgmr.msrb.gmra.mxu1 %vm361_vm15, %v754_v51 }
 0x3b8   :  { %9145 = vmatpush.msk.msrb.mxu1 %vm374_vm14, %v10641_v2 }
 0x3bf   :  { %9090 = vmatmul.msk.f32.gmra.mxu1 %vm361_vm15, %v757_v55 }
 0x3c7   :  { %9091 = vmatmul.msk.f32.gmra.mxu1 %vm361_vm15, %v760_v56 }
 0x3cf   :  { %9092 = vmatmul.msk.f32.gmra.mxu1 %vm361_vm15, %v763_v58 }
 0x3d7   :  { %9120 = vmatmul.msk.f32.vlgmr.msra.gmra.mxu1 %vm167_vm0, %v10596_v4 }
 0x3df   :  { %9121 = vmatmul.msk.f32.gmra.mxu1 %vm167_vm0, %v10606_v15 }
 0x3e7   :  { %9122 = vmatmul.msk.f32.gmra.mxu1 %vm167_vm0, %v10615_v5 }
 0x3ef   :  { %9123 = vmatmul.msk.f32.gmra.mxu1 %vm167_vm0, %v10624_v22 }
 0x3fb   :  { %v637_v59 = vpop.xlane.xlu2 %636 }
 0x3fc   :  { %9915 = vrcp.f32 %v637_v59  ;;  %v664_v7 = vand.u32 2147483648, %v637_v59  ;;  %v662_v9 = vand.u32 2147483647, %v637_v59  ;;  %vm658_vm3 = vweird.f32 %v637_v59 }
 0x3fe   :  { %v665_v11 = vor.u32 1.1754944e-38, %v664_v7  ;;  %vm663_vm5 = vcmp.eq.f32.partialorder %v662_v9, 8.507059e+37 }
 0x402   :  { %v9916_v60 = vpop.eup %9915 }
 0x403   :  { %v654_v62 = vmul.f32 %v9916_v60, %v637_v59  ;;  %vm659_vm2 = vweird.f32 %v9916_v60 }
 0x404   :  { %v10773_v3 = vpop.f32.mrf.mxu1  ;;  %vm660_vm4 = vmor %vm658_vm3, %vm659_vm2 }
 0x405   :  { %v655_v0 = vsub.f32 1.0, %v654_v62 }
 0x407   :  { %v656_v8 = vmul.f32 %v9916_v60, %v655_v0 }
 0x409   :  { %v657_v10 = vadd.f32 %v9916_v60, %v656_v8 }
 0x40b   :  { %v661_v1 = vsel %vm660_vm4, %v9916_v60, %v657_v10 }
 0x40c   :  { %v666_v12 = vsel %vm663_vm5, %v665_v11, %v661_v1  ;;  %v580_v13 = vpop.f32.mrf.mxu1 }
 0x40d   :  { %v667_v14 = vmul.f32 %v10736_v6, %v666_v12 }
 0x40f   :  { %9058 = vmatmul.msk.f32.gmra.mxu0 %vm505_vm1, %v667_v14 }
 0x414   :  { %v720_v16 = vpop.f32.mrf.mxu1  ;;  %v691_v41 = vpop.f32.mrf.mxu0 }
 0x415   :  { %v800_v47 = vmul.f32 %v720_v16, %v10664_v43 }
 0x417   :  { %9084 = vmatmul.msk.f32.vlgmr.msra.gmra.mxu0 %vm361_vm15, %v720_v16 }
 0x41c   :  { %v723_v17 = vpop.f32.mrf.mxu1 }
 0x41d   :  { %v801_v51 = vmul.f32 %v723_v17, %v10656_v38 }
 0x41f   :  { %9085 = vmatmul.msk.f32.gmra.mxu0 %vm361_vm15, %v723_v17 }
 0x424   :  { %v726_v18 = vpop.f32.mrf.mxu1 }
 0x425   :  { %v802_v56 = vmul.f32 %v726_v18, %v10687_v61 }
 0x427   :  { %9086 = vmatmul.msk.f32.gmra.mxu0 %vm361_vm15, %v726_v18 }
 0x42c   :  { %v729_v19 = vpop.f32.mrf.mxu1 }
 0x42d   :  { %v803_v62 = vmul.f32 %v729_v19, %v10677_v53 }
 0x42f   :  { %9087 = vmatmul.msk.f32.gmra.mxu0 %vm361_vm15, %v729_v19 }
 0x434   :  { %v886_v20 = vpop.f32.mrf.mxu1 }
 0x435   :  { %v898_v25 = vmul.f32 %v886_v20, %v10667_v44 }
 0x437   :  { %v902_v28 = vadd.f32 %v898_v25, %v853_v27 }
 0x43c   :  { %v889_v23 = vpop.f32.mrf.mxu1 }
 0x43d   :  { %v899_v6 = vmul.f32 %v889_v23, %v10659_v39 }
 0x43f   :  { %v903_v26 = vadd.f32 %v899_v6, %v854_v24 }
 0x441   :  { %9093 = vmatpush.xpose.msk.msra.mxu2 %vm361_vm15, %v903_v26 }
 0x444   :  { %v892_v29 = vpop.f32.mrf.mxu1 }
 0x445   :  { %9094 = vmatpush.xpose.msk.msra.mxu2 %vm361_vm15, %v902_v28  ;;  %v900_v35 = vmul.f32 %v892_v29, %v10690_v63 }
 0x447   :  { %v904_v40 = vadd.f32 %v900_v35, %v855_v37 }
 0x449   :  { %1125 = vmatpush.msrb.mxu2 %v797_v30 }
 0x44b   :  { %1126 = vmatpush.msrb.mxu2 %v794_v21 }
 0x44c   :  { %v895_v32 = vpop.f32.mrf.mxu1 }
 0x44d   :  { %v901_v34 = vmul.f32 %v895_v32, %v10682_v57 }
 0x44f   :  { %v905_v36 = vadd.f32 %v901_v34, %v856_v33 }
 0x451   :  { %9099 = vmatpush.xpose.msk.msrb.mxu0 %vm361_vm15, %v905_v36 }
 0x454   :  { %v10814_v8 = vpop.f32.mrf.mxu1 }
 0x455   :  { %9100 = vmatpush.xpose.msk.msrb.mxu0 %vm361_vm15, %v904_v40  ;;  %v9127_v40 = vld [vmem:[%s10442_s4 + $0x58] sm:$0xff] }
 0x459   :  { %9111 = vmatpush.msk.msra.mxu0 %vm374_vm14, %v697_v45  ;;  %v9125_v45 = vld [vmem:[%s10442_s4 + $0x48] sm:$0xff] }
 0x48c   :  { %v694_v42 = vpop.f32.mrf.mxu0 }
 0x494   :  { %v833_v46 = vpop.f32.mrf.mxu0 }
 0x495   :  { %v845_v49 = vmul.f32 %v833_v46, %v10667_v44  ;;  %v9124_v46 = vld [vmem:[%s10442_s4 + $0x40] sm:$0xff] }
 0x497   :  { %v849_v48 = vadd.f32 %v845_v49, %v800_v47 }
 0x499   :  { %9095 = vmatmul.msk.f32.vlgmr.msra.gmra.mxu2 %vm361_vm15, %v849_v48 }
 0x49a   :  { %1275 = vmatpush.msra.mxu2 %v9127_v40 }
 0x49c   :  { %v836_v50 = vpop.f32.mrf.mxu0 }
 0x49d   :  { %v846_v54 = vmul.f32 %v836_v50, %v10659_v39 }
 0x49f   :  { %v850_v52 = vadd.f32 %v846_v54, %v801_v51 }
 0x4a1   :  { %9096 = vmatmul.msk.f32.gmra.mxu2 %vm361_vm15, %v850_v52 }
 0x4a4   :  { %v839_v55 = vpop.f32.mrf.mxu0 }
 0x4a5   :  { %v847_v58 = vmul.f32 %v839_v55, %v10690_v63 }
 0x4a7   :  { %v851_v59 = vadd.f32 %v847_v58, %v802_v56 }
 0x4a9   :  { %9101 = vmatmul.msk.f32.vlgmr.msrb.gmra.mxu0 %vm361_vm15, %v851_v59 }
 0x4aa   :  { %9140 = vmatpush.msk.msrb.mxu0 %vm374_vm14, %v10641_v2  ;;  %v10818_v2 = vpop.f32.mrf.mxu1 }
 0x4ac   :  { %v842_v60 = vpop.f32.mrf.mxu0 }
 0x4ad   :  { %v848_v0 = vmul.f32 %v842_v60, %v10682_v57 }
 0x4af   :  { %v852_v7 = vadd.f32 %v848_v0, %v803_v62 }
 0x4b1   :  { %9102 = vmatmul.msk.f32.gmra.mxu0 %vm361_vm15, %v852_v7 }
 0x4b2   :  { %v10822_v9 = vpop.f32.mrf.mxu1 }
 0x4b9   :  { %9112 = vmatmul.msk.f32.vlgmr.msra.gmra.mxu0 %vm361_vm15, %v10773_v3 }
 0x4ba   :  { %v10826_v3 = vpop.f32.mrf.mxu1 }
 0x4c1   :  { %9113 = vmatmul.msk.f32.gmra.mxu0 %vm361_vm15, %v580_v13 }
 0x4c9   :  { %9114 = vmatmul.msk.f32.gmra.mxu0 %vm361_vm15, %v691_v41  ;;  %v9126_v41 = vld [vmem:[%s10442_s4 + $0x50] sm:$0xff] }
 0x4ca   :  { %1276 = vmatpush.msra.mxu2 %v9126_v41 }
 0x4cc   :  { %1277 = vmatpush.msra.mxu2 %v9125_v45 }
 0x4ce   :  { %1278 = vmatpush.msra.mxu2 %v9124_v46 }
 0x4d1   :  { %9115 = vmatmul.msk.f32.gmra.mxu0 %vm361_vm15, %v694_v42 }
 0x4d9   :  { %9141 = vmatmul.msk.f32.vlgmr.msrb.gmra.mxu0 %vm361_vm15, %v10814_v8 }
 0x4e1   :  { %9142 = vmatmul.msk.f32.gmra.mxu0 %vm361_vm15, %v10818_v2 }
 0x4e9   :  { %9143 = vmatmul.msk.f32.gmra.mxu0 %vm361_vm15, %v10822_v9 }
 0x4f1   :  { %9144 = vmatmul.msk.f32.gmra.mxu0 %vm361_vm15, %v10826_v3 }
 0x51c   :  { %v935_v16 = vpop.f32.mrf.mxu2 }
 0x51d   :  { %v941_v17 = vmul.f32 0.5, %v935_v16 }
 0x51f   :  { %v943_v18 = vsel %vm505_vm1, %v941_v17, -inf }
 0x524   :  { %v938_v27 = vpop.f32.mrf.mxu2 }
 0x525   :  { %v942_v28 = vmul.f32 0.5, %v938_v27 }
 0x526   :  { %v1049_v10 = vpop.f32.mrf.mxu0 }
 0x527   :  { %v1055_v11 = vmul.f32 0.5, %v1049_v10  ;;  %v946_v34 = vsel %vm505_vm1, %v942_v28, -inf }
 0x529   :  { %v1057_v1 = vsel %vm505_vm1, %v1055_v11, -inf }
 0x52a   :  { %1058 = vmax.xlane.f32.xlu0 %v1057_v1 }
 0x52e   :  { %v1052_v12 = vpop.f32.mrf.mxu0 }
 0x52f   :  { %v1056_v13 = vmul.f32 0.5, %v1052_v12 }
 0x531   :  { %v1060_v14 = vsel %vm505_vm1, %v1056_v13, -inf }
 0x532   :  { %1061 = vmax.xlane.f32.xlu1 %v1060_v14 }
 0x53a   :  { %944 = vmax.xlane.f32.xlu1 %v943_v18 }
 0x59d   :  { %v1059_v19 = vpop.xlane.xlu0 %1058 }
 0x59e   :  { %v1063_v20 = vsub.f32 %v1055_v11, %v1059_v19 }
 0x5a0   :  { %v1065_v21 = vmul.f32 1.442695, %v1063_v20 }
 0x5a2   :  { %9917 = vpow2.f32 %v1065_v21 }
 0x5a5   :  { %v1062_v23 = vpop.xlane.xlu1 %1061 }
 0x5a6   :  { %v1064_v24 = vsub.f32 %v1056_v13, %v1062_v23 }
 0x5a8   :  { %v9918_v6 = vpop.eup %9917  ;;  %v1067_v25 = vmul.f32 1.442695, %v1064_v24 }
 0x5a9   :  { %v1069_v26 = vsel %vm505_vm1, %v9918_v6, 0.0 }
 0x5aa   :  { %9919 = vpow2.f32 %v1067_v25  ;;  %1070 = vadd.xlane.f32.xlu2 %v1069_v26 }
 0x5ad   :  { %v945_v29 = vpop.xlane.xlu1 %944 }
 0x5ae   :  { %v949_v30 = vsub.f32 %v941_v17, %v945_v29 }
 0x5b0   :  { %v10834_v32 = vpop.eup %9919  ;;  %v951_v33 = vmul.f32 1.442695, %v949_v30 }
 0x5b1   :  { %v1072_v35 = vsel %vm505_vm1, %v10834_v32, 0.0 }
 0x5b2   :  { %9921 = vpow2.f32 %v951_v33  ;;  %947 = vmax.xlane.f32.xlu2 %v946_v34  ;;  %1073 = vadd.xlane.f32.xlu0 %v1072_v35 }
 0x5b8   :  { %v10839_v36 = vpop.eup %9921 }
 0x5b9   :  { %v955_v37 = vsel %vm505_vm1, %v10839_v36, 0.0 }
 0x5ba   :  { %956 = vadd.xlane.f32.xlu0 %v955_v37 }
 0x61d   :  { %v1071_v42 = vpop.xlane.xlu2 %1070 }
 0x61e   :  { %9923 = vrcp.f32 %v1071_v42  ;;  %v1086_v52 = vand.u32 2147483648, %v1071_v42  ;;  %v1084_v58 = vand.u32 2147483647, %v1071_v42  ;;  %vm1080_vm7 = vweird.f32 %v1071_v42 }
 0x620   :  { %v1087_v62 = vor.u32 1.1754944e-38, %v1086_v52  ;;  %vm1085_vm9 = vcmp.eq.f32.partialorder %v1084_v58, 8.507059e+37 }
 0x624   :  { %v9924_v47 = vpop.eup %9923 }
 0x625   :  { %v1076_v49 = vmul.f32 %v9924_v47, %v1071_v42  ;;  %v948_v48 = vpop.xlane.xlu2 %947  ;;  %v1074_v50 = vpop.xlane.xlu0 %1073  ;;  %vm1081_vm6 = vweird.f32 %v9924_v47 }
 0x626   :  { %v950_v51 = vsub.f32 %v942_v28, %v948_v48  ;;  %9925 = vrcp.f32 %v1074_v50  ;;  %vm1082_vm8 = vmor %vm1080_vm7, %vm1081_vm6  ;;  %v1101_v14 = vand.u32 2147483648, %v1074_v50  ;;  %v1099_v18 = vand.u32 2147483647, %v1074_v50 }
 0x627   :  { %v1077_v54 = vsub.f32 1.0, %v1076_v49  ;;  %vm1095_vm11 = vweird.f32 %v1074_v50 }
 0x628   :  { %v953_v55 = vmul.f32 1.442695, %v950_v51  ;;  %v1102_v21 = vor.u32 1.1754944e-38, %v1101_v14  ;;  %vm1100_vm13 = vcmp.eq.f32.partialorder %v1099_v18, 8.507059e+37 }
 0x629   :  { %v1078_v56 = vmul.f32 %v9924_v47, %v1077_v54 }
 0x62a   :  { %9927 = vpow2.f32 %v953_v55 }
 0x62b   :  { %v1079_v59 = vadd.f32 %v9924_v47, %v1078_v56 }
 0x62c   :  { %v9926_v60 = vpop.eup %9925 }
 0x62d   :  { %v1083_v0 = vsel %vm1082_vm8, %v9924_v47, %v1079_v59  ;;  %v1091_v7 = vmul.f32 %v9926_v60, %v1074_v50  ;;  %v957_v10 = vpop.xlane.xlu0 %956  ;;  %vm1096_vm10 = vweird.f32 %v9926_v60 }
 0x62e   :  { %v1088_v11 = vsel %vm1085_vm9, %v1087_v62, %v1083_v0  ;;  %9929 = vrcp.f32 %v957_v10  ;;  %vm1097_vm12 = vmor %vm1095_vm11, %vm1096_vm10  ;;  %v972_v27 = vand.u32 2147483648, %v957_v10  ;;  %v970_v29 = vand.u32 2147483647, %v957_v10  ;;  %v10869_v0 = vpop.f32.mrf.mxu0 }
 0x62f   :  { %v1092_v1 = vsub.f32 1.0, %v1091_v7  ;;  %v1089_v12 = vmul.f32 %v9918_v6, %v1088_v11  ;;  %vm966_vm3 = vweird.f32 %v957_v10  ;;  %v9134_v11 = vld [vmem:[%s10447_s11 + $0x50] sm:$0xff] }
 0x630   :  { %v9928_v13 = vpop.eup %9927  ;;  %v973_v33 = vor.u32 1.1754944e-38, %v972_v27  ;;  %vm971_vm5 = vcmp.eq.f32.partialorder %v970_v29, 8.507059e+37  ;;  %v1326_v27 = vmul.f32 %v10814_v8, %v10664_v43 }
 0x631   :  { %v1093_v16 = vmul.f32 %v9926_v60, %v1092_v1  ;;  %9103 = vmatmul.msk.f32.vlgmr.msrb.gmra.mxu2 %vm505_vm1, %v1089_v12  ;;  %v958_v17 = vsel %vm505_vm1, %v9928_v13, 0.0  ;;  %v9133_v1 = vld [vmem:[%s10447_s11 + $0x48] sm:$0xff]  ;;  %v9132_v12 = vld [vmem:[%s10447_s11 + $0x40] sm:$0xff] }
 0x632   :  { %959 = vadd.xlane.f32.xlu1 %v958_v17 }
 0x633   :  { %v1094_v19 = vadd.f32 %v9926_v60, %v1093_v16 }
 0x634   :  { %v9930_v20 = vpop.eup %9929 }
 0x635   :  { %v962_v23 = vmul.f32 %v9930_v20, %v957_v10  ;;  %v1098_v24 = vsel %vm1097_vm12, %v9926_v60, %v1094_v19  ;;  %vm967_vm2 = vweird.f32 %v9930_v20  ;;  %v9135_v10 = vld [vmem:[%s10447_s11 + $0x58] sm:$0xff] }
 0x636   :  { %v1103_v25 = vsel %vm1100_vm13, %v1102_v21, %v1098_v24  ;;  %vm968_vm4 = vmor %vm966_vm3, %vm967_vm2  ;;  %v10871_v7 = vpop.f32.mrf.mxu0 }
 0x637   :  { %v963_v6 = vsub.f32 1.0, %v962_v23  ;;  %v1104_v26 = vmul.f32 %v10834_v32, %v1103_v25  ;;  %v9105_v32 = vld [vmem:[%s10452_s18 + $0x4] sm:$0xf] }
 0x638   :  { %9106 = vmatpush.msk.msrb.mxu3 %vm374_vm14, %v9105_v32 }
 0x639   :  { %v964_v28 = vmul.f32 %v9930_v20, %v963_v6  ;;  %9104 = vmatmul.msk.f32.gmra.mxu2 %vm505_vm1, %v1104_v26 }
 0x63b   :  { %v965_v30 = vadd.f32 %v9930_v20, %v964_v28 }
 0x63d   :  { %v969_v34 = vsel %vm968_vm4, %v9930_v20, %v965_v30 }
 0x63e   :  { %v974_v35 = vsel %vm971_vm5, %v973_v33, %v969_v34 }
 0x63f   :  { %v975_v37 = vmul.f32 %v10839_v36, %v974_v35 }
 0x641   :  { %9097 = vmatmul.msk.f32.vlgmr.msra.gmra.mxu3 %vm505_vm1, %v975_v37  ;;  %9128 = vmatmul.msk.f32.vlgmr.msra.gmra.mxu2 %vm167_vm0, %v10596_v4 }
 0x642   :  { %1309 = vmatpush.msra.mxu3 %v9135_v10 }
 0x644   :  { %1310 = vmatpush.msra.mxu3 %v9134_v11 }
 0x646   :  { %1311 = vmatpush.msra.mxu3 %v9133_v1 }
 0x648   :  { %1312 = vmatpush.msra.mxu3 %v9132_v12 }
 0x649   :  { %9129 = vmatmul.msk.f32.gmra.mxu2 %vm167_vm0, %v10606_v15 }
 0x651   :  { %9130 = vmatmul.msk.f32.gmra.mxu2 %vm167_vm0, %v10615_v5 }
 0x659   :  { %9131 = vmatmul.msk.f32.gmra.mxu2 %vm167_vm0, %v10624_v22 }
 0x6a5   :  { %v960_v40 = vpop.xlane.xlu1 %959 }
 0x6a6   :  { %9931 = vrcp.f32 %v960_v40  ;;  %v987_v45 = vand.u32 2147483648, %v960_v40  ;;  %v985_v47 = vand.u32 2147483647, %v960_v40  ;;  %vm981_vm7 = vweird.f32 %v960_v40 }
 0x6a8   :  { %v988_v48 = vor.u32 1.1754944e-38, %v987_v45  ;;  %vm986_vm9 = vcmp.eq.f32.partialorder %v985_v47, 8.507059e+37 }
 0x6ac   :  { %v9932_v36 = vpop.eup %9931 }
 0x6ad   :  { %v977_v41 = vmul.f32 %v9932_v36, %v960_v40  ;;  %vm982_vm6 = vweird.f32 %v9932_v36  ;;  %v9178_v40 = vld [vmem:[%s10442_s4 + $0x70] sm:$0xff] }
 0x6ae   :  { %vm983_vm8 = vmor %vm981_vm7, %vm982_vm6 }
 0x6af   :  { %v978_v42 = vsub.f32 1.0, %v977_v41  ;;  %v9176_v41 = vld [vmem:[%s10442_s4 + $0x60] sm:$0xff] }
 0x6b1   :  { %v979_v46 = vmul.f32 %v9932_v36, %v978_v42 }
 0x6b3   :  { %v980_v49 = vadd.f32 %v9932_v36, %v979_v46  ;;  %v1328_v46 = vmul.f32 %v10822_v9, %v10687_v61 }
 0x6b4   :  { %v1128_v50 = vpop.f32.mrf.mxu2 }
 0x6b5   :  { %v984_v51 = vsel %vm983_vm8, %v9932_v36, %v980_v49  ;;  %v9177_v36 = vld [vmem:[%s10442_s4 + $0x68] sm:$0xff] }
 0x6b6   :  { %v989_v54 = vsel %vm986_vm9, %v988_v48, %v984_v51 }
 0x6b7   :  { %v990_v52 = vmul.f32 %v9928_v13, %v989_v54  ;;  %v10877_v13 = vpop.f32.mrf.mxu0 }
 0x6b9   :  { %9098 = vmatmul.msk.f32.gmra.mxu3 %vm505_vm1, %v990_v52 }
 0x6bc   :  { %v1131_v55 = vpop.f32.mrf.mxu2 }
 0x6bf   :  { %v10880_v16 = vpop.f32.mrf.mxu0 }
 0x6c4   :  { %v1014_v56 = vpop.f32.mrf.mxu3  ;;  %v1280_v58 = vpop.f32.mrf.mxu2 }
 0x6c5   :  { %9107 = vmatmul.msk.f32.vlgmr.msrb.gmra.mxu3 %vm361_vm15, %v1014_v56  ;;  %9146 = vmatmul.msk.f32.vlgmr.msrb.gmra.mxu1 %vm361_vm15, %v1280_v58  ;;  %v1379_v25 = vmul.f32 %v1280_v58, %v10664_v43 }
 0x6c7   :  { %v1359_v19 = vpop.f32.mrf.mxu0 }
 0x6c8   :  { %v1371_v6 = vmul.f32 %v1359_v19, %v10667_v44 }
 0x6ca   :  { %v1375_v29 = vadd.f32 %v1371_v6, %v1326_v27 }
 0x6cc   :  { %v1283_v59 = vpop.f32.mrf.mxu2 }
 0x6cd   :  { %9147 = vmatmul.msk.f32.gmra.mxu1 %vm361_vm15, %v1283_v59  ;;  %v1380_v20 = vmul.f32 %v1283_v59, %v10656_v38 }
 0x6cf   :  { %v1362_v30 = vpop.f32.mrf.mxu0 }
 0x6d0   :  { %v1372_v33 = vmul.f32 %v1362_v30, %v10659_v39 }
 0x6d4   :  { %v1286_v60 = vpop.f32.mrf.mxu2 }
 0x6d5   :  { %9148 = vmatmul.msk.f32.gmra.mxu1 %vm361_vm15, %v1286_v60 }
 0x6d7   :  { %v1365_v42 = vpop.f32.mrf.mxu0 }
 0x6d8   :  { %v1373_v45 = vmul.f32 %v1365_v42, %v10690_v63 }
 0x6da   :  { %v1377_v47 = vadd.f32 %v1373_v45, %v1328_v46 }
 0x6dc   :  { %v1289_v62 = vpop.f32.mrf.mxu2 }
 0x6dd   :  { %9149 = vmatmul.msk.f32.gmra.mxu1 %vm361_vm15, %v1289_v62  ;;  %v1382_v43 = vmul.f32 %v1289_v62, %v10677_v53 }
 0x6df   :  { %v1368_v49 = vpop.f32.mrf.mxu0 }
 0x6e0   :  { %v1374_v48 = vmul.f32 %v1368_v49, %v10682_v57 }
 0x73c   :  { %v1017_v14 = vpop.f32.mrf.mxu3 }
 0x73d   :  { %9108 = vmatmul.msk.f32.gmra.mxu3 %vm361_vm15, %v1017_v14 }
 0x742   :  { %v1412_v17 = vpop.f32.mrf.mxu1 }
 0x743   :  { %v1424_v23 = vmul.f32 %v1412_v17, %v10667_v44  ;;  %v1327_v44 = vmul.f32 %v10818_v2, %v10656_v38  ;;  %v9179_v2 = vld [vmem:[%s10442_s4 + $0x78] sm:$0xff] }
 0x745   :  { %9109 = vmatmul.msk.f32.gmra.mxu3 %vm361_vm15, %v1128_v50  ;;  %v1428_v26 = vadd.f32 %v1424_v23, %v1379_v25  ;;  %v1376_v35 = vadd.f32 %v1372_v33, %v1327_v44  ;;  %v1329_v50 = vmul.f32 %v10826_v3, %v10677_v53 }
 0x747   :  { %v1378_v51 = vadd.f32 %v1374_v48, %v1329_v50 }
 0x74a   :  { %v1415_v18 = vpop.f32.mrf.mxu1 }
 0x74b   :  { %v1425_v21 = vmul.f32 %v1415_v18, %v10659_v39  ;;  %v1381_v39 = vmul.f32 %v1286_v60, %v10687_v61  ;;  %v10932_v61 = vpop.f32.mrf.mxu3 }
 0x74d   :  { %v1429_v24 = vadd.f32 %v1425_v21, %v1380_v20  ;;  %9110 = vmatmul.msk.f32.gmra.mxu3 %vm361_vm15, %v1131_v55 }
 0x74f   :  { %9150 = vmatpush.xpose.msk.msrb.mxu2 %vm361_vm15, %v1429_v24 }
 0x752   :  { %v1418_v28 = vpop.f32.mrf.mxu1 }
 0x753   :  { %9151 = vmatpush.xpose.msk.msrb.mxu2 %vm361_vm15, %v1428_v26  ;;  %v1426_v37 = vmul.f32 %v1418_v28, %v10690_v63 }
 0x755   :  { %9136 = vmatmul.msk.f32.vlgmr.msra.gmra.mxu3 %vm167_vm0, %v10596_v4  ;;  %v1430_v38 = vadd.f32 %v1426_v37, %v1381_v39  ;;  %v9170_v39 = vld [vmem:[%s10437_s28 + $0x70] sm:$0xff] }
 0x756   :  { %9152 = vmatmul.msk.f32.vlgmr.msrb.gmra.mxu2 %vm361_vm15, %v1375_v29 }
 0x75a   :  { %v1421_v34 = vpop.f32.mrf.mxu1 }
 0x75b   :  { %v1427_v8 = vmul.f32 %v1421_v34, %v10682_v57 }
 0x75d   :  { %v1431_v32 = vadd.f32 %v1427_v8, %v1382_v43  ;;  %9137 = vmatmul.msk.f32.gmra.mxu3 %vm167_vm0, %v10606_v15 }
 0x75e   :  { %9153 = vmatmul.msk.f32.gmra.mxu2 %vm361_vm15, %v1376_v35 }
 0x75f   :  { %9156 = vmatpush.xpose.msk.msrb.mxu3 %vm361_vm15, %v1431_v32  ;;  %v9171_v32 = vld [vmem:[%s10437_s28 + $0x78] sm:$0xff] }
 0x763   :  { %9157 = vmatpush.xpose.msk.msrb.mxu3 %vm361_vm15, %v1430_v38 }
 0x765   :  { %9138 = vmatmul.msk.f32.gmra.mxu3 %vm167_vm0, %v10615_v5 }
 0x767   :  { %1761 = vmatpush.msra.mxu3 %v9179_v2  ;;  %v9169_v2 = vld [vmem:[%s10437_s28 + $0x68] sm:$0xff] }
 0x769   :  { %1762 = vmatpush.msra.mxu3 %v9178_v40  ;;  %v9168_v40 = vld [vmem:[%s10437_s28 + $0x60] sm:$0xff] }
 0x76b   :  { %1763 = vmatpush.msra.mxu3 %v9177_v36 }
 0x76d   :  { %1764 = vmatpush.msra.mxu3 %v9176_v41 }
 0x76e   :  { %9139 = vmatmul.msk.f32.gmra.mxu3 %vm167_vm0, %v10624_v22 }
 0x776   :  { %9158 = vmatmul.msk.f32.vlgmr.msrb.gmra.mxu3 %vm361_vm15, %v1377_v47 }
 0x77e   :  { %9159 = vmatmul.msk.f32.gmra.mxu3 %vm361_vm15, %v1378_v51 }
 0x786   :  { %9180 = vmatmul.msk.f32.vlgmr.msra.gmra.mxu3 %vm167_vm0, %v10596_v4 }
 0x78e   :  { %9181 = vmatmul.msk.f32.gmra.mxu3 %vm167_vm0, %v10606_v15 }
 0x796   :  { %9182 = vmatmul.msk.f32.gmra.mxu3 %vm167_vm0, %v10615_v5 }
 0x79e   :  { %9183 = vmatmul.msk.f32.gmra.mxu3 %vm167_vm0, %v10624_v22 }
 0x7c0   :  { %v10934_v57 = vpop.f32.mrf.mxu3 }
 0x7c8   :  { %v10936_v53 = vpop.f32.mrf.mxu3 }
 0x7d0   :  { %v10938_v63 = vpop.f32.mrf.mxu3 }
 0x7d8   :  { %v1314_v9 = vpop.f32.mrf.mxu3 }
 0x7d9   :  { %v1461_v3 = vpop.f32.mrf.mxu2 }
 0x7da   :  { %v1467_v54 = vmul.f32 0.5, %v1461_v3 }
 0x7dc   :  { %v1469_v52 = vsel %vm505_vm1, %v1467_v54, -inf }
 0x7dd   :  { %1470 = vmax.xlane.f32.xlu2 %v1469_v52 }
 0x7e0   :  { %v1317_v55 = vpop.f32.mrf.mxu3 }
 0x7e1   :  { %v1464_v56 = vpop.f32.mrf.mxu2  ;;  %1537 = vmatpush.msra.mxu2 %v1317_v55 }
 0x7e2   :  { %v1468_v58 = vmul.f32 0.5, %v1464_v56 }
 0x7e3   :  { %1538 = vmatpush.msra.mxu2 %v1314_v9 }
 0x7e4   :  { %v1472_v59 = vsel %vm505_vm1, %v1468_v58, -inf }
 0x7e5   :  { %1473 = vmax.xlane.f32.xlu0 %v1472_v59  ;;  %1727 = vmatpush.msrb.mxu2 %v9171_v32 }
 0x7e7   :  { %1728 = vmatpush.msrb.mxu2 %v9170_v39 }
 0x7e8   :  { %v1320_v60 = vpop.f32.mrf.mxu3 }
 0x7e9   :  { %1729 = vmatpush.msrb.mxu2 %v9169_v2 }
 0x7eb   :  { %1730 = vmatpush.msrb.mxu2 %v9168_v40 }
 0x7f1   :  { %v1323_v62 = vpop.f32.mrf.mxu3 }
 0x7f2   :  { %1651 = vmatpush.msra.mxu0 %v1323_v62 }
 0x7f4   :  { %1652 = vmatpush.msra.mxu0 %v1320_v60  ;;  %v10960_v60 = vld [vmem:[%s10412_s3] sm:$0xf] }
 0x7f9   :  { %v1575_v10 = vpop.f32.mrf.mxu3 }
 0x7fa   :  { %v1581_v11 = vmul.f32 0.5, %v1575_v10 }
 0x7fc   :  { %v1583_v1 = vsel %vm505_vm1, %v1581_v11, -inf }
 0x7fd   :  { %1584 = vmax.xlane.f32.xlu1 %v1583_v1 }
 0x801   :  { %v1578_v12 = vpop.f32.mrf.mxu3 }
 0x802   :  { %v1582_v14 = vmul.f32 0.5, %v1578_v12 }
 0x804   :  { %v1586_v17 = vsel %vm505_vm1, %v1582_v14, -inf }
 0x805   :  { %1587 = vmax.xlane.f32.xlu2 %v1586_v17  ;;  %v9186_v17 = vld [vmem:[%s10447_s11 + $0x70] sm:$0xff] }
 0x850   :  { %v1471_v18 = vpop.xlane.xlu2 %1470 }
 0x851   :  { %v1475_v19 = vsub.f32 %v1467_v54, %v1471_v18  ;;  %v9185_v18 = vld [vmem:[%s10447_s11 + $0x68] sm:$0xff] }
 0x853   :  { %v1477_v20 = vmul.f32 1.442695, %v1475_v19 }
 0x855   :  { %9933 = vpow2.f32 %v1477_v20  ;;  %v9184_v20 = vld [vmem:[%s10447_s11 + $0x60] sm:$0xff] }
 0x858   :  { %v1474_v21 = vpop.xlane.xlu0 %1473 }
 0x859   :  { %v1476_v23 = vsub.f32 %v1468_v58, %v1474_v21 }
 0x85b   :  { %v9934_v24 = vpop.eup %9933  ;;  %v1479_v25 = vmul.f32 1.442695, %v1476_v23 }
 0x85c   :  { %v1481_v6 = vsel %vm505_vm1, %v9934_v24, 0.0 }
 0x85d   :  { %9935 = vpow2.f32 %v1479_v25  ;;  %1482 = vadd.xlane.f32.xlu0 %v1481_v6 }
 0x863   :  { %v9936_v26 = vpop.eup %9935 }
 0x864   :  { %v1484_v27 = vsel %vm505_vm1, %v9936_v26, 0.0 }
 0x865   :  { %1485 = vadd.xlane.f32.xlu1 %v1484_v27 }
 0x870   :  { %v1585_v28 = vpop.xlane.xlu1 %1584 }
 0x871   :  { %v1589_v29 = vsub.f32 %v1581_v11, %v1585_v28 }
 0x873   :  { %v1591_v30 = vmul.f32 1.442695, %v1589_v29 }
 0x875   :  { %9937 = vpow2.f32 %v1591_v30 }
 0x878   :  { %v1588_v33 = vpop.xlane.xlu2 %1587 }
 0x879   :  { %v1590_v44 = vsub.f32 %v1582_v14, %v1588_v33  ;;  %v9187_v14 = vld [vmem:[%s10447_s11 + $0x78] sm:$0xff] }
 0x87a   :  { %1795 = vmatpush.msrb.mxu0 %v9187_v14 }
 0x87b   :  { %v10946_v34 = vpop.eup %9937  ;;  %v1593_v43 = vmul.f32 1.442695, %v1590_v44 }
 0x87c   :  { %v1595_v8 = vsel %vm505_vm1, %v10946_v34, 0.0  ;;  %1796 = vmatpush.msrb.mxu0 %v9186_v17  ;;  %v11026_v17 = vld [vmem:[%s10407_s29 + $0x8] sm:$0xff] }
 0x87d   :  { %9939 = vpow2.f32 %v1593_v43  ;;  %1596 = vadd.xlane.f32.xlu2 %v1595_v8 }
 0x87e   :  { %1797 = vmatpush.msrb.mxu0 %v9185_v18 }
 0x880   :  { %1798 = vmatpush.msrb.mxu0 %v9184_v20  ;;  %v11032_v20 = vld [vmem:[%s10407_s29] sm:$0xff] }
 0x883   :  { %v10950_v35 = vpop.eup %9939 }
 0x884   :  { %v1598_v37 = vsel %vm505_vm1, %v10950_v35, 0.0 }
 0x885   :  { %1599 = vadd.xlane.f32.xlu0 %v1598_v37 }
 0x8d0   :  { %v1483_v38 = vpop.xlane.xlu0 %1482 }
 0x8d1   :  { %9941 = vrcp.f32 %v1483_v38  ;;  %v1498_v46 = vand.u32 2147483648, %v1483_v38  ;;  %v1496_v49 = vand.u32 2147483647, %v1483_v38  ;;  %vm1492_vm11 = vweird.f32 %v1483_v38 }
 0x8d3   :  { %v1499_v51 = vor.u32 1.1754944e-38, %v1498_v46  ;;  %vm1497_vm13 = vcmp.eq.f32.partialorder %v1496_v49, 8.507059e+37  ;;  %v1766_v46 = vpop.f32.mrf.mxu3  ;;  %v9220_v49 = vld [vmem:[%s10437_s28 + $0x80] sm:$0xff] }
 0x8d7   :  { %v9942_v36 = vpop.eup %9941 }
 0x8d8   :  { %v1488_v41 = vmul.f32 %v9942_v36, %v1483_v38  ;;  %v1486_v42 = vpop.xlane.xlu1 %1485  ;;  %vm1493_vm10 = vweird.f32 %v9942_v36 }
 0x8d9   :  { %9943 = vrcp.f32 %v1486_v42  ;;  %vm1494_vm12 = vmor %vm1492_vm11, %vm1493_vm10  ;;  %v1513_v56 = vand.u32 2147483648, %v1486_v42  ;;  %v1511_v59 = vand.u32 2147483647, %v1486_v42  ;;  %vm1507_vm3 = vweird.f32 %v1486_v42 }
 0x8da   :  { %v1489_v45 = vsub.f32 1.0, %v1488_v41 }
 0x8db   :  { %v1514_v10 = vor.u32 1.1754944e-38, %v1513_v56  ;;  %vm1512_vm5 = vcmp.eq.f32.partialorder %v1511_v59, 8.507059e+37 }
 0x8dc   :  { %v1490_v47 = vmul.f32 %v9942_v36, %v1489_v45  ;;  %v9222_v45 = vld [vmem:[%s10437_s28 + $0x90] sm:$0xff] }
 0x8de   :  { %v1491_v48 = vadd.f32 %v9942_v36, %v1490_v47  ;;  %v9221_v47 = vld [vmem:[%s10437_s28 + $0x88] sm:$0xff] }
 0x8df   :  { %v9944_v50 = vpop.eup %9943 }
 0x8e0   :  { %v1495_v9 = vsel %vm1494_vm12, %v9942_v36, %v1491_v48  ;;  %v1503_v3 = vmul.f32 %v9944_v50, %v1486_v42  ;;  %vm1508_vm2 = vweird.f32 %v9944_v50  ;;  %v9223_v42 = vld [vmem:[%s10437_s28 + $0x98] sm:$0xff] }
 0x8e1   :  { %v1500_v54 = vsel %vm1497_vm13, %v1499_v51, %v1495_v9  ;;  %vm1509_vm4 = vmor %vm1507_vm3, %vm1508_vm2  ;;  %v9162_v51 = vld [vmem:[%s10452_s18 + $0x8] sm:$0xf] }
 0x8e2   :  { %v1504_v52 = vsub.f32 1.0, %v1503_v3  ;;  %v1501_v55 = vmul.f32 %v9934_v24, %v1500_v54  ;;  %9163 = vmatpush.msk.msra.mxu1 %vm374_vm14, %v9162_v51 }
 0x8e4   :  { %v1505_v58 = vmul.f32 %v9944_v50, %v1504_v52  ;;  %9154 = vmatmul.msk.f32.vlgmr.msra.gmra.mxu2 %vm505_vm1, %v1501_v55  ;;  %9192 = vmatpush.msk.msrb.mxu1 %vm374_vm14, %v10960_v60 }
 0x8e5   :  { %9197 = vmatpush.msk.msra.mxu2 %vm374_vm14, %v10960_v60 }
 0x8e6   :  { %v1506_v62 = vadd.f32 %v9944_v50, %v1505_v58 }
 0x8e8   :  { %v1510_v11 = vsel %vm1509_vm4, %v9944_v50, %v1506_v62 }
 0x8e9   :  { %v1515_v1 = vsel %vm1512_vm5, %v1514_v10, %v1510_v11 }
 0x8ea   :  { %v1516_v12 = vmul.f32 %v9936_v26, %v1515_v1 }
 0x8ec   :  { %9155 = vmatmul.msk.f32.gmra.mxu2 %vm505_vm1, %v1516_v12  ;;  %v11022_v12 = vld [vmem:[%s10402_s25 + $0x8] sm:$0xff] }
 0x8f0   :  { %v1597_v19 = vpop.xlane.xlu2 %1596 }
 0x8f1   :  { %9945 = vrcp.f32 %v1597_v19  ;;  %v1612_v6 = vand.u32 2147483648, %v1597_v19  ;;  %v1610_v27 = vand.u32 2147483647, %v1597_v19  ;;  %vm1606_vm7 = vweird.f32 %v1597_v19 }
 0x8f3   :  { %v1613_v30 = vor.u32 1.1754944e-38, %v1612_v6  ;;  %vm1611_vm9 = vcmp.eq.f32.partialorder %v1610_v27, 8.507059e+37 }
 0x8f4   :  { %9172 = vmatmul.msk.f32.vlgmr.msrb.gmra.mxu2 %vm167_vm0, %v10596_v4 }
 0x8f5   :  { %2213 = vmatpush.msrb.mxu2 %v9223_v42 }
 0x8f7   :  { %v9946_v21 = vpop.eup %9945  ;;  %2214 = vmatpush.msrb.mxu2 %v9222_v45 }
 0x8f8   :  { %v1602_v23 = vmul.f32 %v9946_v21, %v1597_v19  ;;  %v1600_v24 = vpop.xlane.xlu0 %1599  ;;  %vm1607_vm6 = vweird.f32 %v9946_v21 }
 0x8f9   :  { %9947 = vrcp.f32 %v1600_v24  ;;  %vm1608_vm8 = vmor %vm1606_vm7, %vm1607_vm6  ;;  %v1627_v32 = vand.u32 2147483648, %v1600_v24  ;;  %v1625_v38 = vand.u32 2147483647, %v1600_v24  ;;  %vm1621_vm11 = vweird.f32 %v1600_v24  ;;  %2215 = vmatpush.msrb.mxu2 %v9221_v47  ;;  %v9231_v47 = vld [vmem:[%s10442_s4 + $0x98] sm:$0xff] }
 0x8fa   :  { %v1603_v25 = vsub.f32 1.0, %v1602_v23 }
 0x8fb   :  { %v1628_v40 = vor.u32 1.1754944e-38, %v1627_v32  ;;  %vm1626_vm13 = vcmp.eq.f32.partialorder %v1625_v38, 8.507059e+37  ;;  %2216 = vmatpush.msrb.mxu2 %v9220_v49  ;;  %v11056_v32 = vld [vmem:[%s10402_s25 + $0x10] sm:$0xff] }
 0x8fc   :  { %v1604_v26 = vmul.f32 %v9946_v21, %v1603_v25  ;;  %9173 = vmatmul.msk.f32.gmra.mxu2 %vm167_vm0, %v10606_v15  ;;  %v9230_v49 = vld [vmem:[%s10442_s4 + $0x90] sm:$0xff] }
 0x8fe   :  { %v1605_v28 = vadd.f32 %v9946_v21, %v1604_v26 }
 0x8ff   :  { %v9948_v29 = vpop.eup %9947 }
 0x900   :  { %v1609_v33 = vsel %vm1608_vm8, %v9946_v21, %v1605_v28  ;;  %v1617_v44 = vmul.f32 %v9948_v29, %v1600_v24  ;;  %vm1622_vm10 = vweird.f32 %v9948_v29  ;;  %v11036_v24 = vld [vmem:[%s10402_s25] sm:$0xff] }
 0x901   :  { %v1614_v43 = vsel %vm1611_vm9, %v1613_v30, %v1609_v33  ;;  %vm1623_vm12 = vmor %vm1621_vm11, %vm1622_vm10  ;;  %v1865_v25 = vmul.f32 %v11036_v24, %v1766_v46  ;;  %v11048_v33 = vld [vmem:[%s10407_s29 + $0x18] sm:$0xff] }
 0x902   :  { %v1618_v8 = vsub.f32 1.0, %v1617_v44  ;;  %v1615_v37 = vmul.f32 %v10946_v34, %v1614_v43  ;;  %v11052_v43 = vld [vmem:[%s10407_s29 + $0x10] sm:$0xff] }
 0x904   :  { %v1619_v39 = vmul.f32 %v9948_v29, %v1618_v8  ;;  %9160 = vmatmul.msk.f32.vlgmr.msra.gmra.mxu0 %vm505_vm1, %v1615_v37  ;;  %9174 = vmatmul.msk.f32.gmra.mxu2 %vm167_vm0, %v10615_v5 }
 0x906   :  { %v1620_v2 = vadd.f32 %v9948_v29, %v1619_v39 }
 0x908   :  { %v1624_v36 = vsel %vm1623_vm12, %v9948_v29, %v1620_v2  ;;  %v11044_v29 = vld [vmem:[%s10402_s25 + $0x18] sm:$0xff] }
 0x909   :  { %v1629_v34 = vsel %vm1626_vm13, %v1628_v40, %v1624_v36 }
 0x90a   :  { %v1630_v41 = vmul.f32 %v10950_v35, %v1629_v34  ;;  %v1769_v35 = vpop.f32.mrf.mxu3 }
 0x90b   :  { %v1866_v14 = vmul.f32 %v11022_v12, %v1769_v35 }
 0x90c   :  { %9161 = vmatmul.msk.f32.gmra.mxu0 %vm505_vm1, %v1630_v41  ;;  %9175 = vmatmul.msk.f32.gmra.mxu2 %vm167_vm0, %v10624_v22 }
 0x912   :  { %v1772_v48 = vpop.f32.mrf.mxu3 }
 0x913   :  { %v1867_v39 = vmul.f32 %v11056_v32, %v1772_v48 }
 0x914   :  { %9188 = vmatmul.msk.f32.vlgmr.msrb.gmra.mxu0 %vm167_vm0, %v10596_v4  ;;  %9198 = vmatmul.msk.f32.vlgmr.msra.gmra.mxu2 %vm361_vm15, %v1766_v46 }
 0x915   :  { %9249 = vmatpush.msk.msra.mxu2 %vm374_vm14, %v10960_v60 }
 0x91a   :  { %v1775_v50 = vpop.f32.mrf.mxu3 }
 0x91b   :  { %v1868_v30 = vmul.f32 %v11044_v29, %v1775_v50 }
 0x91c   :  { %9189 = vmatmul.msk.f32.gmra.mxu0 %vm167_vm0, %v10606_v15  ;;  %9199 = vmatmul.msk.f32.gmra.mxu2 %vm361_vm15, %v1769_v35  ;;  %v9229_v35 = vld [vmem:[%s10442_s4 + $0x88] sm:$0xff] }
 0x924   :  { %9190 = vmatmul.msk.f32.gmra.mxu0 %vm167_vm0, %v10615_v5  ;;  %9200 = vmatmul.msk.f32.gmra.mxu2 %vm361_vm15, %v1772_v48 }
 0x92c   :  { %9191 = vmatmul.msk.f32.gmra.mxu0 %vm167_vm0, %v10624_v22  ;;  %9201 = vmatmul.msk.f32.gmra.mxu2 %vm361_vm15, %v1775_v50 }
 0x934   :  { %9224 = vmatmul.msk.f32.vlgmr.msrb.gmra.mxu2 %vm167_vm0, %v10596_v4 }
 0x93c   :  { %9225 = vmatmul.msk.f32.gmra.mxu2 %vm167_vm0, %v10606_v15 }
 0x944   :  { %9226 = vmatmul.msk.f32.gmra.mxu2 %vm167_vm0, %v10615_v5 }
 0x94c   :  { %9227 = vmatmul.msk.f32.gmra.mxu2 %vm167_vm0, %v10624_v22 }
 0x967   :  { %v1540_v9 = vpop.f32.mrf.mxu2 }
 0x968   :  { %9164 = vmatmul.msk.f32.vlgmr.msra.gmra.mxu1 %vm361_vm15, %v1540_v9  ;;  %v9228_v9 = vld [vmem:[%s10442_s4 + $0x80] sm:$0xff] }
 0x96f   :  { %v1543_v3 = vpop.f32.mrf.mxu2 }
 0x970   :  { %9165 = vmatmul.msk.f32.gmra.mxu1 %vm361_vm15, %v1543_v3 }
 0x977   :  { %v1732_v54 = vpop.f32.mrf.mxu2 }
 0x978   :  { %v1812_v42 = vmul.f32 %v11036_v24, %v1732_v54 }
 0x97f   :  { %v1735_v52 = vpop.f32.mrf.mxu2 }
 0x980   :  { %v1813_v50 = vmul.f32 %v11022_v12, %v1735_v52 }
 0x981   :  { %v1654_v55 = vpop.f32.mrf.mxu0 }
 0x982   :  { %9166 = vmatmul.msk.f32.gmra.mxu1 %vm361_vm15, %v1654_v55 }
 0x987   :  { %v11014_v56 = vpop.f32.mrf.mxu2 }
 0x988   :  { %v1814_v55 = vmul.f32 %v11056_v32, %v11014_v56 }
 0x989   :  { %v1657_v58 = vpop.f32.mrf.mxu0 }
 0x98a   :  { %9167 = vmatmul.msk.f32.gmra.mxu1 %vm361_vm15, %v1657_v58 }
 0x98f   :  { %v11017_v59 = vpop.f32.mrf.mxu2 }
 0x991   :  { %v1800_v62 = vpop.f32.mrf.mxu0 }
 0x992   :  { %9193 = vmatmul.msk.f32.vlgmr.msrb.gmra.mxu1 %vm361_vm15, %v1732_v54 }
 0x997   :  { %v1898_v10 = vpop.f32.mrf.mxu2 }
 0x998   :  { %v1910_v21 = vmul.f32 %v11032_v20, %v1898_v10 }
 0x999   :  { %v1803_v11 = vpop.f32.mrf.mxu0 }
 0x99a   :  { %9194 = vmatmul.msk.f32.gmra.mxu1 %vm361_vm15, %v1735_v52  ;;  %2023 = vmatpush.msra.mxu0 %v1803_v11  ;;  %v1914_v6 = vadd.f32 %v1910_v21, %v1865_v25  ;;  %v1815_v52 = vmul.f32 %v11044_v29, %v11017_v59 }
 0x99c   :  { %2024 = vmatpush.msra.mxu0 %v1800_v62 }
 0x99f   :  { %v1901_v1 = vpop.f32.mrf.mxu2 }
 0x9a0   :  { %v1911_v18 = vmul.f32 %v11026_v17, %v1901_v1 }
 0x9a1   :  { %v1806_v19 = vpop.f32.mrf.mxu0 }
 0x9a2   :  { %9195 = vmatmul.msk.f32.gmra.mxu1 %vm361_vm15, %v11014_v56  ;;  %v1915_v23 = vadd.f32 %v1911_v18, %v1866_v14 }
 0x9a4   :  { %9202 = vmatpush.xpose.msk.msrb.mxu3 %vm361_vm15, %v1915_v23 }
 0x9a7   :  { %v1904_v26 = vpop.f32.mrf.mxu2 }
 0x9a8   :  { %9203 = vmatpush.xpose.msk.msrb.mxu3 %vm361_vm15, %v1914_v6  ;;  %v1912_v8 = vmul.f32 %v11052_v43, %v1904_v26 }
 0x9a9   :  { %v1809_v27 = vpop.f32.mrf.mxu0 }
 0x9aa   :  { %9196 = vmatmul.msk.f32.gmra.mxu1 %vm361_vm15, %v11017_v59  ;;  %2137 = vmatpush.msrb.mxu0 %v1809_v27  ;;  %v1916_v38 = vadd.f32 %v1912_v8, %v1867_v39  ;;  %v9273_v8 = vld [vmem:[%s10437_s28 + $0xa8] sm:$0xff] }
 0x9ac   :  { %2138 = vmatpush.msrb.mxu0 %v1806_v19 }
 0x9af   :  { %v1907_v28 = vpop.f32.mrf.mxu2 }
 0x9b0   :  { %v1913_v44 = vmul.f32 %v11048_v33, %v1907_v28  ;;  %v9275_v28 = vld [vmem:[%s10437_s28 + $0xb8] sm:$0xff] }
 0x9b1   :  { %2699 = vmatpush.msrb.mxu2 %v9275_v28 }
 0x9b2   :  { %v1917_v37 = vadd.f32 %v1913_v44, %v1868_v30  ;;  %v9274_v30 = vld [vmem:[%s10437_s28 + $0xb0] sm:$0xff] }
 0x9b3   :  { %2700 = vmatpush.msrb.mxu2 %v9274_v30 }
 0x9b4   :  { %9208 = vmatpush.xpose.msk.msra.mxu3 %vm361_vm15, %v1917_v37  ;;  %v9272_v37 = vld [vmem:[%s10437_s28 + $0xa0] sm:$0xff] }
 0x9b5   :  { %2701 = vmatpush.msrb.mxu2 %v9273_v8 }
 0x9b7   :  { %2702 = vmatpush.msrb.mxu2 %v9272_v37 }
 0x9b8   :  { %9209 = vmatpush.xpose.msk.msra.mxu3 %vm361_vm15, %v1916_v38 }
 0x9e5   :  { %v11061_v2 = vpop.f32.mrf.mxu1 }
 0x9ed   :  { %v11063_v40 = vpop.f32.mrf.mxu1 }
 0x9ff   :  { %v11065_v36 = vpop.f32.mrf.mxu1 }
 0xa07   :  { %v11067_v34 = vpop.f32.mrf.mxu1 }
 0xa0f   :  { %v1845_v41 = vpop.f32.mrf.mxu1 }
 0xa10   :  { %v1857_v45 = vmul.f32 %v11032_v20, %v1845_v41 }
 0xa12   :  { %v1861_v46 = vadd.f32 %v1857_v45, %v1812_v42 }
 0xa14   :  { %9204 = vmatmul.msk.f32.vlgmr.msrb.gmra.mxu3 %vm361_vm15, %v1861_v46 }
 0xa15   :  { %2247 = vmatpush.msrb.mxu3 %v9231_v47 }
 0xa17   :  { %v1848_v48 = vpop.f32.mrf.mxu1  ;;  %2248 = vmatpush.msrb.mxu3 %v9230_v49  ;;  %v11117_v49 = vpop.f32.mrf.mxu2 }
 0xa18   :  { %v1858_v51 = vmul.f32 %v11026_v17, %v1848_v48 }
 0xa19   :  { %2249 = vmatpush.msrb.mxu3 %v9229_v35 }
 0xa1a   :  { %v1862_v3 = vadd.f32 %v1858_v51, %v1813_v50 }
 0xa1b   :  { %2250 = vmatpush.msrb.mxu3 %v9228_v9 }
 0xa1c   :  { %9205 = vmatmul.msk.f32.gmra.mxu3 %vm361_vm15, %v1862_v3 }
 0xa1f   :  { %v1851_v54 = vpop.f32.mrf.mxu1 }
 0xa20   :  { %v1859_v58 = vmul.f32 %v11052_v43, %v1851_v54  ;;  %v11123_v54 = vpop.f32.mrf.mxu2 }
 0xa22   :  { %v1863_v62 = vadd.f32 %v1859_v58, %v1814_v55 }
 0xa24   :  { %9210 = vmatmul.msk.f32.vlgmr.msra.gmra.mxu3 %vm361_vm15, %v1863_v62 }
 0xa27   :  { %v1854_v10 = vpop.f32.mrf.mxu1 }
 0xa28   :  { %v1860_v11 = vmul.f32 %v11048_v33, %v1854_v10 }
 0xa2a   :  { %v1864_v1 = vadd.f32 %v1860_v11, %v1815_v52 }
 0xa2c   :  { %9211 = vmatmul.msk.f32.gmra.mxu3 %vm361_vm15, %v1864_v1 }
 0xa34   :  { %9232 = vmatmul.msk.f32.vlgmr.msrb.gmra.mxu3 %vm167_vm0, %v10596_v4 }
 0xa3c   :  { %9233 = vmatmul.msk.f32.gmra.mxu3 %vm167_vm0, %v10606_v15 }
 0xa44   :  { %9234 = vmatmul.msk.f32.gmra.mxu3 %vm167_vm0, %v10615_v5 }
 0xa4c   :  { %9235 = vmatmul.msk.f32.gmra.mxu3 %vm167_vm0, %v10624_v22 }
 0xa97   :  { %v1947_v56 = vpop.f32.mrf.mxu3 }
 0xa98   :  { %v1953_v59 = vmul.f32 0.5, %v1947_v56  ;;  %v11131_v56 = vpop.f32.mrf.mxu2 }
 0xa9a   :  { %v1955_v14 = vsel %vm505_vm1, %v1953_v59, -inf }
 0xa9b   :  { %1956 = vmax.xlane.f32.xlu1 %v1955_v14 }
 0xa9f   :  { %v1950_v18 = vpop.f32.mrf.mxu3 }
 0xaa0   :  { %v1954_v19 = vmul.f32 0.5, %v1950_v18 }
 0xaa2   :  { %v1958_v21 = vsel %vm505_vm1, %v1954_v19, -inf }
 0xaa3   :  { %1959 = vmax.xlane.f32.xlu2 %v1958_v21  ;;  %v11139_v21 = vpop.f32.mrf.mxu2 }
 0xaa7   :  { %v2061_v23 = vpop.f32.mrf.mxu3 }
 0xaa8   :  { %v2067_v25 = vmul.f32 0.5, %v2061_v23 }
 0xaaa   :  { %v2069_v6 = vsel %vm505_vm1, %v2067_v25, -inf }
 0xaab   :  { %2070 = vmax.xlane.f32.xlu0 %v2069_v6 }
 0xaaf   :  { %v2064_v26 = vpop.f32.mrf.mxu3 }
 0xab0   :  { %v2068_v27 = vmul.f32 0.5, %v2064_v26 }
 0xab2   :  { %v2072_v44 = vsel %vm505_vm1, %v2068_v27, -inf }
 0xab3   :  { %2073 = vmax.xlane.f32.xlu1 %v2072_v44 }
 0xab7   :  { %v2252_v39 = vpop.f32.mrf.mxu3 }
 0xab8   :  { %9250 = vmatmul.msk.f32.vlgmr.msra.gmra.mxu2 %vm361_vm15, %v2252_v39  ;;  %v2351_v30 = vmul.f32 %v11036_v24, %v2252_v39 }
 0xab9   :  { %9301 = vmatpush.msk.msra.mxu2 %vm374_vm14, %v10960_v60 }
 0xabf   :  { %v2255_v38 = vpop.f32.mrf.mxu3 }
 0xac0   :  { %9251 = vmatmul.msk.f32.gmra.mxu2 %vm361_vm15, %v2255_v38  ;;  %v2352_v6 = vmul.f32 %v11022_v12, %v2255_v38 }
 0xac7   :  { %v2258_v41 = vpop.f32.mrf.mxu3 }
 0xac8   :  { %9252 = vmatmul.msk.f32.gmra.mxu2 %vm361_vm15, %v2258_v41 }
 0xacf   :  { %v2261_v42 = vpop.f32.mrf.mxu3 }
 0xad0   :  { %9253 = vmatmul.msk.f32.gmra.mxu2 %vm361_vm15, %v2261_v42 }
 0xad8   :  { %9276 = vmatmul.msk.f32.vlgmr.msrb.gmra.mxu2 %vm167_vm0, %v10596_v4 }
 0xae0   :  { %9277 = vmatmul.msk.f32.gmra.mxu2 %vm167_vm0, %v10606_v15 }
 0xae8   :  { %9278 = vmatmul.msk.f32.gmra.mxu2 %vm167_vm0, %v10615_v5 }
 0xaf0   :  { %9279 = vmatmul.msk.f32.gmra.mxu2 %vm167_vm0, %v10624_v22 }
 0xb0e   :  { %v1957_v45 = vpop.xlane.xlu1 %1956 }
 0xb0f   :  { %v1961_v46 = vsub.f32 %v1953_v59, %v1957_v45  ;;  %v2354_v45 = vmul.f32 %v11044_v29, %v2261_v42 }
 0xb11   :  { %v1963_v47 = vmul.f32 1.442695, %v1961_v46 }
 0xb13   :  { %9949 = vpow2.f32 %v1963_v47 }
 0xb16   :  { %v1960_v35 = vpop.xlane.xlu2 %1959 }
 0xb17   :  { %v1962_v48 = vsub.f32 %v1954_v19, %v1960_v35  ;;  %v2353_v35 = vmul.f32 %v11056_v32, %v2258_v41 }
 0xb19   :  { %v11119_v50 = vpop.eup %9949  ;;  %v1965_v51 = vmul.f32 1.442695, %v1962_v48 }
 0xb1a   :  { %v1967_v9 = vsel %vm505_vm1, %v11119_v50, 0.0 }
 0xb1b   :  { %9951 = vpow2.f32 %v1965_v51  ;;  %1968 = vadd.xlane.f32.xlu2 %v1967_v9 }
 0xb1e   :  { %v2071_v3 = vpop.xlane.xlu0 %2070 }
 0xb1f   :  { %v2075_v55 = vsub.f32 %v2067_v25, %v2071_v3 }
 0xb21   :  { %v11125_v58 = vpop.eup %9951  ;;  %v2077_v62 = vmul.f32 1.442695, %v2075_v55 }
 0xb22   :  { %v1970_v10 = vsel %vm505_vm1, %v11125_v58, 0.0 }
 0xb23   :  { %9953 = vpow2.f32 %v2077_v62  ;;  %1971 = vadd.xlane.f32.xlu0 %v1970_v10 }
 0xb26   :  { %v2074_v52 = vpop.xlane.xlu1 %2073 }
 0xb27   :  { %v2076_v11 = vsub.f32 %v2068_v27, %v2074_v52 }
 0xb29   :  { %v11129_v1 = vpop.eup %9953  ;;  %v2079_v59 = vmul.f32 1.442695, %v2076_v11 }
 0xb2a   :  { %v2081_v14 = vsel %vm505_vm1, %v11129_v1, 0.0 }
 0xb2b   :  { %9955 = vpow2.f32 %v2079_v59  ;;  %2082 = vadd.xlane.f32.xlu1 %v2081_v14 }
 0xb31   :  { %v11135_v18 = vpop.eup %9955 }
 0xb32   :  { %v2084_v19 = vsel %vm505_vm1, %v11135_v18, 0.0 }
 0xb33   :  { %2085 = vadd.xlane.f32.xlu2 %v2084_v19 }
 0xb3b   :  { %v2384_v23 = vpop.f32.mrf.mxu2 }
 0xb3c   :  { %v2396_v27 = vmul.f32 %v11032_v20, %v2384_v23 }
 0xb3e   :  { %v2400_v44 = vadd.f32 %v2396_v27, %v2351_v30  ;;  %v9238_v30 = vld [vmem:[%s10447_s11 + $0x90] sm:$0xff] }
 0xb43   :  { %v2387_v25 = vpop.f32.mrf.mxu2 }
 0xb44   :  { %v2397_v26 = vmul.f32 %v11026_v17, %v2387_v25 }
 0xb46   :  { %v2401_v28 = vadd.f32 %v2397_v26, %v2352_v6  ;;  %v9239_v26 = vld [vmem:[%s10447_s11 + $0x98] sm:$0xff] }
 0xb48   :  { %9254 = vmatpush.xpose.msk.msra.mxu3 %vm361_vm15, %v2401_v28 }
 0xb4b   :  { %v2390_v8 = vpop.f32.mrf.mxu2 }
 0xb4c   :  { %9255 = vmatpush.xpose.msk.msra.mxu3 %vm361_vm15, %v2400_v44  ;;  %v2398_v38 = vmul.f32 %v11052_v43, %v2390_v8 }
 0xb4e   :  { %v2402_v48 = vadd.f32 %v2398_v38, %v2353_v35  ;;  %v9236_v35 = vld [vmem:[%s10447_s11 + $0x80] sm:$0xff] }
 0xb53   :  { %v2393_v37 = vpop.f32.mrf.mxu2 }
 0xb54   :  { %v2399_v46 = vmul.f32 %v11048_v33, %v2393_v37  ;;  %v9237_v37 = vld [vmem:[%s10447_s11 + $0x88] sm:$0xff] }
 0xb56   :  { %v2403_v47 = vadd.f32 %v2399_v46, %v2354_v45 }
 0xb58   :  { %9260 = vmatpush.xpose.msk.msrb.mxu3 %vm361_vm15, %v2403_v47 }
 0xb5c   :  { %9261 = vmatpush.xpose.msk.msrb.mxu3 %vm361_vm15, %v2402_v48 }
 0xb8e   :  { %v1969_v39 = vpop.xlane.xlu2 %1968 }
 0xb8f   :  { %9957 = vrcp.f32 %v1969_v39  ;;  %v1984_v42 = vand.u32 2147483648, %v1969_v39  ;;  %v1982_v10 = vand.u32 2147483647, %v1969_v39  ;;  %vm1978_vm3 = vweird.f32 %v1969_v39 }
 0xb91   :  { %v1985_v11 = vor.u32 1.1754944e-38, %v1984_v42  ;;  %vm1983_vm5 = vcmp.eq.f32.partialorder %v1982_v10, 8.507059e+37 }
 0xb95   :  { %v9958_v51 = vpop.eup %9957 }
 0xb96   :  { %v1974_v9 = vmul.f32 %v9958_v51, %v1969_v39  ;;  %v1972_v3 = vpop.xlane.xlu0 %1971  ;;  %vm1979_vm2 = vweird.f32 %v9958_v51 }
 0xb97   :  { %9959 = vrcp.f32 %v1972_v3  ;;  %vm1980_vm4 = vmor %vm1978_vm3, %vm1979_vm2  ;;  %v1999_v28 = vand.u32 2147483648, %v1972_v3  ;;  %v1997_v44 = vand.u32 2147483647, %v1972_v3  ;;  %vm1993_vm7 = vweird.f32 %v1972_v3 }
 0xb98   :  { %v1975_v55 = vsub.f32 1.0, %v1974_v9 }
 0xb99   :  { %v2000_v46 = vor.u32 1.1754944e-38, %v1999_v28  ;;  %vm1998_vm9 = vcmp.eq.f32.partialorder %v1997_v44, 8.507059e+37 }
 0xb9a   :  { %v1976_v62 = vmul.f32 %v9958_v51, %v1975_v55 }
 0xb9c   :  { %v1977_v52 = vadd.f32 %v9958_v51, %v1976_v62 }
 0xb9d   :  { %v9960_v41 = vpop.eup %9959 }
 0xb9e   :  { %v1981_v59 = vsel %vm1980_vm4, %v9958_v51, %v1977_v52  ;;  %v1989_v14 = vmul.f32 %v9960_v41, %v1972_v3  ;;  %v2083_v19 = vpop.xlane.xlu1 %2082  ;;  %vm1994_vm6 = vweird.f32 %v9960_v41 }
 0xb9f   :  { %v1986_v23 = vsel %vm1983_vm5, %v1985_v11, %v1981_v59  ;;  %9961 = vrcp.f32 %v2083_v19  ;;  %vm1995_vm8 = vmor %vm1993_vm7, %vm1994_vm6  ;;  %v2098_v51 = vand.u32 2147483648, %v2083_v19  ;;  %v2096_v3 = vand.u32 2147483647, %v2083_v19 }
 0xba0   :  { %v1987_v25 = vmul.f32 %v11119_v50, %v1986_v23  ;;  %v1990_v6 = vsub.f32 1.0, %v1989_v14  ;;  %vm2092_vm11 = vweird.f32 %v2083_v19 }
 0xba1   :  { %v2099_v10 = vor.u32 1.1754944e-38, %v2098_v51  ;;  %vm2097_vm13 = vcmp.eq.f32.partialorder %v2096_v3, 8.507059e+37  ;;  %v2298_v51 = vmul.f32 %v11036_v24, %v11117_v49  ;;  %v9283_v3 = vld [vmem:[%s10442_s4 + $0xb8] sm:$0xff] }
 0xba2   :  { %v1991_v27 = vmul.f32 %v9960_v41, %v1990_v6  ;;  %9206 = vmatmul.msk.f32.vlgmr.msra.gmra.mxu0 %vm505_vm1, %v1987_v25 }
 0xba3   :  { %2281 = vmatpush.msra.mxu0 %v9239_v26 }
 0xba4   :  { %v1992_v8 = vadd.f32 %v9960_v41, %v1991_v27 }
 0xba5   :  { %v9962_v45 = vpop.eup %9961  ;;  %2282 = vmatpush.msra.mxu0 %v9238_v30 }
 0xba6   :  { %v2088_v38 = vmul.f32 %v9962_v45, %v2083_v19  ;;  %v2086_v50 = vpop.xlane.xlu2 %2085  ;;  %v1996_v47 = vsel %vm1995_vm8, %v9960_v41, %v1992_v8  ;;  %vm2093_vm10 = vweird.f32 %v9962_v45 }
 0xba7   :  { %9963 = vrcp.f32 %v2086_v50  ;;  %2283 = vmatpush.msra.mxu0 %v9237_v37  ;;  %v2001_v39 = vsel %vm1998_vm9, %v2000_v46, %v1996_v47  ;;  %vm2094_vm12 = vmor %vm2092_vm11, %vm2093_vm10  ;;  %v2111_v25 = vand.u32 2147483647, %v2086_v50  ;;  %vm2107_vm3 = vweird.f32 %v2086_v50 }
 0xba8   :  { %v2089_v48 = vsub.f32 1.0, %v2088_v38  ;;  %v2002_v9 = vmul.f32 %v11125_v58, %v2001_v39  ;;  %v2113_v58 = vand.u32 2147483648, %v2086_v50 }
 0xba9   :  { %2284 = vmatpush.msra.mxu0 %v9236_v35  ;;  %vm2112_vm5 = vcmp.eq.f32.partialorder %v2111_v25, 8.507059e+37 }
 0xbaa   :  { %v2090_v55 = vmul.f32 %v9962_v45, %v2089_v48  ;;  %9207 = vmatmul.msk.f32.gmra.mxu0 %vm505_vm1, %v2002_v9  ;;  %v2114_v19 = vor.u32 1.1754944e-38, %v2113_v58 }
 0xbac   :  { %v2091_v42 = vadd.f32 %v9962_v45, %v2090_v55 }
 0xbad   :  { %v9964_v62 = vpop.eup %9963 }
 0xbae   :  { %v2095_v52 = vsel %vm2094_vm12, %v9962_v45, %v2091_v42  ;;  %v2103_v41 = vmul.f32 %v9964_v62, %v2086_v50  ;;  %vm2108_vm2 = vweird.f32 %v9964_v62  ;;  %v9282_v42 = vld [vmem:[%s10442_s4 + $0xb0] sm:$0xff] }
 0xbaf   :  { %v2100_v11 = vsel %vm2097_vm13, %v2099_v10, %v2095_v52  ;;  %vm2109_vm4 = vmor %vm2107_vm3, %vm2108_vm2  ;;  %v2299_v52 = vmul.f32 %v11022_v12, %v11123_v54 }
 0xbb0   :  { %v2101_v59 = vmul.f32 %v11129_v1, %v2100_v11  ;;  %v2104_v14 = vsub.f32 1.0, %v2103_v41  ;;  %v9214_v1 = vld [vmem:[%s10452_s18 + $0xc] sm:$0xf]  ;;  %v9280_v11 = vld [vmem:[%s10442_s4 + $0xa0] sm:$0xff] }
 0xbb1   :  { %9215 = vmatpush.msk.msra.mxu1 %vm374_vm14, %v9214_v1 }
 0xbb2   :  { %v2105_v23 = vmul.f32 %v9964_v62, %v2104_v14  ;;  %9212 = vmatmul.msk.f32.vlgmr.msrb.gmra.mxu0 %vm505_vm1, %v2101_v59  ;;  %v2300_v14 = vmul.f32 %v11056_v32, %v11131_v56 }
 0xbb3   :  { %9244 = vmatpush.msk.msrb.mxu1 %vm374_vm14, %v10960_v60 }
 0xbb4   :  { %v2106_v6 = vadd.f32 %v9964_v62, %v2105_v23 }
 0xbb6   :  { %v2110_v26 = vsel %vm2109_vm4, %v9964_v62, %v2106_v6  ;;  %v9281_v62 = vld [vmem:[%s10442_s4 + $0xa8] sm:$0xff] }
 0xbb7   :  { %v2115_v27 = vsel %vm2112_vm5, %v2114_v19, %v2110_v26 }
 0xbb8   :  { %v2116_v28 = vmul.f32 %v11135_v18, %v2115_v27 }
 0xbba   :  { %9213 = vmatmul.msk.f32.gmra.mxu0 %vm505_vm1, %v2116_v28 }
 0xbc2   :  { %9240 = vmatmul.msk.f32.vlgmr.msra.gmra.mxu0 %vm167_vm0, %v10596_v4 }
 0xbca   :  { %9241 = vmatmul.msk.f32.gmra.mxu0 %vm167_vm0, %v10606_v15 }
 0xbd2   :  { %9242 = vmatmul.msk.f32.gmra.mxu0 %vm167_vm0, %v10615_v5 }
 0xbda   :  { %9243 = vmatmul.msk.f32.gmra.mxu0 %vm167_vm0, %v10624_v22 }
 0xc1f   :  { %v2026_v18 = vpop.f32.mrf.mxu0 }
 0xc20   :  { %9216 = vmatmul.msk.f32.vlgmr.msra.gmra.mxu1 %vm361_vm15, %v2026_v18 }
 0xc27   :  { %v2029_v30 = vpop.f32.mrf.mxu0 }
 0xc28   :  { %9217 = vmatmul.msk.f32.gmra.mxu1 %vm361_vm15, %v2029_v30 }
 0xc2f   :  { %v2140_v44 = vpop.f32.mrf.mxu0 }
 0xc30   :  { %9218 = vmatmul.msk.f32.gmra.mxu1 %vm361_vm15, %v2140_v44 }
 0xc37   :  { %v2143_v8 = vpop.f32.mrf.mxu0 }
 0xc38   :  { %9219 = vmatmul.msk.f32.gmra.mxu1 %vm361_vm15, %v2143_v8 }
 0xc3f   :  { %v2286_v37 = vpop.f32.mrf.mxu0 }
 0xc40   :  { %9245 = vmatmul.msk.f32.vlgmr.msrb.gmra.mxu1 %vm361_vm15, %v11117_v49 }
 0xc47   :  { %v2289_v45 = vpop.f32.mrf.mxu0 }
 0xc48   :  { %9246 = vmatmul.msk.f32.gmra.mxu1 %vm361_vm15, %v11123_v54  ;;  %2509 = vmatpush.msrb.mxu0 %v2289_v45  ;;  %v2301_v54 = vmul.f32 %v11044_v29, %v11139_v21  ;;  %v9327_v45 = vld [vmem:[%s10437_s28 + $0xd8] sm:$0xff] }
 0xc49   :  { %3185 = vmatpush.msrb.mxu2 %v9327_v45 }
 0xc4a   :  { %2510 = vmatpush.msrb.mxu0 %v2286_v37 }
 0xc4f   :  { %v2292_v46 = vpop.f32.mrf.mxu0 }
 0xc50   :  { %9247 = vmatmul.msk.f32.gmra.mxu1 %vm361_vm15, %v11131_v56 }
 0xc57   :  { %v2295_v38 = vpop.f32.mrf.mxu0 }
 0xc58   :  { %9248 = vmatmul.msk.f32.gmra.mxu1 %vm361_vm15, %v11139_v21  ;;  %2623 = vmatpush.msra.mxu0 %v2295_v38 }
 0xc5a   :  { %2624 = vmatpush.msra.mxu0 %v2292_v46  ;;  %v9326_v46 = vld [vmem:[%s10437_s28 + $0xd0] sm:$0xff] }
 0xc5b   :  { %3186 = vmatpush.msrb.mxu2 %v9326_v46 }
 0xc9d   :  { %v11189_v50 = vpop.f32.mrf.mxu1 }
 0xca5   :  { %v11191_v47 = vpop.f32.mrf.mxu1 }
 0xcad   :  { %v11193_v35 = vpop.f32.mrf.mxu1 }
 0xcb5   :  { %v11195_v48 = vpop.f32.mrf.mxu1 }
 0xcbd   :  { %v2331_v39 = vpop.f32.mrf.mxu1 }
 0xcbe   :  { %v2343_v9 = vmul.f32 %v11032_v20, %v2331_v39  ;;  %v9325_v39 = vld [vmem:[%s10437_s28 + $0xc8] sm:$0xff] }
 0xcbf   :  { %3187 = vmatpush.msrb.mxu2 %v9325_v39 }
 0xcc0   :  { %v2347_v55 = vadd.f32 %v2343_v9, %v2298_v51  ;;  %v9324_v51 = vld [vmem:[%s10437_s28 + $0xc0] sm:$0xff] }
 0xcc1   :  { %3188 = vmatpush.msrb.mxu2 %v9324_v51 }
 0xcc2   :  { %9256 = vmatmul.msk.f32.vlgmr.msra.gmra.mxu3 %vm361_vm15, %v2347_v55 }
 0xcc3   :  { %2733 = vmatpush.msra.mxu3 %v9283_v3 }
 0xcc5   :  { %v2334_v10 = vpop.f32.mrf.mxu1  ;;  %2734 = vmatpush.msra.mxu3 %v9282_v42 }
 0xcc6   :  { %v2344_v41 = vmul.f32 %v11026_v17, %v2334_v10 }
 0xcc7   :  { %2735 = vmatpush.msra.mxu3 %v9281_v62 }
 0xcc8   :  { %v2348_v59 = vadd.f32 %v2344_v41, %v2299_v52  ;;  %v11247_v52 = vpop.f32.mrf.mxu2 }
 0xcc9   :  { %2736 = vmatpush.msra.mxu3 %v9280_v11 }
 0xcca   :  { %9257 = vmatmul.msk.f32.gmra.mxu3 %vm361_vm15, %v2348_v59 }
 0xccd   :  { %v2337_v49 = vpop.f32.mrf.mxu1 }
 0xcce   :  { %v2345_v58 = vmul.f32 %v11052_v43, %v2337_v49 }
 0xcd0   :  { %v2349_v23 = vadd.f32 %v2345_v58, %v2300_v14 }
 0xcd2   :  { %9262 = vmatmul.msk.f32.vlgmr.msrb.gmra.mxu3 %vm361_vm15, %v2349_v23  ;;  %v11253_v23 = vpop.f32.mrf.mxu2 }
 0xcd5   :  { %v2340_v25 = vpop.f32.mrf.mxu1 }
 0xcd6   :  { %v2346_v6 = vmul.f32 %v11048_v33, %v2340_v25 }
 0xcd8   :  { %v2350_v19 = vadd.f32 %v2346_v6, %v2301_v54 }
 0xcda   :  { %9263 = vmatmul.msk.f32.gmra.mxu3 %vm361_vm15, %v2350_v19 }
 0xce2   :  { %9284 = vmatmul.msk.f32.vlgmr.msra.gmra.mxu3 %vm167_vm0, %v10596_v4 }
 0xcea   :  { %9285 = vmatmul.msk.f32.gmra.mxu3 %vm167_vm0, %v10606_v15 }
 0xcf2   :  { %9286 = vmatmul.msk.f32.gmra.mxu3 %vm167_vm0, %v10615_v5 }
 0xcfa   :  { %9287 = vmatmul.msk.f32.gmra.mxu3 %vm167_vm0, %v10624_v22 }
 0xd45   :  { %v2433_v56 = vpop.f32.mrf.mxu3 }
 0xd46   :  { %v2439_v21 = vmul.f32 0.5, %v2433_v56 }
 0xd48   :  { %v2441_v26 = vsel %vm505_vm1, %v2439_v21, -inf }
 0xd49   :  { %2442 = vmax.xlane.f32.xlu0 %v2441_v26 }
 0xd4d   :  { %v2436_v27 = vpop.f32.mrf.mxu3 }
 0xd4e   :  { %v2440_v28 = vmul.f32 0.5, %v2436_v27  ;;  %v11261_v27 = vpop.f32.mrf.mxu2 }
 0xd50   :  { %v2444_v1 = vsel %vm505_vm1, %v2440_v28, -inf }
 0xd51   :  { %2445 = vmax.xlane.f32.xlu1 %v2444_v1 }
 0xd55   :  { %v2547_v18 = vpop.f32.mrf.mxu3 }
 0xd56   :  { %v2553_v30 = vmul.f32 0.5, %v2547_v18 }
 0xd58   :  { %v2555_v44 = vsel %vm505_vm1, %v2553_v30, -inf }
 0xd59   :  { %2556 = vmax.xlane.f32.xlu2 %v2555_v44  ;;  %v11269_v44 = vpop.f32.mrf.mxu2 }
 0xd5d   :  { %v2550_v8 = vpop.f32.mrf.mxu3 }
 0xd5e   :  { %v2554_v37 = vmul.f32 0.5, %v2550_v8 }
 0xd60   :  { %v2558_v38 = vsel %vm505_vm1, %v2554_v37, -inf }
 0xd61   :  { %2559 = vmax.xlane.f32.xlu0 %v2558_v38 }
 0xd65   :  { %v2738_v9 = vpop.f32.mrf.mxu3 }
 0xd66   :  { %9302 = vmatmul.msk.f32.vlgmr.msra.gmra.mxu2 %vm361_vm15, %v2738_v9  ;;  %v2837_v51 = vmul.f32 %v11036_v24, %v2738_v9 }
 0xd67   :  { %9353 = vmatpush.msk.msra.mxu2 %vm374_vm14, %v10960_v60 }
 0xd6d   :  { %v2741_v55 = vpop.f32.mrf.mxu3 }
 0xd6e   :  { %9303 = vmatmul.msk.f32.gmra.mxu2 %vm361_vm15, %v2741_v55  ;;  %v2838_v45 = vmul.f32 %v11022_v12, %v2741_v55 }
 0xd75   :  { %v2744_v3 = vpop.f32.mrf.mxu3 }
 0xd76   :  { %9304 = vmatmul.msk.f32.gmra.mxu2 %vm361_vm15, %v2744_v3 }
 0xd7d   :  { %v2747_v42 = vpop.f32.mrf.mxu3 }
 0xd7e   :  { %9305 = vmatmul.msk.f32.gmra.mxu2 %vm361_vm15, %v2747_v42 }
 0xd86   :  { %9328 = vmatmul.msk.f32.vlgmr.msrb.gmra.mxu2 %vm167_vm0, %v10596_v4 }
 0xd8e   :  { %9329 = vmatmul.msk.f32.gmra.mxu2 %vm167_vm0, %v10606_v15 }
 0xd96   :  { %9330 = vmatmul.msk.f32.gmra.mxu2 %vm167_vm0, %v10615_v5 }
 0xd9e   :  { %9331 = vmatmul.msk.f32.gmra.mxu2 %vm167_vm0, %v10624_v22 }
 0xdbc   :  { %v2443_v60 = vpop.xlane.xlu0 %2442 }
 0xdbd   :  { %v2447_v62 = vsub.f32 %v2439_v21, %v2443_v60 }
 0xdbf   :  { %v2449_v10 = vmul.f32 1.442695, %v2447_v62 }
 0xdc1   :  { %9965 = vpow2.f32 %v2449_v10 }
 0xdc4   :  { %v2446_v41 = vpop.xlane.xlu1 %2445 }
 0xdc5   :  { %v2448_v11 = vsub.f32 %v2440_v28, %v2446_v41  ;;  %v2840_v41 = vmul.f32 %v11044_v29, %v2747_v42 }
 0xdc7   :  { %v11249_v59 = vpop.eup %9965  ;;  %v2451_v49 = vmul.f32 1.442695, %v2448_v11 }
 0xdc8   :  { %v2453_v14 = vsel %vm505_vm1, %v11249_v59, 0.0 }
 0xdc9   :  { %9967 = vpow2.f32 %v2451_v49  ;;  %2454 = vadd.xlane.f32.xlu1 %v2453_v14  ;;  %v2839_v14 = vmul.f32 %v11056_v32, %v2744_v3 }
 0xdcc   :  { %v2557_v58 = vpop.xlane.xlu2 %2556 }
 0xdcd   :  { %v2561_v25 = vsub.f32 %v2553_v30, %v2557_v58 }
 0xdcf   :  { %v11255_v54 = vpop.eup %9967  ;;  %v2563_v6 = vmul.f32 1.442695, %v2561_v25 }
 0xdd0   :  { %v2456_v19 = vsel %vm505_vm1, %v11255_v54, 0.0 }
 0xdd1   :  { %9969 = vpow2.f32 %v2563_v6  ;;  %2457 = vadd.xlane.f32.xlu2 %v2456_v19 }
 0xdd4   :  { %v2560_v56 = vpop.xlane.xlu0 %2559 }
 0xdd5   :  { %v2562_v21 = vsub.f32 %v2554_v37, %v2560_v56 }
 0xdd7   :  { %v11259_v26 = vpop.eup %9969  ;;  %v2565_v28 = vmul.f32 1.442695, %v2562_v21 }
 0xdd8   :  { %v2567_v1 = vsel %vm505_vm1, %v11259_v26, 0.0 }
 0xdd9   :  { %9971 = vpow2.f32 %v2565_v28  ;;  %2568 = vadd.xlane.f32.xlu0 %v2567_v1 }
 0xddf   :  { %v11265_v18 = vpop.eup %9971 }
 0xde0   :  { %v2570_v30 = vsel %vm505_vm1, %v11265_v18, 0.0 }
 0xde1   :  { %2571 = vadd.xlane.f32.xlu1 %v2570_v30 }
 0xde9   :  { %v2870_v8 = vpop.f32.mrf.mxu2 }
 0xdea   :  { %v2882_v38 = vmul.f32 %v11032_v20, %v2870_v8 }
 0xdec   :  { %v2886_v60 = vadd.f32 %v2882_v38, %v2837_v51  ;;  %v9291_v51 = vld [vmem:[%s10447_s11 + $0xb8] sm:$0xff] }
 0xdf1   :  { %v2873_v37 = vpop.f32.mrf.mxu2 }
 0xdf2   :  { %v2883_v46 = vmul.f32 %v11026_v17, %v2873_v37 }
 0xdf4   :  { %v2887_v39 = vadd.f32 %v2883_v46, %v2838_v45 }
 0xdf6   :  { %9306 = vmatpush.xpose.msk.msrb.mxu3 %vm361_vm15, %v2887_v39 }
 0xdf9   :  { %v2876_v62 = vpop.f32.mrf.mxu2 }
 0xdfa   :  { %9307 = vmatpush.xpose.msk.msrb.mxu3 %vm361_vm15, %v2886_v60  ;;  %v2884_v55 = vmul.f32 %v11052_v43, %v2876_v62 }
 0xdfc   :  { %v2888_v58 = vadd.f32 %v2884_v55, %v2839_v14  ;;  %v9289_v55 = vld [vmem:[%s10447_s11 + $0xa8] sm:$0xff] }
 0xe01   :  { %v2879_v10 = vpop.f32.mrf.mxu2 }
 0xe02   :  { %v2885_v11 = vmul.f32 %v11048_v33, %v2879_v10  ;;  %v9290_v10 = vld [vmem:[%s10447_s11 + $0xb0] sm:$0xff] }
 0xe04   :  { %v2889_v49 = vadd.f32 %v2885_v11, %v2840_v41 }
 0xe06   :  { %9312 = vmatpush.xpose.msk.msra.mxu3 %vm361_vm15, %v2889_v49 }
 0xe0a   :  { %9313 = vmatpush.xpose.msk.msra.mxu3 %vm361_vm15, %v2888_v58 }
 0xe3c   :  { %v2455_v9 = vpop.xlane.xlu1 %2454 }
 0xe3d   :  { %9973 = vrcp.f32 %v2455_v9  ;;  %v2470_v42 = vand.u32 2147483648, %v2455_v9  ;;  %v2468_v28 = vand.u32 2147483647, %v2455_v9  ;;  %vm2464_vm7 = vweird.f32 %v2455_v9 }
 0xe3f   :  { %v2471_v30 = vor.u32 1.1754944e-38, %v2470_v42  ;;  %vm2469_vm9 = vcmp.eq.f32.partialorder %v2468_v28, 8.507059e+37 }
 0xe43   :  { %v9974_v25 = vpop.eup %9973 }
 0xe44   :  { %v2460_v6 = vmul.f32 %v9974_v25, %v2455_v9  ;;  %v2458_v19 = vpop.xlane.xlu2 %2457  ;;  %vm2465_vm6 = vweird.f32 %v9974_v25 }
 0xe45   :  { %9975 = vrcp.f32 %v2458_v19  ;;  %vm2466_vm8 = vmor %vm2464_vm7, %vm2465_vm6  ;;  %v2485_v62 = vand.u32 2147483648, %v2458_v19  ;;  %v2483_v41 = vand.u32 2147483647, %v2458_v19  ;;  %vm2479_vm11 = vweird.f32 %v2458_v19 }
 0xe46   :  { %v2461_v56 = vsub.f32 1.0, %v2460_v6 }
 0xe47   :  { %v2486_v14 = vor.u32 1.1754944e-38, %v2485_v62  ;;  %vm2484_vm13 = vcmp.eq.f32.partialorder %v2483_v41, 8.507059e+37 }
 0xe48   :  { %v2462_v21 = vmul.f32 %v9974_v25, %v2461_v56 }
 0xe4a   :  { %v2463_v1 = vadd.f32 %v9974_v25, %v2462_v21 }
 0xe4b   :  { %v9976_v3 = vpop.eup %9975 }
 0xe4c   :  { %v2467_v8 = vsel %vm2466_vm8, %v9974_v25, %v2463_v1  ;;  %v2475_v37 = vmul.f32 %v9976_v3, %v2458_v19  ;;  %v2569_v45 = vpop.xlane.xlu0 %2568  ;;  %vm2480_vm10 = vweird.f32 %v9976_v3  ;;  %v9288_v25 = vld [vmem:[%s10447_s11 + $0xa0] sm:$0xff] }
 0xe4d   :  { %v2472_v46 = vsel %vm2469_vm9, %v2471_v30, %v2467_v8  ;;  %9977 = vrcp.f32 %v2569_v45  ;;  %vm2481_vm12 = vmor %vm2479_vm11, %vm2480_vm10  ;;  %v2584_v42 = vand.u32 2147483648, %v2569_v45  ;;  %v2582_v19 = vand.u32 2147483647, %v2569_v45 }
 0xe4e   :  { %v2473_v38 = vmul.f32 %v11249_v59, %v2472_v46  ;;  %v2476_v39 = vsub.f32 1.0, %v2475_v37  ;;  %vm2578_vm3 = vweird.f32 %v2569_v45 }
 0xe4f   :  { %vm2583_vm5 = vcmp.eq.f32.partialorder %v2582_v19, 8.507059e+37 }
 0xe50   :  { %v2477_v60 = vmul.f32 %v9976_v3, %v2476_v39  ;;  %9258 = vmatmul.msk.f32.vlgmr.msrb.gmra.mxu0 %vm505_vm1, %v2473_v38 }
 0xe51   :  { %2767 = vmatpush.msrb.mxu0 %v9291_v51 }
 0xe52   :  { %v2478_v11 = vadd.f32 %v9976_v3, %v2477_v60 }
 0xe53   :  { %v9978_v49 = vpop.eup %9977  ;;  %2768 = vmatpush.msrb.mxu0 %v9290_v10 }
 0xe54   :  { %v2574_v58 = vmul.f32 %v9978_v49, %v2569_v45  ;;  %v2572_v59 = vpop.xlane.xlu1 %2571  ;;  %v2482_v9 = vsel %vm2481_vm12, %v9976_v3, %v2478_v11  ;;  %vm2579_vm2 = vweird.f32 %v9978_v49  ;;  %v2585_v3 = vor.u32 1.1754944e-38, %v2584_v42 }
 0xe55   :  { %9979 = vrcp.f32 %v2572_v59  ;;  %2769 = vmatpush.msrb.mxu0 %v9289_v55  ;;  %v2487_v56 = vsel %vm2484_vm13, %v2486_v14, %v2482_v9  ;;  %vm2580_vm4 = vmor %vm2578_vm3, %vm2579_vm2  ;;  %v2597_v60 = vand.u32 2147483647, %v2572_v59  ;;  %vm2593_vm7 = vweird.f32 %v2572_v59  ;;  %v11298_v55 = vld [vmem:[%s10412_s3] sm:$0xf] }
 0xe56   :  { %v2575_v6 = vsub.f32 1.0, %v2574_v58  ;;  %v2488_v21 = vmul.f32 %v11255_v54, %v2487_v56  ;;  %v2599_v54 = vand.u32 2147483648, %v2572_v59 }
 0xe57   :  { %2770 = vmatpush.msrb.mxu0 %v9288_v25  ;;  %vm2598_vm9 = vcmp.eq.f32.partialorder %v2597_v60, 8.507059e+37 }
 0xe58   :  { %v2576_v28 = vmul.f32 %v9978_v49, %v2575_v6  ;;  %9259 = vmatmul.msk.f32.gmra.mxu0 %vm505_vm1, %v2488_v21  ;;  %v2600_v45 = vor.u32 1.1754944e-38, %v2599_v54 }
 0xe5a   :  { %v2577_v1 = vadd.f32 %v9978_v49, %v2576_v28 }
 0xe5b   :  { %v9980_v30 = vpop.eup %9979 }
 0xe5c   :  { %v2581_v8 = vsel %vm2580_vm4, %v9978_v49, %v2577_v1  ;;  %v2589_v37 = vmul.f32 %v9980_v30, %v2572_v59  ;;  %vm2594_vm6 = vweird.f32 %v9980_v30  ;;  %v2784_v1 = vmul.f32 %v11036_v24, %v11247_v52 }
 0xe5d   :  { %v2586_v46 = vsel %vm2583_vm5, %v2585_v3, %v2581_v8  ;;  %vm2595_vm8 = vmor %vm2593_vm7, %vm2594_vm6  ;;  %v9335_v8 = vld [vmem:[%s10442_s4 + $0xd8] sm:$0xff]  ;;  %v2786_v24 = vmul.f32 %v11056_v32, %v11261_v27 }
 0xe5e   :  { %v2587_v38 = vmul.f32 %v11259_v26, %v2586_v46  ;;  %v2590_v39 = vsub.f32 1.0, %v2589_v37  ;;  %v9266_v26 = vld [vmem:[%s10452_s18 + $0x10] sm:$0xf]  ;;  %v9333_v46 = vld [vmem:[%s10442_s4 + $0xc8] sm:$0xff] }
 0xe5f   :  { %9267 = vmatpush.msk.msra.mxu1 %vm374_vm14, %v9266_v26  ;;  %v9334_v37 = vld [vmem:[%s10442_s4 + $0xd0] sm:$0xff] }
 0xe60   :  { %v2591_v51 = vmul.f32 %v9980_v30, %v2590_v39  ;;  %9264 = vmatmul.msk.f32.vlgmr.msra.gmra.mxu0 %vm505_vm1, %v2587_v38  ;;  %v2785_v39 = vmul.f32 %v11022_v12, %v11253_v23  ;;  %v2787_v12 = vmul.f32 %v11044_v29, %v11269_v44 }
 0xe61   :  { %9296 = vmatpush.msk.msrb.mxu1 %vm374_vm14, %v11298_v55 }
 0xe62   :  { %v2592_v62 = vadd.f32 %v9980_v30, %v2591_v51  ;;  %v9332_v51 = vld [vmem:[%s10442_s4 + $0xc0] sm:$0xff] }
 0xe64   :  { %v2596_v10 = vsel %vm2595_vm8, %v9980_v30, %v2592_v62 }
 0xe65   :  { %v2601_v41 = vsel %vm2598_vm9, %v2600_v45, %v2596_v10 }
 0xe66   :  { %v2602_v11 = vmul.f32 %v11265_v18, %v2601_v41 }
 0xe68   :  { %9265 = vmatmul.msk.f32.gmra.mxu0 %vm505_vm1, %v2602_v11 }
 0xe70   :  { %9292 = vmatmul.msk.f32.vlgmr.msrb.gmra.mxu0 %vm167_vm0, %v10596_v4 }
 0xe78   :  { %9293 = vmatmul.msk.f32.gmra.mxu0 %vm167_vm0, %v10606_v15 }
 0xe80   :  { %9294 = vmatmul.msk.f32.gmra.mxu0 %vm167_vm0, %v10615_v5 }
 0xe88   :  { %9295 = vmatmul.msk.f32.gmra.mxu0 %vm167_vm0, %v10624_v22 }
 0xecd   :  { %v2512_v18 = vpop.f32.mrf.mxu0 }
 0xece   :  { %9268 = vmatmul.msk.f32.vlgmr.msra.gmra.mxu1 %vm361_vm15, %v2512_v18 }
 0xed5   :  { %v2515_v49 = vpop.f32.mrf.mxu0 }
 0xed6   :  { %9269 = vmatmul.msk.f32.gmra.mxu1 %vm361_vm15, %v2515_v49  ;;  %v9379_v49 = vld [vmem:[%s10437_s28 + $0xf8] sm:$0xff] }
 0xed7   :  { %3671 = vmatpush.msrb.mxu2 %v9379_v49 }
 0xedd   :  { %v2626_v14 = vpop.f32.mrf.mxu0 }
 0xede   :  { %9270 = vmatmul.msk.f32.gmra.mxu1 %vm361_vm15, %v2626_v14  ;;  %v9378_v14 = vld [vmem:[%s10437_s28 + $0xf0] sm:$0xff] }
 0xedf   :  { %3672 = vmatpush.msrb.mxu2 %v9378_v14  ;;  %v11416_v14 = vld [vmem:[%s10407_s29] sm:$0xff] }
 0xee5   :  { %v2629_v58 = vpop.f32.mrf.mxu0 }
 0xee6   :  { %9271 = vmatmul.msk.f32.gmra.mxu1 %vm361_vm15, %v2629_v58 }
 0xeed   :  { %v2772_v59 = vpop.f32.mrf.mxu0 }
 0xeee   :  { %9297 = vmatmul.msk.f32.vlgmr.msrb.gmra.mxu1 %vm361_vm15, %v11247_v52 }
 0xef5   :  { %v2775_v9 = vpop.f32.mrf.mxu0 }
 0xef6   :  { %9298 = vmatmul.msk.f32.gmra.mxu1 %vm361_vm15, %v11253_v23  ;;  %2995 = vmatpush.msra.mxu0 %v2775_v9  ;;  %v9376_v9 = vld [vmem:[%s10437_s28 + $0xe0] sm:$0xff] }
 0xef8   :  { %2996 = vmatpush.msra.mxu0 %v2772_v59  ;;  %v9377_v59 = vld [vmem:[%s10437_s28 + $0xe8] sm:$0xff]  ;;  %s13385_s28 = sld [smem:[#allocation11_spill]] }
 0xef9   :  { %3673 = vmatpush.msrb.mxu2 %v9377_v59 }
 0xefb   :  { %3674 = vmatpush.msrb.mxu2 %v9376_v9  ;;  %v11420_v9 = vld [vmem:[%s10402_s25] sm:$0xff] }
 0xefd   :  { %v2778_v25 = vpop.f32.mrf.mxu0 }
 0xefe   :  { %9299 = vmatmul.msk.f32.gmra.mxu1 %vm361_vm15, %v11261_v27 }
 0xf05   :  { %v2781_v6 = vpop.f32.mrf.mxu0 }
 0xf06   :  { %9300 = vmatmul.msk.f32.gmra.mxu1 %vm361_vm15, %v11269_v44  ;;  %3109 = vmatpush.msrb.mxu0 %v2781_v6 }
 0xf08   :  { %3110 = vmatpush.msrb.mxu0 %v2778_v25 }
 0xf4b   :  { %v11322_v56 = vpop.f32.mrf.mxu1 }
 0xf53   :  { %v11324_v42 = vpop.f32.mrf.mxu1 }
 0xf5b   :  { %v11326_v21 = vpop.f32.mrf.mxu1 }
 0xf63   :  { %v11328_v28 = vpop.f32.mrf.mxu1 }
 0xf6b   :  { %v2817_v19 = vpop.f32.mrf.mxu1 }
 0xf6c   :  { %v2829_v30 = vmul.f32 %v11032_v20, %v2817_v19 }
 0xf6e   :  { %v2833_v3 = vadd.f32 %v2829_v30, %v2784_v1 }
 0xf70   :  { %9308 = vmatmul.msk.f32.vlgmr.msrb.gmra.mxu3 %vm361_vm15, %v2833_v3 }
 0xf71   :  { %3219 = vmatpush.msrb.mxu3 %v9335_v8 }
 0xf73   :  { %v2820_v38 = vpop.f32.mrf.mxu1  ;;  %3220 = vmatpush.msrb.mxu3 %v9334_v37  ;;  %v11383_v37 = vpop.f32.mrf.mxu2 }
 0xf74   :  { %v2830_v54 = vmul.f32 %v11026_v17, %v2820_v38 }
 0xf75   :  { %3221 = vmatpush.msrb.mxu3 %v9333_v46 }
 0xf76   :  { %v2834_v60 = vadd.f32 %v2830_v54, %v2785_v39 }
 0xf77   :  { %3222 = vmatpush.msrb.mxu3 %v9332_v51 }
 0xf78   :  { %9309 = vmatmul.msk.f32.gmra.mxu3 %vm361_vm15, %v2834_v60 }
 0xf7b   :  { %v2823_v20 = vpop.f32.mrf.mxu1 }
 0xf7c   :  { %v2831_v52 = vmul.f32 %v11052_v43, %v2823_v20  ;;  %v11389_v20 = vpop.f32.mrf.mxu2 }
 0xf7e   :  { %v2835_v62 = vadd.f32 %v2831_v52, %v2786_v24 }
 0xf80   :  { %9314 = vmatmul.msk.f32.vlgmr.msra.gmra.mxu3 %vm361_vm15, %v2835_v62 }
 0xf83   :  { %v2826_v45 = vpop.f32.mrf.mxu1 }
 0xf84   :  { %v2832_v17 = vmul.f32 %v11048_v33, %v2826_v45 }
 0xf86   :  { %v2836_v23 = vadd.f32 %v2832_v17, %v2787_v12 }
 0xf88   :  { %9315 = vmatmul.msk.f32.gmra.mxu3 %vm361_vm15, %v2836_v23 }
 0xf90   :  { %9336 = vmatmul.msk.f32.vlgmr.msrb.gmra.mxu3 %vm167_vm0, %v10596_v4 }
 0xf98   :  { %9337 = vmatmul.msk.f32.gmra.mxu3 %vm167_vm0, %v10606_v15 }
 0xfa0   :  { %9338 = vmatmul.msk.f32.gmra.mxu3 %vm167_vm0, %v10615_v5 }
 0xfa8   :  { %9339 = vmatmul.msk.f32.gmra.mxu3 %vm167_vm0, %v10624_v22 }
 0xff3   :  { %v2919_v29 = vpop.f32.mrf.mxu3 }
 0xff4   :  { %v2925_v43 = vmul.f32 0.5, %v2919_v29  ;;  %v11397_v29 = vpop.f32.mrf.mxu2 }
 0xff6   :  { %v2927_v33 = vsel %vm505_vm1, %v2925_v43, -inf }
 0xff7   :  { %2928 = vmax.xlane.f32.xlu2 %v2927_v33 }
 0xffb   :  { %v2922_v32 = vpop.f32.mrf.mxu3 }
 0xffc   :  { %v2926_v27 = vmul.f32 0.5, %v2922_v32 }
 0xffe   :  { %v2930_v44 = vsel %vm505_vm1, %v2926_v27, -inf }
 0xfff   :  { %2931 = vmax.xlane.f32.xlu0 %v2930_v44  ;;  %v11405_v44 = vpop.f32.mrf.mxu2 }
0x1003   :  { %v3033_v10 = vpop.f32.mrf.mxu3 }
0x1004   :  { %v3039_v41 = vmul.f32 0.5, %v3033_v10 }
0x1006   :  { %v3041_v11 = vsel %vm505_vm1, %v3039_v41, -inf }
0x1007   :  { %3042 = vmax.xlane.f32.xlu1 %v3041_v11  ;;  %v11408_v11 = vld [vmem:[%s10402_s25 + $0x8] sm:$0xff] }
0x100b   :  { %v3036_v26 = vpop.f32.mrf.mxu3 }
0x100c   :  { %v3040_v18 = vmul.f32 0.5, %v3036_v26 }
0x100e   :  { %v3044_v58 = vsel %vm505_vm1, %v3040_v18, -inf }
0x100f   :  { %3045 = vmax.xlane.f32.xlu2 %v3044_v58 }
0x1013   :  { %v3224_v25 = vpop.f32.mrf.mxu3 }
0x1014   :  { %9354 = vmatmul.msk.f32.vlgmr.msra.gmra.mxu2 %vm361_vm15, %v3224_v25 }
0x1015   :  { %9405 = vmatpush.msk.msra.mxu2 %vm374_vm14, %v11298_v55 }
0x101b   :  { %v3227_v6 = vpop.f32.mrf.mxu3 }
0x101c   :  { %9355 = vmatmul.msk.f32.gmra.mxu2 %vm361_vm15, %v3227_v6  ;;  %v3324_v26 = vmul.f32 %v11408_v11, %v3227_v6 }
0x1023   :  { %v11370_v19 = vpop.f32.mrf.mxu3 }
0x1024   :  { %9356 = vmatmul.msk.f32.gmra.mxu2 %vm361_vm15, %v11370_v19 }
0x102b   :  { %v3233_v1 = vpop.f32.mrf.mxu3 }
0x102c   :  { %9357 = vmatmul.msk.f32.gmra.mxu2 %vm361_vm15, %v3233_v1 }
0x1034   :  { %9380 = vmatmul.msk.f32.vlgmr.msrb.gmra.mxu2 %vm167_vm0, %v10596_v4 }
0x103c   :  { %9381 = vmatmul.msk.f32.gmra.mxu2 %vm167_vm0, %v10606_v15 }
0x1044   :  { %9382 = vmatmul.msk.f32.gmra.mxu2 %vm167_vm0, %v10615_v5 }
0x104c   :  { %9383 = vmatmul.msk.f32.gmra.mxu2 %vm167_vm0, %v10624_v22 }
0x106a   :  { %v2929_v30 = vpop.xlane.xlu2 %2928 }
0x106b   :  { %v2933_v3 = vsub.f32 %v2925_v43, %v2929_v30  ;;  %v3323_v30 = vmul.f32 %v11420_v9, %v3224_v25 }
0x106d   :  { %v2935_v8 = vmul.f32 1.442695, %v2933_v3 }
0x106f   :  { %9981 = vpow2.f32 %v2935_v8 }
0x1072   :  { %v2932_v46 = vpop.xlane.xlu0 %2931 }
0x1073   :  { %v2934_v38 = vsub.f32 %v2926_v27, %v2932_v46  ;;  %v11426_v46 = vld [vmem:[%s10402_s25 + $0x18] sm:$0xff] }
0x1075   :  { %v11385_v39 = vpop.eup %9981  ;;  %v2937_v54 = vmul.f32 1.442695, %v2934_v38  ;;  %v3326_v38 = vmul.f32 %v11426_v46, %v3233_v1 }
0x1076   :  { %v2939_v51 = vsel %vm505_vm1, %v11385_v39, 0.0 }
0x1077   :  { %9983 = vpow2.f32 %v2937_v54  ;;  %2940 = vadd.xlane.f32.xlu0 %v2939_v51  ;;  %v11430_v54 = vld [vmem:[%s10407_s29 + $0x18] sm:$0xff] }
0x107a   :  { %v3043_v60 = vpop.xlane.xlu1 %3042 }
0x107b   :  { %v3047_v24 = vsub.f32 %v3039_v41, %v3043_v60  ;;  %v11434_v60 = vld [vmem:[%s10407_s29 + $0x10] sm:$0xff] }
0x107d   :  { %v11391_v52 = vpop.eup %9983  ;;  %v3049_v62 = vmul.f32 1.442695, %v3047_v24 }
0x107e   :  { %v2942_v45 = vsel %vm505_vm1, %v11391_v52, 0.0 }
0x107f   :  { %9985 = vpow2.f32 %v3049_v62  ;;  %2943 = vadd.xlane.f32.xlu1 %v2942_v45  ;;  %v11438_v62 = vld [vmem:[%s10402_s25 + $0x10] sm:$0xff] }
0x1080   :  { %v3325_v45 = vmul.f32 %v11438_v62, %v11370_v19 }
0x1082   :  { %v3046_v12 = vpop.xlane.xlu2 %3045 }
0x1083   :  { %v3048_v17 = vsub.f32 %v3040_v18, %v3046_v12  ;;  %v11412_v18 = vld [vmem:[%s10407_s29 + $0x8] sm:$0xff] }
0x1085   :  { %v11395_v23 = vpop.eup %9985  ;;  %v3051_v43 = vmul.f32 1.442695, %v3048_v17 }
0x1086   :  { %v3053_v33 = vsel %vm505_vm1, %v11395_v23, 0.0 }
0x1087   :  { %9987 = vpow2.f32 %v3051_v43  ;;  %3054 = vadd.xlane.f32.xlu2 %v3053_v33 }
0x108d   :  { %v11401_v32 = vpop.eup %9987 }
0x108e   :  { %v3056_v27 = vsel %vm505_vm1, %v11401_v32, 0.0 }
0x108f   :  { %3057 = vadd.xlane.f32.xlu0 %v3056_v27 }
0x1097   :  { %v3356_v10 = vpop.f32.mrf.mxu2 }
0x1098   :  { %v3368_v58 = vmul.f32 %v11416_v14, %v3356_v10 }
0x109a   :  { %v3372_v3 = vadd.f32 %v3368_v58, %v3323_v30 }
0x109f   :  { %v3359_v41 = vpop.f32.mrf.mxu2 }
0x10a0   :  { %v3369_v49 = vmul.f32 %v11412_v18, %v3359_v41 }
0x10a2   :  { %v3373_v59 = vadd.f32 %v3369_v49, %v3324_v26 }
0x10a4   :  { %9358 = vmatpush.xpose.msk.msra.mxu3 %vm361_vm15, %v3373_v59 }
0x10a7   :  { %v3362_v8 = vpop.f32.mrf.mxu2 }
0x10a8   :  { %9359 = vmatpush.xpose.msk.msra.mxu3 %vm361_vm15, %v3372_v3  ;;  %v3370_v24 = vmul.f32 %v11434_v60, %v3362_v8 }
0x10aa   :  { %v3374_v12 = vadd.f32 %v3370_v24, %v3325_v45  ;;  %v9342_v45 = vld [vmem:[%s10447_s11 + $0xd0] sm:$0xff] }
0x10af   :  { %v3365_v6 = vpop.f32.mrf.mxu2 }
0x10b0   :  { %v3371_v51 = vmul.f32 %v11430_v54, %v3365_v6 }
0x10b2   :  { %v3375_v25 = vadd.f32 %v3371_v51, %v3326_v38  ;;  %v9343_v51 = vld [vmem:[%s10447_s11 + $0xd8] sm:$0xff] }
0x10b4   :  { %9364 = vmatpush.xpose.msk.msrb.mxu3 %vm361_vm15, %v3375_v25 }
0x10b8   :  { %9365 = vmatpush.xpose.msk.msrb.mxu3 %vm361_vm15, %v3374_v12 }
0x10ea   :  { %v2941_v1 = vpop.xlane.xlu0 %2940 }
0x10eb   :  { %9989 = vrcp.f32 %v2941_v1  ;;  %v2956_v10 = vand.u32 2147483648, %v2941_v1  ;;  %v2954_v26 = vand.u32 2147483647, %v2941_v1  ;;  %vm2950_vm11 = vweird.f32 %v2941_v1 }
0x10ed   :  { %v2957_v58 = vor.u32 1.1754944e-38, %v2956_v10  ;;  %vm2955_vm13 = vcmp.eq.f32.partialorder %v2954_v26, 8.507059e+37  ;;  %v9340_v26 = vld [vmem:[%s10447_s11 + $0xc0] sm:$0xff] }
0x10f1   :  { %v9990_v17 = vpop.eup %9989 }
0x10f2   :  { %v2946_v43 = vmul.f32 %v9990_v17, %v2941_v1  ;;  %v2944_v33 = vpop.xlane.xlu1 %2943  ;;  %vm2951_vm10 = vweird.f32 %v9990_v17 }
0x10f3   :  { %9991 = vrcp.f32 %v2944_v33  ;;  %vm2952_vm12 = vmor %vm2950_vm11, %vm2951_vm10  ;;  %v2971_v25 = vand.u32 2147483648, %v2944_v33  ;;  %v2969_v12 = vand.u32 2147483647, %v2944_v33  ;;  %vm2965_vm3 = vweird.f32 %v2944_v33 }
0x10f4   :  { %v2947_v27 = vsub.f32 1.0, %v2946_v43 }
0x10f5   :  { %vm2970_vm5 = vcmp.eq.f32.partialorder %v2969_v12, 8.507059e+37 }
0x10f6   :  { %v2948_v41 = vmul.f32 %v9990_v17, %v2947_v27  ;;  %v2972_v27 = vor.u32 1.1754944e-38, %v2971_v25 }
0x10f8   :  { %v2949_v49 = vadd.f32 %v9990_v17, %v2948_v41 }
0x10f9   :  { %v9992_v19 = vpop.eup %9991 }
0x10fa   :  { %v2953_v59 = vsel %vm2952_vm12, %v9990_v17, %v2949_v49  ;;  %v2961_v30 = vmul.f32 %v9992_v19, %v2944_v33  ;;  %v3055_v3 = vpop.xlane.xlu2 %3054  ;;  %vm2966_vm2 = vweird.f32 %v9992_v19  ;;  %v9341_v17 = vld [vmem:[%s10447_s11 + $0xc8] sm:$0xff] }
0x10fb   :  { %v2958_v8 = vsel %vm2955_vm13, %v2957_v58, %v2953_v59  ;;  %9993 = vrcp.f32 %v3055_v3  ;;  %vm2967_vm4 = vmor %vm2965_vm3, %vm2966_vm2  ;;  %v3070_v59 = vand.u32 2147483648, %v3055_v3  ;;  %v3068_v33 = vand.u32 2147483647, %v3055_v3 }
0x10fc   :  { %v2959_v6 = vmul.f32 %v11385_v39, %v2958_v8  ;;  %v2962_v38 = vsub.f32 1.0, %v2961_v30  ;;  %vm3064_vm7 = vweird.f32 %v3055_v3 }
0x10fd   :  { %vm3069_vm9 = vcmp.eq.f32.partialorder %v3068_v33, 8.507059e+37 }
0x10fe   :  { %v2963_v24 = vmul.f32 %v9992_v19, %v2962_v38  ;;  %9310 = vmatmul.msk.f32.vlgmr.msra.gmra.mxu0 %vm505_vm1, %v2959_v6 }
0x10ff   :  { %3253 = vmatpush.msra.mxu0 %v9343_v51 }
0x1100   :  { %v2964_v1 = vadd.f32 %v9992_v19, %v2963_v24 }
0x1101   :  { %v9994_v43 = vpop.eup %9993  ;;  %3254 = vmatpush.msra.mxu0 %v9342_v45 }
0x1102   :  { %v3060_v10 = vmul.f32 %v9994_v43, %v3055_v3  ;;  %v3058_v39 = vpop.xlane.xlu0 %3057  ;;  %v2968_v41 = vsel %vm2967_vm4, %v9992_v19, %v2964_v1  ;;  %vm3065_vm6 = vweird.f32 %v9994_v43  ;;  %v3071_v19 = vor.u32 1.1754944e-38, %v3070_v59 }
0x1103   :  { %9995 = vrcp.f32 %v3058_v39  ;;  %3255 = vmatpush.msra.mxu0 %v9341_v17  ;;  %v2973_v58 = vsel %vm2970_vm5, %v2972_v27, %v2968_v41  ;;  %vm3066_vm8 = vmor %vm3064_vm7, %vm3065_vm6  ;;  %v3083_v17 = vand.u32 2147483647, %v3058_v39  ;;  %vm3079_vm11 = vweird.f32 %v3058_v39 }
0x1104   :  { %v3061_v49 = vsub.f32 1.0, %v3060_v10  ;;  %v2974_v30 = vmul.f32 %v11391_v52, %v2973_v58  ;;  %v3085_v52 = vand.u32 2147483648, %v3058_v39 }
0x1105   :  { %3256 = vmatpush.msra.mxu0 %v9340_v26  ;;  %vm3084_vm13 = vcmp.eq.f32.partialorder %v3083_v17, 8.507059e+37 }
0x1106   :  { %v3062_v8 = vmul.f32 %v9994_v43, %v3061_v49  ;;  %9311 = vmatmul.msk.f32.gmra.mxu0 %vm505_vm1, %v2974_v30  ;;  %v3086_v3 = vor.u32 1.1754944e-38, %v3085_v52  ;;  %v9386_v52 = vld [vmem:[%s10442_s4 + $0xf0] sm:$0xff] }
0x1108   :  { %v3063_v6 = vadd.f32 %v9994_v43, %v3062_v8 }
0x1109   :  { %v9996_v38 = vpop.eup %9995 }
0x110a   :  { %v3067_v51 = vsel %vm3066_vm8, %v9994_v43, %v3063_v6  ;;  %v3075_v24 = vmul.f32 %v9996_v38, %v3058_v39  ;;  %vm3080_vm10 = vweird.f32 %v9996_v38 }
0x110b   :  { %v3072_v25 = vsel %vm3069_vm9, %v3071_v19, %v3067_v51  ;;  %vm3081_vm12 = vmor %vm3079_vm11, %vm3080_vm10 }
0x110c   :  { %v3073_v45 = vmul.f32 %v11395_v23, %v3072_v25  ;;  %v3076_v12 = vsub.f32 1.0, %v3075_v24  ;;  %v9318_v23 = vld [vmem:[%s10452_s18 + $0x14] sm:$0xf]  ;;  %v3270_v24 = vmul.f32 %v11420_v9, %v11383_v37 }
0x110d   :  { %9319 = vmatpush.msk.msra.mxu1 %vm374_vm14, %v9318_v23 }
0x110e   :  { %v3077_v1 = vmul.f32 %v9996_v38, %v3076_v12  ;;  %9316 = vmatmul.msk.f32.vlgmr.msrb.gmra.mxu0 %vm505_vm1, %v3073_v45  ;;  %v9387_v12 = vld [vmem:[%s10442_s4 + $0xf8] sm:$0xff] }
0x110f   :  { %9348 = vmatpush.msk.msrb.mxu1 %vm374_vm14, %v11298_v55 }
0x1110   :  { %v3078_v27 = vadd.f32 %v9996_v38, %v3077_v1  ;;  %v9385_v1 = vld [vmem:[%s10442_s4 + $0xe8] sm:$0xff] }
0x1112   :  { %v3082_v10 = vsel %vm3081_vm12, %v9996_v38, %v3078_v27  ;;  %v3271_v27 = vmul.f32 %v11408_v11, %v11389_v20 }
0x1113   :  { %v3087_v43 = vsel %vm3084_vm13, %v3086_v3, %v3082_v10  ;;  %v9384_v10 = vld [vmem:[%s10442_s4 + $0xe0] sm:$0xff]  ;;  %s13386_s4 = sld [smem:[#allocation12_spill]] }
0x1114   :  { %v3088_v41 = vmul.f32 %v11401_v32, %v3087_v43 }
0x1116   :  { %9317 = vmatmul.msk.f32.gmra.mxu0 %vm505_vm1, %v3088_v41  ;;  %v3272_v41 = vmul.f32 %v11438_v62, %v11397_v29 }
0x111e   :  { %9344 = vmatmul.msk.f32.vlgmr.msra.gmra.mxu0 %vm167_vm0, %v10596_v4 }
0x1126   :  { %9345 = vmatmul.msk.f32.gmra.mxu0 %vm167_vm0, %v10606_v15 }
0x112e   :  { %9346 = vmatmul.msk.f32.gmra.mxu0 %vm167_vm0, %v10615_v5 }
0x1136   :  { %9347 = vmatmul.msk.f32.gmra.mxu0 %vm167_vm0, %v10624_v22 }
0x117b   :  { %v2998_v32 = vpop.f32.mrf.mxu0 }
0x117c   :  { %9320 = vmatmul.msk.f32.vlgmr.msra.gmra.mxu1 %vm361_vm15, %v2998_v32 }
0x1183   :  { %v3001_v39 = vpop.f32.mrf.mxu0 }
0x1184   :  { %9321 = vmatmul.msk.f32.gmra.mxu1 %vm361_vm15, %v3001_v39 }
0x118b   :  { %v3112_v26 = vpop.f32.mrf.mxu0 }
0x118c   :  { %9322 = vmatmul.msk.f32.gmra.mxu1 %vm361_vm15, %v3112_v26 }
0x1193   :  { %v3115_v49 = vpop.f32.mrf.mxu0 }
0x1194   :  { %9323 = vmatmul.msk.f32.gmra.mxu1 %vm361_vm15, %v3115_v49 }
0x119b   :  { %v3258_v58 = vpop.f32.mrf.mxu0 }
0x119c   :  { %9349 = vmatmul.msk.f32.vlgmr.msrb.gmra.mxu1 %vm361_vm15, %v11383_v37 }
0x11a3   :  { %v3261_v59 = vpop.f32.mrf.mxu0 }
0x11a4   :  { %9350 = vmatmul.msk.f32.gmra.mxu1 %vm361_vm15, %v11389_v20  ;;  %3481 = vmatpush.msrb.mxu0 %v3261_v59  ;;  %v3273_v20 = vmul.f32 %v11426_v46, %v11405_v44 }
0x11a6   :  { %3482 = vmatpush.msrb.mxu0 %v3258_v58 }
0x11ab   :  { %v3264_v30 = vpop.f32.mrf.mxu0 }
0x11ac   :  { %9351 = vmatmul.msk.f32.gmra.mxu1 %vm361_vm15, %v11397_v29 }
0x11b3   :  { %v3267_v8 = vpop.f32.mrf.mxu0 }
0x11b4   :  { %9352 = vmatmul.msk.f32.gmra.mxu1 %vm361_vm15, %v11405_v44  ;;  %3595 = vmatpush.msra.mxu0 %v3267_v8 }
0x11b6   :  { %3596 = vmatpush.msra.mxu0 %v3264_v30 }
0x11f9   :  { %v11480_v33 = vpop.f32.mrf.mxu1 }
0x1201   :  { %v11482_v6 = vpop.f32.mrf.mxu1 }
0x1209   :  { %v11484_v38 = vpop.f32.mrf.mxu1 }
0x1211   :  { %v11486_v19 = vpop.f32.mrf.mxu1 }
0x1219   :  { %v3303_v51 = vpop.f32.mrf.mxu1 }
0x121a   :  { %v3315_v25 = vmul.f32 %v11416_v14, %v3303_v51 }
0x121c   :  { %v3319_v45 = vadd.f32 %v3315_v25, %v3270_v24 }
0x121e   :  { %9360 = vmatmul.msk.f32.vlgmr.msra.gmra.mxu3 %vm361_vm15, %v3319_v45 }
0x121f   :  { %3705 = vmatpush.msra.mxu3 %v9387_v12 }
0x1221   :  { %v3306_v17 = vpop.f32.mrf.mxu1  ;;  %3706 = vmatpush.msra.mxu3 %v9386_v52 }
0x1222   :  { %v3316_v3 = vmul.f32 %v11412_v18, %v3306_v17 }
0x1223   :  { %3707 = vmatpush.msra.mxu3 %v9385_v1 }
0x1224   :  { %v3320_v43 = vadd.f32 %v3316_v3, %v3271_v27 }
0x1225   :  { %3708 = vmatpush.msra.mxu3 %v9384_v10 }
0x1226   :  { %9361 = vmatmul.msk.f32.gmra.mxu3 %vm361_vm15, %v3320_v43 }
0x1229   :  { %v3309_v37 = vpop.f32.mrf.mxu1 }
0x122a   :  { %v3317_v23 = vmul.f32 %v11434_v60, %v3309_v37 }
0x122c   :  { %v3321_v32 = vadd.f32 %v3317_v23, %v3272_v41  ;;  %v11524_v41 = vpop.f32.mrf.mxu2 }
0x122e   :  { %9366 = vmatmul.msk.f32.vlgmr.msrb.gmra.mxu3 %vm361_vm15, %v3321_v32 }
0x1231   :  { %v3312_v39 = vpop.f32.mrf.mxu1 }
0x1232   :  { %v3318_v26 = vmul.f32 %v11430_v54, %v3312_v39 }
0x1234   :  { %v3322_v49 = vadd.f32 %v3318_v26, %v3273_v20 }
0x1236   :  { %9367 = vmatmul.msk.f32.gmra.mxu3 %vm361_vm15, %v3322_v49 }
0x123e   :  { %9388 = vmatmul.msk.f32.vlgmr.msra.gmra.mxu3 %vm167_vm0, %v10596_v4 }
0x1246   :  { %9389 = vmatmul.msk.f32.gmra.mxu3 %vm167_vm0, %v10606_v15 }
0x124e   :  { %9390 = vmatmul.msk.f32.gmra.mxu3 %vm167_vm0, %v10615_v5 }
0x1256   :  { %9391 = vmatmul.msk.f32.gmra.mxu3 %vm167_vm0, %v10624_v22 }
0x12a1   :  { %v3405_v29 = vpop.f32.mrf.mxu3 }
0x12a2   :  { %v3411_v58 = vmul.f32 0.5, %v3405_v29  ;;  %v11530_v29 = vpop.f32.mrf.mxu2 }
0x12a4   :  { %v3413_v44 = vsel %vm505_vm1, %v3411_v58, -inf }
0x12a5   :  { %3414 = vmax.xlane.f32.xlu1 %v3413_v44 }
0x12a9   :  { %v3408_v59 = vpop.f32.mrf.mxu3 }
0x12aa   :  { %v3412_v30 = vmul.f32 0.5, %v3408_v59 }
0x12ac   :  { %v3416_v8 = vsel %vm505_vm1, %v3412_v30, -inf }
0x12ad   :  { %3417 = vmax.xlane.f32.xlu2 %v3416_v8 }
0x12b1   :  { %v3519_v51 = vpop.f32.mrf.mxu3 }
0x12b2   :  { %v3525_v24 = vmul.f32 0.5, %v3519_v51 }
0x12b4   :  { %v3527_v25 = vsel %vm505_vm1, %v3525_v24, -inf }
0x12b5   :  { %3528 = vmax.xlane.f32.xlu0 %v3527_v25 }
0x12b9   :  { %v3522_v45 = vpop.f32.mrf.mxu3 }
0x12ba   :  { %v3526_v12 = vmul.f32 0.5, %v3522_v45  ;;  %v11538_v45 = vpop.f32.mrf.mxu2 }
0x12bc   :  { %v3530_v52 = vsel %vm505_vm1, %v3526_v12, -inf }
0x12bd   :  { %3531 = vmax.xlane.f32.xlu1 %v3530_v52 }
0x12c1   :  { %v3710_v1 = vpop.f32.mrf.mxu3 }
0x12c2   :  { %9406 = vmatmul.msk.f32.vlgmr.msra.gmra.mxu2 %vm361_vm15, %v3710_v1 }
0x12c9   :  { %v3713_v17 = vpop.f32.mrf.mxu3 }
0x12ca   :  { %9407 = vmatmul.msk.f32.gmra.mxu2 %vm361_vm15, %v3713_v17 }
0x12d1   :  { %v3716_v27 = vpop.f32.mrf.mxu3 }
0x12d2   :  { %9408 = vmatmul.msk.f32.gmra.mxu2 %vm361_vm15, %v3716_v27 }
0x12d9   :  { %v3719_v3 = vpop.f32.mrf.mxu3 }
0x12da   :  { %9409 = vmatmul.msk.f32.gmra.mxu2 %vm361_vm15, %v3719_v3 }
0x1318   :  { %v3415_v10 = vpop.xlane.xlu1 %3414 }
0x1319   :  { %v3419_v43 = vsub.f32 %v3411_v58, %v3415_v10 }
0x131b   :  { %v3421_v37 = vmul.f32 1.442695, %v3419_v43 }
0x131d   :  { %9997 = vpow2.f32 %v3421_v37  ;;  %v11546_v37 = vpop.f32.mrf.mxu2 }
0x1320   :  { %v3418_v23 = vpop.xlane.xlu2 %3417 }
0x1321   :  { %v3420_v32 = vsub.f32 %v3412_v30, %v3418_v23 }
0x1323   :  { %v11526_v39 = vpop.eup %9997  ;;  %v3423_v20 = vmul.f32 1.442695, %v3420_v32  ;;  %v3810_v32 = vmul.f32 %v11408_v11, %v3713_v17 }
0x1324   :  { %v3425_v26 = vsel %vm505_vm1, %v11526_v39, 0.0 }
0x1325   :  { %9999 = vpow2.f32 %v3423_v20  ;;  %3426 = vadd.xlane.f32.xlu2 %v3425_v26 }
0x1328   :  { %v3529_v49 = vpop.xlane.xlu0 %3528 }
0x1329   :  { %v3533_v44 = vsub.f32 %v3525_v24, %v3529_v49 }
0x132b   :  { %v11532_v59 = vpop.eup %9999  ;;  %v3535_v58 = vmul.f32 1.442695, %v3533_v44  ;;  %v3809_v44 = vmul.f32 %v11420_v9, %v3710_v1 }
0x132c   :  { %v3428_v8 = vsel %vm505_vm1, %v11532_v59, 0.0 }
0x132d   :  { %10001 = vpow2.f32 %v3535_v58  ;;  %3429 = vadd.xlane.f32.xlu0 %v3428_v8 }
0x1330   :  { %v3532_v30 = vpop.xlane.xlu1 %3531 }
0x1331   :  { %v3534_v51 = vsub.f32 %v3526_v12, %v3532_v30 }
0x1333   :  { %v11536_v25 = vpop.eup %10001  ;;  %v3537_v52 = vmul.f32 1.442695, %v3534_v51  ;;  %v3812_v51 = vmul.f32 %v11426_v46, %v3719_v3 }
0x1334   :  { %v3539_v10 = vsel %vm505_vm1, %v11536_v25, 0.0 }
0x1335   :  { %10003 = vpow2.f32 %v3537_v52  ;;  %3540 = vadd.xlane.f32.xlu1 %v3539_v10 }
0x133b   :  { %v11542_v24 = vpop.eup %10003 }
0x133c   :  { %v3542_v43 = vsel %vm505_vm1, %v11542_v24, 0.0 }
0x133d   :  { %3543 = vadd.xlane.f32.xlu2 %v3542_v43  ;;  %v3811_v43 = vmul.f32 %v11438_v62, %v3716_v27 }
0x1345   :  { %v3842_v23 = vpop.f32.mrf.mxu2 }
0x1346   :  { %v3854_v26 = vmul.f32 %v11416_v14, %v3842_v23 }
0x1348   :  { %v3858_v58 = vadd.f32 %v3854_v26, %v3809_v44 }
0x134d   :  { %v3845_v12 = vpop.f32.mrf.mxu2 }
0x134e   :  { %v3855_v20 = vmul.f32 %v11412_v18, %v3845_v12 }
0x1350   :  { %v3859_v49 = vadd.f32 %v3855_v20, %v3810_v32 }
0x1352   :  { %9410 = vmatpush.xpose.msk.msrb.mxu3 %vm361_vm15, %v3859_v49 }
0x1355   :  { %v3848_v8 = vpop.f32.mrf.mxu2 }
0x1356   :  { %9411 = vmatpush.xpose.msk.msrb.mxu3 %vm361_vm15, %v3858_v58  ;;  %v3856_v17 = vmul.f32 %v11434_v60, %v3848_v8 }
0x1358   :  { %v3860_v23 = vadd.f32 %v3856_v17, %v3811_v43 }
0x135d   :  { %v3851_v30 = vpop.f32.mrf.mxu2 }
0x135e   :  { %v3857_v52 = vmul.f32 %v11430_v54, %v3851_v30 }
0x1360   :  { %v3861_v10 = vadd.f32 %v3857_v52, %v3812_v51 }
0x1362   :  { %9416 = vmatpush.xpose.msk.msra.mxu3 %vm361_vm15, %v3861_v10 }
0x1366   :  { %9417 = vmatpush.xpose.msk.msra.mxu3 %vm361_vm15, %v3860_v23  ;;  %v9395_v23 = vld [vmem:[%s10447_s11 + $0xf8] sm:$0xff] }
0x1398   :  { %v3427_v1 = vpop.xlane.xlu2 %3426 }
0x1399   :  { %10005 = vrcp.f32 %v3427_v1  ;;  %v3442_v3 = vand.u32 2147483648, %v3427_v1  ;;  %v3440_v44 = vand.u32 2147483647, %v3427_v1  ;;  %vm3436_vm3 = vweird.f32 %v3427_v1 }
0x139b   :  { %v3443_v8 = vor.u32 1.1754944e-38, %v3442_v3  ;;  %vm3441_vm5 = vcmp.eq.f32.partialorder %v3440_v44, 8.507059e+37  ;;  %v9393_v3 = vld [vmem:[%s10447_s11 + $0xe8] sm:$0xff] }
0x139f   :  { %v10006_v12 = vpop.eup %10005 }
0x13a0   :  { %v3432_v32 = vmul.f32 %v10006_v12, %v3427_v1  ;;  %v3430_v20 = vpop.xlane.xlu0 %3429  ;;  %vm3437_vm2 = vweird.f32 %v10006_v12  ;;  %v9394_v1 = vld [vmem:[%s10447_s11 + $0xf0] sm:$0xff] }
0x13a1   :  { %10007 = vrcp.f32 %v3430_v20  ;;  %vm3438_vm4 = vmor %vm3436_vm3, %vm3437_vm2  ;;  %vm3451_vm7 = vweird.f32 %v3430_v20 }
0x13a2   :  { %v3433_v26 = vsub.f32 1.0, %v3432_v32 }
0x13a4   :  { %v3434_v49 = vmul.f32 %v10006_v12, %v3433_v26  ;;  %v3457_v26 = vand.u32 2147483648, %v3430_v20 }
0x13a6   :  { %v3435_v58 = vadd.f32 %v10006_v12, %v3434_v49  ;;  %v3455_v49 = vand.u32 2147483647, %v3430_v20 }
0x13a7   :  { %v10008_v27 = vpop.eup %10007 }
0x13a8   :  { %v3439_v30 = vsel %vm3438_vm4, %v10006_v12, %v3435_v58  ;;  %v3447_v51 = vmul.f32 %v10008_v27, %v3430_v20  ;;  %v3541_v52 = vpop.xlane.xlu1 %3540  ;;  %vm3452_vm6 = vweird.f32 %v10008_v27  ;;  %v3458_v58 = vor.u32 1.1754944e-38, %v3457_v26 }
0x13a9   :  { %v3444_v17 = vsel %vm3441_vm5, %v3443_v8, %v3439_v30  ;;  %10009 = vrcp.f32 %v3541_v52  ;;  %vm3453_vm8 = vmor %vm3451_vm7, %vm3452_vm6  ;;  %vm3456_vm9 = vcmp.eq.f32.partialorder %v3455_v49, 8.507059e+37  ;;  %v3554_v20 = vand.u32 2147483647, %v3541_v52 }
0x13aa   :  { %v3445_v10 = vmul.f32 %v11526_v39, %v3444_v17  ;;  %v3448_v43 = vsub.f32 1.0, %v3447_v51  ;;  %v9392_v51 = vld [vmem:[%s10447_s11 + $0xe0] sm:$0xff]  ;;  %vm3550_vm11 = vweird.f32 %v3541_v52  ;;  %s13387_s11 = sld [smem:[#allocation18_spill]] }
0x13ab   :  { %vm3555_vm13 = vcmp.eq.f32.partialorder %v3554_v20, 8.507059e+37 }
0x13ac   :  { %v3449_v32 = vmul.f32 %v10008_v27, %v3448_v43  ;;  %9362 = vmatmul.msk.f32.vlgmr.msrb.gmra.mxu0 %vm505_vm1, %v3445_v10  ;;  %v3556_v10 = vand.u32 2147483648, %v3541_v52 }
0x13ad   :  { %3739 = vmatpush.msrb.mxu0 %v9395_v23 }
0x13ae   :  { %v3450_v12 = vadd.f32 %v10008_v27, %v3449_v32 }
0x13af   :  { %v10010_v44 = vpop.eup %10009  ;;  %3740 = vmatpush.msrb.mxu0 %v9394_v1 }
0x13b0   :  { %v3546_v8 = vmul.f32 %v10010_v44, %v3541_v52  ;;  %v3544_v39 = vpop.xlane.xlu2 %3543  ;;  %v3454_v30 = vsel %vm3453_vm8, %v10008_v27, %v3450_v12  ;;  %vm3551_vm10 = vweird.f32 %v10010_v44  ;;  %v3557_v27 = vor.u32 1.1754944e-38, %v3556_v10 }
0x13b1   :  { %10011 = vrcp.f32 %v3544_v39  ;;  %3741 = vmatpush.msrb.mxu0 %v9393_v3  ;;  %v3459_v43 = vsel %vm3456_vm9, %v3458_v58, %v3454_v30  ;;  %vm3552_vm12 = vmor %vm3550_vm11, %vm3551_vm10  ;;  %v3569_v30 = vand.u32 2147483647, %v3544_v39  ;;  %vm3565_vm3 = vweird.f32 %v3544_v39 }
0x13b2   :  { %v3547_v17 = vsub.f32 1.0, %v3546_v8  ;;  %v3460_v31 = vmul.f32 %v11532_v59, %v3459_v43  ;;  %v3571_v59 = vand.u32 2147483648, %v3544_v39 }
0x13b3   :  { %3742 = vmatpush.msrb.mxu0 %v9392_v51  ;;  %vm3570_vm5 = vcmp.eq.f32.partialorder %v3569_v30, 8.507059e+37  ;;  %v3758_v30 = vmul.f32 %v11438_v62, %v11538_v45 }
0x13b4   :  { %v3548_v23 = vmul.f32 %v10010_v44, %v3547_v17  ;;  %9363 = vmatmul.msk.f32.gmra.mxu0 %vm505_vm1, %v3460_v31  ;;  %v3572_v52 = vor.u32 1.1754944e-38, %v3571_v59 }
0x13b6   :  { %v3549_v32 = vadd.f32 %v10010_v44, %v3548_v23 }
0x13b7   :  { %v10012_v26 = vpop.eup %10011 }
0x13b8   :  { %v3553_v1 = vsel %vm3552_vm12, %v10010_v44, %v3549_v32  ;;  %v3561_v49 = vmul.f32 %v10012_v26, %v3544_v39  ;;  %vm3566_vm2 = vweird.f32 %v10012_v26 }
0x13b9   :  { %v3558_v12 = vsel %vm3555_vm13, %v3557_v27, %v3553_v1  ;;  %vm3567_vm4 = vmor %vm3565_vm3, %vm3566_vm2  ;;  %v3756_v27 = vmul.f32 %v11420_v9, %v11524_v41 }
0x13ba   :  { %v3559_v3 = vmul.f32 %v11536_v25, %v3558_v12  ;;  %v3562_v58 = vsub.f32 1.0, %v3561_v49  ;;  %v9370_v25 = vld [vmem:[%s10452_s18 + $0x18] sm:$0xf] }
0x13bb   :  { %9371 = vmatpush.msk.msra.mxu1 %vm374_vm14, %v9370_v25 }
0x13bc   :  { %v3563_v8 = vmul.f32 %v10012_v26, %v3562_v58  ;;  %9368 = vmatmul.msk.f32.vlgmr.msra.gmra.mxu0 %vm505_vm1, %v3559_v3  ;;  %v3757_v3 = vmul.f32 %v11408_v11, %v11530_v29 }
0x13bd   :  { %9400 = vmatpush.msk.msrb.mxu1 %vm374_vm14, %v11298_v55 }
0x13be   :  { %v3564_v31 = vadd.f32 %v10012_v26, %v3563_v8 }
0x13c0   :  { %v3568_v51 = vsel %vm3567_vm4, %v10012_v26, %v3564_v31  ;;  %v3759_v31 = vmul.f32 %v11426_v46, %v11546_v37 }
0x13c1   :  { %v3573_v44 = vsel %vm3570_vm5, %v3572_v52, %v3568_v51 }
0x13c2   :  { %v3574_v17 = vmul.f32 %v11542_v24, %v3573_v44 }
0x13c4   :  { %9369 = vmatmul.msk.f32.gmra.mxu0 %vm505_vm1, %v3574_v17 }
0x13cc   :  { %9396 = vmatmul.msk.f32.vlgmr.msrb.gmra.mxu0 %vm167_vm0, %v10596_v4 }
0x13d4   :  { %9397 = vmatmul.msk.f32.gmra.mxu0 %vm167_vm0, %v10606_v15 }
0x13dc   :  { %9398 = vmatmul.msk.f32.gmra.mxu0 %vm167_vm0, %v10615_v5 }
0x13e4   :  { %9399 = vmatmul.msk.f32.gmra.mxu0 %vm167_vm0, %v10624_v22 }
0x1429   :  { %v3484_v24 = vpop.f32.mrf.mxu0 }
0x142a   :  { %9372 = vmatmul.msk.f32.vlgmr.msra.gmra.mxu1 %vm361_vm15, %v3484_v24 }
0x1431   :  { %v3487_v39 = vpop.f32.mrf.mxu0 }
0x1432   :  { %9373 = vmatmul.msk.f32.gmra.mxu1 %vm361_vm15, %v3487_v39 }
0x1439   :  { %v3598_v43 = vpop.f32.mrf.mxu0 }
0x143a   :  { %9374 = vmatmul.msk.f32.gmra.mxu1 %vm361_vm15, %v3598_v43 }
0x1441   :  { %v3601_v55 = vpop.f32.mrf.mxu0 }
0x1442   :  { %9375 = vmatmul.msk.f32.gmra.mxu1 %vm361_vm15, %v3601_v55 }
0x1449   :  { %v3744_v4 = vpop.f32.mrf.mxu0 }
0x144a   :  { %9401 = vmatmul.msk.f32.vlgmr.msrb.gmra.mxu1 %vm361_vm15, %v11524_v41 }
0x1451   :  { %v3747_v15 = vpop.f32.mrf.mxu0 }
0x1452   :  { %9402 = vmatmul.msk.f32.gmra.mxu1 %vm361_vm15, %v11530_v29  ;;  %3967 = vmatpush.msra.mxu0 %v3747_v15 }
0x1454   :  { %3968 = vmatpush.msra.mxu0 %v3744_v4 }
0x1459   :  { %v3750_v5 = vpop.f32.mrf.mxu0 }
0x145a   :  { %9403 = vmatmul.msk.f32.gmra.mxu1 %vm361_vm15, %v11538_v45 }
0x1461   :  { %v3753_v22 = vpop.f32.mrf.mxu0 }
0x1462   :  { %9404 = vmatmul.msk.f32.gmra.mxu1 %vm361_vm15, %v11546_v37  ;;  %4081 = vmatpush.msrb.mxu0 %v3753_v22 }
0x1464   :  { %4082 = vmatpush.msrb.mxu0 %v3750_v5 }
0x14a7   :  { %v11596_v10 = vpop.f32.mrf.mxu1 }
0x14af   :  { %v11598_v23 = vpop.f32.mrf.mxu1 }
0x14b7   :  { %v11600_v20 = vpop.f32.mrf.mxu1 }
0x14bf   :  { %v11602_v32 = vpop.f32.mrf.mxu1 }
0x14c7   :  { %v3789_v26 = vpop.f32.mrf.mxu1 }
0x14c8   :  { %v3801_v1 = vmul.f32 %v11416_v14, %v3789_v26 }
0x14ca   :  { %v3805_v49 = vadd.f32 %v3801_v1, %v3756_v27 }
0x14cc   :  { %9412 = vmatmul.msk.f32.vlgmr.msrb.gmra.mxu3 %vm361_vm15, %v3805_v49 }
0x14cf   :  { %v3792_v12 = vpop.f32.mrf.mxu1 }
0x14d0   :  { %v3802_v58 = vmul.f32 %v11412_v18, %v3792_v12 }
0x14d2   :  { %v3806_v59 = vadd.f32 %v3802_v58, %v3757_v3 }
0x14d4   :  { %9413 = vmatmul.msk.f32.gmra.mxu3 %vm361_vm15, %v3806_v59 }
0x14d7   :  { %v3795_v8 = vpop.f32.mrf.mxu1 }
0x14d8   :  { %v3803_v9 = vmul.f32 %v11434_v60, %v3795_v8 }
0x14da   :  { %v3807_v41 = vadd.f32 %v3803_v9, %v3758_v30 }
0x14dc   :  { %9418 = vmatmul.msk.f32.vlgmr.msra.gmra.mxu3 %vm361_vm15, %v3807_v41 }
0x14df   :  { %v3798_v14 = vpop.f32.mrf.mxu1 }
0x14e0   :  { %v3804_v11 = vmul.f32 %v11430_v54, %v3798_v14 }
0x14e2   :  { %v3808_v29 = vadd.f32 %v3804_v11, %v3759_v31 }
0x14e4   :  { %9419 = vmatmul.msk.f32.gmra.mxu3 %vm361_vm15, %v3808_v29 }
0x154f   :  { %v3891_v18 = vpop.f32.mrf.mxu3 }
0x1550   :  { %v3897_v52 = vmul.f32 0.5, %v3891_v18 }
0x1552   :  { %v3899_v51 = vsel %vm505_vm1, %v3897_v52, -inf }
0x1553   :  { %3900 = vmax.xlane.f32.xlu0 %v3899_v51 }
0x1557   :  { %v3894_v62 = vpop.f32.mrf.mxu3 }
0x1558   :  { %v3898_v45 = vmul.f32 0.5, %v3894_v62 }
0x155a   :  { %v3902_v60 = vsel %vm505_vm1, %v3898_v45, -inf }
0x155b   :  { %3903 = vmax.xlane.f32.xlu1 %v3902_v60 }
0x155f   :  { %v4005_v44 = vpop.f32.mrf.mxu3 }
0x1560   :  { %v4011_v17 = vmul.f32 0.5, %v4005_v44 }
0x1562   :  { %v4013_v25 = vsel %vm505_vm1, %v4011_v17, -inf }
0x1563   :  { %4014 = vmax.xlane.f32.xlu2 %v4013_v25 }
0x1567   :  { %v4008_v46 = vpop.f32.mrf.mxu3 }
0x1568   :  { %v4012_v54 = vmul.f32 0.5, %v4008_v46 }
0x156a   :  { %v4016_v37 = vsel %vm505_vm1, %v4012_v54, -inf }
0x156b   :  { %4017 = vmax.xlane.f32.xlu0 %v4016_v37 }
0x15c6   :  { %v3901_v24 = vpop.xlane.xlu0 %3900 }
0x15c7   :  { %v3905_v39 = vsub.f32 %v3897_v52, %v3901_v24 }
0x15c9   :  { %v3907_v43 = vmul.f32 1.442695, %v3905_v39 }
0x15cb   :  { %10013 = vpow2.f32 %v3907_v43 }
0x15ce   :  { %v3904_v55 = vpop.xlane.xlu1 %3903 }
0x15cf   :  { %v3906_v4 = vsub.f32 %v3898_v45, %v3904_v55  ;;  %v9422_v45 = vld [vmem:[%s10452_s18 + $0x1c] sm:$0xf]  ;;  %s13391_s18 = sld [smem:[#allocation14_spill]] }
0x15d0   :  { %9423 = vmatpush.msk.msra.mxu1 %vm374_vm14, %v9422_v45 }
0x15d1   :  { %v10014_v15 = vpop.eup %10013  ;;  %v3909_v5 = vmul.f32 1.442695, %v3906_v4 }
0x15d2   :  { %v3911_v22 = vsel %vm505_vm1, %v10014_v15, 0.0 }
0x15d3   :  { %10015 = vpow2.f32 %v3909_v5  ;;  %3912 = vadd.xlane.f32.xlu1 %v3911_v22 }
0x15d6   :  { %v4015_v26 = vpop.xlane.xlu2 %4014 }
0x15d7   :  { %v4019_v27 = vsub.f32 %v4011_v17, %v4015_v26 }
0x15d9   :  { %v10016_v1 = vpop.eup %10015  ;;  %v4021_v49 = vmul.f32 1.442695, %v4019_v27 }
0x15da   :  { %v3914_v12 = vsel %vm505_vm1, %v10016_v1, 0.0 }
0x15db   :  { %10017 = vpow2.f32 %v4021_v49  ;;  %3915 = vadd.xlane.f32.xlu2 %v3914_v12 }
0x15de   :  { %v4018_v3 = vpop.xlane.xlu0 %4017 }
0x15df   :  { %v4020_v58 = vsub.f32 %v4012_v54, %v4018_v3 }
0x15e1   :  { %v11626_v59 = vpop.eup %10017  ;;  %v4023_v8 = vmul.f32 1.442695, %v4020_v58 }
0x15e2   :  { %v4025_v30 = vsel %vm505_vm1, %v11626_v59, 0.0 }
0x15e3   :  { %10019 = vpow2.f32 %v4023_v8  ;;  %4026 = vadd.xlane.f32.xlu0 %v4025_v30 }
0x15e9   :  { %v11630_v9 = vpop.eup %10019 }
0x15ea   :  { %v4028_v41 = vsel %vm505_vm1, %v11630_v9, 0.0 }
0x15eb   :  { %4029 = vadd.xlane.f32.xlu1 %v4028_v41 }
0x1646   :  { %v3913_v14 = vpop.xlane.xlu1 %3912 }
0x1647   :  { %10021 = vrcp.f32 %v3913_v14  ;;  %v3928_v52 = vand.u32 2147483648, %v3913_v14  ;;  %v3926_v62 = vand.u32 2147483647, %v3913_v14  ;;  %vm3922_vm7 = vweird.f32 %v3913_v14 }
0x1649   :  { %v3929_v17 = vor.u32 1.1754944e-38, %v3928_v52  ;;  %vm3927_vm9 = vcmp.eq.f32.partialorder %v3926_v62, 8.507059e+37 }
0x164d   :  { %v10022_v31 = vpop.eup %10021 }
0x164e   :  { %v3918_v11 = vmul.f32 %v10022_v31, %v3913_v14  ;;  %v3916_v29 = vpop.xlane.xlu2 %3915  ;;  %vm3923_vm6 = vweird.f32 %v10022_v31 }
0x164f   :  { %10023 = vrcp.f32 %v3916_v29  ;;  %vm3924_vm8 = vmor %vm3922_vm7, %vm3923_vm6  ;;  %v3943_v55 = vand.u32 2147483648, %v3916_v29  ;;  %v3941_v4 = vand.u32 2147483647, %v3916_v29  ;;  %vm3937_vm11 = vweird.f32 %v3916_v29 }
0x1650   :  { %v3919_v18 = vsub.f32 1.0, %v3918_v11 }
0x1651   :  { %v3944_v26 = vor.u32 1.1754944e-38, %v3943_v55  ;;  %vm3942_vm13 = vcmp.eq.f32.partialorder %v3941_v4, 8.507059e+37 }
0x1652   :  { %v3920_v51 = vmul.f32 %v10022_v31, %v3919_v18 }
0x1654   :  { %v3921_v60 = vadd.f32 %v10022_v31, %v3920_v51 }
0x1655   :  { %v10024_v44 = vpop.eup %10023 }
0x1656   :  { %v3925_v25 = vsel %vm3924_vm8, %v10022_v31, %v3921_v60  ;;  %v3933_v46 = vmul.f32 %v10024_v44, %v3916_v29  ;;  %v4027_v54 = vpop.xlane.xlu0 %4026  ;;  %vm3938_vm10 = vweird.f32 %v10024_v44 }
0x1657   :  { %v3930_v37 = vsel %vm3927_vm9, %v3929_v17, %v3925_v25  ;;  %10025 = vrcp.f32 %v4027_v54  ;;  %vm3939_vm12 = vmor %vm3937_vm11, %vm3938_vm10  ;;  %v4040_v41 = vand.u32 2147483647, %v4027_v54  ;;  %vm4036_vm3 = vweird.f32 %v4027_v54 }
0x1658   :  { %v3931_v24 = vmul.f32 %v10014_v15, %v3930_v37  ;;  %v3934_v39 = vsub.f32 1.0, %v3933_v46  ;;  %v4042_v15 = vand.u32 2147483648, %v4027_v54 }
0x1659   :  { %vm4041_vm5 = vcmp.eq.f32.partialorder %v4040_v41, 8.507059e+37 }
0x165a   :  { %v3935_v43 = vmul.f32 %v10024_v44, %v3934_v39  ;;  %9414 = vmatmul.msk.f32.vlgmr.msra.gmra.mxu0 %vm505_vm1, %v3931_v24  ;;  %v4043_v11 = vor.u32 1.1754944e-38, %v4042_v15  ;;  %v10226_v15 = vld [vmem:[%s10384_s9 + $0x8] sm:$0xff] }
0x165c   :  { %v3936_v5 = vadd.f32 %v10024_v44, %v3935_v43  ;;  %v1213_v43 = vadd.f32 %v10869_v0, %v10932_v61  ;;  %v10225_v61 = vld [vmem:[%s10384_s9] sm:$0xff] }
0x165d   :  { %v10026_v22 = vpop.eup %10025 }
0x165e   :  { %v4032_v27 = vmul.f32 %v10026_v22, %v4027_v54  ;;  %v4030_v49 = vpop.xlane.xlu1 %4029  ;;  %v3940_v12 = vsel %vm3939_vm12, %v10024_v44, %v3936_v5  ;;  %vm4037_vm2 = vweird.f32 %v10026_v22 }
0x165f   :  { %10027 = vrcp.f32 %v4030_v49  ;;  %v3945_v58 = vsel %vm3942_vm13, %v3944_v26, %v3940_v12  ;;  %vm4038_vm4 = vmor %vm4036_vm3, %vm4037_vm2  ;;  %v4057_v45 = vand.u32 2147483648, %v4030_v49  ;;  %vm4051_vm7 = vweird.f32 %v4030_v49 }
0x1660   :  { %v4033_v3 = vsub.f32 1.0, %v4032_v27  ;;  %v3946_v8 = vmul.f32 %v10016_v1, %v3945_v58  ;;  %v4055_v1 = vand.u32 2147483647, %v4030_v49 }
0x1661   :  { %v4058_v17 = vor.u32 1.1754944e-38, %v4057_v45  ;;  %v4222_v45 = vld [vmem:[%s10477_s21 + $0x10] sm:$0xff] }
0x1662   :  { %v4034_v30 = vmul.f32 %v10026_v22, %v4033_v3  ;;  %9415 = vmatmul.msk.f32.gmra.mxu0 %vm505_vm1, %v3946_v8  ;;  %vm4056_vm9 = vcmp.eq.f32.partialorder %v4055_v1, 8.507059e+37  ;;  %v4370_v1 = vld [vmem:[%s10487_s10 + $0x28] sm:$0xff] }
0x1664   :  { %v4035_v14 = vadd.f32 %v10026_v22, %v4034_v30 }
0x1665   :  { %v10028_v31 = vpop.eup %10027 }
0x1666   :  { %v4039_v29 = vsel %vm4038_vm4, %v10026_v22, %v4035_v14  ;;  %v4047_v18 = vmul.f32 %v10028_v31, %v4030_v49  ;;  %vm4052_vm6 = vweird.f32 %v10028_v31  ;;  %v1216_v22 = vadd.f32 %v10871_v7, %v10934_v57 }
0x1667   :  { %v4044_v52 = vsel %vm4041_vm5, %v4043_v11, %v4039_v29  ;;  %vm4053_vm8 = vmor %vm4051_vm7, %vm4052_vm6  ;;  %v1219_v7 = vadd.f32 %v10877_v13, %v10936_v53  ;;  %v1222_v13 = vadd.f32 %v10880_v16, %v10938_v63  ;;  %v10227_v63 = vld [vmem:[%s10384_s9 + $0x10] sm:$0xff]  ;;  %v10228_v11 = vld [vmem:[%s10384_s9 + $0x18] sm:$0xff]  ;;  %s13363_s9 = sld [smem:[#allocation10_spill]] }
0x1668   :  { %v4045_v51 = vmul.f32 %v11626_v59, %v4044_v52  ;;  %v4048_v62 = vsub.f32 1.0, %v4047_v18  ;;  %v1707_v27 = vadd.f32 %v11063_v40, %v1216_v22  ;;  %v4223_v52 = vld [vmem:[%s10477_s21 + $0x18] sm:$0xff] }
0x1669   :  { %4252 = vmatpush.msrb.mxu2 %v4223_v52 }
0x166a   :  { %v4049_v60 = vmul.f32 %v10028_v31, %v4048_v62  ;;  %9420 = vmatmul.msk.f32.vlgmr.msrb.gmra.mxu0 %vm505_vm1, %v4045_v51  ;;  %v2193_v0 = vadd.f32 %v11191_v47, %v1707_v27  ;;  %v4372_v51 = vld [vmem:[%s10487_s10 + $0x38] sm:$0xff]  ;;  %v4597_v62 = vld [vmem:[%s10492_s24 + $0x30] sm:$0xff] }
0x166b   :  { %4414 = vmatpush.msra.mxu0 %v4372_v51  ;;  %4611 = vmatpush.msrb.mxu1 %v4597_v62 }
0x166c   :  { %v4050_v44 = vadd.f32 %v10028_v31, %v4049_v60  ;;  %v4369_v60 = vld [vmem:[%s10487_s10 + $0x20] sm:$0xff]  ;;  %4253 = vmatpush.msrb.mxu2 %v4222_v45 }
0x166d   :  { %4415 = vmatpush.msra.mxu0 %v4370_v1 }
0x166e   :  { %v4054_v25 = vsel %vm4053_vm8, %v10028_v31, %v4050_v44  ;;  %v4595_v44 = vld [vmem:[%s10492_s24 + $0x20] sm:$0xff] }
0x166f   :  { %v4059_v46 = vsel %vm4056_vm9, %v4058_v17, %v4054_v25  ;;  %4612 = vmatpush.msrb.mxu1 %v4595_v44  ;;  %v4221_v17 = vld [vmem:[%s10477_s21 + $0x8] sm:$0xff]  ;;  %v4367_v25 = vld [vmem:[%s10487_s10 + $0x10] sm:$0xff] }
0x1670   :  { %v4060_v54 = vmul.f32 %v11630_v9, %v4059_v46  ;;  %v1706_v9 = vadd.f32 %v11061_v2, %v1213_v43  ;;  %v4368_v46 = vld [vmem:[%s10487_s10 + $0x18] sm:$0xff]  ;;  %4254 = vmatpush.msrb.mxu2 %v4221_v17 }
0x1671   :  { %4416 = vmatpush.msra.mxu0 %v4368_v46  ;;  %v9887_v46 = vld [vmem:[%s10482_s17] ss:$0 sm:$0xff]  ;;  %s13364_s17 = sld [smem:[#allocation19_spill]] }
0x1672   :  { %9421 = vmatmul.msk.f32.gmra.mxu0 %vm505_vm1, %v4060_v54  ;;  %v2192_v55 = vadd.f32 %v11189_v50, %v1706_v9  ;;  %v2679_v50 = vadd.f32 %v11324_v42, %v2193_v0  ;;  %v4593_v54 = vld [vmem:[%s10492_s24 + $0x10] sm:$0xff]  ;;  %v13361_v9 = vld [vmem:[#allocation26_spill] sm:$0xff] }
0x1673   :  { %4613 = vmatpush.msrb.mxu1 %v4593_v54 }
0x1674   :  { %v2678_v4 = vadd.f32 %v11322_v56, %v2192_v55  ;;  %v3165_v57 = vadd.f32 %v11482_v6, %v2679_v50  ;;  %v1709_v6 = vadd.f32 %v11067_v34, %v1222_v13  ;;  %v4594_v13 = vld [vmem:[%s10492_s24 + $0x18] sm:$0xff] }
0x1676   :  { %v3164_v5 = vadd.f32 %v11480_v33, %v2678_v4  ;;  %v1708_v33 = vadd.f32 %v11065_v36, %v1219_v7  ;;  %v2195_v30 = vadd.f32 %v11195_v48, %v1709_v6 }
0x1678   :  { %v3650_v26 = vadd.f32 %v11596_v10, %v3164_v5  ;;  %v3651_v10 = vadd.f32 %v11598_v23, %v3165_v57  ;;  %v2194_v3 = vadd.f32 %v11193_v35, %v1708_v33  ;;  %v2681_v16 = vadd.f32 %v11328_v28, %v2195_v30  ;;  %v11718_v57 = vld [vmem:[%s10422_s14] ss:$0 sm:$0xff]  ;;  %s13379_s14 = sld [smem:[#allocation16_spill]] }
0x167a   :  { %v2680_v58 = vadd.f32 %v11326_v21, %v2194_v3  ;;  %v3167_v34 = vadd.f32 %v11486_v19, %v2681_v16  ;;  %v4596_v3 = vld [vmem:[%s10492_s24 + $0x28] sm:$0xff] }
0x167c   :  { %v3166_v53 = vadd.f32 %v11484_v38, %v2680_v58  ;;  %v3653_v14 = vadd.f32 %v11602_v32, %v3167_v34  ;;  %v4371_v32 = vld [vmem:[%s10487_s10 + $0x30] sm:$0xff] }
0x167d   :  { %4385 = vmatpush.msrb.mxu3 %v4371_v32 }
0x167e   :  { %v3652_v23 = vadd.f32 %v11600_v20, %v3166_v53 }
0x167f   :  { %4386 = vmatpush.msrb.mxu3 %v4369_v60 }
0x1681   :  { %4387 = vmatpush.msrb.mxu3 %v4367_v25 }
0x16d7   :  { %v3970_v37 = vpop.f32.mrf.mxu0 }
0x16d8   :  { %9424 = vmatmul.msk.f32.vlgmr.msra.gmra.mxu1 %vm361_vm15, %v3970_v37  ;;  %v4220_v37 = vld [vmem:[%s10477_s21] sm:$0xff]  ;;  %s13365_s21 = sld [smem:[#allocation15_spill]] }
0x16d9   :  { %4255 = vmatpush.msrb.mxu2 %v4220_v37 }
0x16df   :  { %v3973_v59 = vpop.f32.mrf.mxu0 }
0x16e0   :  { %9425 = vmatmul.msk.f32.gmra.mxu1 %vm361_vm15, %v3973_v59  ;;  %v4365_v59 = vld [vmem:[%s10487_s10] sm:$0xff] }
0x16e1   :  { %4388 = vmatpush.msrb.mxu3 %v4365_v59 }
0x16e7   :  { %v4084_v24 = vpop.f32.mrf.mxu0 }
0x16e8   :  { %9426 = vmatmul.msk.f32.gmra.mxu1 %vm361_vm15, %v4084_v24  ;;  %v4366_v24 = vld [vmem:[%s10487_s10 + $0x8] sm:$0xff]  ;;  %s13394_s10 = sld [smem:[#allocation22_spill]] }
0x16e9   :  { %4417 = vmatpush.msra.mxu0 %v4366_v24 }
0x16ef   :  { %v4087_v39 = vpop.f32.mrf.mxu0 }
0x16f0   :  { %9427 = vmatmul.msk.f32.gmra.mxu1 %vm361_vm15, %v4087_v39  ;;  %v4591_v39 = vld [vmem:[%s10492_s24] sm:$0xff] }
0x16f1   :  { %4614 = vmatpush.msrb.mxu1 %v4591_v39 }
0x1755   :  { %v4124_v49 = vpop.f32.mrf.mxu1 }
0x1756   :  { %v4136_v12 = vadd.f32 %v4124_v49, %v3650_v26 }
0x1758   :  { %v11658_v2 = vadd.f32 %v10225_v61, %v4136_v12 }
0x175a   :  { %v4145_v56 = vmul.f32 %v11658_v2, %v11658_v2 }
0x175c   :  { %v4149_v40 = vsel %vm167_vm0, %v4145_v56, 0.0 }
0x175d   :  { %4150 = vadd.xlane.f32.xlu2 %v4149_v40  ;;  %v4127_v47 = vpop.f32.mrf.mxu1 }
0x175e   :  { %v4137_v42 = vadd.f32 %v4127_v47, %v3651_v10  ;;  %v4598_v47 = vld [vmem:[%s10492_s24 + $0x38] sm:$0xff] }
0x175f   :  { %4640 = vmatpush.msra.mxu2 %v4598_v47 }
0x1760   :  { %v11672_v8 = vadd.f32 %v10226_v15, %v4137_v42 }
0x1761   :  { %4641 = vmatpush.msra.mxu2 %v4596_v3 }
0x1762   :  { %v4146_v36 = vmul.f32 %v11672_v8, %v11672_v8 }
0x1763   :  { %4642 = vmatpush.msra.mxu2 %v4594_v13 }
0x1764   :  { %v4152_v35 = vsel %vm167_vm0, %v4146_v36, 0.0 }
0x1765   :  { %4153 = vadd.xlane.f32.xlu0 %v4152_v35  ;;  %v4130_v21 = vpop.f32.mrf.mxu1  ;;  %v4592_v35 = vld [vmem:[%s10492_s24 + $0x8] sm:$0xff]  ;;  %s13380_s24 = sld [smem:[#allocation17_spill]] }
0x1766   :  { %v4138_v41 = vadd.f32 %v4130_v21, %v3652_v23  ;;  %4643 = vmatpush.msra.mxu2 %v4592_v35  ;;  %v8552_v35 = vld [vmem:[%s10532_s5] sm:$0xff] }
0x1768   :  { %v11685_v38 = vadd.f32 %v10227_v63, %v4138_v41 }
0x176a   :  { %v4147_v20 = vmul.f32 %v11685_v38, %v11685_v38 }
0x176c   :  { %v4155_v31 = vsel %vm167_vm0, %v4147_v20, 0.0 }
0x176d   :  { %4156 = vadd.xlane.f32.xlu1 %v4155_v31  ;;  %v4133_v48 = vpop.f32.mrf.mxu1 }
0x176e   :  { %v4139_v28 = vadd.f32 %v4133_v48, %v3653_v14 }
0x1770   :  { %v11693_v29 = vadd.f32 %v10228_v11, %v4139_v28 }
0x1772   :  { %v4148_v19 = vmul.f32 %v11693_v29, %v11693_v29 }
0x1774   :  { %v4158_v18 = vsel %vm167_vm0, %v4148_v19, 0.0 }
0x1775   :  { %4159 = vadd.xlane.f32.xlu2 %v4158_v18 }
0x17d0   :  { %v4151_v43 = vpop.xlane.xlu2 %4150 }
0x17d1   :  { %v4161_v55 = vmul.f32 %v4151_v43, %v13361_v9 }
0x17d3   :  { %v4165_v4 = vadd.f32 1e-06, %v4161_v55 }
0x17d5   :  { %10029 = vrsqrt.f32 %v4165_v4  ;;  %vm4175_vm11 = vweird.f32 %v4165_v4 }
0x17d8   :  { %v4154_v5 = vpop.xlane.xlu0 %4153 }
0x17d9   :  { %v4162_v22 = vmul.f32 %v4154_v5, %v13361_v9 }
0x17db   :  { %v10030_v26 = vpop.eup %10029  ;;  %v4166_v49 = vadd.f32 1e-06, %v4162_v22 }
0x17dc   :  { %v4170_v27 = vmul.f32 %v10030_v26, %v4165_v4  ;;  %vm4176_vm10 = vweird.f32 %v10030_v26 }
0x17dd   :  { %10031 = vrsqrt.f32 %v4166_v49  ;;  %vm4177_vm12 = vmor %vm4175_vm11, %vm4176_vm10  ;;  %vm4185_vm2 = vweird.f32 %v4166_v49 }
0x17de   :  { %v4171_v12 = vmul.f32 %v10030_v26, %v4170_v27 }
0x17e0   :  { %v4172_v0 = vmul.f32 0.5, %v4171_v12  ;;  %v4157_v61 = vpop.xlane.xlu1 %4156 }
0x17e1   :  { %v4163_v56 = vmul.f32 %v4157_v61, %v13361_v9 }
0x17e2   :  { %v4173_v50 = vsub.f32 1.5, %v4172_v0 }
0x17e3   :  { %v10032_v7 = vpop.eup %10031  ;;  %v4167_v33 = vadd.f32 1e-06, %v4163_v56 }
0x17e4   :  { %v4174_v40 = vmul.f32 %v10030_v26, %v4173_v50  ;;  %v4180_v10 = vmul.f32 %v10032_v7, %v4166_v49  ;;  %vm4186_vm13 = vweird.f32 %v10032_v7 }
0x17e5   :  { %10033 = vrsqrt.f32 %v4167_v33  ;;  %vm4187_vm3 = vmor %vm4185_vm2, %vm4186_vm13  ;;  %vm4195_vm5 = vweird.f32 %v4167_v33 }
0x17e6   :  { %v4178_v42 = vsel %vm4177_vm12, %v10030_v26, %v4174_v40  ;;  %v4181_v15 = vmul.f32 %v10032_v7, %v4180_v10 }
0x17e7   :  { %v4209_v58 = vmul.f32 %v4178_v42, %v11658_v2 }
0x17e8   :  { %v4182_v36 = vmul.f32 0.5, %v4181_v15  ;;  %v4160_v6 = vpop.xlane.xlu2 %4159 }
0x17e9   :  { %v4216_v53 = vmul.f32 %v11718_v57, %v4209_v58  ;;  %v4164_v23 = vmul.f32 %v4160_v6, %v13361_v9 }
0x17ea   :  { %v4183_v21 = vsub.f32 1.5, %v4182_v36 }
0x17eb   :  { %9428 = vmatmul.msk.f32.vlgmr.msrb.gmra.mxu2 %vm167_vm0, %v4216_v53  ;;  %9432 = vmatmul.msk.f32.vlgmr.msrb.gmra.mxu3 %vm167_vm0, %v4216_v53  ;;  %v10034_v30 = vpop.eup %10033  ;;  %v4168_v41 = vadd.f32 1e-06, %v4164_v23  ;;  %v4665_v23 = vld [vmem:[%s13362_s0] sm:$0xff] }
0x17ec   :  { %9436 = vmatmul.msk.f32.vlgmr.msra.gmra.mxu0 %vm167_vm0, %v4216_v53  ;;  %9448 = vmatmul.msk.f32.vlgmr.msrb.gmra.mxu1 %vm167_vm0, %v4216_v53  ;;  %v4184_v16 = vmul.f32 %v10032_v7, %v4183_v21  ;;  %v4190_v63 = vmul.f32 %v10034_v30, %v4167_v33  ;;  %vm4196_vm4 = vweird.f32 %v10034_v30  ;;  %4667 = vst [vmem:[#allocation1] ss:$2 sm:$0xff] %v4665_v23  ;;  %v4759_v23 = vld [vmem:[%s13364_s17 + $0x38] sm:$0xff] }
0x17ed   :  { %10035 = vrsqrt.f32 %v4168_v41  ;;  %vm4197_vm6 = vmor %vm4195_vm5, %vm4196_vm4  ;;  %vm4205_vm8 = vweird.f32 %v4168_v41 }
0x17ee   :  { %v4188_v34 = vsel %vm4187_vm3, %v10032_v7, %v4184_v16  ;;  %v4191_v20 = vmul.f32 %v10034_v30, %v4190_v63 }
0x17ef   :  { %v4210_v14 = vmul.f32 %v4188_v34, %v11672_v8 }
0x17f0   :  { %v4192_v31 = vmul.f32 0.5, %v4191_v20  ;;  %v11782_v20 = vld [vmem:[%s13363_s9 + $0x8] sm:$0xff] }
0x17f1   :  { %v4217_v48 = vmul.f32 %v11718_v57, %v4210_v14  ;;  %v4873_v14 = vmul.f32 %v11782_v20, %v11782_v20 }
0x17f2   :  { %v4193_v28 = vsub.f32 1.5, %v4192_v31 }
0x17f3   :  { %v10036_v11 = vpop.eup %10035  ;;  %9429 = vmatmul.msk.f32.gmra.mxu2 %vm167_vm0, %v4217_v48  ;;  %9433 = vmatmul.msk.f32.gmra.mxu3 %vm167_vm0, %v4217_v48  ;;  %v4668_v21 = vld.sshfl [vmem:[#allocation1] sm:$0xff pattern:$0x75316420]  ;;  %v4877_v31 = vsel %vm167_vm0, %v4873_v14, 0.0 }
0x17f4   :  { %v4194_v19 = vmul.f32 %v10034_v30, %v4193_v28  ;;  %v4200_v18 = vmul.f32 %v10036_v11, %v4168_v41  ;;  %9437 = vmatmul.msk.f32.gmra.mxu0 %vm167_vm0, %v4217_v48  ;;  %9449 = vmatmul.msk.f32.gmra.mxu1 %vm167_vm0, %v4217_v48  ;;  %vm4206_vm7 = vweird.f32 %v10036_v11  ;;  %v11776_v41 = vld [vmem:[%s13363_s9] sm:$0xff] }
0x17f5   :  { %vm4207_vm9 = vmor %vm4205_vm8, %vm4206_vm7  ;;  %9456 = vmatpush.msk.msra.mxu3 %vm374_vm14, %v4668_v21  ;;  %v4872_v16 = vmul.f32 %v11776_v41, %v11776_v41 }
0x17f6   :  { %v4198_v52 = vsel %vm4197_vm6, %v10034_v30, %v4194_v19  ;;  %v4201_v32 = vmul.f32 %v10036_v11, %v4200_v18  ;;  %v4669_v30 = vld.sshfl [vmem:[#allocation1 + $0x8] sm:$0xff pattern:$0x75316420] }
0x17f7   :  { %v4211_v51 = vmul.f32 %v4198_v52, %v11685_v38  ;;  %9461 = vmatpush.msk.msrb.mxu0 %vm374_vm14, %v4669_v30  ;;  %8558 = vst [vmem:[#allocation1] ss:$2 sm:$0xff] %v8552_v35  ;;  %v4874_v63 = vsel %vm167_vm0, %v4872_v16, 0.0 }
0x17f8   :  { %v4202_v62 = vmul.f32 0.5, %v4201_v32 }
0x17f9   :  { %v4218_v45 = vmul.f32 %v11718_v57, %v4211_v51 }
0x17fa   :  { %v4203_v60 = vsub.f32 1.5, %v4202_v62 }
0x17fb   :  { %9430 = vmatmul.msk.f32.gmra.mxu2 %vm167_vm0, %v4218_v45  ;;  %9434 = vmatmul.msk.f32.gmra.mxu3 %vm167_vm0, %v4218_v45 }
0x17fc   :  { %v4204_v1 = vmul.f32 %v10036_v11, %v4203_v60  ;;  %9438 = vmatmul.msk.f32.gmra.mxu0 %vm167_vm0, %v4218_v45  ;;  %9450 = vmatmul.msk.f32.gmra.mxu1 %vm167_vm0, %v4218_v45  ;;  %v4767_v60 = vld [vmem:[%s13364_s17 + $0x78] sm:$0xff] }
0x17fd   :  { %4789 = vmatpush.msra.mxu1 %v4767_v60 }
0x17fe   :  { %v4208_v44 = vsel %vm4207_vm9, %v10036_v11, %v4204_v1  ;;  %v4766_v1 = vld [vmem:[%s13364_s17 + $0x70] sm:$0xff] }
0x17ff   :  { %v4212_v17 = vmul.f32 %v4208_v44, %v11693_v29  ;;  %4790 = vmatpush.msra.mxu1 %v4766_v1 }
0x1801   :  { %v4219_v25 = vmul.f32 %v11718_v57, %v4212_v17 }
0x1803   :  { %9431 = vmatmul.msk.f32.gmra.mxu2 %vm167_vm0, %v4219_v25  ;;  %9435 = vmatmul.msk.f32.gmra.mxu3 %vm167_vm0, %v4219_v25 }
0x1804   :  { %9439 = vmatmul.msk.f32.gmra.mxu0 %vm167_vm0, %v4219_v25  ;;  %9451 = vmatmul.msk.f32.gmra.mxu1 %vm167_vm0, %v4219_v25 }
0x180b   :  { %9452 = vmatmul.msk.f32.vlgmr.msra.gmra.mxu2 %vm167_vm0, %v4216_v53 }
0x1813   :  { %9453 = vmatmul.msk.f32.gmra.mxu2 %vm167_vm0, %v4217_v48 }
0x181b   :  { %9454 = vmatmul.msk.f32.gmra.mxu2 %vm167_vm0, %v4218_v45 }
0x1823   :  { %9455 = vmatmul.msk.f32.gmra.mxu2 %vm167_vm0, %v4219_v25 }
0x1869   :  { %v11817_v1 = vpop.f32.mrf.mxu0 }
0x186e   :  { %v4257_v54 = vpop.f32.mrf.mxu2 }
0x186f   :  { %v4258_v37 = vadd.f32 %v9887_v46, %v4257_v54 }
0x1871   :  { %v4269_v59 = vsel %vm361_vm15, %v4258_v37, -inf }
0x1872   :  { %4270 = vmax.xlane.f32.xlu0 %v4269_v59  ;;  %v4775_v59 = vld [vmem:[%s13364_s17 + $0xb8] sm:$0xff] }
0x1873   :  { %4826 = vmatpush.msrb.mxu2 %v4775_v59 }
0x1876   :  { %v4260_v24 = vpop.f32.mrf.mxu2 }
0x1877   :  { %v4261_v39 = vadd.f32 %v9887_v46, %v4260_v24  ;;  %v4774_v24 = vld [vmem:[%s13364_s17 + $0xb0] sm:$0xff] }
0x1878   :  { %4827 = vmatpush.msrb.mxu2 %v4774_v24 }
0x1879   :  { %v4272_v43 = vsel %vm361_vm15, %v4261_v39, -inf }
0x187a   :  { %4273 = vmax.xlane.f32.xlu1 %v4272_v43  ;;  %v4764_v43 = vld [vmem:[%s13364_s17 + $0x60] sm:$0xff] }
0x187e   :  { %v4263_v55 = vpop.f32.mrf.mxu2 }
0x187f   :  { %v4264_v4 = vadd.f32 %v9887_v46, %v4263_v55  ;;  %v4773_v55 = vld [vmem:[%s13364_s17 + $0xa8] sm:$0xff] }
0x1880   :  { %4828 = vmatpush.msrb.mxu2 %v4773_v55  ;;  %v4771_v55 = vld [vmem:[%s13364_s17 + $0x98] sm:$0xff] }
0x1881   :  { %v4275_v5 = vsel %vm361_vm15, %v4264_v4, -inf }
0x1882   :  { %4276 = vmax.xlane.f32.xlu2 %v4275_v5 }
0x1886   :  { %v4266_v22 = vpop.f32.mrf.mxu2 }
0x1887   :  { %v4267_v26 = vadd.f32 %v9887_v46, %v4266_v22 }
0x1889   :  { %v4278_v27 = vsel %vm361_vm15, %v4267_v26, -inf }
0x188a   :  { %4279 = vmax.xlane.f32.xlu0 %v4278_v27  ;;  %v4772_v27 = vld [vmem:[%s13364_s17 + $0xa0] sm:$0xff] }
0x188b   :  { %4829 = vmatpush.msrb.mxu2 %v4772_v27 }
0x188d   :  { %4830 = vmatpush.msrb.mxu2 %v4771_v55 }
0x18e5   :  { %v4271_v49 = vpop.xlane.xlu0 %4270 }
0x18e6   :  { %v4281_v12 = vsub.f32 %v4258_v37, %v4271_v49  ;;  %v4765_v37 = vld [vmem:[%s13364_s17 + $0x68] sm:$0xff] }
0x18e7   :  { %4791 = vmatpush.msra.mxu1 %v4765_v37 }
0x18e8   :  { %v4285_v0 = vmul.f32 1.442695, %v4281_v12 }
0x18e9   :  { %4792 = vmatpush.msra.mxu1 %v4764_v43  ;;  %v4758_v43 = vld [vmem:[%s13364_s17 + $0x30] sm:$0xff] }
0x18ea   :  { %10037 = vpow2.f32 %v4285_v0  ;;  %v4762_v0 = vld [vmem:[%s13364_s17 + $0x50] sm:$0xff] }
0x18ed   :  { %v4274_v61 = vpop.xlane.xlu1 %4273 }
0x18ee   :  { %v4282_v56 = vsub.f32 %v4261_v39, %v4274_v61 }
0x18f0   :  { %v10038_v50 = vpop.eup %10037  ;;  %v4287_v57 = vmul.f32 1.442695, %v4282_v56 }
0x18f1   :  { %v4293_v7 = vsel %vm361_vm15, %v10038_v50, 0.0 }
0x18f2   :  { %4294 = vadd.xlane.f32.xlu1 %v4293_v7  ;;  %10039 = vpow2.f32 %v4287_v57  ;;  %v4761_v7 = vld [vmem:[%s13364_s17 + $0x48] sm:$0xff] }
0x18f5   :  { %v4277_v40 = vpop.xlane.xlu2 %4276 }
0x18f6   :  { %v4283_v33 = vsub.f32 %v4264_v4, %v4277_v40 }
0x18f8   :  { %v4289_v10 = vmul.f32 1.442695, %v4283_v33  ;;  %v11759_v47 = vpop.eup %10039 }
0x18f9   :  { %v4296_v3 = vsel %vm361_vm15, %v11759_v47, 0.0 }
0x18fa   :  { %10041 = vpow2.f32 %v4289_v10  ;;  %4297 = vadd.xlane.f32.xlu2 %v4296_v3 }
0x18fd   :  { %v4280_v58 = vpop.xlane.xlu0 %4279 }
0x18fe   :  { %v4284_v15 = vsub.f32 %v4267_v26, %v4280_v58  ;;  %v4763_v26 = vld [vmem:[%s13364_s17 + $0x58] sm:$0xff]  ;;  %v4760_v58 = vld [vmem:[%s13364_s17 + $0x40] sm:$0xff] }
0x18ff   :  { %4793 = vmatpush.msra.mxu1 %v4763_v26 }
0x1900   :  { %v11763_v42 = vpop.eup %10041  ;;  %v4291_v53 = vmul.f32 1.442695, %v4284_v15 }
0x1901   :  { %v4299_v13 = vsel %vm361_vm15, %v11763_v42, 0.0  ;;  %4794 = vmatpush.msra.mxu1 %v4762_v0 }
0x1902   :  { %4300 = vadd.xlane.f32.xlu0 %v4299_v13  ;;  %10043 = vpow2.f32 %v4291_v53  ;;  %4875 = vadd.xlane.f32.xlu2 %v4874_v63 }
0x1903   :  { %4795 = vmatpush.msra.mxu1 %v4761_v7  ;;  %v4769_v7 = vld [vmem:[%s13364_s17 + $0x88] sm:$0xff] }
0x1905   :  { %4796 = vmatpush.msra.mxu1 %v4760_v58  ;;  %v4754_v58 = vld [vmem:[%s13364_s17 + $0x10] sm:$0xff] }
0x1907   :  { %4797 = vmatpush.msra.mxu1 %v4759_v23 }
0x1908   :  { %v11767_v36 = vpop.eup %10043 }
0x1909   :  { %v4302_v6 = vsel %vm361_vm15, %v11767_v36, 0.0  ;;  %4798 = vmatpush.msra.mxu1 %v4758_v43  ;;  %v4914_v43 = vld [vmem:[%s13365_s21 + $0x18] sm:$0xff] }
0x190a   :  { %4303 = vadd.xlane.f32.xlu1 %v4302_v6  ;;  %4878 = vadd.xlane.f32.xlu0 %v4877_v31 }
0x190b   :  { %4933 = vmatpush.msrb.mxu3 %v4914_v43 }
0x1965   :  { %v4295_v34 = vpop.xlane.xlu1 %4294 }
0x1966   :  { %10045 = vrcp.f32 %v4295_v34  ;;  %v4316_v18 = vand.u32 2147483648, %v4295_v34  ;;  %v4314_v32 = vand.u32 2147483647, %v4295_v34  ;;  %vm4310_vm11 = vweird.f32 %v4295_v34 }
0x1968   :  { %v4317_v62 = vor.u32 1.1754944e-38, %v4316_v18  ;;  %vm4315_vm13 = vcmp.eq.f32.partialorder %v4314_v32, 8.507059e+37 }
0x196c   :  { %v10046_v48 = vpop.eup %10045 }
0x196d   :  { %v4306_v28 = vmul.f32 %v10046_v48, %v4295_v34  ;;  %v4298_v19 = vpop.xlane.xlu2 %4297  ;;  %vm4311_vm10 = vweird.f32 %v10046_v48 }
0x196e   :  { %10047 = vrcp.f32 %v4298_v19  ;;  %vm4312_vm12 = vmor %vm4310_vm11, %vm4311_vm10  ;;  %v4331_v4 = vand.u32 2147483648, %v4298_v19  ;;  %v4329_v22 = vand.u32 2147483647, %v4298_v19  ;;  %vm4325_vm3 = vweird.f32 %v4298_v19 }
0x196f   :  { %v4307_v11 = vsub.f32 1.0, %v4306_v28 }
0x1970   :  { %v4332_v61 = vor.u32 1.1754944e-38, %v4331_v4  ;;  %vm4330_vm5 = vcmp.eq.f32.partialorder %v4329_v22, 8.507059e+37  ;;  %v4757_v4 = vld [vmem:[%s13364_s17 + $0x28] sm:$0xff]  ;;  %v4770_v22 = vld [vmem:[%s13364_s17 + $0x90] sm:$0xff] }
0x1971   :  { %v4308_v52 = vmul.f32 %v10046_v48, %v4307_v11  ;;  %4799 = vmatpush.msra.mxu1 %v4757_v4  ;;  %4831 = vmatpush.msrb.mxu2 %v4770_v22 }
0x1973   :  { %v4309_v51 = vadd.f32 %v10046_v48, %v4308_v52  ;;  %4832 = vmatpush.msrb.mxu2 %v4769_v7 }
0x1974   :  { %v10048_v44 = vpop.eup %10047 }
0x1975   :  { %v4313_v45 = vsel %vm4312_vm12, %v10046_v48, %v4309_v51  ;;  %v4301_v25 = vpop.xlane.xlu0 %4300  ;;  %v4321_v54 = vmul.f32 %v10048_v44, %v4298_v19  ;;  %vm4326_vm2 = vweird.f32 %v10048_v44 }
0x1976   :  { %v4318_v17 = vsel %vm4315_vm13, %v4317_v62, %v4313_v45  ;;  %10049 = vrcp.f32 %v4301_v25  ;;  %vm4327_vm4 = vmor %vm4325_vm3, %vm4326_vm2  ;;  %v4346_v33 = vand.u32 2147483648, %v4301_v25  ;;  %v4344_v13 = vand.u32 2147483647, %v4301_v25 }
0x1977   :  { %v4319_v46 = vmul.f32 %v10038_v50, %v4318_v17  ;;  %v4322_v39 = vsub.f32 1.0, %v4321_v54  ;;  %vm4340_vm7 = vweird.f32 %v4301_v25  ;;  %v9441_v17 = vmul.f32 -1.442695, %v11817_v1 }
0x1978   :  { %vm4345_vm9 = vcmp.eq.f32.partialorder %v4344_v13, 8.507059e+37  ;;  %v11857_v13 = vld [vmem:[%s10412_s3] sm:$0xf] }
0x1979   :  { %9457 = vmatmul.msk.f32.vlgmr.msra.gmra.mxu3 %vm361_vm15, %v4319_v46  ;;  %9462 = vmatmul.msk.f32.vlgmr.msrb.gmra.mxu0 %vm361_vm15, %v4319_v46  ;;  %v4323_v5 = vmul.f32 %v10048_v44, %v4322_v39  ;;  %v4847_v53 = vsel %vm361_vm15, %v4319_v46, 0.0 }
0x197b   :  { %v4324_v12 = vadd.f32 %v10048_v44, %v4323_v5 }
0x197c   :  { %v10050_v49 = vpop.eup %10049 }
0x197d   :  { %v4336_v50 = vmul.f32 %v10050_v49, %v4301_v25  ;;  %v4328_v56 = vsel %vm4327_vm4, %v10048_v44, %v4324_v12  ;;  %v4304_v10 = vpop.xlane.xlu1 %4303  ;;  %vm4341_vm6 = vweird.f32 %v10050_v49  ;;  %v11819_v44 = vpop.f32.mrf.mxu3 }
0x197e   :  { %v4333_v40 = vsel %vm4330_vm5, %v4332_v61, %v4328_v56  ;;  %10051 = vrcp.f32 %v4304_v10  ;;  %vm4342_vm8 = vmor %vm4340_vm7, %vm4341_vm6  ;;  %v4361_v11 = vand.u32 2147483648, %v4304_v10  ;;  %v4359_v18 = vand.u32 2147483647, %v4304_v10  ;;  %v11823_v25 = vpop.f32.mrf.mxu0  ;;  %v4756_v56 = vld [vmem:[%s13364_s17 + $0x20] sm:$0xff] }
0x197f   :  { %v4337_v57 = vsub.f32 1.0, %v4336_v50  ;;  %v4334_v3 = vmul.f32 %v11759_v47, %v4333_v40  ;;  %v4347_v47 = vor.u32 1.1754944e-38, %v4346_v33  ;;  %vm4355_vm11 = vweird.f32 %v4304_v10  ;;  %v4876_v50 = vpop.xlane.xlu2 %4875  ;;  %4800 = vmatpush.msra.mxu1 %v4756_v56  ;;  %v4912_v56 = vld [vmem:[%s13365_s21 + $0x8] sm:$0xff] }
0x1980   :  { %v4362_v32 = vor.u32 1.1754944e-38, %v4361_v11  ;;  %vm4360_vm13 = vcmp.eq.f32.partialorder %v4359_v18, 8.507059e+37  ;;  %10053 = vpow2.f32 %v9441_v17  ;;  %v9443_v46 = vmul.f32 -1.442695, %v11823_v25 }
0x1981   :  { %v4338_v15 = vmul.f32 %v10050_v49, %v4337_v57  ;;  %9458 = vmatmul.msk.f32.gmra.mxu3 %vm361_vm15, %v4334_v3  ;;  %v4848_v6 = vsel %vm361_vm15, %v4334_v3, 0.0  ;;  %9463 = vmatmul.msk.f32.gmra.mxu0 %vm361_vm15, %v4334_v3  ;;  %v4755_v57 = vld [vmem:[%s13364_s17 + $0x18] sm:$0xff]  ;;  %v4880_v33 = vmul.f32 %v4876_v50, %v13361_v9  ;;  %v4913_v50 = vld [vmem:[%s13365_s21 + $0x10] sm:$0xff] }
0x1982   :  { %v4849_v21 = vadd.f32 %v4848_v6, %v4847_v53  ;;  %4801 = vmatpush.msra.mxu1 %v4755_v57  ;;  %4934 = vmatpush.msrb.mxu3 %v4913_v50 }
0x1983   :  { %v4339_v35 = vadd.f32 %v10050_v49, %v4338_v15  ;;  %v4882_v15 = vadd.f32 1e-06, %v4880_v33 }
0x1984   :  { %v10052_v63 = vpop.eup %10051  ;;  %4802 = vmatpush.msra.mxu1 %v4754_v58  ;;  %4935 = vmatpush.msrb.mxu3 %v4912_v56 }
0x1985   :  { %v4343_v30 = vsel %vm4342_vm8, %v10050_v49, %v4339_v35  ;;  %v4351_v14 = vmul.f32 %v10052_v63, %v4304_v10  ;;  %vm4356_vm10 = vweird.f32 %v10052_v63  ;;  %v11826_v54 = vpop.f32.mrf.mxu3  ;;  %v4768_v10 = vld [vmem:[%s13364_s17 + $0x80] sm:$0xff]  ;;  %vm4890_vm2 = vweird.f32 %v4882_v15 }
0x1986   :  { %v4348_v16 = vsel %vm4345_vm9, %v4347_v47, %v4343_v30  ;;  %vm4357_vm12 = vmor %vm4355_vm11, %vm4356_vm10  ;;  %v10054_v37 = vpop.eup %10053  ;;  %v9442_v24 = vmul.f32 -1.442695, %v11826_v54  ;;  %v11834_v5 = vpop.f32.mrf.mxu0  ;;  %4833 = vmatpush.msrb.mxu2 %v4768_v10 }
0x1987   :  { %v4349_v34 = vmul.f32 %v11763_v42, %v4348_v16  ;;  %v4352_v48 = vsub.f32 1.0, %v4351_v14  ;;  %v11828_v59 = vadd.f32 1.0, %v10054_v37  ;;  %v9445_v49 = vmul.f32 -1.442695, %v11834_v5  ;;  %v4879_v16 = vpop.xlane.xlu0 %4878 }
0x1988   :  { %9484 = vmatpush.msk.msra.mxu2 %vm374_vm14, %v11857_v13 }
0x1989   :  { %v4850_v31 = vsel %vm361_vm15, %v4349_v34, 0.0  ;;  %9459 = vmatmul.msk.f32.gmra.mxu3 %vm361_vm15, %v4349_v34  ;;  %9464 = vmatmul.msk.f32.gmra.mxu0 %vm361_vm15, %v4349_v34  ;;  %v4353_v19 = vmul.f32 %v10052_v63, %v4352_v48  ;;  %v4881_v48 = vmul.f32 %v4879_v16, %v13361_v9  ;;  %v4487_v37 = vand.u32 2147483647, %v11828_v59  ;;  %v9888_v16 = vld [vmem:[%s13366_s8] ss:$0 sm:$0xff] }
0x198a   :  { %v4851_v28 = vadd.f32 %v4850_v31, %v4849_v21  ;;  %v4753_v21 = vld [vmem:[%s13364_s17 + $0x8] sm:$0xff]  ;;  %vm4483_vm5 = vweird.f32 %v11828_v59 }
0x198b   :  { %v4354_v52 = vadd.f32 %v10052_v63, %v4353_v19  ;;  %4803 = vmatpush.msra.mxu1 %v4753_v21  ;;  %v4752_v19 = vld [vmem:[%s13364_s17] sm:$0xff]  ;;  %vm11910_vm6 = vcmp.eq.f32.partialorder %v4487_v37, 8.507059e+37  ;;  %v4645_v37 = vpop.f32.mrf.mxu2 }
0x198d   :  { %v4358_v51 = vsel %vm4357_vm12, %v10052_v63, %v4354_v52  ;;  %v11841_v12 = vpop.f32.mrf.mxu3  ;;  %v11882_v52 = vadd.f32 1e-06, %v4881_v48  ;;  %4804 = vmatpush.msra.mxu1 %v4752_v19 }
0x198e   :  { %v4363_v42 = vsel %vm4360_vm13, %v4362_v32, %v4358_v51  ;;  %v9444_v61 = vmul.f32 -1.442695, %v11841_v12  ;;  %v11865_v23 = vpop.f32.mrf.mxu0 }
0x198f   :  { %v4364_v62 = vmul.f32 %v11767_v36, %v4363_v42  ;;  %v9440_v36 = vmul.f32 -1.442695, %v11819_v44  ;;  %v9447_v30 = vmul.f32 -1.442695, %v11865_v23  ;;  %9481 = vmatpush.msk.msrb.mxu1 %vm374_vm14, %v11857_v13  ;;  %vm4900_vm11 = vweird.f32 %v11882_v52 }
0x1991   :  { %9460 = vmatmul.msk.f32.gmra.mxu3 %vm361_vm15, %v4364_v62  ;;  %v4852_v45 = vsel %vm361_vm15, %v4364_v62, 0.0  ;;  %9465 = vmatmul.msk.f32.gmra.mxu0 %vm361_vm15, %v4364_v62  ;;  %10055 = vpow2.f32 %v9440_v36 }
0x1992   :  { %v11815_v60 = vadd.f32 %v4852_v45, %v4851_v28  ;;  %10057 = vpow2.f32 %v9443_v46 }
0x1993   :  { %10059 = vrcp.f32 %v11828_v59 }
0x1994   :  { %10061 = vpow2.f32 %v9442_v24  ;;  %v4489_v24 = vand.u32 2147483648, %v11828_v59 }
0x1995   :  { %v11876_v31 = vpop.f32.mrf.mxu3 }
0x1996   :  { %v9446_v32 = vmul.f32 -1.442695, %v11876_v31 }
0x1997   :  { %v10056_v39 = vpop.eup %10055 }
0x1998   :  { %v10058_v26 = vpop.eup %10057  ;;  %v11838_v27 = vadd.f32 1.0, %v10056_v39 }
0x1999   :  { %v11843_v0 = vadd.f32 1.0, %v10058_v26  ;;  %v11850_v40 = vpop.eup %10059 }
0x199a   :  { %10063 = vrcp.f32 %v11838_v27  ;;  %v10062_v3 = vpop.eup %10061  ;;  %v4479_v53 = vmul.f32 %v11850_v40, %v11828_v59  ;;  %vm4484_vm4 = vweird.f32 %v11850_v40  ;;  %v4490_v59 = vor.u32 1.1754944e-38, %v4489_v24 }
0x199b   :  { %10065 = vpow2.f32 %v9445_v49  ;;  %v11863_v6 = vadd.f32 1.0, %v10062_v3  ;;  %vm11924_vm8 = vmor %vm4483_vm5, %vm4484_vm4  ;;  %vm4468_vm9 = vweird.f32 %v11838_v27  ;;  %vm4513_vm5 = vweird.f32 %v11843_v0 }
0x199c   :  { %10067 = vrcp.f32 %v11843_v0  ;;  %v4480_v34 = vsub.f32 1.0, %v4479_v53  ;;  %v4911_v53 = vld [vmem:[%s13365_s21] sm:$0xff]  ;;  %v4517_v57 = vand.u32 2147483647, %v11843_v0 }
0x199d   :  { %10069 = vpow2.f32 %v9444_v61  ;;  %4936 = vmatpush.msrb.mxu3 %v4911_v53 }
0x199e   :  { %10071 = vrsqrt.f32 %v4882_v15  ;;  %v4481_v42 = vmul.f32 %v11850_v40, %v4480_v34 }
0x199f   :  { %10073 = vrcp.f32 %v11863_v6 }
0x19a0   :  { %v11867_v35 = vpop.eup %10063  ;;  %10075 = vpow2.f32 %v9447_v30  ;;  %v4482_v55 = vadd.f32 %v11850_v40, %v4481_v42 }
0x19a1   :  { %v10066_v47 = vpop.eup %10065  ;;  %v4464_v14 = vmul.f32 %v11867_v35, %v11838_v27  ;;  %10077 = vrsqrt.f32 %v11882_v52  ;;  %vm4469_vm10 = vweird.f32 %v11867_v35 }
0x19a2   :  { %v11871_v63 = vpop.eup %10067  ;;  %v11879_v11 = vadd.f32 1.0, %v10066_v47  ;;  %v4486_v21 = vsel %vm11924_vm8, %v11850_v40, %v4482_v55  ;;  %v4474_v40 = vand.u32 2147483648, %v11838_v27  ;;  %vm11959_vm13 = vmor %vm4468_vm9, %vm4469_vm10  ;;  %vm4776_vm8 = vcmask 523264  }
0x19a3   :  { %v10070_v28 = vpop.eup %10069  ;;  %v4465_v62 = vsub.f32 1.0, %v4464_v14  ;;  %v4509_v45 = vmul.f32 %v11871_v63, %v11843_v0  ;;  %vm4518_vm9 = vcmp.eq.f32.partialorder %v4517_v57, 8.507059e+37  ;;  %vm4498_vm10 = vweird.f32 %v11863_v6 }
0x19a4   :  { %v10072_v18 = vpop.eup %10071  ;;  %10079 = vrcp.f32 %v11879_v11  ;;  %v11892_v17 = vadd.f32 1.0, %v10070_v28 }
0x19a5   :  { %v4885_v51 = vmul.f32 %v10072_v18, %v4882_v15  ;;  %v11894_v46 = vpop.eup %10073  ;;  %10081 = vpow2.f32 %v9446_v32  ;;  %vm4891_vm3 = vweird.f32 %v10072_v18  ;;  %v4466_v4 = vmul.f32 %v11867_v35, %v4465_v62 }
0x19a6   :  { %v10076_v22 = vpop.eup %10075  ;;  %v4510_v26 = vsub.f32 1.0, %v4509_v45  ;;  %v4494_v49 = vmul.f32 %v11894_v46, %v11863_v6  ;;  %10083 = vrcp.f32 %v11892_v17  ;;  %vm11916_vm7 = vmor %vm4890_vm2, %vm4891_vm3  ;;  %v4472_v32 = vand.u32 2147483647, %v11838_v27 }
0x19a7   :  { %v4886_v36 = vmul.f32 %v10072_v18, %v4885_v51  ;;  %v11907_v7 = vpop.eup %10077  ;;  %v4467_v47 = vadd.f32 %v11867_v35, %v4466_v4  ;;  %v11937_v30 = vadd.f32 1.0, %v10076_v22  ;;  %v4491_v45 = vsel %vm11910_vm6, %v4490_v59, %v4486_v21 }
0x19a8   :  { %v4895_v15 = vmul.f32 %v11907_v7, %v11882_v52  ;;  %v4511_v14 = vmul.f32 %v11871_v63, %v4510_v26  ;;  %v4495_v48 = vsub.f32 1.0, %v4494_v49  ;;  %vm4901_vm12 = vweird.f32 %v11907_v7 }
0x19a9   :  { %v4887_v39 = vmul.f32 0.5, %v4886_v36  ;;  %vm4514_vm2 = vweird.f32 %v11871_v63  ;;  %10085 = vrcp.f32 %v11937_v30  ;;  %vm4473_vm3 = vcmp.eq.f32.partialorder %v4472_v32, 8.507059e+37  ;;  %vm11980_vm4 = vmor %vm4900_vm11, %vm4901_vm12 }
0x19aa   :  { %v11920_v10 = vpop.eup %10079  ;;  %v4896_v19 = vmul.f32 %v11907_v7, %v4895_v15  ;;  %v4512_v43 = vadd.f32 %v11871_v63, %v4511_v14  ;;  %v4496_v27 = vmul.f32 %v11894_v46, %v4495_v48  ;;  %v4475_v4 = vor.u32 1.1754944e-38, %v4474_v40  ;;  %vm11992_vm6 = vmor %vm4513_vm5, %vm4514_vm2  ;;  %v4616_v48 = vpop.f32.mrf.mxu1 }
0x19ab   :  { %v4888_v61 = vsub.f32 1.5, %v4887_v39  ;;  %v10082_v34 = vpop.eup %10081  ;;  %v4539_v51 = vmul.f32 %v11920_v10, %v11879_v11  ;;  %v4471_v39 = vsel %vm11959_vm13, %v11867_v35, %v4467_v47  ;;  %v4584_v35 = vmul.f32 %v4491_v45, %v11817_v1 }
0x19ac   :  { %v11949_v62 = vpop.eup %10083  ;;  %v4897_v36 = vmul.f32 0.5, %v4896_v19  ;;  %v4476_v56 = vsel %vm4473_vm3, %v4475_v4, %v4471_v39  ;;  %v4516_v1 = vsel %vm11992_vm6, %v11871_v63, %v4512_v43  ;;  %v4497_v33 = vadd.f32 %v11894_v46, %v4496_v27 }
0x19ad   :  { %v4889_v58 = vmul.f32 %v10072_v18, %v4888_v61  ;;  %v4540_v22 = vsub.f32 1.0, %v4539_v51  ;;  %v4524_v26 = vmul.f32 %v11949_v62, %v11892_v17  ;;  %v4519_v61 = vand.u32 2147483648, %v11843_v0  ;;  %v4648_v51 = vpop.f32.mrf.mxu2 }
0x19ae   :  { %v4898_v55 = vsub.f32 1.5, %v4897_v36  ;;  %v4658_v3 = vmul.f32 %v4645_v37, %v4584_v35  ;;  %v4583_v47 = vmul.f32 %v4476_v56, %v11819_v44  ;;  %v4504_v63 = vand.u32 2147483648, %v11863_v6  ;;  %v4992_v37 = vld [vmem:[%s13380_s24 + $0x18] sm:$0xff] }
0x19af   :  { %v4893_v28 = vsel %vm11916_vm7, %v10072_v18, %v4889_v58  ;;  %vm4499_vm7 = vweird.f32 %v11894_v46  ;;  %v12006_v58 = vpop.eup %10085  ;;  %v4541_v15 = vmul.f32 %v11920_v10, %v4540_v22  ;;  %v4525_v0 = vsub.f32 1.0, %v4524_v26  ;;  %v4947_v18 = vld [vmem:[%s13379_s14 + $0x18] sm:$0xff]  ;;  %5005 = vmatpush.msra.mxu3 %v4992_v37 }
0x19b0   :  { %v4904_v42 = vmul.f32 %v4893_v28, %v11776_v41  ;;  %v11965_v41 = vadd.f32 1.0, %v10082_v34  ;;  %v4899_v50 = vmul.f32 %v11907_v7, %v4898_v55  ;;  %v4520_v34 = vor.u32 1.1754944e-38, %v4519_v61  ;;  %vm12018_vm11 = vmor %vm4498_vm10, %vm4499_vm7  ;;  %4972 = vmatpush.msra.mxu0 %v4947_v18 }
0x19b1   :  { %v4569_v44 = vmul.f32 %v12006_v58, %v11937_v30  ;;  %vm4544_vm12 = vweird.f32 %v11920_v10  ;;  %v4526_v40 = vmul.f32 %v11949_v62, %v4525_v0  ;;  %v4549_v45 = vand.u32 2147483648, %v11879_v11 }
0x19b2   :  { %v11967_v24 = vmul.f32 %v9888_v16, %v4904_v42  ;;  %10087 = vrcp.f32 %v11965_v41  ;;  %v4903_v59 = vsel %vm11980_vm4, %v11907_v7, %v4899_v50  ;;  %v4502_v7 = vand.u32 2147483647, %v11863_v6 }
0x19b3   :  { %v4905_v21 = vmul.f32 %v4903_v59, %v11782_v20  ;;  %v4521_v19 = vsel %vm4518_vm9, %v4520_v34, %v4516_v1  ;;  %v4501_v6 = vsel %vm12018_vm11, %v11894_v46, %v4497_v33  ;;  %v4505_v42 = vor.u32 1.1754944e-38, %v4504_v63 }
0x19b4   :  { %9471 = vmatmul.msk.f32.vlgmr.msrb.gmra.mxu3 %vm167_vm0, %v11967_v24  ;;  %v4657_v36 = vmul.f32 %v4616_v48, %v4583_v47  ;;  %v4586_v46 = vmul.f32 %v4521_v19, %v11823_v25  ;;  %vm4503_vm13 = vcmp.eq.f32.partialorder %v4502_v7, 8.507059e+37  ;;  %vm4543_vm2 = vweird.f32 %v11879_v11 }
0x19b5   :  { %v12014_v28 = vmul.f32 %v9888_v16, %v4905_v21  ;;  %v4542_v16 = vadd.f32 %v11920_v10, %v4541_v15  ;;  %v4547_v39 = vand.u32 2147483647, %v11879_v11  ;;  %v4506_v27 = vsel %vm4503_vm13, %v4505_v42, %v4501_v6  ;;  %vm12045_vm3 = vmor %vm4543_vm2, %vm4544_vm12  ;;  %v4651_v0 = vpop.f32.mrf.mxu2 }
0x19b6   :  { %v4570_v4 = vsub.f32 1.0, %v4569_v44  ;;  %v4527_v11 = vadd.f32 %v11949_v62, %v4526_v40  ;;  %vm4529_vm4 = vweird.f32 %v11949_v62  ;;  %v4550_v49 = vor.u32 1.1754944e-38, %v4549_v45 }
0x19b7   :  { %v4546_v26 = vsel %vm12045_vm3, %v11920_v10, %v4542_v16  ;;  %v4534_v35 = vand.u32 2147483648, %v11892_v17  ;;  %v4660_v61 = vmul.f32 %v4648_v51, %v4586_v46  ;;  %v4585_v50 = vmul.f32 %v4506_v27, %v11826_v54 }
0x19b8   :  { %v12025_v32 = vpop.eup %10087  ;;  %vm4548_vm5 = vcmp.eq.f32.partialorder %v4547_v39, 8.507059e+37  ;;  %vm4528_vm6 = vweird.f32 %v11892_v17  ;;  %v4532_v56 = vand.u32 2147483647, %v11892_v17  ;;  %v4571_v10 = vmul.f32 %v12006_v58, %v4570_v4 }
0x19b9   :  { %v4554_v22 = vmul.f32 %v12025_v32, %v11965_v41  ;;  %v4551_v57 = vsel %vm4548_vm5, %v4550_v49, %v4546_v26  ;;  %vm4530_vm7 = vmor %vm4528_vm6, %vm4529_vm4  ;;  %v4535_v15 = vor.u32 1.1754944e-38, %v4534_v35  ;;  %vm4574_vm10 = vweird.f32 %v12006_v58  ;;  %v4945_v26 = vld [vmem:[%s13379_s14 + $0x8] sm:$0xff]  ;;  %v4944_v49 = vld [vmem:[%s13379_s14] sm:$0xff] }
0x19ba   :  { %v4531_v59 = vsel %vm4530_vm7, %v11949_v62, %v4527_v11  ;;  %v4588_v54 = vmul.f32 %v4551_v57, %v11834_v5  ;;  %vm4533_vm9 = vcmp.eq.f32.partialorder %v4532_v56, 8.507059e+37  ;;  %v4579_v34 = vand.u32 2147483648, %v11937_v30  ;;  %v4990_v11 = vld [vmem:[%s13380_s24 + $0x8] sm:$0xff]  ;;  %v4989_v35 = vld [vmem:[%s13380_s24] sm:$0xff]  ;;  %v9500_v57 = vld [vmem:[%s13365_s21 + $0x38] sm:$0xff] }
0x19bb   :  { %v4555_v1 = vsub.f32 1.0, %v4554_v22  ;;  %v4536_v17 = vsel %vm4533_vm9, %v4535_v15, %v4531_v59  ;;  %vm4573_vm11 = vweird.f32 %v11937_v30  ;;  %v4577_v62 = vand.u32 2147483647, %v11937_v30  ;;  %v4946_v22 = vld [vmem:[%s13379_s14 + $0x10] sm:$0xff] }
0x19bc   :  { %9472 = vmatmul.msk.f32.gmra.mxu3 %vm167_vm0, %v12014_v28  ;;  %v4587_v5 = vmul.f32 %v4536_v17, %v11841_v12  ;;  %vm4575_vm12 = vmor %vm4573_vm11, %vm4574_vm10  ;;  %vm4559_vm13 = vweird.f32 %v12025_v32  ;;  %v4580_v6 = vor.u32 1.1754944e-38, %v4579_v34  ;;  %v4564_v16 = vand.u32 2147483648, %v11965_v41  ;;  %4973 = vmatpush.msra.mxu0 %v4946_v22 }
0x19bd   :  { %v4556_v21 = vmul.f32 %v12025_v32, %v4555_v1  ;;  %vm4578_vm2 = vcmp.eq.f32.partialorder %v4577_v62, 8.507059e+37  ;;  %vm4558_vm3 = vweird.f32 %v11965_v41  ;;  %v4562_v30 = vand.u32 2147483647, %v11965_v41  ;;  %v4654_v45 = vpop.f32.mrf.mxu2 }
0x19be   :  { %vm4560_vm4 = vmor %vm4558_vm3, %vm4559_vm13  ;;  %v4565_v42 = vor.u32 1.1754944e-38, %v4564_v16  ;;  %4974 = vmatpush.msra.mxu0 %v4945_v26  ;;  %v12183_v26 = vld [vmem:[%s13385_s28 + $0x8] sm:$0xff] }
0x19bf   :  { %v4557_v20 = vadd.f32 %v12025_v32, %v4556_v21  ;;  %vm4563_vm5 = vcmp.eq.f32.partialorder %v4562_v30, 8.507059e+37  ;;  %v12155_v30 = vld [vmem:[%s13385_s28] sm:$0xff] }
0x19c0   :  { %4975 = vmatpush.msra.mxu0 %v4944_v49 }
0x19f6   :  { %v4732_v53 = vpop.f32.mrf.mxu0 }
0x19f7   :  { %v4745_v14 = vmul.f32 %v4732_v53, %v4658_v3  ;;  %v4619_v3 = vpop.f32.mrf.mxu1  ;;  %v4572_v53 = vadd.f32 %v12006_v58, %v4571_v10  ;;  %v9499_v10 = vld [vmem:[%s13365_s21 + $0x30] sm:$0xff] }
0x19f8   :  { %v4659_v47 = vmul.f32 %v4619_v3, %v4585_v50  ;;  %v9497_v3 = vld [vmem:[%s13365_s21 + $0x20] sm:$0xff] }
0x19f9   :  { %9466 = vmatmul.msk.f32.vlgmr.msrb.gmra.mxu2 %vm4776_vm8, %v4745_v14  ;;  %v4662_v14 = vmul.f32 %v4651_v0, %v4588_v54  ;;  %v4576_v19 = vsel %vm4575_vm12, %v12006_v58, %v4572_v53  ;;  %v4561_v58 = vsel %vm4560_vm4, %v12025_v32, %v4557_v20 }
0x19fa   :  { %9519 = vmatpush.msk.msrb.mxu2 %vm374_vm14, %v11857_v13  ;;  %v4581_v40 = vsel %vm4578_vm2, %v4580_v6, %v4576_v19  ;;  %v4566_v46 = vsel %vm4563_vm5, %v4565_v42, %v4561_v58  ;;  %v12162_v58 = vld [vmem:[%s13386_s4] sm:$0xff] }
0x19fb   :  { %v4590_v18 = vmul.f32 %v4581_v40, %v11865_v23  ;;  %v4589_v32 = vmul.f32 %v4566_v46, %v11876_v31  ;;  %v12165_v42 = vld [vmem:[%s10407_s29] sm:$0xff] }
0x19fc   :  { %v4703_v43 = vpop.f32.mrf.mxu3 }
0x19fd   :  { %v4744_v25 = vmul.f32 %v4703_v43, %v4657_v36  ;;  %v4664_v41 = vmul.f32 %v4654_v45, %v4590_v18 }
0x19fe   :  { %v4735_v52 = vpop.f32.mrf.mxu0 }
0x19ff   :  { %4805 = vmatmul.f32.vlgmr.msra.gmra.mxu1 %v4744_v25  ;;  %v4747_v33 = vmul.f32 %v4735_v52, %v4660_v61  ;;  %v4622_v12 = vpop.f32.mrf.mxu1  ;;  %v4991_v25 = vld [vmem:[%s13380_s24 + $0x10] sm:$0xff] }
0x1a00   :  { %v4661_v51 = vmul.f32 %v4622_v12, %v4587_v5  ;;  %5006 = vmatpush.msra.mxu3 %v4991_v25  ;;  %v12158_v12 = vld [vmem:[%s10402_s25 + $0x8] sm:$0xff] }
0x1a01   :  { %9467 = vmatmul.msk.f32.gmra.mxu2 %vm4776_vm8, %v4747_v33  ;;  %v9498_v33 = vld [vmem:[%s13365_s21 + $0x28] sm:$0xff] }
0x1a02   :  { %5007 = vmatpush.msra.mxu3 %v4990_v11  ;;  %v12186_v11 = vld [vmem:[%s13386_s4 + $0x8] sm:$0xff] }
0x1a04   :  { %v4706_v63 = vpop.f32.mrf.mxu3  ;;  %5008 = vmatpush.msra.mxu3 %v4989_v35  ;;  %v12189_v35 = vld [vmem:[%s10402_s25 + $0x18] sm:$0xff] }
0x1a05   :  { %v4746_v48 = vmul.f32 %v4706_v63, %v4659_v47 }
0x1a06   :  { %v4738_v7 = vpop.f32.mrf.mxu0  ;;  %5286 = vmatpush.msrb.mxu3 %v9500_v57 }
0x1a07   :  { %v4749_v44 = vmul.f32 %v4738_v7, %v4662_v14  ;;  %4808 = vmatmul.f32.gmra.mxu1 %v4746_v48  ;;  %v4625_v27 = vpop.f32.mrf.mxu1 }
0x1a08   :  { %v4663_v55 = vmul.f32 %v4625_v27, %v4589_v32  ;;  %5287 = vmatpush.msrb.mxu3 %v9499_v10  ;;  %v12201_v10 = vld [vmem:[%s10402_s25 + $0x10] sm:$0xff] }
0x1a09   :  { %9468 = vmatmul.msk.f32.gmra.mxu2 %vm4776_vm8, %v4749_v44 }
0x1a0a   :  { %5288 = vmatpush.msrb.mxu3 %v9498_v33 }
0x1a0c   :  { %v4709_v36 = vpop.f32.mrf.mxu3  ;;  %5289 = vmatpush.msrb.mxu3 %v9497_v3 }
0x1a0d   :  { %v4748_v37 = vmul.f32 %v4709_v36, %v4661_v51  ;;  %v12169_v36 = vld [vmem:[%s10407_s29 + $0x8] sm:$0xff] }
0x1a0e   :  { %v4741_v39 = vpop.f32.mrf.mxu0 }
0x1a0f   :  { %4811 = vmatmul.f32.gmra.mxu1 %v4748_v37  ;;  %v4751_v43 = vmul.f32 %v4741_v39, %v4664_v41  ;;  %v12173_v37 = vld [vmem:[%s10402_s25] sm:$0xff] }
0x1a11   :  { %9469 = vmatmul.msk.f32.gmra.mxu2 %vm4776_vm8, %v4751_v43 }
0x1a14   :  { %v4712_v4 = vpop.f32.mrf.mxu3 }
0x1a15   :  { %v4750_v23 = vmul.f32 %v4712_v4, %v4663_v55 }
0x1a17   :  { %4814 = vmatmul.f32.gmra.mxu1 %v4750_v23 }
0x1a37   :  { %v12088_v31 = vpop.f32.mrf.mxu3 }
0x1a38   :  { %9482 = vmatmul.msk.f32.vlgmr.msrb.gmra.mxu1 %vm361_vm15, %v12088_v31  ;;  %v5022_v39 = vmul.f32 %v12088_v31, %v12155_v30 }
0x1a3f   :  { %v12092_v52 = vpop.f32.mrf.mxu3 }
0x1a40   :  { %9483 = vmatmul.msk.f32.gmra.mxu1 %vm361_vm15, %v12092_v52 }
0x1a7c   :  { %v4806_v61 = vpop.f32.mrf.mxu1  ;;  %v4835_v50 = vpop.f32.mrf.mxu2 }
0x1a7d   :  { %v4836_v56 = vadd.f32 %v4835_v50, %v4806_v61  ;;  %v12193_v61 = vld [vmem:[%s10407_s29 + $0x10] sm:$0xff] }
0x1a7f   :  { %v12099_v1 = vadd.f32 %v4836_v56, %v11658_v2  ;;  %v12197_v56 = vld [vmem:[%s10407_s29 + $0x18] sm:$0xff] }
0x1a81   :  { %8931 = vst.msk [vmem:[#allocation5] sm:$0xff] %vm167_vm0, %v12099_v1  ;;  %9473 = vmatmul.msk.f32.vlgmr.msra.gmra.mxu0 %vm167_vm0, %v12099_v1  ;;  %9477 = vmatmul.msk.f32.vlgmr.msra.gmra.mxu3 %vm167_vm0, %v12099_v1 }
0x1a82   :  { %9522 = vmatpush.msk.msra.mxu3 %vm374_vm14, %v11857_v13 }
0x1a84   :  { %v4809_v59 = vpop.f32.mrf.mxu1  ;;  %v4838_v2 = vpop.f32.mrf.mxu2 }
0x1a85   :  { %v4839_v15 = vadd.f32 %v4838_v2, %v4809_v59  ;;  %v5023_v59 = vmul.f32 %v12092_v52, %v12183_v26  ;;  %v9503_v52 = vld [vmem:[%s13379_s14 + $0x20] sm:$0xff] }
0x1a87   :  { %v12112_v54 = vadd.f32 %v4839_v15, %v11672_v8 }
0x1a89   :  { %8932 = vst.msk [vmem:[#allocation5 + $0x8] sm:$0xff] %vm167_vm0, %v12112_v54  ;;  %9474 = vmatmul.msk.f32.gmra.mxu0 %vm167_vm0, %v12112_v54  ;;  %9478 = vmatmul.msk.f32.gmra.mxu3 %vm167_vm0, %v12112_v54 }
0x1a8c   :  { %v4812_v0 = vpop.f32.mrf.mxu1  ;;  %v4841_v17 = vpop.f32.mrf.mxu2 }
0x1a8d   :  { %v4842_v53 = vadd.f32 %v4841_v17, %v4812_v0 }
0x1a8f   :  { %v12121_v21 = vadd.f32 %v4842_v53, %v11685_v38 }
0x1a91   :  { %8933 = vst.msk [vmem:[#allocation5 + $0x10] sm:$0xff] %vm167_vm0, %v12121_v21  ;;  %9475 = vmatmul.msk.f32.gmra.mxu0 %vm167_vm0, %v12121_v21  ;;  %9479 = vmatmul.msk.f32.gmra.mxu3 %vm167_vm0, %v12121_v21 }
0x1a94   :  { %v4815_v8 = vpop.f32.mrf.mxu1  ;;  %v4844_v47 = vpop.f32.mrf.mxu2 }
0x1a95   :  { %v4845_v34 = vadd.f32 %v4844_v47, %v4815_v8  ;;  %v9506_v8 = vld [vmem:[%s13379_s14 + $0x38] sm:$0xff] }
0x1a97   :  { %v12130_v63 = vadd.f32 %v4845_v34, %v11693_v29  ;;  %v9505_v34 = vld [vmem:[%s13379_s14 + $0x30] sm:$0xff] }
0x1a99   :  { %8934 = vst.msk [vmem:[#allocation5 + $0x18] sm:$0xff] %vm167_vm0, %v12130_v63  ;;  %9476 = vmatmul.msk.f32.gmra.mxu0 %vm167_vm0, %v12130_v63  ;;  %9480 = vmatmul.msk.f32.gmra.mxu3 %vm167_vm0, %v12130_v63 }
0x1aa1   :  { %9501 = vmatmul.msk.f32.vlgmr.msrb.gmra.mxu3 %vm167_vm0, %v11967_v24 }
0x1aa9   :  { %9502 = vmatmul.msk.f32.gmra.mxu3 %vm167_vm0, %v12014_v28 }
0x1ab5   :  { %v5047_v51 = vpop.f32.mrf.mxu1 }
0x1ab6   :  { %v5053_v32 = vmul.f32 %v5047_v51, %v12162_v58 }
0x1ab8   :  { %v5055_v55 = vadd.f32 %v5053_v32, %v5022_v39 }
0x1aba   :  { %v5057_v22 = vmul.f32 0.70710677, %v5055_v55 }
0x1abd   :  { %v5050_v49 = vpop.f32.mrf.mxu1 }
0x1abe   :  { %v5054_v2 = vmul.f32 %v5050_v49, %v12186_v11 }
0x1ac0   :  { %v5056_v17 = vadd.f32 %v5054_v2, %v5023_v59 }
0x1ac2   :  { %v5058_v47 = vmul.f32 0.70710677, %v5056_v17 }
0x1afe   :  { %v4977_v38 = vpop.f32.mrf.mxu0 }
0x1aff   :  { %9485 = vmatmul.msk.f32.vlgmr.msra.gmra.mxu2 %vm361_vm15, %v4977_v38  ;;  %v5059_v46 = vmul.f32 %v12173_v37, %v4977_v38  ;;  %v9504_v38 = vld [vmem:[%s13379_s14 + $0x28] sm:$0xff] }
0x1b04   :  { %v5010_v29 = vpop.f32.mrf.mxu3 }
0x1b06   :  { %v4980_v62 = vpop.f32.mrf.mxu0 }
0x1b07   :  { %9486 = vmatmul.msk.f32.gmra.mxu2 %vm361_vm15, %v4980_v62  ;;  %v5060_v40 = vmul.f32 %v12158_v12, %v4980_v62 }
0x1b0c   :  { %v5013_v14 = vpop.f32.mrf.mxu3 }
0x1b0d   :  { %5186 = vmatpush.msra.mxu1 %v5013_v14 }
0x1b0e   :  { %v4983_v48 = vpop.f32.mrf.mxu0 }
0x1b0f   :  { %9487 = vmatmul.msk.f32.gmra.mxu2 %vm361_vm15, %v4983_v48  ;;  %5187 = vmatpush.msra.mxu1 %v5010_v29  ;;  %v5061_v33 = vmul.f32 %v12201_v10, %v4983_v48 }
0x1b14   :  { %v5016_v5 = vpop.f32.mrf.mxu3 }
0x1b16   :  { %v4986_v7 = vpop.f32.mrf.mxu0 }
0x1b17   :  { %9488 = vmatmul.msk.f32.gmra.mxu2 %vm361_vm15, %v4986_v7  ;;  %v5062_v31 = vmul.f32 %v12189_v35, %v4986_v7  ;;  %v9550_v7 = vld [vmem:[%s13379_s14 + $0x50] sm:$0xff] }
0x1b1c   :  { %v5019_v19 = vpop.f32.mrf.mxu3 }
0x1b1d   :  { %5262 = vmatpush.msrb.mxu1 %v5019_v19  ;;  %v9549_v19 = vld [vmem:[%s13379_s14 + $0x48] sm:$0xff] }
0x1b1f   :  { %5263 = vmatpush.msrb.mxu1 %v5016_v5  ;;  %v9551_v5 = vld [vmem:[%s13379_s14 + $0x58] sm:$0xff] }
0x1b20   :  { %5722 = vmatpush.msrb.mxu3 %v9551_v5 }
0x1b22   :  { %5723 = vmatpush.msrb.mxu3 %v9550_v7 }
0x1b24   :  { %v12146_v20 = vpop.f32.mrf.mxu3  ;;  %5724 = vmatpush.msrb.mxu3 %v9549_v19 }
0x1b25   :  { %9520 = vmatmul.msk.f32.vlgmr.msrb.gmra.mxu2 %vm361_vm15, %v12146_v20 }
0x1b2c   :  { %v12150_v44 = vpop.f32.mrf.mxu3 }
0x1b2d   :  { %9521 = vmatmul.msk.f32.gmra.mxu2 %vm361_vm15, %v12150_v44  ;;  %v5366_v19 = vmul.f32 %v12150_v44, %v12183_v26 }
0x1b82   :  { %v5092_v6 = vpop.f32.mrf.mxu2 }
0x1b83   :  { %v5104_v45 = vmul.f32 %v12165_v42, %v5092_v6  ;;  %v9548_v6 = vld [vmem:[%s13379_s14 + $0x40] sm:$0xff] }
0x1b84   :  { %5725 = vmatpush.msrb.mxu3 %v9548_v6 }
0x1b85   :  { %v5108_v43 = vadd.f32 %v5104_v45, %v5059_v46 }
0x1b87   :  { %v5112_v23 = vmul.f32 0.70710677, %v5108_v43 }
0x1b8a   :  { %v5095_v16 = vpop.f32.mrf.mxu2 }
0x1b8b   :  { %v5105_v18 = vmul.f32 %v12169_v36, %v5095_v16 }
0x1b8d   :  { %v5109_v41 = vadd.f32 %v5105_v18, %v5060_v40 }
0x1b8f   :  { %v5113_v27 = vmul.f32 0.70710677, %v5109_v41 }
0x1b91   :  { %9489 = vmatpush.xpose.msk.msrb.mxu0 %vm361_vm15, %v5113_v27 }
0x1b92   :  { %v5098_v4 = vpop.f32.mrf.mxu2 }
0x1b93   :  { %v5106_v50 = vmul.f32 %v12193_v61, %v5098_v4 }
0x1b95   :  { %9490 = vmatpush.xpose.msk.msrb.mxu0 %vm361_vm15, %v5112_v23  ;;  %v5110_v15 = vadd.f32 %v5106_v50, %v5061_v33 }
0x1b97   :  { %v5114_v53 = vmul.f32 0.70710677, %v5110_v15 }
0x1b98   :  { %9491 = vmatmul.msk.f32.vlgmr.msrb.gmra.mxu0 %vm361_vm15, %v5057_v22 }
0x1b9a   :  { %v5101_v25 = vpop.f32.mrf.mxu2 }
0x1b9b   :  { %v5107_v57 = vmul.f32 %v12197_v56, %v5101_v25 }
0x1b9d   :  { %v5111_v3 = vadd.f32 %v5107_v57, %v5062_v31 }
0x1b9f   :  { %v5115_v0 = vmul.f32 0.70710677, %v5111_v3 }
0x1ba1   :  { %9493 = vmatpush.xpose.msk.msra.mxu0 %vm361_vm15, %v5115_v0  ;;  %v5365_v0 = vmul.f32 %v12146_v20, %v12155_v30 }
0x1ba5   :  { %9494 = vmatpush.xpose.msk.msra.mxu0 %vm361_vm15, %v5114_v53 }
0x1ba8   :  { %9495 = vmatmul.msk.f32.vlgmr.msra.gmra.mxu0 %vm361_vm15, %v5058_v47  ;;  %v5390_v49 = vpop.f32.mrf.mxu2 }
0x1ba9   :  { %5314 = vmatpush.msrb.mxu0 %v9506_v8  ;;  %v5396_v59 = vmul.f32 %v5390_v49, %v12162_v58  ;;  %v9514_v49 = vld [vmem:[%s13380_s24 + $0x38] sm:$0xff] }
0x1bab   :  { %5315 = vmatpush.msrb.mxu0 %v9505_v34  ;;  %v5398_v17 = vadd.f32 %v5396_v59, %v5365_v0 }
0x1bad   :  { %5316 = vmatpush.msrb.mxu0 %v9504_v38  ;;  %v5400_v47 = vmul.f32 0.70710677, %v5398_v17 }
0x1baf   :  { %5317 = vmatpush.msrb.mxu0 %v9503_v52 }
0x1bb0   :  { %9507 = vmatmul.msk.f32.vlgmr.msrb.gmra.mxu0 %vm167_vm0, %v12099_v1  ;;  %v5393_v38 = vpop.f32.mrf.mxu2 }
0x1bb8   :  { %9508 = vmatmul.msk.f32.gmra.mxu0 %vm167_vm0, %v12112_v54 }
0x1bc0   :  { %9509 = vmatmul.msk.f32.gmra.mxu0 %vm167_vm0, %v12121_v21 }
0x1bc8   :  { %9510 = vmatmul.msk.f32.gmra.mxu0 %vm167_vm0, %v12130_v63 }
0x1c15   :  { %v5142_v29 = vpop.f32.mrf.mxu0 }
0x1c16   :  { %v5145_v62 = vsel %vm505_vm1, %v5142_v29, -inf }
0x1c17   :  { %5146 = vmax.xlane.f32.xlu1 %v5145_v62 }
0x1c25   :  { %v5218_v14 = vpop.f32.mrf.mxu0 }
0x1c26   :  { %v5221_v48 = vsel %vm505_vm1, %v5218_v14, -inf }
0x1c27   :  { %5222 = vmax.xlane.f32.xlu2 %v5221_v48  ;;  %v5397_v48 = vmul.f32 %v5393_v38, %v12186_v11 }
0x1c29   :  { %v5399_v6 = vadd.f32 %v5397_v48, %v5366_v19 }
0x1c2d   :  { %v5319_v16 = vpop.f32.mrf.mxu0 }
0x1c2e   :  { %9523 = vmatmul.msk.f32.vlgmr.msra.gmra.mxu3 %vm361_vm15, %v5319_v16  ;;  %v5402_v33 = vmul.f32 %v12173_v37, %v5319_v16 }
0x1c35   :  { %v5322_v40 = vpop.f32.mrf.mxu0 }
0x1c36   :  { %9524 = vmatmul.msk.f32.gmra.mxu3 %vm361_vm15, %v5322_v40  ;;  %v5403_v31 = vmul.f32 %v12158_v12, %v5322_v40  ;;  %v5401_v40 = vmul.f32 0.70710677, %v5399_v6 }
0x1c3d   :  { %v5325_v51 = vpop.f32.mrf.mxu0 }
0x1c3e   :  { %9525 = vmatmul.msk.f32.gmra.mxu3 %vm361_vm15, %v5325_v51  ;;  %v5404_v20 = vmul.f32 %v12201_v10, %v5325_v51 }
0x1c45   :  { %v5328_v45 = vpop.f32.mrf.mxu0 }
0x1c46   :  { %9526 = vmatmul.msk.f32.gmra.mxu3 %vm361_vm15, %v5328_v45  ;;  %v5405_v52 = vmul.f32 %v12189_v35, %v5328_v45 }
0x1c4e   :  { %9552 = vmatmul.msk.f32.vlgmr.msrb.gmra.mxu3 %vm167_vm0, %v12099_v1 }
0x1c56   :  { %9553 = vmatmul.msk.f32.gmra.mxu3 %vm167_vm0, %v12112_v54 }
0x1c5e   :  { %9554 = vmatmul.msk.f32.gmra.mxu3 %vm167_vm0, %v12121_v21 }
0x1c66   :  { %9555 = vmatmul.msk.f32.gmra.mxu3 %vm167_vm0, %v12130_v63 }
0x1c8a   :  { %v5147_v18 = vpop.xlane.xlu1 %5146 }
0x1c8b   :  { %v5148_v46 = vsub.f32 %v5142_v29, %v5147_v18 }
0x1c8d   :  { %v5149_v41 = vmul.f32 1.442695, %v5148_v46 }
0x1c8f   :  { %10089 = vpow2.f32 %v5149_v41 }
0x1c95   :  { %v12240_v39 = vpop.eup %10089 }
0x1c96   :  { %v5151_v32 = vsel %vm505_vm1, %v12240_v39, 0.0 }
0x1c97   :  { %5152 = vadd.xlane.f32.xlu0 %v5151_v32 }
0x1c9a   :  { %v5223_v43 = vpop.xlane.xlu2 %5222 }
0x1c9b   :  { %v5224_v27 = vsub.f32 %v5218_v14, %v5223_v43 }
0x1c9d   :  { %v5225_v55 = vmul.f32 1.442695, %v5224_v27 }
0x1c9f   :  { %10091 = vpow2.f32 %v5225_v55 }
0x1ca5   :  { %v12244_v4 = vpop.eup %10091 }
0x1ca6   :  { %v5227_v23 = vsel %vm505_vm1, %v12244_v4, 0.0 }
0x1ca7   :  { %5228 = vadd.xlane.f32.xlu1 %v5227_v23 }
0x1cb1   :  { %v5435_v22 = vpop.f32.mrf.mxu3 }
0x1cb2   :  { %v5447_v50 = vmul.f32 %v12165_v42, %v5435_v22 }
0x1cb4   :  { %v5451_v2 = vadd.f32 %v5447_v50, %v5402_v33  ;;  %v9512_v50 = vld [vmem:[%s13380_s24 + $0x28] sm:$0xff] }
0x1cb6   :  { %v5455_v8 = vmul.f32 0.70710677, %v5451_v2 }
0x1cb9   :  { %v5438_v25 = vpop.f32.mrf.mxu3 }
0x1cba   :  { %v5448_v57 = vmul.f32 %v12169_v36, %v5438_v25 }
0x1cbc   :  { %v5452_v3 = vadd.f32 %v5448_v57, %v5403_v31  ;;  %v9513_v31 = vld [vmem:[%s13380_s24 + $0x30] sm:$0xff]  ;;  %v9511_v57 = vld [vmem:[%s13380_s24 + $0x20] sm:$0xff] }
0x1cbe   :  { %v5456_v15 = vmul.f32 0.70710677, %v5452_v3 }
0x1cc0   :  { %9527 = vmatpush.xpose.msk.msra.mxu2 %vm361_vm15, %v5456_v15 }
0x1cc1   :  { %v5441_v53 = vpop.f32.mrf.mxu3 }
0x1cc2   :  { %v5449_v29 = vmul.f32 %v12193_v61, %v5441_v53 }
0x1cc4   :  { %9528 = vmatpush.xpose.msk.msra.mxu2 %vm361_vm15, %v5455_v8  ;;  %v5453_v5 = vadd.f32 %v5449_v29, %v5404_v20  ;;  %v5268_v29 = vld [vmem:[%s13387_s11] sm:$0xf] }
0x1cc6   :  { %v5457_v16 = vmul.f32 0.70710677, %v5453_v5 }
0x1cc7   :  { %9529 = vmatmul.msk.f32.vlgmr.msra.gmra.mxu2 %vm361_vm15, %v5400_v47 }
0x1cc9   :  { %v5444_v34 = vpop.f32.mrf.mxu3 }
0x1cca   :  { %v5450_v62 = vmul.f32 %v12197_v56, %v5444_v34 }
0x1ccc   :  { %v5454_v14 = vadd.f32 %v5450_v62, %v5405_v52 }
0x1cce   :  { %v5458_v7 = vmul.f32 0.70710677, %v5454_v14 }
0x1cd0   :  { %9531 = vmatpush.xpose.msk.msra.mxu0 %vm361_vm15, %v5458_v7 }
0x1cd4   :  { %9532 = vmatpush.xpose.msk.msra.mxu0 %vm361_vm15, %v5457_v16 }
0x1cd7   :  { %9533 = vmatmul.msk.f32.vlgmr.msra.gmra.mxu0 %vm361_vm15, %v5401_v40 }
0x1cd8   :  { %9539 = vmatpush.msk.msrb.mxu0 %vm374_vm14, %v5268_v29 }
0x1cda   :  { %9564 = vmatpush.msk.msra.mxu0 %vm374_vm14, %v11857_v13 }
0x1d0a   :  { %v5153_v45 = vpop.xlane.xlu0 %5152 }
0x1d0b   :  { %10093 = vrcp.f32 %v5153_v45  ;;  %v5165_v41 = vand.u32 2147483648, %v5153_v45  ;;  %v5163_v44 = vand.u32 2147483647, %v5153_v45  ;;  %vm5159_vm6 = vweird.f32 %v5153_v45 }
0x1d0d   :  { %v5166_v27 = vor.u32 1.1754944e-38, %v5165_v41  ;;  %vm5164_vm9 = vcmp.eq.f32.partialorder %v5163_v44, 8.507059e+37  ;;  %v9544_v44 = vld [vmem:[%s13365_s21 + $0x50] sm:$0xff] }
0x1d11   :  { %v10094_v51 = vpop.eup %10093 }
0x1d12   :  { %v5155_v18 = vmul.f32 %v10094_v51, %v5153_v45  ;;  %vm5160_vm8 = vweird.f32 %v10094_v51 }
0x1d13   :  { %vm5161_vm7 = vmor %vm5159_vm6, %vm5160_vm8 }
0x1d14   :  { %v5156_v46 = vsub.f32 1.0, %v5155_v18 }
0x1d16   :  { %v5157_v32 = vmul.f32 %v10094_v51, %v5156_v46 }
0x1d18   :  { %v5158_v43 = vadd.f32 %v10094_v51, %v5157_v32  ;;  %v9545_v32 = vld [vmem:[%s13365_s21 + $0x58] sm:$0xff] }
0x1d1a   :  { %v5162_v55 = vsel %vm5161_vm7, %v10094_v51, %v5158_v43  ;;  %v5229_v25 = vpop.xlane.xlu1 %5228 }
0x1d1b   :  { %v5167_v23 = vsel %vm5164_vm9, %v5166_v27, %v5162_v55  ;;  %10095 = vrcp.f32 %v5229_v25  ;;  %v5241_v2 = vand.u32 2147483648, %v5229_v25  ;;  %v5239_v0 = vand.u32 2147483647, %v5229_v25  ;;  %v9543_v27 = vld [vmem:[%s13365_s21 + $0x48] sm:$0xff]  ;;  %v9542_v55 = vld [vmem:[%s13365_s21 + $0x40] sm:$0xff] }
0x1d1c   :  { %v5168_v22 = vmul.f32 %v12240_v39, %v5167_v23  ;;  %vm5235_vm11 = vweird.f32 %v5229_v25 }
0x1d1d   :  { %v5242_v17 = vor.u32 1.1754944e-38, %v5241_v2  ;;  %vm5240_vm13 = vcmp.eq.f32.partialorder %v5239_v0, 8.507059e+37 }
0x1d1e   :  { %9492 = vmatmul.msk.f32.vlgmr.msra.gmra.mxu1 %vm505_vm1, %v5168_v22 }
0x1d1f   :  { %5348 = vmatpush.msra.mxu1 %v9514_v49 }
0x1d21   :  { %5349 = vmatpush.msra.mxu1 %v9513_v31  ;;  %v10096_v33 = vpop.eup %10095 }
0x1d22   :  { %v5231_v3 = vmul.f32 %v10096_v33, %v5229_v25  ;;  %vm5236_vm10 = vweird.f32 %v10096_v33 }
0x1d23   :  { %5350 = vmatpush.msra.mxu1 %v9512_v50  ;;  %vm5237_vm12 = vmor %vm5235_vm11, %vm5236_vm10 }
0x1d24   :  { %v5232_v59 = vsub.f32 1.0, %v5231_v3 }
0x1d25   :  { %5351 = vmatpush.msra.mxu1 %v9511_v57 }
0x1d26   :  { %v5233_v15 = vmul.f32 %v10096_v33, %v5232_v59 }
0x1d28   :  { %v5234_v39 = vadd.f32 %v10096_v33, %v5233_v15 }
0x1d2a   :  { %v5238_v53 = vsel %vm5237_vm12, %v10096_v33, %v5234_v39 }
0x1d2b   :  { %v5243_v8 = vsel %vm5240_vm13, %v5242_v17, %v5238_v53 }
0x1d2c   :  { %v5244_v47 = vmul.f32 %v12244_v4, %v5243_v8 }
0x1d2e   :  { %9496 = vmatmul.msk.f32.vlgmr.msrb.gmra.mxu1 %vm505_vm1, %v5244_v47 }
0x1d36   :  { %9515 = vmatmul.msk.f32.vlgmr.msra.gmra.mxu1 %vm167_vm0, %v12099_v1 }
0x1d3e   :  { %9516 = vmatmul.msk.f32.gmra.mxu1 %vm167_vm0, %v12112_v54 }
0x1d46   :  { %9517 = vmatmul.msk.f32.gmra.mxu1 %vm167_vm0, %v12121_v21 }
0x1d4a   :  { %v5485_v34 = vpop.f32.mrf.mxu2 }
0x1d4b   :  { %v5488_v38 = vsel %vm505_vm1, %v5485_v34, -inf }
0x1d4c   :  { %5489 = vmax.xlane.f32.xlu1 %v5488_v38 }
0x1d4e   :  { %9518 = vmatmul.msk.f32.gmra.mxu1 %vm167_vm0, %v12130_v63 }
0x1d54   :  { %v5561_v52 = vpop.f32.mrf.mxu0 }
0x1d55   :  { %v5564_v4 = vsel %vm505_vm1, %v5561_v52, -inf }
0x1d56   :  { %5565 = vmax.xlane.f32.xlu2 %v5564_v4 }
0x1d9b   :  { %v5189_v62 = vpop.f32.mrf.mxu1 }
0x1d9c   :  { %9540 = vmatmul.msk.f32.vlgmr.msrb.gmra.mxu0 %vm361_vm15, %v5189_v62  ;;  %v12301_v62 = vld [vmem:[%s10412_s3] sm:$0xf] }
0x1dab   :  { %v5265_v20 = vpop.f32.mrf.mxu1 }
0x1dac   :  { %9541 = vmatmul.msk.f32.gmra.mxu0 %vm361_vm15, %v5265_v20  ;;  %v9593_v20 = vld [vmem:[%s13379_s14 + $0x78] sm:$0xff] }
0x1db3   :  { %v5353_v14 = vpop.f32.mrf.mxu1 }
0x1dbb   :  { %v5356_v48 = vpop.f32.mrf.mxu1 }
0x1dbc   :  { %5529 = vmatpush.msrb.mxu2 %v5356_v48  ;;  %v5727_v48 = vpop.f32.mrf.mxu3 }
0x1dbe   :  { %5530 = vmatpush.msrb.mxu2 %v5353_v14  ;;  %v9592_v14 = vld [vmem:[%s13379_s14 + $0x70] sm:$0xff] }
0x1dbf   :  { %v5490_v5 = vpop.xlane.xlu1 %5489 }
0x1dc0   :  { %v5491_v7 = vsub.f32 %v5485_v34, %v5490_v5  ;;  %v9591_v5 = vld [vmem:[%s13379_s14 + $0x68] sm:$0xff] }
0x1dc2   :  { %v5492_v19 = vmul.f32 1.442695, %v5491_v7  ;;  %v9590_v7 = vld [vmem:[%s13379_s14 + $0x60] sm:$0xff] }
0x1dc3   :  { %v5359_v6 = vpop.f32.mrf.mxu1 }
0x1dc4   :  { %10097 = vpow2.f32 %v5492_v19  ;;  %v5730_v19 = vpop.f32.mrf.mxu3 }
0x1dc9   :  { %v5566_v16 = vpop.xlane.xlu2 %5565 }
0x1dca   :  { %v10098_v40 = vpop.eup %10097  ;;  %v5567_v13 = vsub.f32 %v5561_v52, %v5566_v16 }
0x1dcb   :  { %v5362_v45 = vpop.f32.mrf.mxu1  ;;  %v5494_v51 = vsel %vm505_vm1, %v10098_v40, 0.0 }
0x1dcc   :  { %v5568_v18 = vmul.f32 1.442695, %v5567_v13  ;;  %5495 = vadd.xlane.f32.xlu2 %v5494_v51  ;;  %5605 = vmatpush.msrb.mxu1 %v5362_v45  ;;  %v9559_v13 = vld [vmem:[%s13380_s24 + $0x58] sm:$0xff]  ;;  %v9558_v45 = vld [vmem:[%s13380_s24 + $0x50] sm:$0xff]  ;;  %v9557_v51 = vld [vmem:[%s13380_s24 + $0x48] sm:$0xff] }
0x1dce   :  { %10099 = vpow2.f32 %v5568_v18  ;;  %5606 = vmatpush.msrb.mxu1 %v5359_v6  ;;  %v5733_v6 = vpop.f32.mrf.mxu3  ;;  %v9556_v18 = vld [vmem:[%s13380_s24 + $0x40] sm:$0xff] }
0x1dd0   :  { %5694 = vmatpush.msra.mxu1 %v9545_v32 }
0x1dd2   :  { %5695 = vmatpush.msra.mxu1 %v9544_v44 }
0x1dd4   :  { %v10100_v46 = vpop.eup %10099  ;;  %5696 = vmatpush.msra.mxu1 %v9543_v27 }
0x1dd5   :  { %v5570_v41 = vsel %vm505_vm1, %v10100_v46, 0.0 }
0x1dd6   :  { %5571 = vadd.xlane.f32.xlu0 %v5570_v41  ;;  %5697 = vmatpush.msra.mxu1 %v9542_v55  ;;  %v5736_v16 = vpop.f32.mrf.mxu3  ;;  %v5811_v55 = vmul.f32 %v12158_v12, %v5730_v19 }
0x1e3f   :  { %v5496_v43 = vpop.xlane.xlu2 %5495 }
0x1e40   :  { %10101 = vrcp.f32 %v5496_v43  ;;  %v5508_v31 = vand.u32 2147483648, %v5496_v43  ;;  %v5506_v57 = vand.u32 2147483647, %v5496_v43  ;;  %vm5502_vm3 = vweird.f32 %v5496_v43 }
0x1e42   :  { %v5509_v3 = vor.u32 1.1754944e-38, %v5508_v31  ;;  %vm5507_vm5 = vcmp.eq.f32.partialorder %v5506_v57, 8.507059e+37 }
0x1e46   :  { %v10102_v23 = vpop.eup %10101 }
0x1e47   :  { %v5498_v22 = vmul.f32 %v10102_v23, %v5496_v43  ;;  %vm5503_vm2 = vweird.f32 %v10102_v23 }
0x1e48   :  { %vm5504_vm4 = vmor %vm5502_vm3, %vm5503_vm2 }
0x1e49   :  { %v5499_v25 = vsub.f32 1.0, %v5498_v22  ;;  %v5572_v49 = vpop.xlane.xlu0 %5571 }
0x1e4a   :  { %10103 = vrcp.f32 %v5572_v49  ;;  %v5584_v53 = vand.u32 2147483648, %v5572_v49  ;;  %v5582_v47 = vand.u32 2147483647, %v5572_v49  ;;  %vm5578_vm6 = vweird.f32 %v5572_v49 }
0x1e4b   :  { %v5500_v50 = vmul.f32 %v10102_v23, %v5499_v25  ;;  %v5810_v25 = vmul.f32 %v12173_v37, %v5727_v48 }
0x1e4c   :  { %v5585_v38 = vor.u32 1.1754944e-38, %v5584_v53  ;;  %vm5583_vm9 = vcmp.eq.f32.partialorder %v5582_v47, 8.507059e+37  ;;  %v12355_v47 = vpop.f32.mrf.mxu0 }
0x1e4d   :  { %v5501_v33 = vadd.f32 %v10102_v23, %v5500_v50 }
0x1e4f   :  { %v5505_v59 = vsel %vm5504_vm4, %v10102_v23, %v5501_v33 }
0x1e50   :  { %v10104_v2 = vpop.eup %10103  ;;  %v5510_v15 = vsel %vm5507_vm5, %v5509_v3, %v5505_v59  ;;  %v5813_v59 = vmul.f32 %v12189_v35, %v5736_v16 }
0x1e51   :  { %v5511_v0 = vmul.f32 %v10098_v40, %v5510_v15  ;;  %v5574_v39 = vmul.f32 %v10104_v2, %v5572_v49  ;;  %vm5579_vm8 = vweird.f32 %v10104_v2  ;;  %v9535_v40 = vld [vmem:[%s13387_s11 + $0x4] sm:$0xf] }
0x1e52   :  { %vm5580_vm7 = vmor %vm5578_vm6, %vm5579_vm8  ;;  %9536 = vmatpush.msk.msra.mxu2 %vm374_vm14, %v9535_v40  ;;  %v9585_v40 = vld [vmem:[%s13365_s21 + $0x68] sm:$0xff] }
0x1e53   :  { %v5575_v17 = vsub.f32 1.0, %v5574_v39  ;;  %9530 = vmatmul.msk.f32.vlgmr.msrb.gmra.mxu2 %vm505_vm1, %v5511_v0  ;;  %v5812_v0 = vmul.f32 %v12201_v10, %v5733_v6 }
0x1e54   :  { %5756 = vmatpush.msrb.mxu2 %v9559_v13 }
0x1e55   :  { %v5576_v8 = vmul.f32 %v10104_v2, %v5575_v17 }
0x1e56   :  { %5757 = vmatpush.msrb.mxu2 %v9558_v45 }
0x1e57   :  { %v5577_v34 = vadd.f32 %v10104_v2, %v5576_v8 }
0x1e58   :  { %5758 = vmatpush.msrb.mxu2 %v9557_v51  ;;  %v9584_v51 = vld [vmem:[%s13365_s21 + $0x60] sm:$0xff] }
0x1e59   :  { %v5581_v52 = vsel %vm5580_vm7, %v10104_v2, %v5577_v34  ;;  %v12357_v34 = vpop.f32.mrf.mxu0 }
0x1e5a   :  { %v5586_v4 = vsel %vm5583_vm9, %v5585_v38, %v5581_v52  ;;  %5759 = vmatpush.msrb.mxu2 %v9556_v18 }
0x1e5b   :  { %v5587_v29 = vmul.f32 %v10100_v46, %v5586_v4 }
0x1e5d   :  { %9534 = vmatmul.msk.f32.vlgmr.msrb.gmra.mxu1 %vm505_vm1, %v5587_v29 }
0x1e5e   :  { %9567 = vmatpush.msk.msrb.mxu1 %vm374_vm14, %v12301_v62 }
0x1e65   :  { %9546 = vmatmul.msk.f32.vlgmr.msra.gmra.mxu1 %vm167_vm0, %v11967_v24 }
0x1e66   :  { %6100 = vmatpush.msra.mxu1 %v9593_v20 }
0x1e68   :  { %6101 = vmatpush.msra.mxu1 %v9592_v14 }
0x1e6a   :  { %6102 = vmatpush.msra.mxu1 %v9591_v5  ;;  %v9587_v5 = vld [vmem:[%s13365_s21 + $0x78] sm:$0xff] }
0x1e6c   :  { %6103 = vmatpush.msra.mxu1 %v9590_v7  ;;  %v9586_v7 = vld [vmem:[%s13365_s21 + $0x70] sm:$0xff] }
0x1e6d   :  { %9547 = vmatmul.msk.f32.gmra.mxu1 %vm167_vm0, %v12014_v28 }
0x1e75   :  { %9568 = vmatmul.msk.f32.vlgmr.msrb.gmra.mxu1 %vm361_vm15, %v5727_v48 }
0x1e7d   :  { %9569 = vmatmul.msk.f32.gmra.mxu1 %vm361_vm15, %v5730_v19 }
0x1e85   :  { %9570 = vmatmul.msk.f32.gmra.mxu1 %vm361_vm15, %v5733_v6 }
0x1e8d   :  { %9571 = vmatmul.msk.f32.gmra.mxu1 %vm361_vm15, %v5736_v16 }
0x1e95   :  { %9594 = vmatmul.msk.f32.vlgmr.msra.gmra.mxu1 %vm167_vm0, %v12099_v1 }
0x1e9d   :  { %9595 = vmatmul.msk.f32.gmra.mxu1 %vm167_vm0, %v12112_v54 }
0x1ea5   :  { %9596 = vmatmul.msk.f32.gmra.mxu1 %vm167_vm0, %v12121_v21 }
0x1ead   :  { %9597 = vmatmul.msk.f32.gmra.mxu1 %vm167_vm0, %v12130_v63 }
0x1ed6   :  { %v5532_v46 = vpop.f32.mrf.mxu2 }
0x1ed7   :  { %9537 = vmatmul.msk.f32.vlgmr.msra.gmra.mxu2 %vm361_vm15, %v5532_v46 }
0x1eda   :  { %v5608_v41 = vpop.f32.mrf.mxu1 }
0x1edf   :  { %9538 = vmatmul.msk.f32.gmra.mxu2 %vm361_vm15, %v5608_v41 }
0x1ee2   :  { %v5699_v32 = vpop.f32.mrf.mxu1 }
0x1ee3   :  { %9565 = vmatmul.msk.f32.vlgmr.msra.gmra.mxu0 %vm361_vm15, %v5699_v32  ;;  %v5773_v4 = vmul.f32 %v5699_v32, %v12155_v30  ;;  %v9643_v32 = vld [vmem:[%s13380_s24 + $0x98] sm:$0xff] }
0x1ee7   :  { %9560 = vmatmul.msk.f32.vlgmr.msrb.gmra.mxu2 %vm167_vm0, %v12099_v1 }
0x1eea   :  { %v5702_v44 = vpop.f32.mrf.mxu1 }
0x1eeb   :  { %9566 = vmatmul.msk.f32.gmra.mxu0 %vm361_vm15, %v5702_v44  ;;  %v5774_v6 = vmul.f32 %v5702_v44, %v12183_v26  ;;  %v9642_v44 = vld [vmem:[%s13380_s24 + $0x90] sm:$0xff] }
0x1eef   :  { %9561 = vmatmul.msk.f32.gmra.mxu2 %vm167_vm0, %v12112_v54 }
0x1ef2   :  { %v5843_v43 = vpop.f32.mrf.mxu1 }
0x1ef3   :  { %v5855_v23 = vmul.f32 %v12165_v42, %v5843_v43 }
0x1ef5   :  { %v5859_v31 = vadd.f32 %v5855_v23, %v5810_v25  ;;  %v9640_v23 = vld [vmem:[%s13380_s24 + $0x80] sm:$0xff] }
0x1ef7   :  { %9562 = vmatmul.msk.f32.gmra.mxu2 %vm167_vm0, %v12121_v21  ;;  %v5863_v33 = vmul.f32 0.70710677, %v5859_v31 }
0x1efa   :  { %v5846_v27 = vpop.f32.mrf.mxu1 }
0x1efb   :  { %v5856_v22 = vmul.f32 %v12169_v36, %v5846_v27  ;;  %v9641_v27 = vld [vmem:[%s13380_s24 + $0x88] sm:$0xff] }
0x1efd   :  { %v5860_v49 = vadd.f32 %v5856_v22, %v5811_v55 }
0x1eff   :  { %v5864_v50 = vmul.f32 0.70710677, %v5860_v49  ;;  %9563 = vmatmul.msk.f32.gmra.mxu2 %vm167_vm0, %v12130_v63 }
0x1f01   :  { %9572 = vmatpush.xpose.msk.msrb.mxu0 %vm361_vm15, %v5864_v50 }
0x1f02   :  { %v5849_v57 = vpop.f32.mrf.mxu1 }
0x1f03   :  { %v5857_v2 = vmul.f32 %v12193_v61, %v5849_v57 }
0x1f05   :  { %9573 = vmatpush.xpose.msk.msrb.mxu0 %vm361_vm15, %v5863_v33  ;;  %v5861_v17 = vadd.f32 %v5857_v2, %v5812_v0 }
0x1f07   :  { %v5865_v8 = vmul.f32 0.70710677, %v5861_v17 }
0x1f0a   :  { %v5852_v3 = vpop.f32.mrf.mxu1 }
0x1f0b   :  { %v5858_v15 = vmul.f32 %v12197_v56, %v5852_v3 }
0x1f0d   :  { %v5862_v39 = vadd.f32 %v5858_v15, %v5813_v59 }
0x1f0f   :  { %v5866_v53 = vmul.f32 0.70710677, %v5862_v39 }
0x1f11   :  { %9576 = vmatpush.xpose.msk.msra.mxu0 %vm361_vm15, %v5866_v53 }
0x1f12   :  { %v12381_v43 = vpop.f32.mrf.mxu1 }
0x1f15   :  { %9577 = vmatpush.xpose.msk.msra.mxu0 %vm361_vm15, %v5865_v8 }
0x1f1a   :  { %v12387_v22 = vpop.f32.mrf.mxu1 }
0x1f22   :  { %v12391_v25 = vpop.f32.mrf.mxu1 }
0x1f2a   :  { %v12395_v49 = vpop.f32.mrf.mxu1 }
0x1f5a   :  { %v12359_v38 = vpop.f32.mrf.mxu2 }
0x1f60   :  { %v5798_v52 = vpop.f32.mrf.mxu0 }
0x1f61   :  { %v5804_v29 = vmul.f32 %v5798_v52, %v12162_v58 }
0x1f62   :  { %v12363_v20 = vpop.f32.mrf.mxu2 }
0x1f63   :  { %v5806_v14 = vadd.f32 %v5804_v29, %v5773_v4 }
0x1f65   :  { %v5808_v48 = vmul.f32 0.70710677, %v5806_v14 }
0x1f67   :  { %9574 = vmatmul.msk.f32.vlgmr.msrb.gmra.mxu0 %vm361_vm15, %v5808_v48  ;;  %v9601_v48 = vld [vmem:[%s13380_s24 + $0x78] sm:$0xff] }
0x1f68   :  { %v5801_v19 = vpop.f32.mrf.mxu0  ;;  %6072 = vmatpush.msrb.mxu0 %v9587_v5  ;;  %v9600_v5 = vld [vmem:[%s13380_s24 + $0x70] sm:$0xff] }
0x1f69   :  { %v5805_v16 = vmul.f32 %v5801_v19, %v12186_v11  ;;  %v9598_v19 = vld [vmem:[%s13380_s24 + $0x60] sm:$0xff] }
0x1f6a   :  { %v5761_v13 = vpop.f32.mrf.mxu2  ;;  %6073 = vmatpush.msrb.mxu0 %v9586_v7  ;;  %v9599_v7 = vld [vmem:[%s13380_s24 + $0x68] sm:$0xff] }
0x1f6b   :  { %v5807_v45 = vadd.f32 %v5805_v16, %v5774_v6 }
0x1f6c   :  { %6074 = vmatpush.msrb.mxu0 %v9585_v40 }
0x1f6d   :  { %v5809_v18 = vmul.f32 0.70710677, %v5807_v45 }
0x1f6e   :  { %6075 = vmatpush.msrb.mxu0 %v9584_v51 }
0x1f6f   :  { %9578 = vmatmul.msk.f32.vlgmr.msra.gmra.mxu0 %vm361_vm15, %v5809_v18 }
0x1f70   :  { %9609 = vmatpush.msk.msra.mxu0 %vm374_vm14, %v12301_v62 }
0x1f72   :  { %v5764_v46 = vpop.f32.mrf.mxu2 }
0x1f73   :  { %5937 = vmatpush.msra.mxu3 %v5764_v46 }
0x1f75   :  { %5938 = vmatpush.msra.mxu3 %v5761_v13 }
0x1f77   :  { %9588 = vmatmul.msk.f32.vlgmr.msrb.gmra.mxu0 %vm167_vm0, %v11967_v24 }
0x1f78   :  { %6512 = vmatpush.msrb.mxu0 %v9643_v32 }
0x1f7a   :  { %v5767_v41 = vpop.f32.mrf.mxu2  ;;  %6513 = vmatpush.msrb.mxu0 %v9642_v44 }
0x1f7c   :  { %6514 = vmatpush.msrb.mxu0 %v9641_v27 }
0x1f7e   :  { %6515 = vmatpush.msrb.mxu0 %v9640_v23 }
0x1f7f   :  { %9589 = vmatmul.msk.f32.gmra.mxu0 %vm167_vm0, %v12014_v28 }
0x1f82   :  { %v5770_v55 = vpop.f32.mrf.mxu2 }
0x1f83   :  { %6013 = vmatpush.msra.mxu2 %v5770_v55 }
0x1f85   :  { %6014 = vmatpush.msra.mxu2 %v5767_v41 }
0x1f87   :  { %9610 = vmatmul.msk.f32.vlgmr.msra.gmra.mxu0 %vm361_vm15, %v12381_v43  ;;  %6134 = vmatpush.msrb.mxu2 %v9601_v48 }
0x1f89   :  { %6135 = vmatpush.msrb.mxu2 %v9600_v5 }
0x1f8b   :  { %6136 = vmatpush.msrb.mxu2 %v9599_v7 }
0x1f8d   :  { %6137 = vmatpush.msrb.mxu2 %v9598_v19 }
0x1f8f   :  { %9611 = vmatmul.msk.f32.gmra.mxu0 %vm361_vm15, %v12387_v22 }
0x1f97   :  { %9612 = vmatmul.msk.f32.gmra.mxu0 %vm361_vm15, %v12391_v25 }
0x1f9f   :  { %9613 = vmatmul.msk.f32.gmra.mxu0 %vm361_vm15, %v12395_v49 }
0x1fa7   :  { %9644 = vmatmul.msk.f32.vlgmr.msrb.gmra.mxu0 %vm167_vm0, %v12099_v1 }
0x1faf   :  { %9645 = vmatmul.msk.f32.gmra.mxu0 %vm167_vm0, %v12112_v54 }
0x1fb7   :  { %9646 = vmatmul.msk.f32.gmra.mxu0 %vm167_vm0, %v12121_v21 }
0x1fbf   :  { %9647 = vmatmul.msk.f32.gmra.mxu0 %vm167_vm0, %v12130_v63 }
0x1fe4   :  { %v5893_v31 = vpop.f32.mrf.mxu0 }
0x1fe5   :  { %v5896_v50 = vsel %vm505_vm1, %v5893_v31, -inf }
0x1fe6   :  { %5897 = vmax.xlane.f32.xlu0 %v5896_v50 }
0x1fec   :  { %v5969_v57 = vpop.f32.mrf.mxu0 }
0x1fed   :  { %v5972_v33 = vsel %vm505_vm1, %v5969_v57, -inf }
0x1fee   :  { %5973 = vmax.xlane.f32.xlu1 %v5972_v33 }
0x1ff4   :  { %v12411_v4 = vpop.f32.mrf.mxu0 }
0x1ffc   :  { %v12413_v29 = vpop.f32.mrf.mxu0 }
0x2004   :  { %v12415_v14 = vpop.f32.mrf.mxu0 }
0x200c   :  { %v6224_v6 = vpop.f32.mrf.mxu0 }
0x2014   :  { %v6227_v40 = vpop.f32.mrf.mxu0 }
0x201c   :  { %v6230_v23 = vpop.f32.mrf.mxu0 }
0x2059   :  { %v5898_v3 = vpop.xlane.xlu0 %5897 }
0x205a   :  { %v5899_v59 = vsub.f32 %v5893_v31, %v5898_v3 }
0x205c   :  { %v5900_v2 = vmul.f32 1.442695, %v5899_v59  ;;  %v6236_v59 = vmul.f32 %v12197_v56, %v6230_v23  ;;  %v6190_v56 = vmul.f32 %v12201_v10, %v12391_v25  ;;  %v6189_v10 = vmul.f32 %v12158_v12, %v12387_v22 }
0x205d   :  { %v6233_v25 = vmul.f32 %v12165_v42, %v12415_v14  ;;  %v9629_v14 = vld [vmem:[%s13365_s21 + $0x98] sm:$0xff] }
0x205e   :  { %10105 = vpow2.f32 %v5900_v2 }
0x2061   :  { %v5974_v15 = vpop.xlane.xlu1 %5973 }
0x2062   :  { %v5975_v0 = vsub.f32 %v5969_v57, %v5974_v15 }
0x2064   :  { %v10106_v39 = vpop.eup %10105  ;;  %v5976_v17 = vmul.f32 1.442695, %v5975_v0 }
0x2065   :  { %v5902_v53 = vsel %vm505_vm1, %v10106_v39, 0.0 }
0x2066   :  { %10107 = vpow2.f32 %v5976_v17  ;;  %5903 = vadd.xlane.f32.xlu2 %v5902_v53  ;;  %v6191_v17 = vmul.f32 %v12189_v35, %v12395_v49 }
0x2068   :  { %v6240_v48 = vadd.f32 %v6236_v59, %v6191_v17 }
0x206c   :  { %v10108_v8 = vpop.eup %10107 }
0x206d   :  { %v5978_v52 = vsel %vm505_vm1, %v10108_v8, 0.0 }
0x206e   :  { %5979 = vadd.xlane.f32.xlu0 %v5978_v52  ;;  %v6235_v52 = vmul.f32 %v12193_v61, %v6227_v40  ;;  %v6234_v61 = vmul.f32 %v12169_v36, %v6224_v6  ;;  %v9628_v6 = vld [vmem:[%s13365_s21 + $0x90] sm:$0xff] }
0x2070   :  { %v6238_v49 = vadd.f32 %v6234_v61, %v6189_v10 }
0x20d9   :  { %v5904_v16 = vpop.xlane.xlu2 %5903 }
0x20da   :  { %10109 = vrcp.f32 %v5904_v16  ;;  %v5916_v46 = vand.u32 2147483648, %v5904_v16  ;;  %v5914_v32 = vand.u32 2147483647, %v5904_v16  ;;  %vm5910_vm11 = vweird.f32 %v5904_v16 }
0x20dc   :  { %v5917_v55 = vor.u32 1.1754944e-38, %v5916_v46  ;;  %vm5915_vm13 = vcmp.eq.f32.partialorder %v5914_v32, 8.507059e+37  ;;  %v9626_v32 = vld [vmem:[%s13365_s21 + $0x80] sm:$0xff] }
0x20e0   :  { %v10110_v13 = vpop.eup %10109 }
0x20e1   :  { %v5906_v45 = vmul.f32 %v10110_v13, %v5904_v16  ;;  %v5980_v51 = vpop.xlane.xlu0 %5979  ;;  %vm5911_vm10 = vweird.f32 %v10110_v13  ;;  %v6239_v16 = vadd.f32 %v6235_v52, %v6190_v56  ;;  %v9635_v56 = vld [vmem:[%s13379_s14 + $0x98] sm:$0xff] }
0x20e2   :  { %10111 = vrcp.f32 %v5980_v51  ;;  %vm5912_vm12 = vmor %vm5910_vm11, %vm5911_vm10  ;;  %v5992_v2 = vand.u32 2147483648, %v5980_v51  ;;  %v5990_v0 = vand.u32 2147483647, %v5980_v51  ;;  %vm5986_vm3 = vweird.f32 %v5980_v51 }
0x20e3   :  { %v5907_v18 = vsub.f32 1.0, %v5906_v45  ;;  %v9580_v45 = vld [vmem:[%s13387_s11 + $0x8] sm:$0xf]  ;;  %v6243_v35 = vmul.f32 0.70710677, %v6239_v16  ;;  %v9632_v16 = vld [vmem:[%s13379_s14 + $0x80] sm:$0xff] }
0x20e4   :  { %vm5991_vm5 = vcmp.eq.f32.partialorder %v5990_v0, 8.507059e+37  ;;  %9581 = vmatpush.msk.msrb.mxu3 %vm374_vm14, %v9580_v45 }
0x20e5   :  { %v5908_v41 = vmul.f32 %v10110_v13, %v5907_v18 }
0x20e7   :  { %v5909_v44 = vadd.f32 %v10110_v13, %v5908_v41  ;;  %v9627_v41 = vld [vmem:[%s13365_s21 + $0x88] sm:$0xff] }
0x20e8   :  { %v10112_v27 = vpop.eup %10111 }
0x20e9   :  { %v5913_v31 = vsel %vm5912_vm12, %v10110_v13, %v5909_v44  ;;  %v5982_v50 = vmul.f32 %v10112_v27, %v5980_v51  ;;  %vm5987_vm2 = vweird.f32 %v10112_v27  ;;  %v6244_v13 = vmul.f32 0.70710677, %v6240_v48 }
0x20ea   :  { %v5918_v57 = vsel %vm5915_vm13, %v5917_v55, %v5913_v31  ;;  %vm5988_vm4 = vmor %vm5986_vm3, %vm5987_vm2  ;;  %v6242_v51 = vmul.f32 0.70710677, %v6238_v49  ;;  %v6151_v55 = vmul.f32 %v12411_v4, %v12155_v30 }
0x20eb   :  { %v5919_v33 = vmul.f32 %v10106_v39, %v5918_v57  ;;  %v5983_v3 = vsub.f32 1.0, %v5982_v50  ;;  %v5993_v39 = vor.u32 1.1754944e-38, %v5992_v2 }
0x20ed   :  { %v5984_v15 = vmul.f32 %v10112_v27, %v5983_v3  ;;  %9575 = vmatmul.msk.f32.vlgmr.msra.gmra.mxu3 %vm505_vm1, %v5919_v33  ;;  %v6152_v33 = vmul.f32 %v12413_v29, %v12183_v26 }
0x20ee   :  { %9606 = vmatpush.msk.msra.mxu3 %vm374_vm14, %v12301_v62 }
0x20ef   :  { %v5985_v53 = vadd.f32 %v10112_v27, %v5984_v15 }
0x20f1   :  { %v5989_v5 = vsel %vm5988_vm4, %v10112_v27, %v5985_v53 }
0x20f2   :  { %v5994_v7 = vsel %vm5991_vm5, %v5993_v39, %v5989_v5 }
0x20f3   :  { %v5995_v19 = vmul.f32 %v10108_v8, %v5994_v7  ;;  %v6188_v8 = vmul.f32 %v12173_v37, %v12381_v43  ;;  %v9634_v7 = vld [vmem:[%s13379_s14 + $0x90] sm:$0xff] }
0x20f5   :  { %9579 = vmatmul.msk.f32.vlgmr.msra.gmra.mxu2 %vm505_vm1, %v5995_v19  ;;  %v6237_v40 = vadd.f32 %v6233_v25, %v6188_v8  ;;  %v9633_v19 = vld [vmem:[%s13379_s14 + $0x88] sm:$0xff] }
0x20f6   :  { %9618 = vmatpush.xpose.msk.msra.mxu2 %vm361_vm15, %v6244_v13 }
0x20f7   :  { %v6241_v36 = vmul.f32 0.70710677, %v6237_v40 }
0x20fa   :  { %9619 = vmatpush.xpose.msk.msra.mxu2 %vm361_vm15, %v6243_v35 }
0x20fd   :  { %9602 = vmatmul.msk.f32.vlgmr.msrb.gmra.mxu2 %vm167_vm0, %v12099_v1 }
0x20fe   :  { %6450 = vmatpush.msrb.mxu2 %v9629_v14 }
0x2100   :  { %6451 = vmatpush.msrb.mxu2 %v9628_v6 }
0x2102   :  { %6452 = vmatpush.msrb.mxu2 %v9627_v41 }
0x2104   :  { %6453 = vmatpush.msrb.mxu2 %v9626_v32 }
0x2105   :  { %9603 = vmatmul.msk.f32.gmra.mxu2 %vm167_vm0, %v12112_v54 }
0x210d   :  { %9604 = vmatmul.msk.f32.gmra.mxu2 %vm167_vm0, %v12121_v21 }
0x2115   :  { %9605 = vmatmul.msk.f32.gmra.mxu2 %vm167_vm0, %v12130_v63 }
0x2170   :  { %v5940_v18 = vpop.f32.mrf.mxu3 }
0x2171   :  { %9582 = vmatmul.msk.f32.vlgmr.msrb.gmra.mxu3 %vm361_vm15, %v5940_v18 }
0x2172   :  { %9614 = vmatpush.xpose.msk.msrb.mxu3 %vm361_vm15, %v6242_v51 }
0x2176   :  { %9615 = vmatpush.xpose.msk.msrb.mxu3 %vm361_vm15, %v6241_v36 }
0x2178   :  { %v6016_v12 = vpop.f32.mrf.mxu2 }
0x2179   :  { %9583 = vmatmul.msk.f32.gmra.mxu3 %vm361_vm15, %v6016_v12 }
0x2180   :  { %v6139_v42 = vpop.f32.mrf.mxu2 }
0x2181   :  { %9607 = vmatmul.msk.f32.vlgmr.msra.gmra.mxu3 %vm361_vm15, %v12411_v4 }
0x2188   :  { %v6142_v37 = vpop.f32.mrf.mxu2 }
0x2189   :  { %9608 = vmatmul.msk.f32.gmra.mxu3 %vm361_vm15, %v12413_v29  ;;  %6315 = vmatpush.msrb.mxu1 %v6142_v37  ;;  %v6517_v37 = vpop.f32.mrf.mxu0 }
0x218b   :  { %6316 = vmatpush.msrb.mxu1 %v6139_v42 }
0x2190   :  { %v6145_v43 = vpop.f32.mrf.mxu2 }
0x2198   :  { %v6148_v22 = vpop.f32.mrf.mxu2 }
0x2199   :  { %6391 = vmatpush.msra.mxu3 %v6148_v22 }
0x219b   :  { %6392 = vmatpush.msra.mxu3 %v6145_v43 }
0x21f4   :  { %v12460_v46 = vpop.f32.mrf.mxu3 }
0x21fc   :  { %v12464_v44 = vpop.f32.mrf.mxu3 }
0x2204   :  { %v6176_v27 = vpop.f32.mrf.mxu3 }
0x2205   :  { %v6182_v23 = vmul.f32 %v6176_v27, %v12162_v58 }
0x2207   :  { %v6184_v31 = vadd.f32 %v6182_v23, %v6151_v55 }
0x2209   :  { %v6186_v50 = vmul.f32 0.70710677, %v6184_v31 }
0x220b   :  { %9616 = vmatmul.msk.f32.vlgmr.msrb.gmra.mxu3 %vm361_vm15, %v6186_v50  ;;  %v6520_v50 = vpop.f32.mrf.mxu0 }
0x220c   :  { %v6179_v57 = vpop.f32.mrf.mxu3  ;;  %6478 = vmatpush.msrb.mxu3 %v9635_v56 }
0x220d   :  { %v6183_v3 = vmul.f32 %v6179_v57, %v12186_v11  ;;  %v9622_v57 = vld [vmem:[%s13387_s11 + $0xc] sm:$0xf] }
0x220e   :  { %6479 = vmatpush.msrb.mxu3 %v9634_v7  ;;  %9623 = vmatpush.msk.msra.mxu1 %vm374_vm14, %v9622_v57 }
0x220f   :  { %v6185_v59 = vadd.f32 %v6183_v3, %v6152_v33 }
0x2210   :  { %6480 = vmatpush.msrb.mxu3 %v9633_v19  ;;  %v12531_v19 = vld [vmem:[%s10407_s29] sm:$0xff] }
0x2211   :  { %v6187_v2 = vmul.f32 0.70710677, %v6185_v59  ;;  %v9685_v59 = vld [vmem:[%s13380_s24 + $0xb8] sm:$0xff] }
0x2212   :  { %6481 = vmatpush.msrb.mxu3 %v9632_v16 }
0x2213   :  { %9620 = vmatmul.msk.f32.vlgmr.msra.gmra.mxu2 %vm361_vm15, %v6187_v2  ;;  %v9684_v2 = vld [vmem:[%s13380_s24 + $0xb0] sm:$0xff] }
0x2214   :  { %9651 = vmatpush.msk.msra.mxu2 %vm374_vm14, %v12301_v62 }
0x221b   :  { %9630 = vmatmul.msk.f32.vlgmr.msrb.gmra.mxu2 %vm167_vm0, %v11967_v24 }
0x221c   :  { %6890 = vmatpush.msrb.mxu2 %v9685_v59 }
0x221e   :  { %6891 = vmatpush.msrb.mxu2 %v9684_v2 }
0x2223   :  { %9631 = vmatmul.msk.f32.gmra.mxu2 %vm167_vm0, %v12014_v28 }
0x228e   :  { %v6271_v30 = vpop.f32.mrf.mxu3 }
0x228f   :  { %v6274_v58 = vsel %vm505_vm1, %v6271_v30, -inf }
0x2290   :  { %6275 = vmax.xlane.f32.xlu2 %v6274_v58  ;;  %v9682_v58 = vld [vmem:[%s13380_s24 + $0xa0] sm:$0xff] }
0x2296   :  { %v6347_v26 = vpop.f32.mrf.mxu2 }
0x2297   :  { %v6350_v11 = vsel %vm505_vm1, %v6347_v26, -inf }
0x2298   :  { %6351 = vmax.xlane.f32.xlu1 %v6350_v11 }
0x2303   :  { %v6276_v4 = vpop.xlane.xlu2 %6275 }
0x2304   :  { %v6277_v29 = vsub.f32 %v6271_v30, %v6276_v4  ;;  %v9683_v30 = vld [vmem:[%s13380_s24 + $0xa8] sm:$0xff] }
0x2305   :  { %6892 = vmatpush.msrb.mxu2 %v9683_v30  ;;  %v12574_v30 = vld [vmem:[%s13385_s28 + $0x8] sm:$0xff] }
0x2306   :  { %v6278_v15 = vmul.f32 1.442695, %v6277_v29 }
0x2307   :  { %6893 = vmatpush.msrb.mxu2 %v9682_v58 }
0x2308   :  { %10113 = vpow2.f32 %v6278_v15 }
0x230b   :  { %v6352_v0 = vpop.xlane.xlu1 %6351 }
0x230c   :  { %v6353_v17 = vsub.f32 %v6347_v26, %v6352_v0  ;;  %v6455_v26 = vpop.f32.mrf.mxu2 }
0x230e   :  { %v10114_v53 = vpop.eup %10113  ;;  %v6354_v52 = vmul.f32 1.442695, %v6353_v17 }
0x230f   :  { %v6280_v48 = vsel %vm505_vm1, %v10114_v53, 0.0 }
0x2310   :  { %10115 = vpow2.f32 %v6354_v52  ;;  %6281 = vadd.xlane.f32.xlu1 %v6280_v48 }
0x2314   :  { %v6458_v4 = vpop.f32.mrf.mxu2 }
0x2315   :  { %v6530_v58 = vmul.f32 %v12574_v30, %v6458_v4 }
0x2316   :  { %v10116_v39 = vpop.eup %10115 }
0x2317   :  { %v6356_v5 = vsel %vm505_vm1, %v10116_v39, 0.0 }
0x2318   :  { %6357 = vadd.xlane.f32.xlu0 %v6356_v5  ;;  %v12527_v5 = vld [vmem:[%s10402_s25 + $0x8] sm:$0xff] }
0x2383   :  { %v6282_v13 = vpop.xlane.xlu1 %6281 }
0x2384   :  { %10117 = vrcp.f32 %v6282_v13  ;;  %v6294_v25 = vand.u32 2147483648, %v6282_v13  ;;  %v6292_v8 = vand.u32 2147483647, %v6282_v13  ;;  %vm6288_vm6 = vweird.f32 %v6282_v13 }
0x2386   :  { %v6295_v18 = vor.u32 1.1754944e-38, %v6294_v25  ;;  %vm6293_vm9 = vcmp.eq.f32.partialorder %v6292_v8, 8.507059e+37  ;;  %v12543_v25 = vld [vmem:[%s13386_s4] sm:$0xff] }
0x238a   :  { %v10118_v45 = vpop.eup %10117 }
0x238b   :  { %v6284_v35 = vmul.f32 %v10118_v45, %v6282_v13  ;;  %v6358_v61 = vpop.xlane.xlu0 %6357  ;;  %vm6289_vm8 = vweird.f32 %v10118_v45  ;;  %v12535_v13 = vld [vmem:[%s10407_s29 + $0x8] sm:$0xff] }
0x238c   :  { %10119 = vrcp.f32 %v6358_v61  ;;  %vm6290_vm7 = vmor %vm6288_vm6, %vm6289_vm8  ;;  %v6370_v14 = vand.u32 2147483648, %v6358_v61  ;;  %v6368_v41 = vand.u32 2147483647, %v6358_v61  ;;  %vm6364_vm11 = vweird.f32 %v6358_v61 }
0x238d   :  { %v6285_v10 = vsub.f32 1.0, %v6284_v35  ;;  %v12539_v35 = vld [vmem:[%s10402_s25] sm:$0xff] }
0x238e   :  { %v6371_v27 = vor.u32 1.1754944e-38, %v6370_v14  ;;  %vm6369_vm13 = vcmp.eq.f32.partialorder %v6368_v41, 8.507059e+37  ;;  %v12554_v14 = vld [vmem:[%s10402_s25 + $0x18] sm:$0xff] }
0x238f   :  { %v6286_v49 = vmul.f32 %v10118_v45, %v6285_v10 }
0x2391   :  { %v6287_v40 = vadd.f32 %v10118_v45, %v6286_v49 }
0x2392   :  { %v10120_v51 = vpop.eup %10119 }
0x2393   :  { %v6291_v36 = vsel %vm6290_vm7, %v10118_v45, %v6287_v40  ;;  %v6360_v12 = vmul.f32 %v10120_v51, %v6358_v61  ;;  %vm6365_vm10 = vweird.f32 %v10120_v51 }
0x2394   :  { %v6296_v42 = vsel %vm6293_vm9, %v6295_v18, %v6291_v36  ;;  %vm6366_vm12 = vmor %vm6364_vm11, %vm6365_vm10 }
0x2395   :  { %v6297_v43 = vmul.f32 %v10114_v53, %v6296_v42  ;;  %v6361_v22 = vsub.f32 1.0, %v6360_v12 }
0x2397   :  { %v6362_v6 = vmul.f32 %v10120_v51, %v6361_v22  ;;  %9617 = vmatmul.msk.f32.vlgmr.msrb.gmra.mxu1 %vm505_vm1, %v6297_v43 }
0x2398   :  { %9648 = vmatpush.msk.msrb.mxu1 %vm374_vm14, %v12301_v62 }
0x2399   :  { %v6363_v32 = vadd.f32 %v10120_v51, %v6362_v6 }
0x239b   :  { %v6367_v55 = vsel %vm6366_vm12, %v10120_v51, %v6363_v32  ;;  %v12547_v51 = vld [vmem:[%s13385_s28] sm:$0xff]  ;;  %v12558_v32 = vld [vmem:[%s10407_s29 + $0x10] sm:$0xff] }
0x239c   :  { %v6372_v23 = vsel %vm6369_vm13, %v6371_v27, %v6367_v55  ;;  %v6529_v18 = vmul.f32 %v12547_v51, %v6455_v26  ;;  %v12562_v55 = vld [vmem:[%s10407_s29 + $0x18] sm:$0xff]  ;;  %s13389_s29 = sld [smem:[#allocation23_spill]] }
0x239d   :  { %v6373_v31 = vmul.f32 %v10116_v39, %v6372_v23  ;;  %v6523_v39 = vpop.f32.mrf.mxu0 }
0x239f   :  { %9621 = vmatmul.msk.f32.vlgmr.msra.gmra.mxu3 %vm505_vm1, %v6373_v31  ;;  %v12566_v31 = vld [vmem:[%s10402_s25 + $0x10] sm:$0xff]  ;;  %s13388_s25 = sld [smem:[#allocation21_spill]] }
0x23a0   :  { %6693 = vmatpush.msra.mxu3 %v6520_v50 }
0x23a2   :  { %6694 = vmatpush.msra.mxu3 %v6517_v37 }
0x23a5   :  { %v6526_v37 = vpop.f32.mrf.mxu0 }
0x23a7   :  { %9636 = vmatmul.msk.f32.vlgmr.msrb.gmra.mxu3 %vm167_vm0, %v12099_v1 }
0x23af   :  { %9637 = vmatmul.msk.f32.gmra.mxu3 %vm167_vm0, %v12112_v54 }
0x23b7   :  { %9638 = vmatmul.msk.f32.gmra.mxu3 %vm167_vm0, %v12121_v21 }
0x23bf   :  { %9639 = vmatmul.msk.f32.gmra.mxu3 %vm167_vm0, %v12130_v63 }
0x2414   :  { %v6318_v33 = vpop.f32.mrf.mxu1 }
0x2415   :  { %9624 = vmatmul.msk.f32.vlgmr.msra.gmra.mxu1 %vm361_vm15, %v6318_v33  ;;  %v12570_v33 = vld [vmem:[%s13386_s4 + $0x8] sm:$0xff] }
0x2422   :  { %v6394_v3 = vpop.f32.mrf.mxu3 }
0x2423   :  { %9625 = vmatmul.msk.f32.gmra.mxu1 %vm361_vm15, %v6394_v3 }
0x242a   :  { %v6483_v11 = vpop.f32.mrf.mxu3 }
0x242b   :  { %9649 = vmatmul.msk.f32.vlgmr.msrb.gmra.mxu1 %vm361_vm15, %v6455_v26  ;;  %9652 = vmatmul.msk.f32.vlgmr.msra.gmra.mxu2 %vm361_vm15, %v6483_v11  ;;  %v6566_v61 = vmul.f32 %v12539_v35, %v6483_v11 }
0x2432   :  { %v6486_v29 = vpop.f32.mrf.mxu3 }
0x2433   :  { %9650 = vmatmul.msk.f32.gmra.mxu1 %vm361_vm15, %v6458_v4  ;;  %9653 = vmatmul.msk.f32.gmra.mxu2 %vm361_vm15, %v6486_v29  ;;  %v6567_v56 = vmul.f32 %v12527_v5, %v6486_v29  ;;  %v9671_v29 = vld [vmem:[%s13365_s21 + $0xb8] sm:$0xff] }
0x243a   :  { %v6489_v15 = vpop.f32.mrf.mxu3 }
0x243b   :  { %9654 = vmatmul.msk.f32.gmra.mxu2 %vm361_vm15, %v6489_v15  ;;  %v6568_v50 = vmul.f32 %v12566_v31, %v6489_v15 }
0x2442   :  { %v6492_v0 = vpop.f32.mrf.mxu3 }
0x2443   :  { %9655 = vmatmul.msk.f32.gmra.mxu2 %vm361_vm15, %v6492_v0  ;;  %v6569_v6 = vmul.f32 %v12554_v14, %v6492_v0  ;;  %v9670_v0 = vld [vmem:[%s13365_s21 + $0xb0] sm:$0xff] }
0x244b   :  { %9686 = vmatmul.msk.f32.vlgmr.msrb.gmra.mxu2 %vm167_vm0, %v12099_v1 }
0x2453   :  { %9687 = vmatmul.msk.f32.gmra.mxu2 %vm167_vm0, %v12112_v54 }
0x245b   :  { %9688 = vmatmul.msk.f32.gmra.mxu2 %vm167_vm0, %v12121_v21 }
0x2463   :  { %9689 = vmatmul.msk.f32.gmra.mxu2 %vm167_vm0, %v12130_v63 }
0x2492   :  { %v12522_v17 = vpop.f32.mrf.mxu1 }
0x24a0   :  { %v12524_v53 = vpop.f32.mrf.mxu1 }
0x24a8   :  { %v6554_v7 = vpop.f32.mrf.mxu1 }
0x24a9   :  { %v6560_v49 = vmul.f32 %v12543_v25, %v6554_v7 }
0x24ab   :  { %v6562_v36 = vadd.f32 %v6560_v49, %v6529_v18 }
0x24ad   :  { %v6564_v43 = vmul.f32 0.70710677, %v6562_v36 }
0x24ae   :  { %v6599_v52 = vpop.f32.mrf.mxu2 }
0x24af   :  { %v6611_v16 = vmul.f32 %v12531_v19, %v6599_v52  ;;  %v9669_v52 = vld [vmem:[%s13365_s21 + $0xa8] sm:$0xff] }
0x24b0   :  { %v6557_v41 = vpop.f32.mrf.mxu1 }
0x24b1   :  { %v6615_v8 = vadd.f32 %v6611_v16, %v6566_v61  ;;  %v6561_v3 = vmul.f32 %v12570_v33, %v6557_v41 }
0x24b3   :  { %v6619_v42 = vmul.f32 0.70710677, %v6615_v8  ;;  %v6563_v26 = vadd.f32 %v6561_v3, %v6530_v58 }
0x24b5   :  { %v6565_v15 = vmul.f32 0.70710677, %v6563_v26 }
0x24b6   :  { %v6602_v48 = vpop.f32.mrf.mxu2 }
0x24b7   :  { %v6612_v45 = vmul.f32 %v12535_v13, %v6602_v48  ;;  %v9668_v48 = vld [vmem:[%s13365_s21 + $0xa0] sm:$0xff] }
0x24b9   :  { %v6616_v10 = vadd.f32 %v6612_v45, %v6567_v56 }
0x24bb   :  { %v6620_v40 = vmul.f32 0.70710677, %v6616_v10 }
0x24bd   :  { %9656 = vmatpush.xpose.msk.msra.mxu1 %vm361_vm15, %v6620_v40 }
0x24be   :  { %v6605_v12 = vpop.f32.mrf.mxu2 }
0x24bf   :  { %v6613_v27 = vmul.f32 %v12558_v32, %v6605_v12 }
0x24c1   :  { %9657 = vmatpush.xpose.msk.msra.mxu1 %vm361_vm15, %v6619_v42  ;;  %v6617_v59 = vadd.f32 %v6613_v27, %v6568_v50  ;;  %v9677_v42 = vld [vmem:[%s13379_s14 + $0xb8] sm:$0xff] }
0x24c3   :  { %v6621_v11 = vmul.f32 0.70710677, %v6617_v59 }
0x24c4   :  { %9658 = vmatmul.msk.f32.vlgmr.msra.gmra.mxu1 %vm361_vm15, %v6564_v43  ;;  %v9676_v43 = vld [vmem:[%s13379_s14 + $0xb0] sm:$0xff] }
0x24c5   :  { %6769 = vmatpush.msrb.mxu1 %v6526_v37 }
0x24c6   :  { %v6608_v22 = vpop.f32.mrf.mxu2 }
0x24c7   :  { %6770 = vmatpush.msrb.mxu1 %v6523_v39  ;;  %v6614_v23 = vmul.f32 %v12562_v55, %v6608_v22  ;;  %v9675_v22 = vld [vmem:[%s13379_s14 + $0xa8] sm:$0xff] }
0x24c9   :  { %v6618_v57 = vadd.f32 %v6614_v23, %v6569_v6  ;;  %6856 = vmatpush.msra.mxu1 %v9677_v42  ;;  %v9674_v6 = vld [vmem:[%s13379_s14 + $0xa0] sm:$0xff]  ;;  %v9725_v42 = vld [vmem:[%s13380_s24 + $0xc8] sm:$0xff] }
0x24cb   :  { %v6622_v2 = vmul.f32 0.70710677, %v6618_v57  ;;  %6857 = vmatpush.msra.mxu1 %v9676_v43 }
0x24cd   :  { %9660 = vmatpush.xpose.msk.msra.mxu0 %vm361_vm15, %v6622_v2  ;;  %6858 = vmatpush.msra.mxu1 %v9675_v22 }
0x24cf   :  { %6859 = vmatpush.msra.mxu1 %v9674_v6 }
0x24d1   :  { %9661 = vmatpush.xpose.msk.msra.mxu0 %vm361_vm15, %v6621_v11 }
0x24d4   :  { %9662 = vmatmul.msk.f32.vlgmr.msra.gmra.mxu0 %vm361_vm15, %v6565_v15 }
0x24d5   :  { %6828 = vmatpush.msrb.mxu0 %v9671_v29 }
0x24d7   :  { %6829 = vmatpush.msrb.mxu0 %v9670_v0 }
0x24d9   :  { %6830 = vmatpush.msrb.mxu0 %v9669_v52  ;;  %v6895_v52 = vpop.f32.mrf.mxu2 }
0x24db   :  { %6831 = vmatpush.msrb.mxu0 %v9668_v48 }
0x24dc   :  { %9672 = vmatmul.msk.f32.vlgmr.msrb.gmra.mxu0 %vm167_vm0, %v11967_v24 }
0x24dd   :  { %9693 = vmatpush.msk.msra.mxu0 %vm374_vm14, %v12301_v62 }
0x24e4   :  { %9673 = vmatmul.msk.f32.gmra.mxu0 %vm167_vm0, %v12014_v28 }
0x2541   :  { %v6649_v4 = vpop.f32.mrf.mxu1 }
0x2542   :  { %v6652_v39 = vsel %vm505_vm1, %v6649_v4, -inf }
0x2543   :  { %6653 = vmax.xlane.f32.xlu0 %v6652_v39 }
0x2551   :  { %v6725_v56 = vpop.f32.mrf.mxu0 }
0x2552   :  { %v6728_v7 = vsel %vm505_vm1, %v6725_v56, -inf }
0x2553   :  { %6729 = vmax.xlane.f32.xlu2 %v6728_v7 }
0x2559   :  { %v6833_v43 = vpop.f32.mrf.mxu0 }
0x25b6   :  { %v6654_v16 = vpop.xlane.xlu0 %6653 }
0x25b7   :  { %v6655_v45 = vsub.f32 %v6649_v4, %v6654_v16 }
0x25b9   :  { %v6656_v61 = vmul.f32 1.442695, %v6655_v45 }
0x25bb   :  { %10121 = vpow2.f32 %v6656_v61 }
0x25c1   :  { %v10122_v10 = vpop.eup %10121 }
0x25c2   :  { %v6658_v49 = vsel %vm505_vm1, %v10122_v10, 0.0 }
0x25c3   :  { %6659 = vadd.xlane.f32.xlu2 %v6658_v49 }
0x25c6   :  { %v6730_v8 = vpop.xlane.xlu2 %6729 }
0x25c7   :  { %v6731_v40 = vsub.f32 %v6725_v56, %v6730_v8  ;;  %v9664_v8 = vld [vmem:[%s13387_s11 + $0x10] sm:$0xf] }
0x25c8   :  { %9665 = vmatpush.msk.msrb.mxu3 %vm374_vm14, %v9664_v8 }
0x25c9   :  { %v6732_v18 = vmul.f32 1.442695, %v6731_v40 }
0x25cb   :  { %10123 = vpow2.f32 %v6732_v18 }
0x25d1   :  { %v10124_v36 = vpop.eup %10123 }
0x25d2   :  { %v6734_v12 = vsel %vm505_vm1, %v10124_v36, 0.0 }
0x25d3   :  { %6735 = vadd.xlane.f32.xlu1 %v6734_v12  ;;  %v9726_v12 = vld [vmem:[%s13380_s24 + $0xd0] sm:$0xff] }
0x2636   :  { %v6660_v37 = vpop.xlane.xlu2 %6659 }
0x2637   :  { %10125 = vrcp.f32 %v6660_v37  ;;  %v6672_v50 = vand.u32 2147483648, %v6660_v37  ;;  %v6670_v3 = vand.u32 2147483647, %v6660_v37  ;;  %vm6666_vm3 = vweird.f32 %v6660_v37 }
0x2639   :  { %v6673_v2 = vor.u32 1.1754944e-38, %v6672_v50  ;;  %vm6671_vm5 = vcmp.eq.f32.partialorder %v6670_v3, 8.507059e+37 }
0x263d   :  { %v10126_v41 = vpop.eup %10125 }
0x263e   :  { %v6662_v27 = vmul.f32 %v10126_v41, %v6660_v37  ;;  %vm6667_vm2 = vweird.f32 %v10126_v41  ;;  %v9724_v37 = vld [vmem:[%s13380_s24 + $0xc0] sm:$0xff] }
0x263f   :  { %vm6668_vm4 = vmor %vm6666_vm3, %vm6667_vm2 }
0x2640   :  { %v6663_v23 = vsub.f32 1.0, %v6662_v27 }
0x2642   :  { %v6664_v57 = vmul.f32 %v10126_v41, %v6663_v23 }
0x2644   :  { %v6665_v59 = vadd.f32 %v10126_v41, %v6664_v57 }
0x2646   :  { %v6669_v58 = vsel %vm6668_vm4, %v10126_v41, %v6665_v59  ;;  %v6736_v26 = vpop.xlane.xlu1 %6735 }
0x2647   :  { %v6674_v11 = vsel %vm6671_vm5, %v6673_v2, %v6669_v58  ;;  %10127 = vrcp.f32 %v6736_v26  ;;  %v6748_v4 = vand.u32 2147483648, %v6736_v26  ;;  %v6746_v56 = vand.u32 2147483647, %v6736_v26 }
0x2648   :  { %v6675_v29 = vmul.f32 %v10122_v10, %v6674_v11  ;;  %vm6742_vm6 = vweird.f32 %v6736_v26  ;;  %v6898_v10 = vpop.f32.mrf.mxu2 }
0x2649   :  { %v6749_v16 = vor.u32 1.1754944e-38, %v6748_v4  ;;  %vm6747_vm9 = vcmp.eq.f32.partialorder %v6746_v56, 8.507059e+37  ;;  %v6907_v4 = vmul.f32 %v12547_v51, %v6833_v43 }
0x264a   :  { %9659 = vmatmul.msk.f32.vlgmr.msra.gmra.mxu3 %vm505_vm1, %v6675_v29 }
0x264b   :  { %9690 = vmatpush.msk.msra.mxu3 %vm374_vm14, %v12301_v62  ;;  %v6836_v62 = vpop.f32.mrf.mxu0 }
0x264d   :  { %v10128_v15 = vpop.eup %10127 }
0x264e   :  { %v6738_v0 = vmul.f32 %v10128_v15, %v6736_v26  ;;  %vm6743_vm8 = vweird.f32 %v10128_v15 }
0x264f   :  { %vm6744_vm7 = vmor %vm6742_vm6, %vm6743_vm8 }
0x2650   :  { %v6739_v48 = vsub.f32 1.0, %v6738_v0  ;;  %v6901_v59 = vpop.f32.mrf.mxu2 }
0x2652   :  { %v6740_v39 = vmul.f32 %v10128_v15, %v6739_v48 }
0x2654   :  { %v6741_v7 = vadd.f32 %v10128_v15, %v6740_v39 }
0x2656   :  { %v6745_v45 = vsel %vm6744_vm7, %v10128_v15, %v6741_v7 }
0x2657   :  { %v6750_v61 = vsel %vm6747_vm9, %v6749_v16, %v6745_v45 }
0x2658   :  { %v6751_v49 = vmul.f32 %v10124_v36, %v6750_v61  ;;  %v9727_v36 = vld [vmem:[%s13380_s24 + $0xd8] sm:$0xff]  ;;  %v6904_v16 = vpop.f32.mrf.mxu2 }
0x2659   :  { %7268 = vmatpush.msrb.mxu0 %v9727_v36 }
0x265a   :  { %9663 = vmatmul.msk.f32.vlgmr.msrb.gmra.mxu1 %vm505_vm1, %v6751_v49 }
0x265b   :  { %7071 = vmatpush.msrb.mxu1 %v6898_v10  ;;  %7269 = vmatpush.msrb.mxu0 %v9726_v12 }
0x265d   :  { %7072 = vmatpush.msrb.mxu1 %v6895_v52  ;;  %7270 = vmatpush.msrb.mxu0 %v9725_v42 }
0x265f   :  { %7271 = vmatpush.msrb.mxu0 %v9724_v37 }
0x2662   :  { %9678 = vmatmul.msk.f32.vlgmr.msra.gmra.mxu1 %vm167_vm0, %v12099_v1 }
0x266a   :  { %9679 = vmatmul.msk.f32.gmra.mxu1 %vm167_vm0, %v12112_v54 }
0x2672   :  { %9680 = vmatmul.msk.f32.gmra.mxu1 %vm167_vm0, %v12121_v21 }
0x267a   :  { %9681 = vmatmul.msk.f32.gmra.mxu1 %vm167_vm0, %v12130_v63 }
0x26cd   :  { %v6696_v40 = vpop.f32.mrf.mxu3 }
0x26ce   :  { %9666 = vmatmul.msk.f32.vlgmr.msrb.gmra.mxu3 %vm361_vm15, %v6696_v40 }
0x26d7   :  { %v6772_v18 = vpop.f32.mrf.mxu1 }
0x26d8   :  { %9667 = vmatmul.msk.f32.gmra.mxu3 %vm361_vm15, %v6772_v18 }
0x26df   :  { %v6861_v22 = vpop.f32.mrf.mxu1 }
0x26e0   :  { %9691 = vmatmul.msk.f32.vlgmr.msra.gmra.mxu3 %vm361_vm15, %v6833_v43  ;;  %9694 = vmatmul.msk.f32.vlgmr.msra.gmra.mxu0 %vm361_vm15, %v6861_v22  ;;  %v6944_v29 = vmul.f32 %v12539_v35, %v6861_v22  ;;  %v6908_v43 = vmul.f32 %v12574_v30, %v6836_v62 }
0x26e7   :  { %v6864_v6 = vpop.f32.mrf.mxu1 }
0x26e8   :  { %9692 = vmatmul.msk.f32.gmra.mxu3 %vm361_vm15, %v6836_v62  ;;  %9695 = vmatmul.msk.f32.gmra.mxu0 %vm361_vm15, %v6864_v6  ;;  %v6945_v2 = vmul.f32 %v12527_v5, %v6864_v6 }
0x26ef   :  { %v6867_v41 = vpop.f32.mrf.mxu1 }
0x26f0   :  { %9696 = vmatmul.msk.f32.gmra.mxu0 %vm361_vm15, %v6867_v41  ;;  %v6946_v18 = vmul.f32 %v12566_v31, %v6867_v41  ;;  %v9711_v41 = vld [vmem:[%s13365_s21 + $0xc8] sm:$0xff] }
0x26f7   :  { %v6870_v27 = vpop.f32.mrf.mxu1 }
0x26f8   :  { %9697 = vmatmul.msk.f32.gmra.mxu0 %vm361_vm15, %v6870_v27  ;;  %v6947_v49 = vmul.f32 %v12554_v14, %v6870_v27  ;;  %v9713_v27 = vld [vmem:[%s13365_s21 + $0xd8] sm:$0xff] }
0x2700   :  { %9728 = vmatmul.msk.f32.vlgmr.msrb.gmra.mxu0 %vm167_vm0, %v12099_v1 }
0x2708   :  { %9729 = vmatmul.msk.f32.gmra.mxu0 %vm167_vm0, %v12112_v54 }
0x2710   :  { %9730 = vmatmul.msk.f32.gmra.mxu0 %vm167_vm0, %v12121_v21 }
0x2718   :  { %9731 = vmatmul.msk.f32.gmra.mxu0 %vm167_vm0, %v12130_v63 }
0x2751   :  { %v12632_v23 = vpop.f32.mrf.mxu3 }
0x275b   :  { %v12634_v50 = vpop.f32.mrf.mxu3 }
0x275d   :  { %v6977_v57 = vpop.f32.mrf.mxu0 }
0x275e   :  { %v6989_v58 = vmul.f32 %v12531_v19, %v6977_v57 }
0x2760   :  { %v6993_v52 = vadd.f32 %v6989_v58, %v6944_v29 }
0x2762   :  { %v6997_v7 = vmul.f32 0.70710677, %v6993_v52 }
0x2763   :  { %v6932_v26 = vpop.f32.mrf.mxu3 }
0x2764   :  { %v6938_v0 = vmul.f32 %v12543_v25, %v6932_v26 }
0x2765   :  { %v6980_v3 = vpop.f32.mrf.mxu0 }
0x2766   :  { %v6990_v11 = vmul.f32 %v12535_v13, %v6980_v3  ;;  %v6940_v39 = vadd.f32 %v6938_v0, %v6907_v4  ;;  %v9712_v3 = vld [vmem:[%s13365_s21 + $0xd0] sm:$0xff] }
0x2768   :  { %v6994_v15 = vadd.f32 %v6990_v11, %v6945_v2  ;;  %v6942_v45 = vmul.f32 0.70710677, %v6940_v39  ;;  %v12659_v2 = vld [vmem:[%s10412_s3] sm:$0xf]  ;;  %s13390_s3 = sld [smem:[#allocation24_spill]] }
0x276a   :  { %v6998_v48 = vmul.f32 0.70710677, %v6994_v15 }
0x276b   :  { %v6935_v10 = vpop.f32.mrf.mxu3 }
0x276c   :  { %9698 = vmatpush.xpose.msk.msrb.mxu3 %vm361_vm15, %v6998_v48  ;;  %v6939_v12 = vmul.f32 %v12570_v33, %v6935_v10  ;;  %v9717_v10 = vld [vmem:[%s13379_s14 + $0xc8] sm:$0xff] }
0x276d   :  { %v6983_v56 = vpop.f32.mrf.mxu0 }
0x276e   :  { %v6991_v8 = vmul.f32 %v12558_v32, %v6983_v56  ;;  %v6941_v22 = vadd.f32 %v6939_v12, %v6908_v43 }
0x2770   :  { %9699 = vmatpush.xpose.msk.msrb.mxu3 %vm361_vm15, %v6997_v7  ;;  %v6995_v42 = vadd.f32 %v6991_v8, %v6946_v18  ;;  %v6943_v57 = vmul.f32 0.70710677, %v6941_v22  ;;  %v9716_v8 = vld [vmem:[%s13379_s14 + $0xc0] sm:$0xff] }
0x2772   :  { %v6999_v6 = vmul.f32 0.70710677, %v6995_v42 }
0x2773   :  { %9700 = vmatmul.msk.f32.vlgmr.msrb.gmra.mxu3 %vm361_vm15, %v6942_v45  ;;  %v9719_v45 = vld [vmem:[%s13379_s14 + $0xd8] sm:$0xff] }
0x2774   :  { %7147 = vmatpush.msra.mxu3 %v6904_v16 }
0x2775   :  { %v6986_v61 = vpop.f32.mrf.mxu0 }
0x2776   :  { %7148 = vmatpush.msra.mxu3 %v6901_v59  ;;  %v6992_v40 = vmul.f32 %v12562_v55, %v6986_v61  ;;  %v9710_v59 = vld [vmem:[%s13365_s21 + $0xc0] sm:$0xff] }
0x2778   :  { %v6996_v36 = vadd.f32 %v6992_v40, %v6947_v49  ;;  %7234 = vmatpush.msrb.mxu3 %v9719_v45  ;;  %v9718_v49 = vld [vmem:[%s13379_s14 + $0xd0] sm:$0xff]  ;;  %v9769_v45 = vld [vmem:[%s13380_s24 + $0xf8] sm:$0xff] }
0x277a   :  { %v7000_v37 = vmul.f32 0.70710677, %v6996_v36  ;;  %7235 = vmatpush.msrb.mxu3 %v9718_v49  ;;  %v9767_v49 = vld [vmem:[%s13380_s24 + $0xe8] sm:$0xff] }
0x277c   :  { %9702 = vmatpush.xpose.msk.msra.mxu2 %vm361_vm15, %v7000_v37  ;;  %7236 = vmatpush.msrb.mxu3 %v9717_v10  ;;  %v9766_v10 = vld [vmem:[%s13380_s24 + $0xe0] sm:$0xff] }
0x277e   :  { %7237 = vmatpush.msrb.mxu3 %v9716_v8 }
0x2780   :  { %9703 = vmatpush.xpose.msk.msra.mxu2 %vm361_vm15, %v6999_v6 }
0x2783   :  { %9704 = vmatmul.msk.f32.vlgmr.msra.gmra.mxu2 %vm361_vm15, %v6943_v57 }
0x2784   :  { %7206 = vmatpush.msrb.mxu2 %v9713_v27 }
0x2786   :  { %7207 = vmatpush.msrb.mxu2 %v9712_v3 }
0x2788   :  { %7208 = vmatpush.msrb.mxu2 %v9711_v41 }
0x278a   :  { %7209 = vmatpush.msrb.mxu2 %v9710_v59 }
0x278b   :  { %9714 = vmatmul.msk.f32.vlgmr.msrb.gmra.mxu2 %vm167_vm0, %v11967_v24 }
0x278c   :  { %9735 = vmatpush.msk.msra.mxu2 %vm374_vm14, %v12659_v2 }
0x278e   :  { %7646 = vmatpush.msrb.mxu2 %v9769_v45 }
0x2793   :  { %9715 = vmatmul.msk.f32.gmra.mxu2 %vm167_vm0, %v12014_v28 }
0x27f6   :  { %v7027_v62 = vpop.f32.mrf.mxu3 }
0x27f7   :  { %v7030_v58 = vsel %vm505_vm1, %v7027_v62, -inf }
0x27f8   :  { %7031 = vmax.xlane.f32.xlu1 %v7030_v58 }
0x2806   :  { %v7103_v26 = vpop.f32.mrf.mxu2 }
0x2807   :  { %v7106_v11 = vsel %vm505_vm1, %v7103_v26, -inf }
0x2808   :  { %7107 = vmax.xlane.f32.xlu0 %v7106_v11 }
0x280e   :  { %v7211_v8 = vpop.f32.mrf.mxu2 }
0x286b   :  { %v7032_v29 = vpop.xlane.xlu1 %7031 }
0x286c   :  { %v7033_v15 = vsub.f32 %v7027_v62, %v7032_v29  ;;  %v7273_v62 = vpop.f32.mrf.mxu0 }
0x286e   :  { %v7034_v0 = vmul.f32 1.442695, %v7033_v15 }
0x2870   :  { %10129 = vpow2.f32 %v7034_v0 }
0x2876   :  { %v10130_v52 = vpop.eup %10129 }
0x2877   :  { %v7036_v48 = vsel %vm505_vm1, %v10130_v52, 0.0 }
0x2878   :  { %7037 = vadd.xlane.f32.xlu0 %v7036_v48 }
0x287b   :  { %v7108_v4 = vpop.xlane.xlu0 %7107 }
0x287c   :  { %v7109_v39 = vsub.f32 %v7103_v26, %v7108_v4 }
0x287e   :  { %v7110_v56 = vmul.f32 1.442695, %v7109_v39 }
0x2880   :  { %10131 = vpow2.f32 %v7110_v56  ;;  %v9706_v56 = vld [vmem:[%s13387_s11 + $0x14] sm:$0xf] }
0x2881   :  { %9707 = vmatpush.msk.msra.mxu1 %vm374_vm14, %v9706_v56 }
0x2886   :  { %v10132_v7 = vpop.eup %10131 }
0x2887   :  { %v7112_v16 = vsel %vm505_vm1, %v10132_v7, 0.0 }
0x2888   :  { %7113 = vadd.xlane.f32.xlu2 %v7112_v16 }
0x28eb   :  { %v7038_v61 = vpop.xlane.xlu0 %7037 }
0x28ec   :  { %10133 = vrcp.f32 %v7038_v61  ;;  %v7050_v12 = vand.u32 2147483648, %v7038_v61  ;;  %v7048_v37 = vand.u32 2147483647, %v7038_v61  ;;  %vm7044_vm11 = vweird.f32 %v7038_v61 }
0x28ee   :  { %v7051_v22 = vor.u32 1.1754944e-38, %v7050_v12  ;;  %vm7049_vm13 = vcmp.eq.f32.partialorder %v7048_v37, 8.507059e+37 }
0x28f2   :  { %v10134_v40 = vpop.eup %10133 }
0x28f3   :  { %v7040_v18 = vmul.f32 %v10134_v40, %v7038_v61  ;;  %vm7045_vm10 = vweird.f32 %v10134_v40  ;;  %v9768_v61 = vld [vmem:[%s13380_s24 + $0xf0] sm:$0xff] }
0x28f4   :  { %vm7046_vm12 = vmor %vm7044_vm11, %vm7045_vm10  ;;  %7647 = vmatpush.msrb.mxu2 %v9768_v61 }
0x28f5   :  { %v7041_v36 = vsub.f32 1.0, %v7040_v18  ;;  %v7214_v18 = vpop.f32.mrf.mxu2 }
0x28f6   :  { %7648 = vmatpush.msrb.mxu2 %v9767_v49 }
0x28f7   :  { %v7042_v42 = vmul.f32 %v10134_v40, %v7041_v36 }
0x28f8   :  { %7649 = vmatpush.msrb.mxu2 %v9766_v10 }
0x28f9   :  { %v7043_v43 = vadd.f32 %v10134_v40, %v7042_v42 }
0x28fb   :  { %v7047_v6 = vsel %vm7046_vm12, %v10134_v40, %v7043_v43  ;;  %v7114_v27 = vpop.xlane.xlu2 %7113 }
0x28fc   :  { %v7052_v57 = vsel %vm7049_vm13, %v7051_v22, %v7047_v6  ;;  %10135 = vrcp.f32 %v7114_v27  ;;  %v7126_v26 = vand.u32 2147483648, %v7114_v27  ;;  %v7124_v29 = vand.u32 2147483647, %v7114_v27 }
0x28fd   :  { %v7053_v3 = vmul.f32 %v10130_v52, %v7052_v57  ;;  %vm7120_vm3 = vweird.f32 %v7114_v27  ;;  %v7276_v52 = vpop.f32.mrf.mxu0 }
0x28fe   :  { %v7127_v0 = vor.u32 1.1754944e-38, %v7126_v26  ;;  %vm7125_vm5 = vcmp.eq.f32.partialorder %v7124_v29, 8.507059e+37 }
0x28ff   :  { %9701 = vmatmul.msk.f32.vlgmr.msrb.gmra.mxu1 %vm505_vm1, %v7053_v3 }
0x2900   :  { %9732 = vmatpush.msk.msrb.mxu1 %vm374_vm14, %v12659_v2 }
0x2902   :  { %v10136_v41 = vpop.eup %10135 }
0x2903   :  { %v7116_v59 = vmul.f32 %v10136_v41, %v7114_v27  ;;  %vm7121_vm2 = vweird.f32 %v10136_v41 }
0x2904   :  { %vm7122_vm4 = vmor %vm7120_vm3, %vm7121_vm2 }
0x2905   :  { %v7117_v58 = vsub.f32 1.0, %v7116_v59  ;;  %v7279_v27 = vpop.f32.mrf.mxu0 }
0x2907   :  { %v7118_v11 = vmul.f32 %v10136_v41, %v7117_v58 }
0x2909   :  { %v7119_v15 = vadd.f32 %v10136_v41, %v7118_v11 }
0x290b   :  { %v7123_v48 = vsel %vm7122_vm4, %v10136_v41, %v7119_v15  ;;  %v7285_v15 = vmul.f32 %v12547_v51, %v7211_v8 }
0x290c   :  { %v7128_v4 = vsel %vm7125_vm5, %v7127_v0, %v7123_v48 }
0x290d   :  { %v7129_v39 = vmul.f32 %v10132_v7, %v7128_v4 }
0x290f   :  { %9705 = vmatmul.msk.f32.vlgmr.msra.gmra.mxu3 %vm505_vm1, %v7129_v39  ;;  %v7282_v39 = vpop.f32.mrf.mxu0 }
0x2910   :  { %7449 = vmatpush.msra.mxu3 %v7276_v52 }
0x2912   :  { %7450 = vmatpush.msra.mxu3 %v7273_v62 }
0x2917   :  { %9720 = vmatmul.msk.f32.vlgmr.msrb.gmra.mxu3 %vm167_vm0, %v12099_v1 }
0x291f   :  { %9721 = vmatmul.msk.f32.gmra.mxu3 %vm167_vm0, %v12112_v54 }
0x2927   :  { %9722 = vmatmul.msk.f32.gmra.mxu3 %vm167_vm0, %v12121_v21 }
0x292f   :  { %9723 = vmatmul.msk.f32.gmra.mxu3 %vm167_vm0, %v12130_v63 }
0x297c   :  { %v7074_v7 = vpop.f32.mrf.mxu1 }
0x297d   :  { %9708 = vmatmul.msk.f32.vlgmr.msra.gmra.mxu1 %vm361_vm15, %v7074_v7 }
0x2992   :  { %v7150_v16 = vpop.f32.mrf.mxu3 }
0x2993   :  { %9709 = vmatmul.msk.f32.gmra.mxu1 %vm361_vm15, %v7150_v16 }
0x299a   :  { %v7239_v40 = vpop.f32.mrf.mxu3 }
0x299b   :  { %9733 = vmatmul.msk.f32.vlgmr.msrb.gmra.mxu1 %vm361_vm15, %v7211_v8  ;;  %9736 = vmatmul.msk.f32.vlgmr.msra.gmra.mxu2 %vm361_vm15, %v7239_v40  ;;  %v7322_v62 = vmul.f32 %v12539_v35, %v7239_v40 }
0x29a2   :  { %v7242_v36 = vpop.f32.mrf.mxu3 }
0x29a3   :  { %9734 = vmatmul.msk.f32.gmra.mxu1 %vm361_vm15, %v7214_v18  ;;  %9737 = vmatmul.msk.f32.gmra.mxu2 %vm361_vm15, %v7242_v36  ;;  %v7323_v57 = vmul.f32 %v12527_v5, %v7242_v36 }
0x29aa   :  { %v7245_v12 = vpop.f32.mrf.mxu3 }
0x29ab   :  { %9738 = vmatmul.msk.f32.gmra.mxu2 %vm361_vm15, %v7245_v12  ;;  %v7324_v49 = vmul.f32 %v12566_v31, %v7245_v12  ;;  %v9753_v12 = vld [vmem:[%s13365_s21 + $0xe8] sm:$0xff] }
0x29b2   :  { %v7248_v42 = vpop.f32.mrf.mxu3 }
0x29b3   :  { %9739 = vmatmul.msk.f32.gmra.mxu2 %vm361_vm15, %v7248_v42  ;;  %v7325_v7 = vmul.f32 %v12554_v14, %v7248_v42 }
0x29bb   :  { %9770 = vmatmul.msk.f32.vlgmr.msrb.gmra.mxu2 %vm167_vm0, %v12099_v1 }
0x29c3   :  { %9771 = vmatmul.msk.f32.gmra.mxu2 %vm167_vm0, %v12112_v54 }
0x29cb   :  { %9772 = vmatmul.msk.f32.gmra.mxu2 %vm167_vm0, %v12121_v21 }
0x29d3   :  { %9773 = vmatmul.msk.f32.gmra.mxu2 %vm167_vm0, %v12130_v63 }
0x29fa   :  { %v12709_v37 = vpop.f32.mrf.mxu1 }
0x2a10   :  { %v12711_v43 = vpop.f32.mrf.mxu1 }
0x2a18   :  { %v7310_v3 = vpop.f32.mrf.mxu1 }
0x2a19   :  { %v7316_v26 = vmul.f32 %v12543_v25, %v7310_v3  ;;  %v9754_v3 = vld [vmem:[%s13365_s21 + $0xf0] sm:$0xff] }
0x2a1b   :  { %v7318_v0 = vadd.f32 %v7316_v26, %v7285_v15 }
0x2a1d   :  { %v7320_v52 = vmul.f32 0.70710677, %v7318_v0 }
0x2a1e   :  { %v7355_v22 = vpop.f32.mrf.mxu2 }
0x2a1f   :  { %v7367_v41 = vmul.f32 %v12531_v19, %v7355_v22  ;;  %v7286_v22 = vmul.f32 %v12574_v30, %v7214_v18 }
0x2a20   :  { %v7313_v16 = vpop.f32.mrf.mxu1 }
0x2a21   :  { %v7371_v11 = vadd.f32 %v7367_v41, %v7322_v62  ;;  %v7317_v8 = vmul.f32 %v12570_v33, %v7313_v16  ;;  %v9752_v41 = vld [vmem:[%s13365_s21 + $0xe0] sm:$0xff]  ;;  %v9759_v16 = vld [vmem:[%s13379_s14 + $0xe8] sm:$0xff] }
0x2a23   :  { %v7375_v4 = vmul.f32 0.70710677, %v7371_v11  ;;  %v7319_v42 = vadd.f32 %v7317_v8, %v7286_v22 }
0x2a26   :  { %v7358_v6 = vpop.f32.mrf.mxu2 }
0x2a27   :  { %v7368_v59 = vmul.f32 %v12535_v13, %v7358_v6 }
0x2a29   :  { %v7372_v58 = vadd.f32 %v7368_v59, %v7323_v57  ;;  %v7321_v57 = vmul.f32 0.70710677, %v7319_v42 }
0x2a2b   :  { %v7376_v29 = vmul.f32 0.70710677, %v7372_v58 }
0x2a2d   :  { %9740 = vmatpush.xpose.msk.msra.mxu1 %vm361_vm15, %v7376_v29 }
0x2a2e   :  { %v7361_v48 = vpop.f32.mrf.mxu2 }
0x2a2f   :  { %v7369_v45 = vmul.f32 %v12558_v32, %v7361_v48 }
0x2a31   :  { %9741 = vmatpush.xpose.msk.msra.mxu1 %vm361_vm15, %v7375_v4  ;;  %v7373_v40 = vadd.f32 %v7369_v45, %v7324_v49  ;;  %v9758_v45 = vld [vmem:[%s13379_s14 + $0xe0] sm:$0xff] }
0x2a33   :  { %v7377_v6 = vmul.f32 0.70710677, %v7373_v40 }
0x2a34   :  { %9742 = vmatmul.msk.f32.vlgmr.msra.gmra.mxu1 %vm361_vm15, %v7320_v52  ;;  %v9761_v52 = vld [vmem:[%s13379_s14 + $0xf8] sm:$0xff] }
0x2a35   :  { %7525 = vmatpush.msrb.mxu1 %v7282_v39 }
0x2a36   :  { %v7364_v56 = vpop.f32.mrf.mxu2 }
0x2a37   :  { %7526 = vmatpush.msrb.mxu1 %v7279_v27  ;;  %v7370_v61 = vmul.f32 %v12562_v55, %v7364_v56  ;;  %v9755_v27 = vld [vmem:[%s13365_s21 + $0xf8] sm:$0xff] }
0x2a39   :  { %v7374_v10 = vadd.f32 %v7370_v61, %v7325_v7  ;;  %7612 = vmatpush.msra.mxu1 %v9761_v52  ;;  %v9760_v7 = vld [vmem:[%s13379_s14 + $0xf0] sm:$0xff] }
0x2a3b   :  { %v7378_v36 = vmul.f32 0.70710677, %v7374_v10  ;;  %7613 = vmatpush.msra.mxu1 %v9760_v7 }
0x2a3d   :  { %9744 = vmatpush.xpose.msk.msra.mxu0 %vm361_vm15, %v7378_v36  ;;  %7614 = vmatpush.msra.mxu1 %v9759_v16 }
0x2a3f   :  { %7615 = vmatpush.msra.mxu1 %v9758_v45 }
0x2a41   :  { %9745 = vmatpush.xpose.msk.msra.mxu0 %vm361_vm15, %v7377_v6 }
0x2a44   :  { %9746 = vmatmul.msk.f32.vlgmr.msra.gmra.mxu0 %vm361_vm15, %v7321_v57 }
0x2a45   :  { %7584 = vmatpush.msrb.mxu0 %v9755_v27 }
0x2a47   :  { %7585 = vmatpush.msrb.mxu0 %v9754_v3 }
0x2a49   :  { %7586 = vmatpush.msrb.mxu0 %v9753_v12 }
0x2a4b   :  { %7587 = vmatpush.msrb.mxu0 %v9752_v41 }
0x2a4c   :  { %9756 = vmatmul.msk.f32.vlgmr.msrb.gmra.mxu0 %vm167_vm0, %v11967_v24 }
0x2a4d   :  { %9777 = vmatpush.msk.msra.mxu0 %vm374_vm14, %v12659_v2 }
0x2a54   :  { %9757 = vmatmul.msk.f32.gmra.mxu0 %vm167_vm0, %v12014_v28 }
0x2ab1   :  { %v7405_v18 = vpop.f32.mrf.mxu1 }
0x2ab2   :  { %v7408_v59 = vsel %vm505_vm1, %v7405_v18, -inf }
0x2ab3   :  { %7409 = vmax.xlane.f32.xlu2 %v7408_v59 }
0x2ac1   :  { %v7481_v62 = vpop.f32.mrf.mxu0 }
0x2ac2   :  { %v7484_v58 = vsel %vm505_vm1, %v7481_v62, -inf }
0x2ac3   :  { %7485 = vmax.xlane.f32.xlu1 %v7484_v58 }
0x2b26   :  { %v7410_v26 = vpop.xlane.xlu2 %7409 }
0x2b27   :  { %v7411_v11 = vsub.f32 %v7405_v18, %v7410_v26  ;;  %v7651_v18 = vpop.f32.mrf.mxu2 }
0x2b29   :  { %v7412_v29 = vmul.f32 1.442695, %v7411_v11 }
0x2b2b   :  { %10137 = vpow2.f32 %v7412_v29 }
0x2b31   :  { %v10138_v15 = vpop.eup %10137 }
0x2b32   :  { %v7414_v24 = vsel %vm505_vm1, %v10138_v15, 0.0 }
0x2b33   :  { %7415 = vadd.xlane.f32.xlu1 %v7414_v24 }
0x2b36   :  { %v7486_v28 = vpop.xlane.xlu1 %7485 }
0x2b37   :  { %v7487_v0 = vsub.f32 %v7481_v62, %v7486_v28 }
0x2b39   :  { %v7488_v48 = vmul.f32 1.442695, %v7487_v0 }
0x2b3b   :  { %10139 = vpow2.f32 %v7488_v48  ;;  %v9748_v48 = vld [vmem:[%s13387_s11 + $0x18] sm:$0xf] }
0x2b3c   :  { %9749 = vmatpush.msk.msrb.mxu3 %vm374_vm14, %v9748_v48 }
0x2b41   :  { %v10140_v4 = vpop.eup %10139 }
0x2b42   :  { %v7490_v39 = vsel %vm505_vm1, %v10140_v4, 0.0 }
0x2b43   :  { %7491 = vadd.xlane.f32.xlu0 %v7490_v39 }
0x2ba6   :  { %v7416_v56 = vpop.xlane.xlu1 %7415 }
0x2ba7   :  { %10141 = vrcp.f32 %v7416_v56  ;;  %v7428_v8 = vand.u32 2147483648, %v7416_v56  ;;  %v7426_v36 = vand.u32 2147483647, %v7416_v56  ;;  %vm7422_vm6 = vweird.f32 %v7416_v56 }
0x2ba9   :  { %v7429_v42 = vor.u32 1.1754944e-38, %v7428_v8  ;;  %vm7427_vm9 = vcmp.eq.f32.partialorder %v7426_v36, 8.507059e+37 }
0x2bad   :  { %v10142_v61 = vpop.eup %10141 }
0x2bae   :  { %v7418_v49 = vmul.f32 %v10142_v61, %v7416_v56  ;;  %vm7423_vm8 = vweird.f32 %v10142_v61  ;;  %v5672_v56 = vadd.f32 %v12355_v47, %v12359_v38 }
0x2baf   :  { %vm7424_vm7 = vmor %vm7422_vm6, %vm7423_vm8 }
0x2bb0   :  { %v7419_v10 = vsub.f32 1.0, %v7418_v49  ;;  %v6053_v7 = vadd.f32 %v12460_v46, %v5672_v56 }
0x2bb2   :  { %v7420_v40 = vmul.f32 %v10142_v61, %v7419_v10  ;;  %v6431_v16 = vadd.f32 %v12522_v17, %v6053_v7  ;;  %v5675_v10 = vadd.f32 %v12357_v34, %v12363_v20 }
0x2bb4   :  { %v7421_v22 = vadd.f32 %v10142_v61, %v7420_v40  ;;  %v6809_v45 = vadd.f32 %v12632_v23, %v6431_v16  ;;  %v6054_v40 = vadd.f32 %v12464_v44, %v5675_v10 }
0x2bb6   :  { %v7425_v6 = vsel %vm7424_vm7, %v10142_v61, %v7421_v22  ;;  %v7492_v27 = vpop.xlane.xlu0 %7491  ;;  %v7187_v61 = vadd.f32 %v12709_v37, %v6809_v45  ;;  %v6432_v36 = vadd.f32 %v12524_v53, %v6054_v40 }
0x2bb7   :  { %v7430_v57 = vsel %vm7427_vm9, %v7429_v42, %v7425_v6  ;;  %10143 = vrcp.f32 %v7492_v27  ;;  %v7504_v62 = vand.u32 2147483648, %v7492_v27  ;;  %v7502_v26 = vand.u32 2147483647, %v7492_v27 }
0x2bb8   :  { %v7431_v3 = vmul.f32 %v10138_v15, %v7430_v57  ;;  %vm7498_vm11 = vweird.f32 %v7492_v27  ;;  %v7654_v15 = vpop.f32.mrf.mxu2  ;;  %v6810_v47 = vadd.f32 %v12634_v50, %v6432_v36 }
0x2bb9   :  { %v7505_v29 = vor.u32 1.1754944e-38, %v7504_v62  ;;  %vm7503_vm13 = vcmp.eq.f32.partialorder %v7502_v26, 8.507059e+37 }
0x2bba   :  { %9743 = vmatmul.msk.f32.vlgmr.msra.gmra.mxu3 %vm505_vm1, %v7431_v3  ;;  %v7188_v38 = vadd.f32 %v12711_v43, %v6810_v47 }
0x2bbb   :  { %9774 = vmatpush.msk.msra.mxu3 %vm374_vm14, %v12659_v2 }
0x2bbd   :  { %v10144_v12 = vpop.eup %10143 }
0x2bbe   :  { %v7494_v41 = vmul.f32 %v10144_v12, %v7492_v27  ;;  %vm7499_vm10 = vweird.f32 %v10144_v12 }
0x2bbf   :  { %vm7500_vm12 = vmor %vm7498_vm11, %vm7499_vm10 }
0x2bc0   :  { %v7495_v59 = vsub.f32 1.0, %v7494_v41  ;;  %v7657_v37 = vpop.f32.mrf.mxu2 }
0x2bc2   :  { %v7496_v58 = vmul.f32 %v10144_v12, %v7495_v59 }
0x2bc4   :  { %v7497_v11 = vadd.f32 %v10144_v12, %v7496_v58 }
0x2bc6   :  { %v7501_v24 = vsel %vm7500_vm12, %v10144_v12, %v7497_v11 }
0x2bc7   :  { %v7506_v28 = vsel %vm7503_vm13, %v7505_v29, %v7501_v24 }
0x2bc8   :  { %v7507_v0 = vmul.f32 %v10140_v4, %v7506_v28 }
0x2bca   :  { %9747 = vmatmul.msk.f32.vlgmr.msrb.gmra.mxu1 %vm505_vm1, %v7507_v0 }
0x2bcb   :  { %7827 = vmatpush.msrb.mxu1 %v7654_v15 }
0x2bcd   :  { %7828 = vmatpush.msrb.mxu1 %v7651_v18 }
0x2bd2   :  { %9762 = vmatmul.msk.f32.vlgmr.msra.gmra.mxu1 %vm167_vm0, %v12099_v1  ;;  %v7589_v1 = vpop.f32.mrf.mxu0 }
0x2bd3   :  { %v7663_v57 = vmul.f32 %v12547_v51, %v7589_v1 }
0x2bda   :  { %9763 = vmatmul.msk.f32.gmra.mxu1 %vm167_vm0, %v12112_v54 }
0x2be2   :  { %9764 = vmatmul.msk.f32.gmra.mxu1 %vm167_vm0, %v12121_v21  ;;  %v7592_v21 = vpop.f32.mrf.mxu0 }
0x2be3   :  { %v7664_v29 = vmul.f32 %v12574_v30, %v7592_v21 }
0x2bea   :  { %9765 = vmatmul.msk.f32.gmra.mxu1 %vm167_vm0, %v12130_v63 }
0x2c3d   :  { %v7452_v4 = vpop.f32.mrf.mxu3 }
0x2c3e   :  { %9750 = vmatmul.msk.f32.vlgmr.msrb.gmra.mxu3 %vm361_vm15, %v7452_v4 }
0x2c47   :  { %v7528_v39 = vpop.f32.mrf.mxu1 }
0x2c48   :  { %9751 = vmatmul.msk.f32.gmra.mxu3 %vm361_vm15, %v7528_v39 }
0x2c4f   :  { %v7617_v54 = vpop.f32.mrf.mxu1 }
0x2c50   :  { %9775 = vmatmul.msk.f32.vlgmr.msra.gmra.mxu3 %vm361_vm15, %v7589_v1  ;;  %9778 = vmatmul.msk.f32.vlgmr.msra.gmra.mxu0 %vm361_vm15, %v7617_v54  ;;  %v7700_v44 = vmul.f32 %v12539_v35, %v7617_v54 }
0x2c57   :  { %v7620_v63 = vpop.f32.mrf.mxu1 }
0x2c58   :  { %9776 = vmatmul.msk.f32.gmra.mxu3 %vm361_vm15, %v7592_v21  ;;  %9779 = vmatmul.msk.f32.gmra.mxu0 %vm361_vm15, %v7620_v63  ;;  %v7701_v42 = vmul.f32 %v12527_v5, %v7620_v63  ;;  %v7660_v5 = vpop.f32.mrf.mxu2 }
0x2c5f   :  { %v7623_v52 = vpop.f32.mrf.mxu1 }
0x2c60   :  { %9780 = vmatmul.msk.f32.gmra.mxu0 %vm361_vm15, %v7623_v52  ;;  %v7702_v59 = vmul.f32 %v12566_v31, %v7623_v52 }
0x2c67   :  { %v7626_v2 = vpop.f32.mrf.mxu1 }
0x2c68   :  { %9781 = vmatmul.msk.f32.gmra.mxu0 %vm361_vm15, %v7626_v2  ;;  %v7703_v35 = vmul.f32 %v12554_v14, %v7626_v2 }
0x2cc1   :  { %v7559_v49 = vpop.f32.mrf.mxu3 }
0x2cc2   :  { %v12779_v8 = vadd.f32 %v7559_v49, %v7187_v61 }
0x2ccb   :  { %v7562_v46 = vpop.f32.mrf.mxu3 }
0x2ccc   :  { %v12785_v17 = vadd.f32 %v7562_v46, %v7188_v38 }
0x2ccd   :  { %v7733_v23 = vpop.f32.mrf.mxu0 }
0x2cce   :  { %v7745_v34 = vmul.f32 %v12531_v19, %v7733_v23 }
0x2cd0   :  { %v7749_v27 = vadd.f32 %v7745_v34, %v7700_v44 }
0x2cd2   :  { %v7753_v41 = vmul.f32 0.70710677, %v7749_v27  ;;  %v9790_v27 = vld [vmem:[%s13387_s11 + $0x1c] sm:$0xf] }
0x2cd3   :  { %v7688_v20 = vpop.f32.mrf.mxu3  ;;  %9791 = vmatpush.msk.msra.mxu1 %vm374_vm14, %v9790_v27 }
0x2cd4   :  { %v7694_v50 = vmul.f32 %v12543_v25, %v7688_v20 }
0x2cd5   :  { %v7736_v22 = vpop.f32.mrf.mxu0 }
0x2cd6   :  { %v7746_v6 = vmul.f32 %v12535_v13, %v7736_v22  ;;  %v7696_v3 = vadd.f32 %v7694_v50, %v7663_v57 }
0x2cd8   :  { %v7750_v53 = vadd.f32 %v7746_v6, %v7701_v42  ;;  %v7698_v19 = vmul.f32 0.70710677, %v7696_v3 }
0x2cda   :  { %v7754_v43 = vmul.f32 0.70710677, %v7750_v53 }
0x2cdb   :  { %v7691_v25 = vpop.f32.mrf.mxu3 }
0x2cdc   :  { %9782 = vmatpush.xpose.msk.msrb.mxu3 %vm361_vm15, %v7754_v43  ;;  %v7695_v58 = vmul.f32 %v12570_v33, %v7691_v25 }
0x2cdd   :  { %v7739_v12 = vpop.f32.mrf.mxu0 }
0x2cde   :  { %v7747_v18 = vmul.f32 %v12558_v32, %v7739_v12  ;;  %v7697_v24 = vadd.f32 %v7695_v58, %v7664_v29  ;;  %v8087_v58 = vld [vmem:[%s13389_s29 + $0x78] sm:$0xff]  ;;  %v8082_v29 = vld [vmem:[%s13389_s29 + $0x50] sm:$0xff] }
0x2ce0   :  { %9783 = vmatpush.xpose.msk.msrb.mxu3 %vm361_vm15, %v7753_v41  ;;  %v7751_v26 = vadd.f32 %v7747_v18, %v7702_v59  ;;  %v7699_v14 = vmul.f32 0.70710677, %v7697_v24  ;;  %v10252_v41 = vld [vmem:[%s13363_s9] sm:$0xff]  ;;  %v10253_v18 = vld [vmem:[%s13363_s9 + $0x8] sm:$0xff]  ;;  %v8083_v24 = vld [vmem:[%s13389_s29 + $0x58] sm:$0xff] }
0x2ce2   :  { %v7755_v28 = vmul.f32 0.70710677, %v7751_v26  ;;  %v8088_v26 = vld [vmem:[%s13389_s29 + $0x80] sm:$0xff] }
0x2ce3   :  { %9784 = vmatmul.msk.f32.vlgmr.msrb.gmra.mxu3 %vm361_vm15, %v7698_v19  ;;  %8127 = vmatpush.msrb.mxu0 %v8088_v26  ;;  %v8409_v26 = vld [vmem:[%s13390_s3 + $0x10] sm:$0xff] }
0x2ce4   :  { %7903 = vmatpush.msra.mxu3 %v7660_v5 }
0x2ce5   :  { %v7742_v13 = vpop.f32.mrf.mxu0  ;;  %8128 = vmatpush.msrb.mxu0 %v8083_v24 }
0x2ce6   :  { %7904 = vmatpush.msra.mxu3 %v7657_v37  ;;  %v7748_v51 = vmul.f32 %v12562_v55, %v7742_v13 }
0x2ce8   :  { %v7752_v62 = vadd.f32 %v7748_v51, %v7703_v35  ;;  %8104 = vmatpush.msrb.mxu3 %v8087_v58 }
0x2cea   :  { %v7756_v11 = vmul.f32 0.70710677, %v7752_v62  ;;  %v7990_v62 = vld [vmem:[%s13388_s25 + $0x18] sm:$0xff]  ;;  %8105 = vmatpush.msrb.mxu3 %v8082_v29 }
0x2cec   :  { %9786 = vmatpush.xpose.msk.msra.mxu2 %vm361_vm15, %v7756_v11  ;;  %v7989_v11 = vld [vmem:[%s13388_s25 + $0x10] sm:$0xff] }
0x2cf0   :  { %9787 = vmatpush.xpose.msk.msra.mxu2 %vm361_vm15, %v7755_v28  ;;  %v8084_v28 = vld [vmem:[%s13389_s29 + $0x60] sm:$0xff] }
0x2cf3   :  { %9788 = vmatmul.msk.f32.vlgmr.msra.gmra.mxu2 %vm361_vm15, %v7699_v14  ;;  %v7988_v14 = vld [vmem:[%s13388_s25 + $0x8] sm:$0xff] }
0x2cf4   :  { %8013 = vmatpush.msrb.mxu2 %v7990_v62  ;;  %v8416_v62 = vld [vmem:[%s13390_s3 + $0x48] sm:$0xff] }
0x2cf6   :  { %8014 = vmatpush.msrb.mxu2 %v7989_v11  ;;  %v8411_v11 = vld [vmem:[%s13390_s3 + $0x20] sm:$0xff] }
0x2cf8   :  { %8015 = vmatpush.msrb.mxu2 %v7988_v14 }
0x2d66   :  { %v7783_v32 = vpop.f32.mrf.mxu3 }
0x2d67   :  { %v7786_v55 = vsel %vm505_vm1, %v7783_v32, -inf }
0x2d68   :  { %7787 = vmax.xlane.f32.xlu2 %v7786_v55  ;;  %v8078_v55 = vld [vmem:[%s13389_s29 + $0x30] sm:$0xff] }
0x2d69   :  { %8129 = vmatpush.msrb.mxu0 %v8078_v55  ;;  %v9890_v55 = vld [vmem:[%s13394_s10] ss:$0 sm:$0xff] }
0x2d76   :  { %v7859_v31 = vpop.f32.mrf.mxu2 }
0x2d77   :  { %v7862_v33 = vsel %vm505_vm1, %v7859_v31, -inf }
0x2d78   :  { %7863 = vmax.xlane.f32.xlu0 %v7862_v33  ;;  %v7987_v33 = vld [vmem:[%s13388_s25] sm:$0xff] }
0x2d79   :  { %8016 = vmatpush.msrb.mxu2 %v7987_v33 }
0x2ddb   :  { %v7788_v0 = vpop.xlane.xlu2 %7787 }
0x2ddc   :  { %v7789_v15 = vsub.f32 %v7783_v32, %v7788_v0  ;;  %v8077_v32 = vld [vmem:[%s13389_s29 + $0x28] sm:$0xff]  ;;  %v8072_v0 = vld [vmem:[%s13389_s29] sm:$0xff] }
0x2ddd   :  { %8106 = vmatpush.msrb.mxu3 %v8077_v32 }
0x2dde   :  { %v7790_v30 = vmul.f32 1.442695, %v7789_v15  ;;  %v8073_v15 = vld [vmem:[%s13389_s29 + $0x8] sm:$0xff] }
0x2ddf   :  { %8107 = vmatpush.msrb.mxu3 %v8072_v0  ;;  %8130 = vmatpush.msrb.mxu0 %v8073_v15 }
0x2de0   :  { %10145 = vpow2.f32 %v7790_v30  ;;  %v8074_v30 = vld [vmem:[%s13389_s29 + $0x10] sm:$0xff] }
0x2de6   :  { %v10146_v48 = vpop.eup %10145 }
0x2de7   :  { %v7792_v4 = vsel %vm505_vm1, %v10146_v48, 0.0 }
0x2de8   :  { %7793 = vadd.xlane.f32.xlu1 %v7792_v4 }
0x2deb   :  { %v7864_v39 = vpop.xlane.xlu0 %7863 }
0x2dec   :  { %v7865_v1 = vsub.f32 %v7859_v31, %v7864_v39  ;;  %v8079_v31 = vld [vmem:[%s13389_s29 + $0x38] sm:$0xff] }
0x2dee   :  { %v7866_v54 = vmul.f32 1.442695, %v7865_v1 }
0x2df0   :  { %10147 = vpow2.f32 %v7866_v54 }
0x2df6   :  { %v10148_v21 = vpop.eup %10147 }
0x2df7   :  { %v7868_v63 = vsel %vm505_vm1, %v10148_v21, 0.0 }
0x2df8   :  { %7869 = vadd.xlane.f32.xlu2 %v7868_v63 }
0x2e5b   :  { %v7794_v52 = vpop.xlane.xlu1 %7793 }
0x2e5c   :  { %10149 = vrcp.f32 %v7794_v52  ;;  %v7806_v16 = vand.u32 2147483648, %v7794_v52  ;;  %v7804_v61 = vand.u32 2147483647, %v7794_v52  ;;  %vm7800_vm3 = vweird.f32 %v7794_v52 }
0x2e5e   :  { %v7807_v10 = vor.u32 1.1754944e-38, %v7806_v16  ;;  %vm7805_vm5 = vcmp.eq.f32.partialorder %v7804_v61, 8.507059e+37  ;;  %v8422_v16 = vld [vmem:[%s13390_s3 + $0x78] sm:$0xff]  ;;  %v8423_v61 = vld [vmem:[%s13390_s3 + $0x80] sm:$0xff] }
0x2e5f   :  { %8439 = vmatpush.msra.mxu0 %v8422_v16 }
0x2e62   :  { %v10150_v2 = vpop.eup %10149 }
0x2e63   :  { %v7796_v56 = vmul.f32 %v10150_v2, %v7794_v52  ;;  %vm7801_vm2 = vweird.f32 %v10150_v2 }
0x2e64   :  { %vm7802_vm4 = vmor %vm7800_vm3, %vm7801_vm2 }
0x2e65   :  { %v7797_v7 = vsub.f32 1.0, %v7796_v56  ;;  %v8090_v56 = vld [vmem:[%s13389_s29 + $0x90] sm:$0xff] }
0x2e66   :  { %8173 = vmatpush.msra.mxu2 %v8090_v56 }
0x2e67   :  { %v7798_v45 = vmul.f32 %v10150_v2, %v7797_v7  ;;  %v8091_v7 = vld [vmem:[%s13389_s29 + $0x98] sm:$0xff] }
0x2e69   :  { %v7799_v49 = vadd.f32 %v10150_v2, %v7798_v45  ;;  %v12854_v45 = vld [vmem:[%s13391_s18] ss:$0 sm:$0xff] }
0x2e6b   :  { %v7803_v40 = vsel %vm7802_vm4, %v10150_v2, %v7799_v49  ;;  %v7870_v36 = vpop.xlane.xlu2 %7869  ;;  %v8085_v49 = vld [vmem:[%s13389_s29 + $0x68] sm:$0xff] }
0x2e6c   :  { %v7808_v47 = vsel %vm7805_vm5, %v7807_v10, %v7803_v40  ;;  %10151 = vrcp.f32 %v7870_v36  ;;  %v7882_v37 = vand.u32 2147483648, %v7870_v36  ;;  %v7880_v34 = vand.u32 2147483647, %v7870_v36  ;;  %v8086_v10 = vld [vmem:[%s13389_s29 + $0x70] sm:$0xff]  ;;  %8174 = vmatpush.msra.mxu2 %v8085_v49 }
0x2e6d   :  { %v7809_v38 = vmul.f32 %v10146_v48, %v7808_v47  ;;  %vm7876_vm6 = vweird.f32 %v7870_v36  ;;  %v8418_v47 = vld [vmem:[%s13390_s3 + $0x58] sm:$0xff] }
0x2e6e   :  { %v7883_v6 = vor.u32 1.1754944e-38, %v7882_v37  ;;  %vm7881_vm9 = vcmp.eq.f32.partialorder %v7880_v34, 8.507059e+37  ;;  %v8075_v34 = vld [vmem:[%s13389_s29 + $0x18] sm:$0xff] }
0x2e6f   :  { %9785 = vmatmul.msk.f32.vlgmr.msrb.gmra.mxu1 %vm505_vm1, %v7809_v38  ;;  %v8080_v38 = vld [vmem:[%s13389_s29 + $0x40] sm:$0xff] }
0x2e70   :  { %8175 = vmatpush.msra.mxu2 %v8080_v38  ;;  %v8553_v38 = vld [vmem:[%s10532_s5 + $0x8] sm:$0xff] }
0x2e71   :  { %8560 = vst [vmem:[#allocation1 + $0x10] ss:$2 sm:$0xff] %v8553_v38 }
0x2e72   :  { %v10152_v46 = vpop.eup %10151  ;;  %8176 = vmatpush.msra.mxu2 %v8075_v34 }
0x2e73   :  { %v7872_v23 = vmul.f32 %v10152_v46, %v7870_v36  ;;  %vm7877_vm8 = vweird.f32 %v10152_v46  ;;  %v8417_v36 = vld [vmem:[%s13390_s3 + $0x50] sm:$0xff] }
0x2e74   :  { %vm7878_vm7 = vmor %vm7876_vm6, %vm7877_vm8  ;;  %8440 = vmatpush.msra.mxu0 %v8417_v36 }
0x2e75   :  { %v7873_v22 = vsub.f32 1.0, %v7872_v23  ;;  %v8412_v23 = vld [vmem:[%s13390_s3 + $0x28] sm:$0xff] }
0x2e76   :  { %8441 = vmatpush.msra.mxu0 %v8412_v23  ;;  %v8564_v23 = vld.sshfl [vmem:[#allocation1 + $0x8] sm:$0xff pattern:$0x75316420] }
0x2e77   :  { %v7874_v42 = vmul.f32 %v10152_v46, %v7873_v22  ;;  %v8413_v22 = vld [vmem:[%s13390_s3 + $0x30] sm:$0xff] }
0x2e79   :  { %v7875_v20 = vadd.f32 %v10152_v46, %v7874_v42 }
0x2e7b   :  { %v7879_v44 = vsel %vm7878_vm7, %v10152_v46, %v7875_v20  ;;  %v8081_v46 = vld [vmem:[%s13389_s29 + $0x48] sm:$0xff]  ;;  %v8076_v20 = vld [vmem:[%s13389_s29 + $0x20] sm:$0xff] }
0x2e7c   :  { %v7884_v53 = vsel %vm7881_vm9, %v7883_v6, %v7879_v44 }
0x2e7d   :  { %v7885_v50 = vmul.f32 %v10148_v21, %v7884_v53  ;;  %v8407_v53 = vld [vmem:[%s13390_s3] sm:$0xff] }
0x2e7e   :  { %8442 = vmatpush.msra.mxu0 %v8407_v53  ;;  %v8554_v53 = vld [vmem:[%s10532_s5 + $0x10] sm:$0xf]  ;;  %s8959_s5 = sshll.u32 %s10542_s19, 4  ;;  %s8960_s5 = int_to_ptr.hbm [resolvable:$true] %s8959_s5 }
0x2e7f   :  { %9789 = vmatmul.msk.f32.vlgmr.msra.gmra.mxu3 %vm505_vm1, %v7885_v50  ;;  %v8408_v50 = vld [vmem:[%s13390_s3 + $0x8] sm:$0xff]  ;;  %8562 = vst [vmem:[#allocation1 + $0x20] ss:$2 sm:$0xff] %v8554_v53  ;;  %s10266_s20 = sshra.s32 %s8960_s5, 4  ;;  %s10267_s20 = int_to_ptr.hbm [resolvable:$true] %s10266_s20 }
0x2e80   :  { %8196 = vmatpush.msra.mxu3 %v8091_v7  ;;  %s10268_s22 = scalar_lea.hbm %s10267_s20, 32  ;;  %p10271_p1 = scmp.lt.s32.totalorder %s10267_s20, %s10542_s19 }
0x2e81   :  { %p10269_p0 = scmp.ne.s32.totalorder %s10267_s20, %s10268_s22  ;;  %p10272_p2 = scmp.lt.s32.totalorder %s10270_s23, %s10268_s22 }
0x2e82   :  { %8197 = vmatpush.msra.mxu3 %v8086_v10 }
0x2e83   :  { %p10273_p3 = por %p10272_p2, %p10271_p1 }
0x2e84   :  { %8198 = vmatpush.msra.mxu3 %v8081_v46  ;;  %v8563_v46 = vld.sshfl [vmem:[#allocation1] sm:$0xff pattern:$0x75316420] }
0x2e85   :  { %p10274_p4 = pnand %p10273_p3, %p10269_p0 }
0x2e86   :  { %8199 = vmatpush.msra.mxu3 %v8076_v20 }
0x2eec   :  { %v7830_v43 = vpop.f32.mrf.mxu1 }
0x2eed   :  { %9792 = vmatmul.msk.f32.vlgmr.msra.gmra.mxu1 %vm361_vm15, %v7830_v43 }
0x2f02   :  { %v7906_v57 = vpop.f32.mrf.mxu3 }
0x2f03   :  { %9793 = vmatmul.msk.f32.gmra.mxu1 %vm361_vm15, %v7906_v57 }
0x2f6a   :  { %v7937_v3 = vpop.f32.mrf.mxu1 }
0x2f6b   :  { %v7943_v12 = vadd.f32 %v7937_v3, %v12779_v8 }
0x2f6d   :  { %v12817_v5 = vadd.f32 %v10252_v41, %v7943_v12  ;;  %v8424_v12 = vld [vmem:[%s13390_s3 + $0x88] sm:$0xff]  ;;  %v8425_v41 = vld [vmem:[%s13390_s3 + $0x90] sm:$0xff] }
0x2f6f   :  { %v7948_v19 = vmul.f32 %v12817_v5, %v12817_v5 }
0x2f71   :  { %v7950_v13 = vsel %vm167_vm0, %v7948_v19, 0.0  ;;  %v8426_v19 = vld [vmem:[%s13390_s3 + $0x98] sm:$0xff] }
0x2f72   :  { %7951 = vadd.xlane.f32.xlu0 %v7950_v13  ;;  %v8419_v13 = vld [vmem:[%s13390_s3 + $0x60] sm:$0xff] }
0x2f80   :  { %v7940_v35 = vpop.f32.mrf.mxu1 }
0x2f81   :  { %v7944_v25 = vadd.f32 %v7940_v35, %v12785_v17  ;;  %v8089_v17 = vld [vmem:[%s13389_s29 + $0x88] sm:$0xff] }
0x2f82   :  { %8150 = vmatpush.msrb.mxu1 %v8089_v17  ;;  %v8420_v35 = vld [vmem:[%s13390_s3 + $0x68] sm:$0xff]  ;;  %v8410_v17 = vld [vmem:[%s13390_s3 + $0x18] sm:$0xff] }
0x2f83   :  { %v12824_v51 = vadd.f32 %v10253_v18, %v7944_v25  ;;  %v8421_v18 = vld [vmem:[%s13390_s3 + $0x70] sm:$0xff] }
0x2f84   :  { %8151 = vmatpush.msrb.mxu1 %v8084_v28 }
0x2f85   :  { %v7949_v8 = vmul.f32 %v12824_v51, %v12824_v51 }
0x2f86   :  { %8152 = vmatpush.msrb.mxu1 %v8079_v31  ;;  %v4854_v31 = vrot.slane %v11815_v60, 4 }
0x2f87   :  { %v7953_v59 = vsel %vm167_vm0, %v7949_v8, 0.0  ;;  %v8414_v8 = vld [vmem:[%s13390_s3 + $0x38] sm:$0xff] }
0x2f88   :  { %7954 = vadd.xlane.f32.xlu1 %v7953_v59  ;;  %8153 = vmatpush.msrb.mxu1 %v8074_v30  ;;  %v8415_v59 = vld [vmem:[%s13390_s3 + $0x40] sm:$0xff]  ;;  %v4855_v15 = vadd.f32 %v4854_v31, %v11815_v60  ;;  %v8739_v31 = vld [vmem:[%s13395_s12 + $0xf0] sm:$0xff] }
0x2f8a   :  { %8462 = vmatpush.msra.mxu1 %v8423_v61 }
0x2f8c   :  { %8463 = vmatpush.msra.mxu1 %v8418_v47 }
0x2f8e   :  { %8464 = vmatpush.msra.mxu1 %v8413_v22  ;;  %v8565_v22 = vld.sshfl [vmem:[#allocation1 + $0x10] sm:$0xff pattern:$0x75316420] }
0x2f90   :  { %8465 = vmatpush.msra.mxu1 %v8408_v50 }
0x2fe5   :  { %v7952_v48 = vpop.xlane.xlu0 %7951 }
0x2fe6   :  { %v7956_v4 = vmul.f32 %v7952_v48, %v13361_v9  ;;  %v4856_v48 = vrot.slane %v4855_v15, 2 }
0x2fe8   :  { %v7958_v39 = vadd.f32 1e-06, %v7956_v4  ;;  %v4857_v4 = vadd.f32 %v4856_v48, %v4855_v15  ;;  %v8769_v15 = vld [vmem:[%s13395_s12 + $0x1e0] sm:$0xff] }
0x2fea   :  { %10153 = vrsqrt.f32 %v7958_v39  ;;  %vm7966_vm10 = vweird.f32 %v7958_v39 }
0x2ff0   :  { %v10154_v1 = vpop.eup %10153 }
0x2ff1   :  { %v7961_v54 = vmul.f32 %v10154_v1, %v7958_v39  ;;  %vm7967_vm1 = vweird.f32 %v10154_v1  ;;  %v4858_v39 = vrot.slane %v4857_v4, 1 }
0x2ff2   :  { %vm12846_vm11 = vmor %vm7966_vm10, %vm7967_vm1 }
0x2ff3   :  { %v7962_v21 = vmul.f32 %v10154_v1, %v7961_v54 }
0x2ff5   :  { %v7963_v63 = vmul.f32 0.5, %v7962_v21 }
0x2ff7   :  { %v7964_v2 = vsub.f32 1.5, %v7963_v63 }
0x2ff9   :  { %v7965_v40 = vmul.f32 %v10154_v1, %v7964_v2 }
0x2ffb   :  { %v7969_v37 = vsel %vm12846_vm11, %v10154_v1, %v7965_v40  ;;  %v7955_v42 = vpop.xlane.xlu1 %7954  ;;  %v4859_v1 = vadd.f32 %v4858_v39, %v4857_v4  ;;  %v8738_v4 = vld [vmem:[%s13395_s12 + $0xe8] sm:$0xff] }
0x2ffc   :  { %v7980_v6 = vmul.f32 %v7969_v37, %v12817_v5  ;;  %v7957_v44 = vmul.f32 %v7955_v42, %v13361_v9  ;;  %v8566_v37 = vld.sshfl [vmem:[#allocation1 + $0x18] sm:$0xff pattern:$0x75316420]  ;;  %v8754_v39 = vld [vmem:[%s13395_s12 + $0x168] sm:$0xff] }
0x2ffd   :  { %v4860_v54 = vmul.f32 %v4859_v1, %v13361_v9 }
0x2ffe   :  { %v7985_v27 = vmul.f32 %v12854_v45, %v7980_v6  ;;  %v7959_v43 = vadd.f32 1e-06, %v7957_v44 }
0x2fff   :  { %v9470_v2 = vadd.f32 -0.25, %v4860_v54 }
0x3000   :  { %10155 = vrsqrt.f32 %v7959_v43  ;;  %9794 = vmatmul.msk.f32.vlgmr.msrb.gmra.mxu2 %vm167_vm0, %v7985_v27  ;;  %9796 = vmatmul.msk.f32.vlgmr.msrb.gmra.mxu3 %vm167_vm0, %v7985_v27  ;;  %vm7976_vm13 = vweird.f32 %v7959_v43 }
0x3001   :  { %9798 = vmatmul.msk.f32.vlgmr.msrb.gmra.mxu0 %vm167_vm0, %v7985_v27  ;;  %9800 = vmatmul.msk.f32.vlgmr.msrb.gmra.mxu1 %vm167_vm0, %v7985_v27  ;;  %v4862_v56 = vmul.f32 %v9470_v2, %v9470_v2 }
0x3002   :  { %8485 = vmatpush.msrb.mxu2 %v8424_v12  ;;  %8508 = vmatpush.msrb.mxu3 %v8425_v41 }
0x3003   :  { %8531 = vmatpush.msrb.mxu0 %v8426_v19  ;;  %v4863_v7 = vsel %vm361_vm15, %v4862_v56, 0.0  ;;  %9826 = vmatpush.msk.msrb.mxu1 %vm374_vm14, %v8563_v46  ;;  %v8567_v19 = vld.sshfl [vmem:[#allocation1 + $0x20] sm:$0xff pattern:$0x75316420]  ;;  %v8719_v56 = vld [vmem:[%s13395_s12 + $0x50] sm:$0xff] }
0x3004   :  { %8486 = vmatpush.msrb.mxu2 %v8419_v13  ;;  %8509 = vmatpush.msrb.mxu3 %v8420_v35  ;;  %v8717_v46 = vld [vmem:[%s13395_s12 + $0x40] sm:$0xff] }
0x3005   :  { %8532 = vmatpush.msrb.mxu0 %v8421_v18 }
0x3006   :  { %v10156_v57 = vpop.eup %10155  ;;  %8487 = vmatpush.msrb.mxu2 %v8414_v8  ;;  %8510 = vmatpush.msrb.mxu3 %v8415_v59  ;;  %v8724_v59 = vld [vmem:[%s13395_s12 + $0x78] sm:$0xff] }
0x3007   :  { %v7971_v3 = vmul.f32 %v10156_v57, %v7959_v43  ;;  %vm7977_vm12 = vweird.f32 %v10156_v57  ;;  %8533 = vmatpush.msrb.mxu0 %v8416_v62  ;;  %v8772_v62 = vld [vmem:[%s13395_s12 + $0x1f8] sm:$0xff] }
0x3008   :  { %8488 = vmatpush.msrb.mxu2 %v8409_v26  ;;  %8511 = vmatpush.msrb.mxu3 %v8410_v17  ;;  %vm7978_vm2 = vmor %vm7976_vm13, %vm7977_vm12  ;;  %v8771_v17 = vld [vmem:[%s13395_s12 + $0x1f0] sm:$0xff] }
0x3009   :  { %v7972_v25 = vmul.f32 %v10156_v57, %v7971_v3  ;;  %8534 = vmatpush.msrb.mxu0 %v8411_v11  ;;  %v8722_v11 = vld [vmem:[%s13395_s12 + $0x68] sm:$0xff] }
0x300b   :  { %v7973_v58 = vmul.f32 0.5, %v7972_v25  ;;  %v10365_v25 = vmov 16.0  }
0x300d   :  { %v7974_v29 = vsub.f32 1.5, %v7973_v58  ;;  %v8723_v58 = vld [vmem:[%s13395_s12 + $0x70] sm:$0xff] }
0x300f   :  { %v7975_v24 = vmul.f32 %v10156_v57, %v7974_v29 }
0x3011   :  { %v7979_v28 = vsel %vm7978_vm2, %v10156_v57, %v7975_v24 }
0x3012   :  { %v7981_v14 = vmul.f32 %v7979_v28, %v12824_v51  ;;  %v8770_v28 = vld [vmem:[%s13395_s12 + $0x1e8] sm:$0xff] }
0x3014   :  { %v7986_v32 = vmul.f32 %v12854_v45, %v7981_v14  ;;  %v8740_v14 = vld [vmem:[%s13395_s12 + $0xf8] sm:$0xff] }
0x3016   :  { %9795 = vmatmul.msk.f32.gmra.mxu2 %vm167_vm0, %v7986_v32  ;;  %9797 = vmatmul.msk.f32.gmra.mxu3 %vm167_vm0, %v7986_v32 }
0x3017   :  { %9799 = vmatmul.msk.f32.gmra.mxu0 %vm167_vm0, %v7986_v32  ;;  %9801 = vmatmul.msk.f32.gmra.mxu1 %vm167_vm0, %v7986_v32 }
0x301e   :  { %9802 = vmatmul.msk.f32.vlgmr.msra.gmra.mxu2 %vm167_vm0, %v7985_v27  ;;  %9804 = vmatmul.msk.f32.vlgmr.msra.gmra.mxu3 %vm167_vm0, %v7985_v27 }
0x301f   :  { %9816 = vmatmul.msk.f32.vlgmr.msra.gmra.mxu0 %vm167_vm0, %v7985_v27  ;;  %9818 = vmatmul.msk.f32.vlgmr.msra.gmra.mxu1 %vm167_vm0, %v7985_v27 }
0x3020   :  { %9829 = vmatpush.msk.msra.mxu2 %vm374_vm14, %v8564_v23  ;;  %9832 = vmatpush.msk.msra.mxu3 %vm374_vm14, %v8565_v22  ;;  %v8765_v23 = vld [vmem:[%s13395_s12 + $0x1c0] sm:$0xff] }
0x3021   :  { %9835 = vmatpush.msk.msra.mxu0 %vm374_vm14, %v8566_v37  ;;  %9838 = vmatpush.msk.msra.mxu1 %vm374_vm14, %v8567_v19  ;;  %v8735_v37 = vld [vmem:[%s13395_s12 + $0xd0] sm:$0xff]  ;;  %v8714_v19 = vld [vmem:[%s13395_s12 + $0x28] sm:$0xff] }
0x3026   :  { %9803 = vmatmul.msk.f32.gmra.mxu2 %vm167_vm0, %v7986_v32  ;;  %9805 = vmatmul.msk.f32.gmra.mxu3 %vm167_vm0, %v7986_v32 }
0x3027   :  { %9817 = vmatmul.msk.f32.gmra.mxu0 %vm167_vm0, %v7986_v32  ;;  %9819 = vmatmul.msk.f32.gmra.mxu1 %vm167_vm0, %v7986_v32 }
0x302e   :  { %9820 = vmatmul.msk.f32.vlgmr.msrb.gmra.mxu2 %vm167_vm0, %v7985_v27  ;;  %9822 = vmatmul.msk.f32.vlgmr.msrb.gmra.mxu3 %vm167_vm0, %v7985_v27 }
0x302f   :  { %9824 = vmatmul.msk.f32.vlgmr.msrb.gmra.mxu0 %vm167_vm0, %v7985_v27  ;;  %8789 = vmatpush.msrb.mxu2 %v8724_v59 }
0x3030   :  { %8812 = vmatpush.msrb.mxu3 %v8740_v14  ;;  %v8730_v14 = vld [vmem:[%s13395_s12 + $0xa8] sm:$0xff] }
0x3031   :  { %8790 = vmatpush.msrb.mxu2 %v8723_v58  ;;  %v8731_v58 = vld [vmem:[%s13395_s12 + $0xb0] sm:$0xff] }
0x3032   :  { %8813 = vmatpush.msrb.mxu3 %v8739_v31 }
0x3033   :  { %8791 = vmatpush.msrb.mxu2 %v8722_v11  ;;  %v8747_v11 = vld [vmem:[%s13395_s12 + $0x130] sm:$0xff] }
0x3034   :  { %8814 = vmatpush.msrb.mxu3 %v8738_v4 }
0x3036   :  { %9821 = vmatmul.msk.f32.gmra.mxu2 %vm167_vm0, %v7986_v32  ;;  %9823 = vmatmul.msk.f32.gmra.mxu3 %vm167_vm0, %v7986_v32 }
0x3037   :  { %9825 = vmatmul.msk.f32.gmra.mxu0 %vm167_vm0, %v7986_v32  ;;  %v8756_v32 = vld [vmem:[%s13395_s12 + $0x178] sm:$0xff] }
0x3038   :  { %8835 = vmatpush.msrb.mxu0 %v8756_v32  ;;  %v8746_v32 = vld [vmem:[%s13395_s12 + $0x128] sm:$0xff] }
0x3083   :  { %v8018_v33 = vpop.f32.mrf.mxu2 }
0x3084   :  { %v8019_v0 = vadd.f32 %v9890_v55, %v8018_v33 }
0x3086   :  { %v8024_v30 = vsel %vm361_vm15, %v8019_v0, -inf }
0x3087   :  { %8025 = vmax.xlane.f32.xlu2 %v8024_v30  ;;  %v8755_v30 = vld [vmem:[%s13395_s12 + $0x170] sm:$0xff] }
0x3088   :  { %8836 = vmatpush.msrb.mxu0 %v8755_v30  ;;  %v13018_v30 = vpop.f32.mrf.mxu3 }
0x308a   :  { %8837 = vmatpush.msrb.mxu0 %v8754_v39  ;;  %v9806_v39 = vmul.f32 -1.442695, %v13018_v30 }
0x3099   :  { %v8021_v21 = vpop.f32.mrf.mxu2 }
0x309a   :  { %v8022_v63 = vadd.f32 %v9890_v55, %v8021_v21  ;;  %v8720_v21 = vld [vmem:[%s13395_s12 + $0x58] sm:$0xff] }
0x309c   :  { %v8027_v52 = vsel %vm361_vm15, %v8022_v63, -inf }
0x309d   :  { %8028 = vmax.xlane.f32.xlu0 %v8027_v52 }
0x30a1   :  { %v13022_v4 = vpop.f32.mrf.mxu2 }
0x30a5   :  { %4864 = vadd.xlane.f32.xlu0 %v4863_v7  ;;  %v8767_v7 = vld [vmem:[%s13395_s12 + $0x1d0] sm:$0xff] }
0x30fa   :  { %v8026_v60 = vpop.xlane.xlu2 %8025 }
0x30fb   :  { %v8030_v16 = vsub.f32 %v8019_v0, %v8026_v60  ;;  %v8721_v0 = vld [vmem:[%s13395_s12 + $0x60] sm:$0xff] }
0x30fc   :  { %8792 = vmatpush.msrb.mxu2 %v8721_v0 }
0x30fd   :  { %v8032_v45 = vmul.f32 1.442695, %v8030_v16 }
0x30fe   :  { %8793 = vmatpush.msrb.mxu2 %v8720_v21 }
0x30ff   :  { %10157 = vpow2.f32 %v8032_v45 }
0x3100   :  { %8794 = vmatpush.msrb.mxu2 %v8719_v56 }
0x3105   :  { %v10158_v61 = vpop.eup %10157 }
0x3106   :  { %v8036_v49 = vsel %vm361_vm15, %v10158_v61, 0.0 }
0x3107   :  { %8037 = vadd.xlane.f32.xlu1 %v8036_v49  ;;  %v8753_v49 = vld [vmem:[%s13395_s12 + $0x160] sm:$0xff] }
0x3108   :  { %8838 = vmatpush.msrb.mxu0 %v8753_v49 }
0x3110   :  { %v8029_v9 = vpop.xlane.xlu0 %8028 }
0x3111   :  { %v8031_v10 = vsub.f32 %v8022_v63, %v8029_v9  ;;  %v8768_v63 = vld [vmem:[%s13395_s12 + $0x1d8] sm:$0xff] }
0x3113   :  { %v8034_v40 = vmul.f32 1.442695, %v8031_v10  ;;  %v8718_v10 = vld [vmem:[%s13395_s12 + $0x48] sm:$0xff] }
0x3114   :  { %8795 = vmatpush.msrb.mxu2 %v8718_v10  ;;  %v13044_v10 = vpop.f32.mrf.mxu2 }
0x3115   :  { %10159 = vpow2.f32 %v8034_v40  ;;  %v8766_v40 = vld [vmem:[%s13395_s12 + $0x1c8] sm:$0xff] }
0x3116   :  { %8796 = vmatpush.msrb.mxu2 %v8717_v46  ;;  %v9814_v46 = vmul.f32 -1.442695, %v13044_v10 }
0x311b   :  { %v12918_v36 = vpop.eup %10159 }
0x311c   :  { %v8039_v47 = vsel %vm361_vm15, %v12918_v36, 0.0 }
0x311d   :  { %8040 = vadd.xlane.f32.xlu2 %v8039_v47  ;;  %v8752_v47 = vld [vmem:[%s13395_s12 + $0x158] sm:$0xff] }
0x311e   :  { %8839 = vmatpush.msrb.mxu0 %v8752_v47 }
0x317a   :  { %v8038_v42 = vpop.xlane.xlu1 %8037 }
0x317b   :  { %10161 = vrcp.f32 %v8038_v42  ;;  %v8053_v44 = vand.u32 2147483648, %v8038_v42  ;;  %v8051_v27 = vand.u32 2147483647, %v8038_v42  ;;  %vm8047_vm4 = vweird.f32 %v8038_v42 }
0x317d   :  { %v8054_v57 = vor.u32 1.1754944e-38, %v8053_v44  ;;  %vm8052_vm8 = vcmp.eq.f32.partialorder %v8051_v27, 8.507059e+37  ;;  %v8734_v44 = vld [vmem:[%s13395_s12 + $0xc8] sm:$0xff] }
0x317e   :  { %v8750_v27 = vld [vmem:[%s13395_s12 + $0x148] sm:$0xff] }
0x3181   :  { %v10162_v34 = vpop.eup %10161 }
0x3182   :  { %v8043_v20 = vmul.f32 %v10162_v34, %v8038_v42  ;;  %vm8048_vm3 = vweird.f32 %v10162_v34  ;;  %v8751_v42 = vld [vmem:[%s13395_s12 + $0x150] sm:$0xff] }
0x3183   :  { %vm8049_vm5 = vmor %vm8047_vm4, %vm8048_vm3  ;;  %8840 = vmatpush.msrb.mxu0 %v8751_v42 }
0x3184   :  { %v8044_v6 = vsub.f32 1.0, %v8043_v20  ;;  %v8716_v20 = vld [vmem:[%s13395_s12 + $0x38] sm:$0xff] }
0x3185   :  { %8797 = vmatpush.msrb.mxu2 %v8716_v20  ;;  %8841 = vmatpush.msrb.mxu0 %v8750_v27  ;;  %v8728_v20 = vld [vmem:[%s13395_s12 + $0x98] sm:$0xff]  ;;  %v8727_v27 = vld [vmem:[%s13395_s12 + $0x90] sm:$0xff] }
0x3186   :  { %v8045_v50 = vmul.f32 %v10162_v34, %v8044_v6  ;;  %v8764_v6 = vld [vmem:[%s13395_s12 + $0x1b8] sm:$0xff] }
0x3188   :  { %v8046_v43 = vadd.f32 %v10162_v34, %v8045_v50  ;;  %v8715_v50 = vld [vmem:[%s13395_s12 + $0x30] sm:$0xff] }
0x3189   :  { %8798 = vmatpush.msrb.mxu2 %v8715_v50  ;;  %v8788_v50 = vld [vmem:[%s13395_s12 + $0x278] sm:$0xff] }
0x318a   :  { %v8050_v3 = vsel %vm8049_vm5, %v10162_v34, %v8046_v43 }
0x318b   :  { %v8055_v12 = vsel %vm8052_vm8, %v8054_v57, %v8050_v3  ;;  %v8763_v57 = vld [vmem:[%s13395_s12 + $0x1b0] sm:$0xff]  ;;  %v8733_v3 = vld [vmem:[%s13395_s12 + $0xc0] sm:$0xff]  ;;  %8799 = vmatpush.msrb.mxu2 %v8714_v19 }
0x318c   :  { %v12928_v41 = vmul.f32 %v10158_v61, %v8055_v12  ;;  %v8737_v61 = vld [vmem:[%s13395_s12 + $0xe0] sm:$0xff] }
0x318d   :  { %8815 = vmatpush.msrb.mxu3 %v8737_v61 }
0x318e   :  { %9827 = vmatmul.msk.f32.vlgmr.msrb.gmra.mxu1 %vm361_vm15, %v12928_v41  ;;  %9830 = vmatmul.msk.f32.vlgmr.msra.gmra.mxu2 %vm361_vm15, %v12928_v41  ;;  %v8904_v60 = vsel %vm361_vm15, %v12928_v41, 0.0 }
0x318f   :  { %9833 = vmatmul.msk.f32.vlgmr.msra.gmra.mxu3 %vm361_vm15, %v12928_v41  ;;  %9836 = vmatmul.msk.f32.vlgmr.msra.gmra.mxu0 %vm361_vm15, %v12928_v41 }
0x3190   :  { %v8041_v13 = vpop.xlane.xlu2 %8040  ;;  %8858 = vmatpush.msrb.mxu1 %v8772_v62  ;;  %v8761_v62 = vld [vmem:[%s13395_s12 + $0x1a0] sm:$0xff] }
0x3191   :  { %10163 = vrcp.f32 %v8041_v13  ;;  %v8068_v26 = vand.u32 2147483648, %v8041_v13  ;;  %v8066_v24 = vand.u32 2147483647, %v8041_v13  ;;  %vm8062_vm6 = vweird.f32 %v8041_v13 }
0x3192   :  { %10165 = vrcp.f32 %v10365_v25  ;;  %8859 = vmatpush.msrb.mxu1 %v8771_v17  ;;  %v8712_v17 = vld [vmem:[%s13395_s12 + $0x18] sm:$0xff] }
0x3193   :  { %v8069_v48 = vor.u32 1.1754944e-38, %v8068_v26  ;;  %vm8067_vm9 = vcmp.eq.f32.partialorder %v8066_v24, 8.507059e+37  ;;  %10167 = vpow2.f32 %v9806_v39 }
0x3194   :  { %8860 = vmatpush.msrb.mxu1 %v8770_v28  ;;  %v8711_v28 = vld [vmem:[%s13395_s12 + $0x10] sm:$0xff] }
0x3196   :  { %8861 = vmatpush.msrb.mxu1 %v8769_v15 }
0x3197   :  { %v10164_v35 = vpop.eup %10163 }
0x3198   :  { %v8058_v18 = vmul.f32 %v10164_v35, %v8041_v13  ;;  %vm8063_vm14 = vweird.f32 %v10164_v35  ;;  %v12947_v55 = vpop.eup %10165  ;;  %8862 = vmatpush.msrb.mxu1 %v8768_v63  ;;  %v8749_v13 = vld [vmem:[%s13395_s12 + $0x140] sm:$0xff] }
0x3199   :  { %vm8064_vm7 = vmor %vm8062_vm6, %vm8063_vm14  ;;  %v8914_v54 = vmul.f32 16.0, %v12947_v55  ;;  %vm8918_vm1 = vweird.f32 %v12947_v55  ;;  %8842 = vmatpush.msrb.mxu0 %v8749_v13 }
0x319a   :  { %v8059_v8 = vsub.f32 1.0, %v8058_v18  ;;  %8863 = vmatpush.msrb.mxu1 %v8767_v7  ;;  %v8713_v18 = vld [vmem:[%s13395_s12 + $0x20] sm:$0xff]  ;;  %v13032_v7 = vpop.f32.mrf.mxu3 }
0x319b   :  { %v8915_v45 = vsub.f32 1.0, %v8914_v54  ;;  %8800 = vmatpush.msrb.mxu2 %v8713_v18  ;;  %v13026_v54 = vpop.f32.mrf.mxu1  ;;  %v8742_v18 = vld [vmem:[%s13395_s12 + $0x108] sm:$0xff] }
0x319c   :  { %v8060_v29 = vmul.f32 %v10164_v35, %v8059_v8  ;;  %8864 = vmatpush.msrb.mxu1 %v8766_v40  ;;  %v8748_v8 = vld [vmem:[%s13395_s12 + $0x138] sm:$0xff] }
0x319d   :  { %v8916_v22 = vmul.f32 %v12947_v55, %v8915_v45  ;;  %8843 = vmatpush.msrb.mxu0 %v8748_v8  ;;  %8801 = vmatpush.msrb.mxu2 %v8712_v17  ;;  %v8786_v8 = vld [vmem:[%s13395_s12 + $0x268] sm:$0xff]  ;;  %v8785_v17 = vld [vmem:[%s13395_s12 + $0x260] sm:$0xff] }
0x319e   :  { %v8061_v33 = vadd.f32 %v10164_v35, %v8060_v29  ;;  %8865 = vmatpush.msrb.mxu1 %v8765_v23  ;;  %v8760_v29 = vld [vmem:[%s13395_s12 + $0x198] sm:$0xff]  ;;  %v8729_v23 = vld [vmem:[%s13395_s12 + $0xa0] sm:$0xff] }
0x319f   :  { %v8917_v43 = vadd.f32 %v12947_v55, %v8916_v22  ;;  %8844 = vmatpush.msrb.mxu0 %v8747_v11  ;;  %8802 = vmatpush.msrb.mxu2 %v8711_v28  ;;  %v8745_v22 = vld [vmem:[%s13395_s12 + $0x120] sm:$0xff] }
0x31a0   :  { %v8065_v1 = vsel %vm8064_vm7, %v10164_v35, %v8061_v33  ;;  %8866 = vmatpush.msrb.mxu1 %v8764_v6  ;;  %v8732_v35 = vld [vmem:[%s13395_s12 + $0xb8] sm:$0xff]  ;;  %v8710_v33 = vld [vmem:[%s13395_s12 + $0x8] sm:$0xff] }
0x31a1   :  { %v8070_v52 = vsel %vm8067_vm9, %v8069_v48, %v8065_v1  ;;  %v8919_v59 = vsel %vm8918_vm1, %v12947_v55, %v8917_v43  ;;  %v8759_v55 = vld [vmem:[%s13395_s12 + $0x190] sm:$0xff]  ;;  %8845 = vmatpush.msrb.mxu0 %v8746_v32  ;;  %8803 = vmatpush.msrb.mxu2 %v8710_v33  ;;  %v13020_v48 = vpop.f32.mrf.mxu0  ;;  %v9809_v1 = vmul.f32 -1.442695, %v13022_v4  ;;  %v8744_v6 = vld [vmem:[%s13395_s12 + $0x118] sm:$0xff] }
0x31a2   :  { %v12960_v2 = vmul.f32 %v12918_v36, %v8070_v52  ;;  %v8736_v36 = vld [vmem:[%s13395_s12 + $0xd8] sm:$0xff]  ;;  %8867 = vmatpush.msrb.mxu1 %v8763_v57  ;;  %v9807_v21 = vmul.f32 -1.442695, %v13020_v48  ;;  %v9808_v52 = vmul.f32 -1.442695, %v13026_v54  ;;  %v13049_v47 = vpop.f32.mrf.mxu3  ;;  %v8783_v33 = vld [vmem:[%s13395_s12 + $0x250] sm:$0xff] }
0x31a3   :  { %8816 = vmatpush.msrb.mxu3 %v8736_v36  ;;  %10169 = vpow2.f32 %v9809_v1  ;;  %v9811_v36 = vmul.f32 -1.442695, %v13032_v7  ;;  %8846 = vmatpush.msrb.mxu0 %v8745_v22  ;;  %v8784_v32 = vld [vmem:[%s13395_s12 + $0x258] sm:$0xff]  ;;  %v8781_v22 = vld [vmem:[%s13395_s12 + $0x240] sm:$0xff] }
0x31a4   :  { %9828 = vmatmul.msk.f32.gmra.mxu1 %vm361_vm15, %v12960_v2  ;;  %9831 = vmatmul.msk.f32.gmra.mxu2 %vm361_vm15, %v12960_v2  ;;  %v8905_v16 = vsel %vm361_vm15, %v12960_v2, 0.0  ;;  %10171 = vpow2.f32 %v9807_v21 }
0x31a5   :  { %9834 = vmatmul.msk.f32.gmra.mxu3 %vm361_vm15, %v12960_v2  ;;  %9837 = vmatmul.msk.f32.gmra.mxu0 %vm361_vm15, %v12960_v2  ;;  %v8906_v9 = vadd.f32 %v8905_v16, %v8904_v60  ;;  %10173 = vpow2.f32 %v9808_v52 }
0x31a6   :  { %8817 = vmatpush.msrb.mxu3 %v8735_v37  ;;  %v8758_v37 = vld [vmem:[%s13395_s12 + $0x188] sm:$0xff]  ;;  %8847 = vmatpush.msrb.mxu0 %v8744_v6 }
0x31a7   :  { %v8907_v38 = vrot.slane %v8906_v9, 4 }
0x31a8   :  { %8818 = vmatpush.msrb.mxu3 %v8734_v44  ;;  %v13064_v44 = vpop.f32.mrf.mxu1 }
0x31a9   :  { %v8908_v34 = vadd.f32 %v8907_v38, %v8906_v9  ;;  %v13029_v63 = vpop.f32.mrf.mxu0 }
0x31aa   :  { %8819 = vmatpush.msrb.mxu3 %v8733_v3  ;;  %v8743_v3 = vld [vmem:[%s13395_s12 + $0x110] sm:$0xff]  ;;  %v9812_v19 = vmul.f32 -1.442695, %v13029_v63 }
0x31ab   :  { %v8909_v53 = vrot.slane %v8908_v34, 2  ;;  %8848 = vmatpush.msrb.mxu0 %v8743_v3 }
0x31ac   :  { %9839 = vmatmul.msk.f32.vlgmr.msra.gmra.mxu1 %vm361_vm15, %v12928_v41  ;;  %v8762_v41 = vld [vmem:[%s13395_s12 + $0x1a8] sm:$0xff]  ;;  %8820 = vmatpush.msrb.mxu3 %v8732_v35  ;;  %v9813_v35 = vmul.f32 -1.442695, %v13064_v44 }
0x31ad   :  { %v8910_v12 = vadd.f32 %v8909_v53, %v8908_v34  ;;  %8868 = vmatpush.msrb.mxu1 %v8762_v41  ;;  %v8709_v34 = vld [vmem:[%s13395_s12] sm:$0xff]  ;;  %8849 = vmatpush.msrb.mxu0 %v8742_v18 }
0x31ae   :  { %8821 = vmatpush.msrb.mxu3 %v8731_v58  ;;  %8804 = vmatpush.msrb.mxu2 %v8709_v34  ;;  %v8757_v53 = vld [vmem:[%s13395_s12 + $0x180] sm:$0xff] }
0x31af   :  { %v8911_v25 = vrot.slane %v8910_v12, 1  ;;  %8869 = vmatpush.msrb.mxu1 %v8761_v62  ;;  %v9810_v62 = vmul.f32 -1.442695, %v13049_v47  ;;  %v8725_v58 = vld [vmem:[%s13395_s12 + $0x80] sm:$0xff] }
0x31b0   :  { %8822 = vmatpush.msrb.mxu3 %v8730_v14  ;;  %8881 = vmatpush.msra.mxu2 %v8788_v50  ;;  %v13092_v14 = vpop.f32.mrf.mxu3  ;;  %v13101_v39 = vpop.f32.mrf.mxu1 }
0x31b1   :  { %v8912_v26 = vadd.f32 %v8911_v25, %v8910_v12  ;;  %8870 = vmatpush.msrb.mxu1 %v8760_v29  ;;  %v13038_v61 = vpop.f32.mrf.mxu0  ;;  %v8787_v12 = vld [vmem:[%s13395_s12 + $0x270] sm:$0xff]  ;;  %v8726_v25 = vld [vmem:[%s13395_s12 + $0x88] sm:$0xff] }
0x31b2   :  { %8823 = vmatpush.msrb.mxu3 %v8729_v23  ;;  %8882 = vmatpush.msra.mxu2 %v8787_v12  ;;  %v9815_v23 = vmul.f32 -1.442695, %v13092_v14 }
0x31b3   :  { %v8920_v24 = vmul.f32 %v8919_v59, %v8912_v26  ;;  %8871 = vmatpush.msrb.mxu1 %v8759_v55  ;;  %v8741_v26 = vld [vmem:[%s13395_s12 + $0x100] sm:$0xff] }
0x31b4   :  { %9840 = vmatmul.msk.f32.gmra.mxu1 %vm361_vm15, %v12960_v2  ;;  %v10168_v2 = vpop.eup %10167  ;;  %8824 = vmatpush.msrb.mxu3 %v8728_v20 }
0x31b5   :  { %v9841_v31 = vadd.f32 -0.25, %v8920_v24  ;;  %v10170_v56 = vpop.eup %10169  ;;  %v13034_v60 = vadd.f32 1.0, %v10168_v2  ;;  %8872 = vmatpush.msrb.mxu1 %v8758_v37  ;;  %8883 = vmatpush.msra.mxu2 %v8786_v8 }
0x31b6   :  { %v13036_v16 = vadd.f32 1.0, %v10170_v56  ;;  %v10172_v45 = vpop.eup %10171  ;;  %8825 = vmatpush.msrb.mxu3 %v8727_v27  ;;  %8850 = vmatpush.msrb.mxu0 %v8741_v26  ;;  %v8782_v56 = vld [vmem:[%s13395_s12 + $0x248] sm:$0xff] }
0x31b7   :  { %v8922_v0 = vmul.f32 %v9841_v31, %v9841_v31  ;;  %10175 = vrcp.f32 %v13034_v60  ;;  %v10174_v49 = vpop.eup %10173  ;;  %v13042_v9 = vadd.f32 1.0, %v10172_v45  ;;  %8873 = vmatpush.msrb.mxu1 %v8757_v53  ;;  %8884 = vmatpush.msra.mxu2 %v8785_v17 }
0x31b8   :  { %10177 = vrcp.f32 %v13036_v16  ;;  %v13046_v40 = vadd.f32 1.0, %v10174_v49  ;;  %8826 = vmatpush.msrb.mxu3 %v8726_v25  ;;  %v8256_v49 = vand.u32 2147483647, %v13034_v60  ;;  %v8303_v27 = vand.u32 2147483648, %v13036_v16  ;;  %v8513_v25 = vpop.f32.mrf.mxu3 }
0x31b9   :  { %v8923_v15 = vsel %vm361_vm15, %v8922_v0, 0.0  ;;  %10179 = vrcp.f32 %v13042_v9  ;;  %v13071_v57 = vpop.f32.mrf.mxu0  ;;  %8885 = vmatpush.msra.mxu2 %v8784_v32  ;;  %vm8252_vm15 = vweird.f32 %v13034_v60  ;;  %vm8297_vm13 = vweird.f32 %v13036_v16 }
0x31ba   :  { %8924 = vadd.xlane.f32.xlu1 %v8923_v15  ;;  %10181 = vrcp.f32 %v13046_v40  ;;  %8827 = vmatpush.msrb.mxu3 %v8725_v58  ;;  %v8301_v12 = vand.u32 2147483647, %v13036_v16  ;;  %vm8257_vm4 = vcmp.eq.f32.partialorder %v8256_v49, 8.507059e+37  ;;  %v8304_v58 = vor.u32 1.1754944e-38, %v8303_v27 }
0x31bb   :  { %10183 = vpow2.f32 %v9811_v36  ;;  %8886 = vmatpush.msra.mxu2 %v8783_v33  ;;  %v8273_v17 = vand.u32 2147483648, %v13042_v9  ;;  %vm8267_vm8 = vweird.f32 %v13042_v9  ;;  %v8271_v32 = vand.u32 2147483647, %v13042_v9  ;;  %v8777_v33 = vld [vmem:[%s13395_s12 + $0x220] sm:$0xff] }
0x31bc   :  { %10185 = vpow2.f32 %v9814_v46  ;;  %v8258_v46 = vand.u32 2147483648, %v13034_v60  ;;  %vm8302_vm5 = vcmp.eq.f32.partialorder %v8301_v12, 8.507059e+37  ;;  %vm8282_vm6 = vweird.f32 %v13046_v40 }
0x31bd   :  { %v13051_v38 = vpop.eup %10175  ;;  %10187 = vpow2.f32 %v9812_v19  ;;  %8887 = vmatpush.msra.mxu2 %v8782_v56  ;;  %v13135_v19 = vpop.f32.mrf.mxu2  ;;  %v8288_v56 = vand.u32 2147483648, %v13046_v40  ;;  %vm8272_vm9 = vcmp.eq.f32.partialorder %v8271_v32, 8.507059e+37 }
0x31be   :  { %v13058_v42 = vpop.eup %10177  ;;  %v8248_v43 = vmul.f32 %v13051_v38, %v13034_v60  ;;  %10189 = vpow2.f32 %v9813_v35  ;;  %vm8253_vm10 = vweird.f32 %v13051_v38  ;;  %v8259_v8 = vor.u32 1.1754944e-38, %v8258_v46 }
0x31bf   :  { %v8293_v13 = vmul.f32 %v13058_v42, %v13036_v16  ;;  %v13078_v41 = vpop.eup %10179  ;;  %10191 = vpow2.f32 %v9810_v62  ;;  %vm8298_vm11 = vweird.f32 %v13058_v42  ;;  %vm13129_vm12 = vmor %vm8252_vm15, %vm8253_vm10  ;;  %8888 = vmatpush.msra.mxu2 %v8781_v22  ;;  %v8779_v16 = vld [vmem:[%s13395_s12 + $0x230] sm:$0xff]  ;;  %v8274_v46 = vor.u32 1.1754944e-38, %v8273_v17 }
0x31c0   :  { %v8249_v59 = vsub.f32 1.0, %v8248_v43  ;;  %v13088_v11 = vpop.eup %10181  ;;  %v8263_v28 = vmul.f32 %v13078_v41, %v13042_v9  ;;  %v8780_v43 = vld [vmem:[%s13395_s12 + $0x238] sm:$0xff]  ;;  %vm8268_vm2 = vweird.f32 %v13078_v41  ;;  %vm13145_vm3 = vmor %vm8297_vm13, %vm8298_vm11  ;;  %v13215_v12 = vpop.f32.mrf.mxu3 }
0x31c1   :  { %v8294_v29 = vsub.f32 1.0, %v8293_v13  ;;  %v10184_v24 = vpop.eup %10183  ;;  %v8278_v0 = vmul.f32 %v13088_v11, %v13046_v40  ;;  %v13106_v2 = vpop.f32.mrf.mxu0  ;;  %8889 = vmatpush.msra.mxu2 %v8780_v43  ;;  %vm13174_vm14 = vmor %vm8267_vm8, %vm8268_vm2  ;;  %vm8283_vm7 = vweird.f32 %v13088_v11  ;;  %v8289_v43 = vor.u32 1.1754944e-38, %v8288_v56 }
0x31c2   :  { %v10186_v55 = vpop.eup %10185  ;;  %v8250_v31 = vmul.f32 %v13051_v38, %v8249_v59  ;;  %v13099_v15 = vadd.f32 1.0, %v10184_v24  ;;  %v8264_v21 = vsub.f32 1.0, %v8263_v28  ;;  %v13161_v24 = vpop.f32.mrf.mxu1  ;;  %vm13200_vm1 = vmor %vm8282_vm6, %vm8283_vm7 }
0x31c3   :  { %v8295_v1 = vmul.f32 %v13058_v42, %v8294_v29  ;;  %v13104_v52 = vadd.f32 1.0, %v10186_v55  ;;  %v10188_v45 = vpop.eup %10187  ;;  %v8279_v34 = vsub.f32 1.0, %v8278_v0  ;;  %8890 = vmatpush.msra.mxu2 %v8779_v16 }
0x31c4   :  { %v8251_v36 = vadd.f32 %v13051_v38, %v8250_v31  ;;  %v10190_v37 = vpop.eup %10189  ;;  %10193 = vrcp.f32 %v13099_v15  ;;  %v8265_v53 = vmul.f32 %v13078_v41, %v8264_v21  ;;  %v13120_v50 = vadd.f32 1.0, %v10188_v45 }
0x31c5   :  { %v8296_v20 = vadd.f32 %v13058_v42, %v8295_v1  ;;  %v10192_v6 = vpop.eup %10191  ;;  %10195 = vrcp.f32 %v13104_v52  ;;  %v13141_v35 = vadd.f32 1.0, %v10190_v37  ;;  %v8280_v18 = vmul.f32 %v13088_v11, %v8279_v34 }
0x31c6   :  { %v8255_v13 = vsel %vm13129_vm12, %v13051_v38, %v8251_v36  ;;  %10197 = vpow2.f32 %v9815_v23  ;;  %v13154_v38 = vadd.f32 1.0, %v10192_v6  ;;  %v8266_v62 = vadd.f32 %v13078_v41, %v8265_v53  ;;  %v8776_v36 = vld [vmem:[%s13395_s12 + $0x218] sm:$0xff]  ;;  %v13209_v6 = vpop.f32.mrf.mxu2  ;;  %v8775_v53 = vld [vmem:[%s13395_s12 + $0x210] sm:$0xff] }
0x31c7   :  { %v8300_v59 = vsel %vm13145_vm3, %v13058_v42, %v8296_v20  ;;  %10199 = vrcp.f32 %v13120_v50  ;;  %v8260_v29 = vsel %vm8257_vm4, %v8259_v8, %v8255_v13  ;;  %v8778_v42 = vld [vmem:[%s13395_s12 + $0x228] sm:$0xff]  ;;  %v8281_v1 = vadd.f32 %v13088_v11, %v8280_v18 }
0x31c8   :  { %10201 = vrcp.f32 %v13141_v35  ;;  %v8305_v55 = vsel %vm8302_vm5, %v8304_v58, %v8300_v59  ;;  %8891 = vmatpush.msra.mxu2 %v8778_v42  ;;  %v8270_v21 = vsel %vm13174_vm14, %v13078_v41, %v8266_v62  ;;  %v8397_v45 = vmul.f32 %v8260_v29, %v13018_v30  ;;  %v8774_v13 = vld [vmem:[%s13395_s12 + $0x208] sm:$0xff]  ;;  %v8773_v29 = vld [vmem:[%s13395_s12 + $0x200] sm:$0xff] }
0x31c9   :  { %v13169_v31 = vpop.f32.mrf.mxu0  ;;  %10203 = vrcp.f32 %v13154_v38  ;;  %v8286_v23 = vand.u32 2147483647, %v13046_v40  ;;  %v8400_v22 = vmul.f32 %v8305_v55, %v13022_v4  ;;  %v8275_v34 = vsel %vm8272_vm9, %v8274_v46, %v8270_v21 }
0x31ca   :  { %v13158_v26 = vpop.eup %10193  ;;  %8892 = vmatpush.msra.mxu2 %v8777_v33  ;;  %v8285_v4 = vsel %vm13200_vm1, %v13088_v11, %v8281_v1  ;;  %v8542_v3 = vmul.f32 %v13038_v61, %v8397_v45  ;;  %v8398_v59 = vmul.f32 %v8275_v34, %v13020_v48  ;;  %vm8327_vm12 = vweird.f32 %v13099_v15 }
0x31cb   :  { %v13164_v28 = vpop.eup %10195  ;;  %v8323_v49 = vmul.f32 %v13158_v26, %v13099_v15  ;;  %vm8287_vm15 = vcmp.eq.f32.partialorder %v8286_v23, 8.507059e+37  ;;  %v8545_v18 = vmul.f32 %v8513_v25, %v8400_v22  ;;  %vm8328_vm10 = vweird.f32 %v13158_v26 }
0x31cc   :  { %v10198_v9 = vpop.eup %10197  ;;  %v8368_v37 = vmul.f32 %v13164_v28, %v13104_v52  ;;  %8893 = vmatpush.msra.mxu2 %v8776_v36  ;;  %v8290_v62 = vsel %vm8287_vm15, %v8289_v43, %v8285_v4  ;;  %v8543_v0 = vmul.f32 %v13101_v39, %v8398_v59  ;;  %vm8373_vm11 = vweird.f32 %v13164_v28  ;;  %vm13245_vm13 = vmor %vm8327_vm12, %vm8328_vm10 }
0x31cd   :  { %v13194_v41 = vpop.eup %10199  ;;  %v13207_v20 = vadd.f32 1.0, %v10198_v9  ;;  %v8324_v40 = vsub.f32 1.0, %v8323_v49  ;;  %v8399_v55 = vmul.f32 %v8290_v62, %v13026_v54  ;;  %v8333_v9 = vand.u32 2147483648, %v13099_v15 }
0x31ce   :  { %v13212_v27 = vpop.eup %10201  ;;  %v8338_v11 = vmul.f32 %v13194_v41, %v13120_v50  ;;  %v8369_v16 = vsub.f32 1.0, %v8368_v37  ;;  %8894 = vmatpush.msra.mxu2 %v8775_v53  ;;  %v8378_v37 = vand.u32 2147483648, %v13104_v52  ;;  %vm8372_vm2 = vweird.f32 %v13104_v52 }
0x31cf   :  { %v13218_v60 = vpop.eup %10203  ;;  %v8353_v61 = vmul.f32 %v13212_v27, %v13141_v35  ;;  %10205 = vrcp.f32 %v13207_v20  ;;  %v8325_v32 = vmul.f32 %v13158_v26, %v8324_v40  ;;  %v8544_v21 = vmul.f32 %v13135_v19, %v8399_v55  ;;  %vm13256_vm4 = vmor %vm8372_vm2, %vm8373_vm11 }
0x31d0   :  { %8895 = vmatpush.msra.mxu2 %v8774_v13  ;;  %v8308_v25 = vmul.f32 %v13218_v60, %v13154_v38  ;;  %v8339_v48 = vsub.f32 1.0, %v8338_v11  ;;  %v8370_v33 = vmul.f32 %v13164_v28, %v8369_v16  ;;  %v8331_v19 = vand.u32 2147483647, %v13099_v15 }
0x31d1   :  { %v8354_v1 = vsub.f32 1.0, %v8353_v61  ;;  %v8326_v45 = vadd.f32 %v13158_v26, %v8325_v32  ;;  %v8376_v34 = vand.u32 2147483647, %v13104_v52  ;;  %vm8343_vm3 = vweird.f32 %v13194_v41 }
0x31d2   :  { %8896 = vmatpush.msra.mxu2 %v8773_v29  ;;  %v8309_v49 = vsub.f32 1.0, %v8308_v25  ;;  %v8340_v23 = vmul.f32 %v13194_v41, %v8339_v48  ;;  %v8371_v22 = vadd.f32 %v13164_v28, %v8370_v33  ;;  %vm8342_vm5 = vweird.f32 %v13120_v50 }
0x31d3   :  { %v8330_v4 = vsel %vm13245_vm13, %v13158_v26, %v8326_v45  ;;  %v8355_v52 = vmul.f32 %v13212_v27, %v8354_v1  ;;  %v8348_v26 = vand.u32 2147483648, %v13120_v50  ;;  %vm8332_vm8 = vcmp.eq.f32.partialorder %v8331_v19, 8.507059e+37  ;;  %vm13273_vm6 = vmor %vm8342_vm5, %vm8343_vm3  ;;  %v4865_v19 = vpop.xlane.xlu0 %4864 }
0x31d4   :  { %v8310_v15 = vmul.f32 %v13218_v60, %v8309_v49  ;;  %v8341_v40 = vadd.f32 %v13194_v41, %v8340_v23  ;;  %v8375_v13 = vsel %vm13256_vm4, %v13164_v28, %v8371_v22  ;;  %v8379_v11 = vor.u32 1.1754944e-38, %v8378_v37 }
0x31d5   :  { %v13237_v46 = vpop.eup %10205  ;;  %v8346_v16 = vand.u32 2147483647, %v13120_v50  ;;  %vm8377_vm14 = vcmp.eq.f32.partialorder %v8376_v34, 8.507059e+37  ;;  %vm8313_vm7 = vweird.f32 %v13218_v60  ;;  %vm8358_vm9 = vweird.f32 %v13212_v27 }
0x31d6   :  { %v8383_v43 = vmul.f32 %v13237_v46, %v13207_v20  ;;  %v8311_v28 = vadd.f32 %v13218_v60, %v8310_v15  ;;  %v8380_v62 = vsel %vm8377_vm14, %v8379_v11, %v8375_v13  ;;  %v8345_v50 = vsel %vm13273_vm6, %v13194_v41, %v8341_v40 }
0x31d7   :  { %v8318_v29 = vand.u32 2147483648, %v13154_v38  ;;  %v8349_v61 = vor.u32 1.1754944e-38, %v8348_v26  ;;  %vm8312_vm1 = vweird.f32 %v13154_v38  ;;  %v8316_v32 = vand.u32 2147483647, %v13154_v38 }
0x31d8   :  { %vm8347_vm15 = vcmp.eq.f32.partialorder %v8346_v16, 8.507059e+37  ;;  %vm8357_vm10 = vweird.f32 %v13141_v35  ;;  %v8361_v25 = vand.u32 2147483647, %v13141_v35  ;;  %vm8314_vm11 = vmor %vm8312_vm1, %vm8313_vm7  ;;  %v8405_v41 = vmul.f32 %v8380_v62, %v13044_v10 }
0x31d9   :  { %v8350_v55 = vsel %vm8347_vm15, %v8349_v61, %v8345_v50  ;;  %vm8359_vm12 = vmor %vm8357_vm10, %vm8358_vm9  ;;  %v8315_v48 = vsel %vm8314_vm11, %v13218_v60, %v8311_v28  ;;  %vm8317_vm13 = vcmp.eq.f32.partialorder %v8316_v32, 8.507059e+37  ;;  %vm8388_vm3 = vweird.f32 %v13237_v46 }
0x31da   :  { %vm8362_vm2 = vcmp.eq.f32.partialorder %v8361_v25, 8.507059e+37  ;;  %vm8387_vm4 = vweird.f32 %v13207_v20  ;;  %vm8938_vm14 = vcmask 0  }
0x31db   :  { %vm8389_vm5 = vmor %vm8387_vm4, %vm8388_vm3 }
0x320b   :  { %v8601_v8 = vpop.f32.mrf.mxu1 }
0x320c   :  { %v8699_v58 = vmul.f32 %v8601_v8, %v8542_v3  ;;  %v8670_v17 = vpop.f32.mrf.mxu0  ;;  %v8334_v3 = vor.u32 1.1754944e-38, %v8333_v9  ;;  %v8403_v9 = vmul.f32 %v8350_v55, %v13029_v63  ;;  %v8391_v63 = vand.u32 2147483647, %v13207_v20 }
0x320d   :  { %v8702_v42 = vmul.f32 %v8670_v17, %v8545_v18  ;;  %v8363_v18 = vand.u32 2147483648, %v13141_v35  ;;  %v8356_v17 = vadd.f32 %v13212_v27, %v8355_v52 }
0x320e   :  { %8805 = vmatmul.f32.vlgmr.msrb.gmra.mxu2 %v8699_v58  ;;  %v8335_v8 = vsel %vm8332_vm8, %v8334_v3, %v8330_v4  ;;  %v8384_v58 = vsub.f32 1.0, %v8383_v43  ;;  %vm8392_vm8 = vcmp.eq.f32.partialorder %v8391_v63, 8.507059e+37 }
0x320f   :  { %8874 = vmatmul.f32.vlgmr.msrb.gmra.mxu1 %v8702_v42  ;;  %v8402_v42 = vmul.f32 %v8335_v8, %v13032_v7  ;;  %v8360_v7 = vsel %vm8359_vm12, %v13212_v27, %v8356_v17  ;;  %v8364_v1 = vor.u32 1.1754944e-38, %v8363_v18  ;;  %v8393_v27 = vand.u32 2147483648, %v13207_v20 }
0x3210   :  { %v8385_v33 = vmul.f32 %v13237_v46, %v8384_v58 }
0x3211   :  { %v8624_v56 = vpop.f32.mrf.mxu2  ;;  %v8547_v38 = vmul.f32 %v13071_v57, %v8402_v42  ;;  %v8394_v22 = vor.u32 1.1754944e-38, %v8393_v27 }
0x3212   :  { %v8700_v36 = vmul.f32 %v8624_v56, %v8543_v0  ;;  %v8647_v54 = vpop.f32.mrf.mxu3  ;;  %v8319_v0 = vor.u32 1.1754944e-38, %v8318_v29  ;;  %v8365_v56 = vsel %vm8362_vm2, %v8364_v1, %v8360_v7  ;;  %v8386_v45 = vadd.f32 %v13237_v46, %v8385_v33 }
0x3213   :  { %v8701_v39 = vmul.f32 %v8647_v54, %v8544_v21  ;;  %v8550_v21 = vmul.f32 %v13215_v12, %v8405_v41  ;;  %v8404_v57 = vmul.f32 %v8365_v56, %v13064_v44  ;;  %v8548_v12 = vmul.f32 %v13161_v24, %v8403_v9  ;;  %v8935_v24 = vld [vmem:[#allocation2] sm:$0x1] }
0x3214   :  { %8828 = vmatmul.f32.vlgmr.msrb.gmra.mxu3 %v8700_v36  ;;  %v8320_v35 = vsel %vm8317_vm13, %v8319_v0, %v8315_v48  ;;  %v8390_v23 = vsel %vm8389_vm5, %v13237_v46, %v8386_v45  ;;  %v4866_v44 = vmul.f32 0.01, %v4865_v19 }
0x3215   :  { %8851 = vmatmul.f32.vlgmr.msrb.gmra.mxu0 %v8701_v39  ;;  %v8401_v54 = vmul.f32 %v8320_v35, %v13049_v47  ;;  %v8549_v39 = vmul.f32 %v13209_v6, %v8404_v57  ;;  %v8395_v20 = vsel %vm8392_vm8, %v8394_v22, %v8390_v23 }
0x3216   :  { %v8406_v46 = vmul.f32 %v8395_v20, %v13092_v14  ;;  %v8936_v43 = vadd.f32 %v8935_v24, %v4866_v44 }
0x3217   :  { %v8546_v47 = vmul.f32 %v13106_v2, %v8401_v54 }
0x3218   :  { %v8551_v2 = vmul.f32 %v13169_v31, %v8406_v46 }
0x3221   :  { %v8604_v10 = vpop.f32.mrf.mxu1 }
0x3222   :  { %v8704_v60 = vmul.f32 %v8604_v10, %v8547_v38  ;;  %v8673_v49 = vpop.f32.mrf.mxu0 }
0x3223   :  { %v8707_v36 = vmul.f32 %v8673_v49, %v8550_v21 }
0x3224   :  { %8808 = vmatmul.f32.gmra.mxu2 %v8704_v60 }
0x3225   :  { %8877 = vmatmul.f32.gmra.mxu1 %v8707_v36 }
0x3227   :  { %v8627_v37 = vpop.f32.mrf.mxu2 }
0x3228   :  { %v8705_v30 = vmul.f32 %v8627_v37, %v8548_v12  ;;  %v8650_v34 = vpop.f32.mrf.mxu3 }
0x3229   :  { %v8706_v4 = vmul.f32 %v8650_v34, %v8549_v39  ;;  %v8693_v15 = vpop.f32.mrf.mxu1 }
0x322a   :  { %v8703_v53 = vmul.f32 %v8693_v15, %v8546_v47  ;;  %8831 = vmatmul.f32.gmra.mxu3 %v8705_v30 }
0x322b   :  { %8854 = vmatmul.f32.gmra.mxu0 %v8706_v4 }
0x322c   :  { %8897 = vmatmul.f32.vlgmr.msra.gmra.mxu2 %v8703_v53 }
0x322d   :  { %v8925_v6 = vpop.xlane.xlu1 %8924 }
0x322e   :  { %v8926_v40 = vmul.f32 0.01, %v8925_v6 }
0x3230   :  { %v8937_v52 = vadd.f32 %v8936_v43, %v8926_v40 }
0x3231   :  { %v8696_v3 = vpop.f32.mrf.mxu1 }
0x3232   :  { %v8708_v13 = vmul.f32 %v8696_v3, %v8551_v2  ;;  %8939 = vst.msk [vmem:[#allocation7] sm:$0x1] %vm8938_vm14, %v8937_v52 }
0x3234   :  { %8900 = vmatmul.f32.gmra.mxu2 %v8708_v13 }
0x3235   :  { %10277 = shalt.err (!%p10274_p4)
}
0x3236   :  { %s10367_s26 = smov 128   ;;  %s10368_s27 = smov 8  }
0x3237   :  { %8965 = dma.vmem_to_hbm [thread:$0]  %s8958_s16, 512, %s8960_s5, [#allocation6], %s10367_s26, %s10367_s26, %s10368_s27  }
0x3238   :  { %s8973_s30 = sshll.u32 %s10547_s13, 4  ;;  %s10369_s2 = smov [#allocation7]   ;;  %s8974_s30 = int_to_ptr.hbm [resolvable:$true] %s8973_s30 }
0x3239   :  { %s8971_s6 = sshll.u32 %s10369_s2, 4  ;;  %s10290_s7 = sshra.s32 %s8974_s30, 4  ;;  %s8972_s6 = int_to_ptr.vmem [resolvable:$true] %s8971_s6  ;;  %s10291_s7 = int_to_ptr.hbm [resolvable:$true] %s10290_s7 }
0x323a   :  { %s10292_s19 = scalar_lea.hbm %s10291_s7, 1  ;;  %s10294_s0 = scalar_lea.hbm %s10547_s13, 1 }
0x323b   :  { %p10293_p5 = scmp.ne.s32.totalorder %s10291_s7, %s10292_s19  ;;  %p10295_p6 = scmp.lt.s32.totalorder %s10291_s7, %s10547_s13 }
0x323c   :  { %p10296_p7 = scmp.lt.s32.totalorder %s10294_s0, %s10292_s19 }
0x323e   :  { %p10297_p8 = por %p10296_p7, %p10295_p6 }
0x3240   :  { %p10298_p9 = pnand %p10297_p8, %p10293_p5 }
0x3242   :  { %10301 = shalt.err (!%p10298_p9)
}
0x3243   :  { %8976 = dma.vmem_to_hbm [thread:$0]  %s8972_s6, 16, %s8974_s30, [#allocation6]  }
0x3244   :  { %s10370_s13 = smov [#allocation3]   ;;  %s8946_s17 = sshll.u32 %s10537_s1, 4  ;;  %s8947_s17 = int_to_ptr.hbm [resolvable:$true] %s8946_s17 }
0x3245   :  { %s8944_s9 = sshll.u32 %s10370_s13, 4  ;;  %s10314_s21 = sshra.s32 %s8947_s17, 4  ;;  %s8945_s9 = int_to_ptr.vmem [resolvable:$true] %s8944_s9  ;;  %s10315_s21 = int_to_ptr.hbm [resolvable:$true] %s10314_s21 }
0x3246   :  { %s10316_s8 = scalar_lea.hbm %s10315_s21, 16  ;;  %s10318_s14 = scalar_lea.hbm %s10537_s1, 16 }
0x3247   :  { %p10317_p10 = scmp.ne.s32.totalorder %s10315_s21, %s10316_s8  ;;  %p10319_p11 = scmp.lt.s32.totalorder %s10315_s21, %s10537_s1 }
0x3248   :  { %p10320_p12 = scmp.lt.s32.totalorder %s10318_s14, %s10316_s8 }
0x324a   :  { %p10321_p13 = por %p10320_p12, %p10319_p11 }
0x324c   :  { %p10322_p0 = pnand %p10321_p13, %p10317_p10 }
0x328c   :  { %v8875_v8 = vpop.f32.mrf.mxu1 }
0x3291   :  { %v8806_v14 = vpop.f32.mrf.mxu2 }
0x3292   :  { %v8852_v16 = vpop.f32.mrf.mxu0 }
0x3297   :  { %v8829_v31 = vpop.f32.mrf.mxu3 }
0x3298   :  { %v8830_v26 = vadd.f32 %v8829_v31, %v8806_v14 }
0x329a   :  { %v8853_v18 = vadd.f32 %v8852_v16, %v8830_v26 }
0x329c   :  { %v8876_v62 = vadd.f32 %v8875_v8, %v8853_v18 }
0x32a2   :  { %v8878_v42 = vpop.f32.mrf.mxu1 }
0x32a7   :  { %v8809_v11 = vpop.f32.mrf.mxu2 }
0x32a8   :  { %v8855_v17 = vpop.f32.mrf.mxu0 }
0x32ad   :  { %v8832_v59 = vpop.f32.mrf.mxu3 }
0x32ae   :  { %v8833_v28 = vadd.f32 %v8832_v59, %v8809_v11 }
0x32af   :  { %v8898_v58 = vpop.f32.mrf.mxu2 }
0x32b0   :  { %v8899_v50 = vadd.f32 %v8898_v58, %v8876_v62  ;;  %v8856_v29 = vadd.f32 %v8855_v17, %v8833_v28 }
0x32b2   :  { %v8927_v61 = vadd.f32 %v8899_v50, %v12817_v5  ;;  %v8879_v32 = vadd.f32 %v8878_v42, %v8856_v29 }
0x32b4   :  { %8929 = vst.msk [vmem:[#allocation3] sm:$0xff] %vm167_vm0, %v8927_v61 }
0x32b7   :  { %v8901_v25 = vpop.f32.mrf.mxu2 }
0x32b8   :  { %v8902_v41 = vadd.f32 %v8901_v25, %v8879_v32 }
0x32ba   :  { %v8928_v55 = vadd.f32 %v8902_v41, %v12824_v51 }
0x32bc   :  { %8930 = vst.msk [vmem:[#allocation3 + $0x8] sm:$0xff] %vm167_vm0, %v8928_v55 }
0x32bd   :  { %10325 = shalt.err (!%p10322_p0)
}
0x32be   :  { %8952 = dma.vmem_to_hbm [thread:$0]  %s8945_s9, 256, %s8947_s17, [#allocation4], %s10367_s26, %s10367_s26, %s10368_s27  }
0x32bf   :  { %10326 = dma.done.wait [#allocation4], 256  }
0x32c0   :  { %10327 = vsyncadd [#allocation4], 4294967040 }
0x32c1   :  { %10328 = dma.done.wait [#allocation6], 528  }
0x32c2   :  { %10329 = vsyncadd [#allocation6], 4294966768 }
0x32c3   :  { %8989 = vsyncpa [#allocation4], 1 }
0x32c4   :  { %8990 = vsyncpa [#allocation6], 1 }

</bundles_post_ra>
